<compile_context>
chip_gen: v7x
topology: tpu7x:2x2x1
jax: 0.10.0
libtpu: 0.0.40
codegen_flags: <defaults>
</compile_context>

<pallas_src>
import functools

import jax
import jax.numpy as jnp
from jax.experimental import pallas as pl
from jax.experimental.pallas import tpu as pltpu


# ---------------------------------------------------------------------------
# Helpers: padding / weight packing into the fused kernel layout.
# ---------------------------------------------------------------------------
def _round_up(n, m):
    return -(-n // m) * m


def _pad2(x, rows, cols):
    return jnp.pad(x, ((0, rows - x.shape[0]), (0, cols - x.shape[1])))


def pack_gru(wih, whh, bih, bhh, e_pad, h_pad):
    """Pack PyTorch-style GRU weights (gate order [r, z, n], stored transposed as
    (in_features, 3H)) into one fused (e_pad + h_pad, 4*h_pad) matrix with gate
    column blocks [r | z | n_x | n_h], plus a fused (1, 4*h_pad) bias."""
    emb, three_h = wih.shape
    hid = three_h // 3
    w = jnp.zeros((e_pad + h_pad, 4 * h_pad), jnp.float32)
    # x rows
    w = w.at[:emb, 0 * h_pad:0 * h_pad + hid].set(wih[:, 0 * hid:1 * hid])  # r
    w = w.at[:emb, 1 * h_pad:1 * h_pad + hid].set(wih[:, 1 * hid:2 * hid])  # z
    w = w.at[:emb, 2 * h_pad:2 * h_pad + hid].set(wih[:, 2 * hid:3 * hid])  # n (x part)
    # h rows
    w = w.at[e_pad:e_pad + hid, 0 * h_pad:0 * h_pad + hid].set(whh[:, 0 * hid:1 * hid])  # r
    w = w.at[e_pad:e_pad + hid, 1 * h_pad:1 * h_pad + hid].set(whh[:, 1 * hid:2 * hid])  # z
    w = w.at[e_pad:e_pad + hid, 3 * h_pad:3 * h_pad + hid].set(whh[:, 2 * hid:3 * hid])  # n (h part)
    b = jnp.zeros((1, 4 * h_pad), jnp.float32)
    b = b.at[0, 0 * h_pad:0 * h_pad + hid].set(bih[0 * hid:1 * hid] + bhh[0 * hid:1 * hid])
    b = b.at[0, 1 * h_pad:1 * h_pad + hid].set(bih[1 * hid:2 * hid] + bhh[1 * hid:2 * hid])
    b = b.at[0, 2 * h_pad:2 * h_pad + hid].set(bih[2 * hid:3 * hid])
    b = b.at[0, 3 * h_pad:3 * h_pad + hid].set(bhh[2 * hid:3 * hid])
    return w, b


def pack_params(params, emb_dim, hidden_dim, output_dim):
    e_pad = _round_up(emb_dim, 128)
    h_pad = _round_up(hidden_dim, 128)
    v_pad = _round_up(output_dim, 128)
    enc_w, enc_b = pack_gru(params["enc_wih"], params["enc_whh"],
                            params["enc_bih"], params["enc_bhh"], e_pad, h_pad)
    dec_w, dec_b = pack_gru(params["dec_wih"], params["dec_whh"],
                            params["dec_bih"], params["dec_bhh"], e_pad, h_pad)
    return {
        "enc_w": enc_w, "enc_b": enc_b,
        "dec_w": dec_w, "dec_b": dec_b,
        "dec_emb": _pad2(params["dec_emb"], v_pad, e_pad),
        "wout": _pad2(params["dec_wout"], h_pad, v_pad),
        "bout": jnp.zeros((1, v_pad), jnp.float32).at[0, :output_dim].set(params["dec_bout"]),
    }


# ---------------------------------------------------------------------------
# The single fused Seq2Seq kernel.
# ---------------------------------------------------------------------------
def _seq2seq_kernel(tf_ref,                     # SMEM (trg_len,) int32 (scalar prefetch)
                    src_emb_ref,                # (src_len, B_pad, E_pad) f32
                    trg_oh_ref,                 # (trg_len, B_pad, V_pad) f32 one-hots
                    enc_w_ref, enc_b_ref,       # (E_pad+H_pad, 4H_pad), (1, 4H_pad)
                    dec_emb_ref,                # (V_pad, E_pad)
                    dec_w_ref, dec_b_ref,       # (E_pad+H_pad, 4H_pad), (1, 4H_pad)
                    wout_ref, bout_ref,         # (H_pad, V_pad), (1, V_pad)
                    out_ref,                    # (trg_len, B_pad, V_pad)
                    *, real_vocab):
    src_len, b_pad, _ = src_emb_ref.shape
    trg_len = trg_oh_ref.shape[0]
    h_pad = wout_ref.shape[0]
    v_pad = wout_ref.shape[1]

    def gru_cell(x_emb, h, w_ref, b_ref):
        # One MXU push for all gates: concat([x, h]) @ [r | z | n_x | n_h].
        xh = jnp.concatenate([x_emb, h], axis=1)                      # (B, E_pad+H_pad)
        g = jnp.dot(xh, w_ref[...], preferred_element_type=jnp.float32) + b_ref[...]
        r = jax.nn.sigmoid(g[:, 0 * h_pad:1 * h_pad])
        z = jax.nn.sigmoid(g[:, 1 * h_pad:2 * h_pad])
        n = jnp.tanh(g[:, 2 * h_pad:3 * h_pad] + r * g[:, 3 * h_pad:4 * h_pad])
        return (1.0 - z) * n + z * h

    # ---------------- Encoder recurrence (fully unrolled, static indices) ----------
    h = jnp.zeros((b_pad, h_pad), jnp.float32)
    for s in range(src_len):
        h = gru_cell(src_emb_ref[s], h, enc_w_ref, enc_b_ref)

    # ---------------- Decoder loop ------------------------------------------------
    out_ref[0] = jnp.zeros((b_pad, v_pad), jnp.float32)       # outputs[0] stays zero
    lane = jax.lax.broadcasted_iota(jnp.int32, (b_pad, v_pad), 1)
    lane_f = lane.astype(jnp.float32)
    vocab_mask = lane < real_vocab                            # mask padded logit lanes

    x_oh = trg_oh_ref[0]                                      # one-hot of trg[0]
    for t in range(1, trg_len):
        # Embedding lookup as a one-hot matmul (stays on the MXU, no host gather).
        x_emb = jnp.dot(x_oh, dec_emb_ref[...], preferred_element_type=jnp.float32)
        h = gru_cell(x_emb, h, dec_w_ref, dec_b_ref)
        pred = (jnp.dot(h, wout_ref[...], preferred_element_type=jnp.float32)
                + bout_ref[...])
        out_ref[t] = pred

        # First-occurrence argmax over the real vocab lanes, produced as a one-hot.
        masked = jnp.where(vocab_mask, pred, -1e30)
        m = jnp.max(masked, axis=1, keepdims=True)
        cand = jnp.where(masked == m, lane_f, float(v_pad))
        first = jnp.min(cand, axis=1, keepdims=True)
        top1_oh = (lane_f == first).astype(jnp.float32)

        # Teacher forcing select: tf ? trg[t] : top1 (scalar blend from SMEM flag).
        tf = (tf_ref[t] > 0).astype(jnp.float32)
        x_oh = tf * trg_oh_ref[t] + (1.0 - tf) * top1_oh


# ---------------------------------------------------------------------------
# Host wrapper: embedding of src, one-hot of trg, padding, and the pallas_call.
# ---------------------------------------------------------------------------
def seq2seq_gru_forward(src, trg, params, kparams, teacher_forcing_ratio, tf_key):
    src_len, batch = src.shape
    trg_len, _ = trg.shape
    output_dim = params["dec_wout"].shape[1]

    h_pad = kparams["wout"].shape[0]
    v_pad = kparams["wout"].shape[1]
    e_pad = kparams["enc_w"].shape[0] - h_pad
    b_pad = _round_up(batch, 8)

    # Encoder embedding (dropout p=0.0 -> identity), padded to (src_len, B_pad, E_pad).
    src_emb = params["enc_emb"][src]                              # (src_len, batch, emb)
    src_emb_p = jnp.zeros((src_len, b_pad, e_pad), jnp.float32)
    src_emb_p = src_emb_p.at[:, :batch, :src_emb.shape[2]].set(src_emb)

    # Target tokens as one-hots over the padded vocab (for in-kernel embedding lookup
    # and teacher forcing); padded batch rows are all-zero and never read back.
    trg_oh = jax.nn.one_hot(trg, v_pad, dtype=jnp.float32)        # (trg_len, batch, V_pad)
    trg_oh_p = jnp.zeros((trg_len, b_pad, v_pad), jnp.float32)
    trg_oh_p = trg_oh_p.at[:, :batch, :].set(trg_oh)

    # Deterministic stand-in for python random.random() teacher-forcing draws.
    tf_flags = (jax.random.uniform(tf_key, (trg_len,)) < teacher_forcing_ratio
                ).astype(jnp.int32)

    kernel = functools.partial(_seq2seq_kernel, real_vocab=output_dim)
    out_p = pl.pallas_call(
        kernel,
        out_shape=jax.ShapeDtypeStruct((trg_len, b_pad, v_pad), jnp.float32),
        grid_spec=pltpu.PrefetchScalarGridSpec(
            num_scalar_prefetch=1,
            grid=(1,),
            in_specs=[
                pl.BlockSpec((src_len, b_pad, e_pad), lambda i, tf: (0, 0, 0)),
                pl.BlockSpec((trg_len, b_pad, v_pad), lambda i, tf: (0, 0, 0)),
                pl.BlockSpec(kparams["enc_w"].shape, lambda i, tf: (0, 0)),
                pl.BlockSpec(kparams["enc_b"].shape, lambda i, tf: (0, 0)),
                pl.BlockSpec(kparams["dec_emb"].shape, lambda i, tf: (0, 0)),
                pl.BlockSpec(kparams["dec_w"].shape, lambda i, tf: (0, 0)),
                pl.BlockSpec(kparams["dec_b"].shape, lambda i, tf: (0, 0)),
                pl.BlockSpec(kparams["wout"].shape, lambda i, tf: (0, 0)),
                pl.BlockSpec(kparams["bout"].shape, lambda i, tf: (0, 0)),
            ],
            out_specs=pl.BlockSpec((trg_len, b_pad, v_pad), lambda i, tf: (0, 0, 0)),
        ),
        compiler_params=pltpu.CompilerParams(dimension_semantics=("arbitrary",)),
    )(tf_flags, src_emb_p, trg_oh_p,
      kparams["enc_w"], kparams["enc_b"], kparams["dec_emb"],
      kparams["dec_w"], kparams["dec_b"], kparams["wout"], kparams["bout"])

    return out_p[:, :batch, :output_dim]                           # drop padding


# ---------------------------------------------------------------------------
# Deterministic parameter construction (PyTorch-equivalent real-dim layouts).
# ---------------------------------------------------------------------------
def make_params(key, input_dim, output_dim, emb_dim, hidden_dim):
    ks = jax.random.split(key, 12)
    s = 0.1

    def rnd(k, shape):
        return jax.random.normal(k, shape, jnp.float32) * s

    return {
        # Encoder
        "enc_emb": rnd(ks[0], (input_dim, emb_dim)),
        "enc_wih": rnd(ks[1], (emb_dim, 3 * hidden_dim)),     # W_ih^T, gate order [r,z,n]
        "enc_whh": rnd(ks[2], (hidden_dim, 3 * hidden_dim)),  # W_hh^T
        "enc_bih": rnd(ks[3], (3 * hidden_dim,)),
        "enc_bhh": rnd(ks[4], (3 * hidden_dim,)),
        # Decoder
        "dec_emb": rnd(ks[5], (output_dim, emb_dim)),
        "dec_wih": rnd(ks[6], (emb_dim, 3 * hidden_dim)),
        "dec_whh": rnd(ks[7], (hidden_dim, 3 * hidden_dim)),
        "dec_bih": rnd(ks[8], (3 * hidden_dim,)),
        "dec_bhh": rnd(ks[9], (3 * hidden_dim,)),
        "dec_wout": rnd(ks[10], (hidden_dim, output_dim)),    # fc_out weight^T
        "dec_bout": rnd(ks[11], (output_dim,)),
    }


# ---------------------------------------------------------------------------
# Pure-JAX reference (unpadded, unfused) for numerical parity checking.
# ---------------------------------------------------------------------------
def reference_forward(src, trg, params, tf_flags):
    def cell(x, h, wih, whh, bih, bhh):
        H = h.shape[1]
        gi = x @ wih + bih
        gh = h @ whh + bhh
        r = jax.nn.sigmoid(gi[:, :H] + gh[:, :H])
        z = jax.nn.sigmoid(gi[:, H:2 * H] + gh[:, H:2 * H])
        n = jnp.tanh(gi[:, 2 * H:] + r * gh[:, 2 * H:])
        return (1.0 - z) * n + z * h

    src_emb = params["enc_emb"][src]
    h = jnp.zeros((src.shape[1], params["enc_whh"].shape[0]), jnp.float32)
    for s in range(src.shape[0]):
        h = cell(src_emb[s], h, params["enc_wih"], params["enc_whh"],
                 params["enc_bih"], params["enc_bhh"])

    trg_len, batch = trg.shape
    vocab = params["dec_wout"].shape[1]
    outputs = [jnp.zeros((batch, vocab), jnp.float32)]
    inp = trg[0]
    for t in range(1, trg_len):
        x = params["dec_emb"][inp]
        h = cell(x, h, params["dec_wih"], params["dec_whh"],
                 params["dec_bih"], params["dec_bhh"])
        pred = h @ params["dec_wout"] + params["dec_bout"]
        outputs.append(pred)
        top1 = jnp.argmax(pred, axis=1).astype(trg.dtype)
        inp = jnp.where(tf_flags[t] > 0, trg[t], top1)
    return jnp.stack(outputs, axis=0)


if __name__ == "__main__":
    INPUT_DIM = 32    # src vocab
    OUTPUT_DIM = 32   # trg vocab
    EMB_DIM = 16
    HID_DIM = 32
    SRC_LEN = 10
    TRG_LEN = 8
    BATCH = 4

    root = jax.random.PRNGKey(0)
    k_params, k_src, k_trg, k_tf = jax.random.split(root, 4)

    params = make_params(k_params, INPUT_DIM, OUTPUT_DIM, EMB_DIM, HID_DIM)
    kparams = pack_params(params, EMB_DIM, HID_DIM, OUTPUT_DIM)
    src = jax.random.randint(k_src, (SRC_LEN, BATCH), 0, INPUT_DIM, dtype=jnp.int32)
    trg = jax.random.randint(k_trg, (TRG_LEN, BATCH), 0, OUTPUT_DIM, dtype=jnp.int32)

    # --- numerical parity check vs pure-JAX reference (fully teacher-forced path,
    #     so the comparison is deterministic and independent of argmax tie-breaks) ---
    out_k = seq2seq_gru_forward(src, trg, params, kparams,
                                teacher_forcing_ratio=1.0, tf_key=k_tf)
    tf_all = (jax.random.uniform(k_tf, (TRG_LEN,)) < 1.0).astype(jnp.int32)
    out_r = reference_forward(src, trg, params, tf_all)
    out_k = jax.block_until_ready(out_k)
    assert out_k.shape == out_r.shape, (out_k.shape, out_r.shape)
    assert bool(jnp.allclose(out_k, out_r, atol=2e-3, rtol=2e-3)), \
        float(jnp.max(jnp.abs(out_k - out_r)))

    # --- demo run with mixed teacher forcing (argmax path exercised in-kernel) ---
    out = seq2seq_gru_forward(src, trg, params, kparams,
                              teacher_forcing_ratio=0.5, tf_key=k_tf)
    out = jax.block_until_ready(out)

    assert out.shape == (TRG_LEN, BATCH, OUTPUT_DIM), out.shape
    assert bool(jnp.all(out[0] == 0.0))           # outputs[0] never written
    assert bool(jnp.all(jnp.isfinite(out)))
    print("KERNEL_OK")
</pallas_src>

<mosaic_0001>
module attributes {stable_mosaic.version = 11 : i64} {
  func.func @_seq2seq_kernel(%arg0: i32, %arg1: memref<8xi32, #tpu.memory_space<smem>>, %arg2: memref<10x8x128xf32, #tpu.memory_space<vmem>>, %arg3: memref<8x8x128xf32, #tpu.memory_space<vmem>>, %arg4: memref<256x512xf32, #tpu.memory_space<vmem>>, %arg5: memref<1x512xf32, #tpu.memory_space<vmem>>, %arg6: memref<128x128xf32, #tpu.memory_space<vmem>>, %arg7: memref<256x512xf32, #tpu.memory_space<vmem>>, %arg8: memref<1x512xf32, #tpu.memory_space<vmem>>, %arg9: memref<128x128xf32, #tpu.memory_space<vmem>>, %arg10: memref<1x128xf32, #tpu.memory_space<vmem>>, %arg11: memref<8x8x128xf32, #tpu.memory_space<vmem>>) attributes {dimension_semantics = [#tpu.dimension_semantics<arbitrary>], iteration_bounds = array<i64: 1>, scalar_prefetch = 1 : i64, scratch_operands = 0 : i64, tpu.core_type = #tpu.core_type<tc>, window_params = [{pipeline_mode = #tpu.pipeline_mode<synchronous>, transform_indices = @transform_0, window_bounds = array<i64: 10, 8, 128>}, {pipeline_mode = #tpu.pipeline_mode<synchronous>, transform_indices = @transform_1, window_bounds = array<i64: 8, 8, 128>}, {pipeline_mode = #tpu.pipeline_mode<synchronous>, transform_indices = @transform_2, window_bounds = array<i64: 256, 512>}, {pipeline_mode = #tpu.pipeline_mode<synchronous>, transform_indices = @transform_3, window_bounds = array<i64: 1, 512>}, {pipeline_mode = #tpu.pipeline_mode<synchronous>, transform_indices = @transform_4, window_bounds = array<i64: 128, 128>}, {pipeline_mode = #tpu.pipeline_mode<synchronous>, transform_indices = @transform_5, window_bounds = array<i64: 256, 512>}, {pipeline_mode = #tpu.pipeline_mode<synchronous>, transform_indices = @transform_6, window_bounds = array<i64: 1, 512>}, {pipeline_mode = #tpu.pipeline_mode<synchronous>, transform_indices = @transform_7, window_bounds = array<i64: 128, 128>}, {pipeline_mode = #tpu.pipeline_mode<synchronous>, transform_indices = @transform_8, window_bounds = array<i64: 1, 128>}, {pipeline_mode = #tpu.pipeline_mode<synchronous>, transform_indices = @transform_9, window_bounds = array<i64: 8, 8, 128>}]} {
    %cst = arith.constant 0.000000e+00 : f32
    %0 = vector.broadcast %cst : f32 to vector<8x128xf32>
    %c0 = arith.constant 0 : index
    %c0_0 = arith.constant 0 : index
    %c0_1 = arith.constant 0 : index
    %1 = vector.load %arg2[%c0, %c0_0, %c0_1] : memref<10x8x128xf32, #tpu.memory_space<vmem>>, vector<1x8x128xf32>
    %2 = vector.shape_cast %1 : vector<1x8x128xf32> to vector<8x128xf32>
    %3 = tpu.concatenate %2, %0 in 1 : vector<8x128xf32>, vector<8x128xf32> -> vector<8x256xf32>
    %c0_2 = arith.constant 0 : index
    %c0_3 = arith.constant 0 : index
    %4 = vector.load %arg4[%c0_2, %c0_3] : memref<256x512xf32, #tpu.memory_space<vmem>>, vector<256x512xf32>
    %cst_4 = arith.constant dense<0.000000e+00> : vector<8x512xf32>
    %5 = tpu.matmul %3, %4, %cst_4 {dimension_numbers = #tpu.dot_dimension_numbers<[1], [0], [0], [1], [0, 0, 1, 1], [], []>} : vector<8x256xf32>, vector<256x512xf32>, vector<8x512xf32> -> vector<8x512xf32>
    %c0_5 = arith.constant 0 : index
    %c0_6 = arith.constant 0 : index
    %6 = vector.load %arg5[%c0_5, %c0_6] : memref<1x512xf32, #tpu.memory_space<vmem>>, vector<1x512xf32>
    %7 = vector.broadcast %6 : vector<1x512xf32> to vector<8x512xf32>
    %8 = arith.addf %5, %7 : vector<8x512xf32>
    %9 = vector.extract_strided_slice %8 {offsets = [0, 0], sizes = [8, 128], strides = [1, 1]} : vector<8x512xf32> to vector<8x128xf32>
    %10 = arith.negf %9 : vector<8x128xf32>
    %11 = math.exp %10 : vector<8x128xf32>
    %cst_7 = arith.constant 1.000000e+00 : f32
    %12 = vector.broadcast %cst_7 : f32 to vector<8x128xf32>
    %13 = arith.addf %12, %11 : vector<8x128xf32>
    %14 = arith.divf %12, %13 : vector<8x128xf32>
    %15 = vector.extract_strided_slice %8 {offsets = [0, 128], sizes = [8, 128], strides = [1, 1]} : vector<8x512xf32> to vector<8x128xf32>
    %16 = arith.negf %15 : vector<8x128xf32>
    %17 = math.exp %16 : vector<8x128xf32>
    %cst_8 = arith.constant 1.000000e+00 : f32
    %18 = vector.broadcast %cst_8 : f32 to vector<8x128xf32>
    %19 = arith.addf %18, %17 : vector<8x128xf32>
    %20 = arith.divf %18, %19 : vector<8x128xf32>
    %21 = vector.extract_strided_slice %8 {offsets = [0, 256], sizes = [8, 128], strides = [1, 1]} : vector<8x512xf32> to vector<8x128xf32>
    %22 = vector.extract_strided_slice %8 {offsets = [0, 384], sizes = [8, 128], strides = [1, 1]} : vector<8x512xf32> to vector<8x128xf32>
    %23 = arith.mulf %14, %22 : vector<8x128xf32>
    %24 = arith.addf %21, %23 : vector<8x128xf32>
    %25 = math.tanh %24 : vector<8x128xf32>
    %cst_9 = arith.constant 1.000000e+00 : f32
    %26 = vector.broadcast %cst_9 : f32 to vector<8x128xf32>
    %27 = arith.subf %26, %20 : vector<8x128xf32>
    %28 = arith.mulf %27, %25 : vector<8x128xf32>
    %29 = arith.mulf %20, %0 : vector<8x128xf32>
    %30 = arith.addf %28, %29 : vector<8x128xf32>
    %c1 = arith.constant 1 : index
    %c0_10 = arith.constant 0 : index
    %c0_11 = arith.constant 0 : index
    %31 = vector.load %arg2[%c1, %c0_10, %c0_11] : memref<10x8x128xf32, #tpu.memory_space<vmem>>, vector<1x8x128xf32>
    %32 = vector.shape_cast %31 : vector<1x8x128xf32> to vector<8x128xf32>
    %33 = tpu.concatenate %32, %30 in 1 : vector<8x128xf32>, vector<8x128xf32> -> vector<8x256xf32>
    %c0_12 = arith.constant 0 : index
    %c0_13 = arith.constant 0 : index
    %34 = vector.load %arg4[%c0_12, %c0_13] : memref<256x512xf32, #tpu.memory_space<vmem>>, vector<256x512xf32>
    %cst_14 = arith.constant dense<0.000000e+00> : vector<8x512xf32>
    %35 = tpu.matmul %33, %34, %cst_14 {dimension_numbers = #tpu.dot_dimension_numbers<[1], [0], [0], [1], [0, 0, 1, 1], [], []>} : vector<8x256xf32>, vector<256x512xf32>, vector<8x512xf32> -> vector<8x512xf32>
    %c0_15 = arith.constant 0 : index
    %c0_16 = arith.constant 0 : index
    %36 = vector.load %arg5[%c0_15, %c0_16] : memref<1x512xf32, #tpu.memory_space<vmem>>, vector<1x512xf32>
    %37 = vector.broadcast %36 : vector<1x512xf32> to vector<8x512xf32>
    %38 = arith.addf %35, %37 : vector<8x512xf32>
    %39 = vector.extract_strided_slice %38 {offsets = [0, 0], sizes = [8, 128], strides = [1, 1]} : vector<8x512xf32> to vector<8x128xf32>
    %40 = arith.negf %39 : vector<8x128xf32>
    %41 = math.exp %40 : vector<8x128xf32>
    %cst_17 = arith.constant 1.000000e+00 : f32
    %42 = vector.broadcast %cst_17 : f32 to vector<8x128xf32>
    %43 = arith.addf %42, %41 : vector<8x128xf32>
    %44 = arith.divf %42, %43 : vector<8x128xf32>
    %45 = vector.extract_strided_slice %38 {offsets = [0, 128], sizes = [8, 128], strides = [1, 1]} : vector<8x512xf32> to vector<8x128xf32>
    %46 = arith.negf %45 : vector<8x128xf32>
    %47 = math.exp %46 : vector<8x128xf32>
    %cst_18 = arith.constant 1.000000e+00 : f32
    %48 = vector.broadcast %cst_18 : f32 to vector<8x128xf32>
    %49 = arith.addf %48, %47 : vector<8x128xf32>
    %50 = arith.divf %48, %49 : vector<8x128xf32>
    %51 = vector.extract_strided_slice %38 {offsets = [0, 256], sizes = [8, 128], strides = [1, 1]} : vector<8x512xf32> to vector<8x128xf32>
    %52 = vector.extract_strided_slice %38 {offsets = [0, 384], sizes = [8, 128], strides = [1, 1]} : vector<8x512xf32> to vector<8x128xf32>
    %53 = arith.mulf %44, %52 : vector<8x128xf32>
    %54 = arith.addf %51, %53 : vector<8x128xf32>
    %55 = math.tanh %54 : vector<8x128xf32>
    %cst_19 = arith.constant 1.000000e+00 : f32
    %56 = vector.broadcast %cst_19 : f32 to vector<8x128xf32>
    %57 = arith.subf %56, %50 : vector<8x128xf32>
    %58 = arith.mulf %57, %55 : vector<8x128xf32>
    %59 = arith.mulf %50, %30 : vector<8x128xf32>
    %60 = arith.addf %58, %59 : vector<8x128xf32>
    %c2 = arith.constant 2 : index
    %c0_20 = arith.constant 0 : index
    %c0_21 = arith.constant 0 : index
    %61 = vector.load %arg2[%c2, %c0_20, %c0_21] : memref<10x8x128xf32, #tpu.memory_space<vmem>>, vector<1x8x128xf32>
    %62 = vector.shape_cast %61 : vector<1x8x128xf32> to vector<8x128xf32>
    %63 = tpu.concatenate %62, %60 in 1 : vector<8x128xf32>, vector<8x128xf32> -> vector<8x256xf32>
    %c0_22 = arith.constant 0 : index
    %c0_23 = arith.constant 0 : index
    %64 = vector.load %arg4[%c0_22, %c0_23] : memref<256x512xf32, #tpu.memory_space<vmem>>, vector<256x512xf32>
    %cst_24 = arith.constant dense<0.000000e+00> : vector<8x512xf32>
    %65 = tpu.matmul %63, %64, %cst_24 {dimension_numbers = #tpu.dot_dimension_numbers<[1], [0], [0], [1], [0, 0, 1, 1], [], []>} : vector<8x256xf32>, vector<256x512xf32>, vector<8x512xf32> -> vector<8x512xf32>
    %c0_25 = arith.constant 0 : index
    %c0_26 = arith.constant 0 : index
    %66 = vector.load %arg5[%c0_25, %c0_26] : memref<1x512xf32, #tpu.memory_space<vmem>>, vector<1x512xf32>
    %67 = vector.broadcast %66 : vector<1x512xf32> to vector<8x512xf32>
    %68 = arith.addf %65, %67 : vector<8x512xf32>
    %69 = vector.extract_strided_slice %68 {offsets = [0, 0], sizes = [8, 128], strides = [1, 1]} : vector<8x512xf32> to vector<8x128xf32>
    %70 = arith.negf %69 : vector<8x128xf32>
    %71 = math.exp %70 : vector<8x128xf32>
    %cst_27 = arith.constant 1.000000e+00 : f32
    %72 = vector.broadcast %cst_27 : f32 to vector<8x128xf32>
    %73 = arith.addf %72, %71 : vector<8x128xf32>
    %74 = arith.divf %72, %73 : vector<8x128xf32>
    %75 = vector.extract_strided_slice %68 {offsets = [0, 128], sizes = [8, 128], strides = [1, 1]} : vector<8x512xf32> to vector<8x128xf32>
    %76 = arith.negf %75 : vector<8x128xf32>
    %77 = math.exp %76 : vector<8x128xf32>
    %cst_28 = arith.constant 1.000000e+00 : f32
    %78 = vector.broadcast %cst_28 : f32 to vector<8x128xf32>
    %79 = arith.addf %78, %77 : vector<8x128xf32>
    %80 = arith.divf %78, %79 : vector<8x128xf32>
    %81 = vector.extract_strided_slice %68 {offsets = [0, 256], sizes = [8, 128], strides = [1, 1]} : vector<8x512xf32> to vector<8x128xf32>
    %82 = vector.extract_strided_slice %68 {offsets = [0, 384], sizes = [8, 128], strides = [1, 1]} : vector<8x512xf32> to vector<8x128xf32>
    %83 = arith.mulf %74, %82 : vector<8x128xf32>
    %84 = arith.addf %81, %83 : vector<8x128xf32>
    %85 = math.tanh %84 : vector<8x128xf32>
    %cst_29 = arith.constant 1.000000e+00 : f32
    %86 = vector.broadcast %cst_29 : f32 to vector<8x128xf32>
    %87 = arith.subf %86, %80 : vector<8x128xf32>
    %88 = arith.mulf %87, %85 : vector<8x128xf32>
    %89 = arith.mulf %80, %60 : vector<8x128xf32>
    %90 = arith.addf %88, %89 : vector<8x128xf32>
    %c3 = arith.constant 3 : index
    %c0_30 = arith.constant 0 : index
    %c0_31 = arith.constant 0 : index
    %91 = vector.load %arg2[%c3, %c0_30, %c0_31] : memref<10x8x128xf32, #tpu.memory_space<vmem>>, vector<1x8x128xf32>
    %92 = vector.shape_cast %91 : vector<1x8x128xf32> to vector<8x128xf32>
    %93 = tpu.concatenate %92, %90 in 1 : vector<8x128xf32>, vector<8x128xf32> -> vector<8x256xf32>
    %c0_32 = arith.constant 0 : index
    %c0_33 = arith.constant 0 : index
    %94 = vector.load %arg4[%c0_32, %c0_33] : memref<256x512xf32, #tpu.memory_space<vmem>>, vector<256x512xf32>
    %cst_34 = arith.constant dense<0.000000e+00> : vector<8x512xf32>
    %95 = tpu.matmul %93, %94, %cst_34 {dimension_numbers = #tpu.dot_dimension_numbers<[1], [0], [0], [1], [0, 0, 1, 1], [], []>} : vector<8x256xf32>, vector<256x512xf32>, vector<8x512xf32> -> vector<8x512xf32>
    %c0_35 = arith.constant 0 : index
    %c0_36 = arith.constant 0 : index
    %96 = vector.load %arg5[%c0_35, %c0_36] : memref<1x512xf32, #tpu.memory_space<vmem>>, vector<1x512xf32>
    %97 = vector.broadcast %96 : vector<1x512xf32> to vector<8x512xf32>
    %98 = arith.addf %95, %97 : vector<8x512xf32>
    %99 = vector.extract_strided_slice %98 {offsets = [0, 0], sizes = [8, 128], strides = [1, 1]} : vector<8x512xf32> to vector<8x128xf32>
    %100 = arith.negf %99 : vector<8x128xf32>
    %101 = math.exp %100 : vector<8x128xf32>
    %cst_37 = arith.constant 1.000000e+00 : f32
    %102 = vector.broadcast %cst_37 : f32 to vector<8x128xf32>
    %103 = arith.addf %102, %101 : vector<8x128xf32>
    %104 = arith.divf %102, %103 : vector<8x128xf32>
    %105 = vector.extract_strided_slice %98 {offsets = [0, 128], sizes = [8, 128], strides = [1, 1]} : vector<8x512xf32> to vector<8x128xf32>
    %106 = arith.negf %105 : vector<8x128xf32>
    %107 = math.exp %106 : vector<8x128xf32>
    %cst_38 = arith.constant 1.000000e+00 : f32
    %108 = vector.broadcast %cst_38 : f32 to vector<8x128xf32>
    %109 = arith.addf %108, %107 : vector<8x128xf32>
    %110 = arith.divf %108, %109 : vector<8x128xf32>
    %111 = vector.extract_strided_slice %98 {offsets = [0, 256], sizes = [8, 128], strides = [1, 1]} : vector<8x512xf32> to vector<8x128xf32>
    %112 = vector.extract_strided_slice %98 {offsets = [0, 384], sizes = [8, 128], strides = [1, 1]} : vector<8x512xf32> to vector<8x128xf32>
    %113 = arith.mulf %104, %112 : vector<8x128xf32>
    %114 = arith.addf %111, %113 : vector<8x128xf32>
    %115 = math.tanh %114 : vector<8x128xf32>
    %cst_39 = arith.constant 1.000000e+00 : f32
    %116 = vector.broadcast %cst_39 : f32 to vector<8x128xf32>
    %117 = arith.subf %116, %110 : vector<8x128xf32>
    %118 = arith.mulf %117, %115 : vector<8x128xf32>
    %119 = arith.mulf %110, %90 : vector<8x128xf32>
    %120 = arith.addf %118, %119 : vector<8x128xf32>
    %c4 = arith.constant 4 : index
    %c0_40 = arith.constant 0 : index
    %c0_41 = arith.constant 0 : index
    %121 = vector.load %arg2[%c4, %c0_40, %c0_41] : memref<10x8x128xf32, #tpu.memory_space<vmem>>, vector<1x8x128xf32>
    %122 = vector.shape_cast %121 : vector<1x8x128xf32> to vector<8x128xf32>
    %123 = tpu.concatenate %122, %120 in 1 : vector<8x128xf32>, vector<8x128xf32> -> vector<8x256xf32>
    %c0_42 = arith.constant 0 : index
    %c0_43 = arith.constant 0 : index
    %124 = vector.load %arg4[%c0_42, %c0_43] : memref<256x512xf32, #tpu.memory_space<vmem>>, vector<256x512xf32>
    %cst_44 = arith.constant dense<0.000000e+00> : vector<8x512xf32>
    %125 = tpu.matmul %123, %124, %cst_44 {dimension_numbers = #tpu.dot_dimension_numbers<[1], [0], [0], [1], [0, 0, 1, 1], [], []>} : vector<8x256xf32>, vector<256x512xf32>, vector<8x512xf32> -> vector<8x512xf32>
    %c0_45 = arith.constant 0 : index
    %c0_46 = arith.constant 0 : index
    %126 = vector.load %arg5[%c0_45, %c0_46] : memref<1x512xf32, #tpu.memory_space<vmem>>, vector<1x512xf32>
    %127 = vector.broadcast %126 : vector<1x512xf32> to vector<8x512xf32>
    %128 = arith.addf %125, %127 : vector<8x512xf32>
    %129 = vector.extract_strided_slice %128 {offsets = [0, 0], sizes = [8, 128], strides = [1, 1]} : vector<8x512xf32> to vector<8x128xf32>
    %130 = arith.negf %129 : vector<8x128xf32>
    %131 = math.exp %130 : vector<8x128xf32>
    %cst_47 = arith.constant 1.000000e+00 : f32
    %132 = vector.broadcast %cst_47 : f32 to vector<8x128xf32>
    %133 = arith.addf %132, %131 : vector<8x128xf32>
    %134 = arith.divf %132, %133 : vector<8x128xf32>
    %135 = vector.extract_strided_slice %128 {offsets = [0, 128], sizes = [8, 128], strides = [1, 1]} : vector<8x512xf32> to vector<8x128xf32>
    %136 = arith.negf %135 : vector<8x128xf32>
    %137 = math.exp %136 : vector<8x128xf32>
    %cst_48 = arith.constant 1.000000e+00 : f32
    %138 = vector.broadcast %cst_48 : f32 to vector<8x128xf32>
    %139 = arith.addf %138, %137 : vector<8x128xf32>
    %140 = arith.divf %138, %139 : vector<8x128xf32>
    %141 = vector.extract_strided_slice %128 {offsets = [0, 256], sizes = [8, 128], strides = [1, 1]} : vector<8x512xf32> to vector<8x128xf32>
    %142 = vector.extract_strided_slice %128 {offsets = [0, 384], sizes = [8, 128], strides = [1, 1]} : vector<8x512xf32> to vector<8x128xf32>
    %143 = arith.mulf %134, %142 : vector<8x128xf32>
    %144 = arith.addf %141, %143 : vector<8x128xf32>
    %145 = math.tanh %144 : vector<8x128xf32>
    %cst_49 = arith.constant 1.000000e+00 : f32
    %146 = vector.broadcast %cst_49 : f32 to vector<8x128xf32>
    %147 = arith.subf %146, %140 : vector<8x128xf32>
    %148 = arith.mulf %147, %145 : vector<8x128xf32>
    %149 = arith.mulf %140, %120 : vector<8x128xf32>
    %150 = arith.addf %148, %149 : vector<8x128xf32>
    %c5 = arith.constant 5 : index
    %c0_50 = arith.constant 0 : index
    %c0_51 = arith.constant 0 : index
    %151 = vector.load %arg2[%c5, %c0_50, %c0_51] : memref<10x8x128xf32, #tpu.memory_space<vmem>>, vector<1x8x128xf32>
    %152 = vector.shape_cast %151 : vector<1x8x128xf32> to vector<8x128xf32>
    %153 = tpu.concatenate %152, %150 in 1 : vector<8x128xf32>, vector<8x128xf32> -> vector<8x256xf32>
    %c0_52 = arith.constant 0 : index
    %c0_53 = arith.constant 0 : index
    %154 = vector.load %arg4[%c0_52, %c0_53] : memref<256x512xf32, #tpu.memory_space<vmem>>, vector<256x512xf32>
    %cst_54 = arith.constant dense<0.000000e+00> : vector<8x512xf32>
    %155 = tpu.matmul %153, %154, %cst_54 {dimension_numbers = #tpu.dot_dimension_numbers<[1], [0], [0], [1], [0, 0, 1, 1], [], []>} : vector<8x256xf32>, vector<256x512xf32>, vector<8x512xf32> -> vector<8x512xf32>
    %c0_55 = arith.constant 0 : index
    %c0_56 = arith.constant 0 : index
    %156 = vector.load %arg5[%c0_55, %c0_56] : memref<1x512xf32, #tpu.memory_space<vmem>>, vector<1x512xf32>
    %157 = vector.broadcast %156 : vector<1x512xf32> to vector<8x512xf32>
    %158 = arith.addf %155, %157 : vector<8x512xf32>
    %159 = vector.extract_strided_slice %158 {offsets = [0, 0], sizes = [8, 128], strides = [1, 1]} : vector<8x512xf32> to vector<8x128xf32>
    %160 = arith.negf %159 : vector<8x128xf32>
    %161 = math.exp %160 : vector<8x128xf32>
    %cst_57 = arith.constant 1.000000e+00 : f32
    %162 = vector.broadcast %cst_57 : f32 to vector<8x128xf32>
    %163 = arith.addf %162, %161 : vector<8x128xf32>
    %164 = arith.divf %162, %163 : vector<8x128xf32>
    %165 = vector.extract_strided_slice %158 {offsets = [0, 128], sizes = [8, 128], strides = [1, 1]} : vector<8x512xf32> to vector<8x128xf32>
    %166 = arith.negf %165 : vector<8x128xf32>
    %167 = math.exp %166 : vector<8x128xf32>
    %cst_58 = arith.constant 1.000000e+00 : f32
    %168 = vector.broadcast %cst_58 : f32 to vector<8x128xf32>
    %169 = arith.addf %168, %167 : vector<8x128xf32>
    %170 = arith.divf %168, %169 : vector<8x128xf32>
    %171 = vector.extract_strided_slice %158 {offsets = [0, 256], sizes = [8, 128], strides = [1, 1]} : vector<8x512xf32> to vector<8x128xf32>
    %172 = vector.extract_strided_slice %158 {offsets = [0, 384], sizes = [8, 128], strides = [1, 1]} : vector<8x512xf32> to vector<8x128xf32>
    %173 = arith.mulf %164, %172 : vector<8x128xf32>
    %174 = arith.addf %171, %173 : vector<8x128xf32>
    %175 = math.tanh %174 : vector<8x128xf32>
    %cst_59 = arith.constant 1.000000e+00 : f32
    %176 = vector.broadcast %cst_59 : f32 to vector<8x128xf32>
    %177 = arith.subf %176, %170 : vector<8x128xf32>
    %178 = arith.mulf %177, %175 : vector<8x128xf32>
    %179 = arith.mulf %170, %150 : vector<8x128xf32>
    %180 = arith.addf %178, %179 : vector<8x128xf32>
    %c6 = arith.constant 6 : index
    %c0_60 = arith.constant 0 : index
    %c0_61 = arith.constant 0 : index
    %181 = vector.load %arg2[%c6, %c0_60, %c0_61] : memref<10x8x128xf32, #tpu.memory_space<vmem>>, vector<1x8x128xf32>
    %182 = vector.shape_cast %181 : vector<1x8x128xf32> to vector<8x128xf32>
    %183 = tpu.concatenate %182, %180 in 1 : vector<8x128xf32>, vector<8x128xf32> -> vector<8x256xf32>
    %c0_62 = arith.constant 0 : index
    %c0_63 = arith.constant 0 : index
    %184 = vector.load %arg4[%c0_62, %c0_63] : memref<256x512xf32, #tpu.memory_space<vmem>>, vector<256x512xf32>
    %cst_64 = arith.constant dense<0.000000e+00> : vector<8x512xf32>
    %185 = tpu.matmul %183, %184, %cst_64 {dimension_numbers = #tpu.dot_dimension_numbers<[1], [0], [0], [1], [0, 0, 1, 1], [], []>} : vector<8x256xf32>, vector<256x512xf32>, vector<8x512xf32> -> vector<8x512xf32>
    %c0_65 = arith.constant 0 : index
    %c0_66 = arith.constant 0 : index
    %186 = vector.load %arg5[%c0_65, %c0_66] : memref<1x512xf32, #tpu.memory_space<vmem>>, vector<1x512xf32>
    %187 = vector.broadcast %186 : vector<1x512xf32> to vector<8x512xf32>
    %188 = arith.addf %185, %187 : vector<8x512xf32>
    %189 = vector.extract_strided_slice %188 {offsets = [0, 0], sizes = [8, 128], strides = [1, 1]} : vector<8x512xf32> to vector<8x128xf32>
    %190 = arith.negf %189 : vector<8x128xf32>
    %191 = math.exp %190 : vector<8x128xf32>
    %cst_67 = arith.constant 1.000000e+00 : f32
    %192 = vector.broadcast %cst_67 : f32 to vector<8x128xf32>
    %193 = arith.addf %192, %191 : vector<8x128xf32>
    %194 = arith.divf %192, %193 : vector<8x128xf32>
    %195 = vector.extract_strided_slice %188 {offsets = [0, 128], sizes = [8, 128], strides = [1, 1]} : vector<8x512xf32> to vector<8x128xf32>
    %196 = arith.negf %195 : vector<8x128xf32>
    %197 = math.exp %196 : vector<8x128xf32>
    %cst_68 = arith.constant 1.000000e+00 : f32
    %198 = vector.broadcast %cst_68 : f32 to vector<8x128xf32>
    %199 = arith.addf %198, %197 : vector<8x128xf32>
    %200 = arith.divf %198, %199 : vector<8x128xf32>
    %201 = vector.extract_strided_slice %188 {offsets = [0, 256], sizes = [8, 128], strides = [1, 1]} : vector<8x512xf32> to vector<8x128xf32>
    %202 = vector.extract_strided_slice %188 {offsets = [0, 384], sizes = [8, 128], strides = [1, 1]} : vector<8x512xf32> to vector<8x128xf32>
    %203 = arith.mulf %194, %202 : vector<8x128xf32>
    %204 = arith.addf %201, %203 : vector<8x128xf32>
    %205 = math.tanh %204 : vector<8x128xf32>
    %cst_69 = arith.constant 1.000000e+00 : f32
    %206 = vector.broadcast %cst_69 : f32 to vector<8x128xf32>
    %207 = arith.subf %206, %200 : vector<8x128xf32>
    %208 = arith.mulf %207, %205 : vector<8x128xf32>
    %209 = arith.mulf %200, %180 : vector<8x128xf32>
    %210 = arith.addf %208, %209 : vector<8x128xf32>
    %c7 = arith.constant 7 : index
    %c0_70 = arith.constant 0 : index
    %c0_71 = arith.constant 0 : index
    %211 = vector.load %arg2[%c7, %c0_70, %c0_71] : memref<10x8x128xf32, #tpu.memory_space<vmem>>, vector<1x8x128xf32>
    %212 = vector.shape_cast %211 : vector<1x8x128xf32> to vector<8x128xf32>
    %213 = tpu.concatenate %212, %210 in 1 : vector<8x128xf32>, vector<8x128xf32> -> vector<8x256xf32>
    %c0_72 = arith.constant 0 : index
    %c0_73 = arith.constant 0 : index
    %214 = vector.load %arg4[%c0_72, %c0_73] : memref<256x512xf32, #tpu.memory_space<vmem>>, vector<256x512xf32>
    %cst_74 = arith.constant dense<0.000000e+00> : vector<8x512xf32>
    %215 = tpu.matmul %213, %214, %cst_74 {dimension_numbers = #tpu.dot_dimension_numbers<[1], [0], [0], [1], [0, 0, 1, 1], [], []>} : vector<8x256xf32>, vector<256x512xf32>, vector<8x512xf32> -> vector<8x512xf32>
    %c0_75 = arith.constant 0 : index
    %c0_76 = arith.constant 0 : index
    %216 = vector.load %arg5[%c0_75, %c0_76] : memref<1x512xf32, #tpu.memory_space<vmem>>, vector<1x512xf32>
    %217 = vector.broadcast %216 : vector<1x512xf32> to vector<8x512xf32>
    %218 = arith.addf %215, %217 : vector<8x512xf32>
    %219 = vector.extract_strided_slice %218 {offsets = [0, 0], sizes = [8, 128], strides = [1, 1]} : vector<8x512xf32> to vector<8x128xf32>
    %220 = arith.negf %219 : vector<8x128xf32>
    %221 = math.exp %220 : vector<8x128xf32>
    %cst_77 = arith.constant 1.000000e+00 : f32
    %222 = vector.broadcast %cst_77 : f32 to vector<8x128xf32>
    %223 = arith.addf %222, %221 : vector<8x128xf32>
    %224 = arith.divf %222, %223 : vector<8x128xf32>
    %225 = vector.extract_strided_slice %218 {offsets = [0, 128], sizes = [8, 128], strides = [1, 1]} : vector<8x512xf32> to vector<8x128xf32>
    %226 = arith.negf %225 : vector<8x128xf32>
    %227 = math.exp %226 : vector<8x128xf32>
    %cst_78 = arith.constant 1.000000e+00 : f32
    %228 = vector.broadcast %cst_78 : f32 to vector<8x128xf32>
    %229 = arith.addf %228, %227 : vector<8x128xf32>
    %230 = arith.divf %228, %229 : vector<8x128xf32>
    %231 = vector.extract_strided_slice %218 {offsets = [0, 256], sizes = [8, 128], strides = [1, 1]} : vector<8x512xf32> to vector<8x128xf32>
    %232 = vector.extract_strided_slice %218 {offsets = [0, 384], sizes = [8, 128], strides = [1, 1]} : vector<8x512xf32> to vector<8x128xf32>
    %233 = arith.mulf %224, %232 : vector<8x128xf32>
    %234 = arith.addf %231, %233 : vector<8x128xf32>
    %235 = math.tanh %234 : vector<8x128xf32>
    %cst_79 = arith.constant 1.000000e+00 : f32
    %236 = vector.broadcast %cst_79 : f32 to vector<8x128xf32>
    %237 = arith.subf %236, %230 : vector<8x128xf32>
    %238 = arith.mulf %237, %235 : vector<8x128xf32>
    %239 = arith.mulf %230, %210 : vector<8x128xf32>
    %240 = arith.addf %238, %239 : vector<8x128xf32>
    %c8 = arith.constant 8 : index
    %c0_80 = arith.constant 0 : index
    %c0_81 = arith.constant 0 : index
    %241 = vector.load %arg2[%c8, %c0_80, %c0_81] : memref<10x8x128xf32, #tpu.memory_space<vmem>>, vector<1x8x128xf32>
    %242 = vector.shape_cast %241 : vector<1x8x128xf32> to vector<8x128xf32>
    %243 = tpu.concatenate %242, %240 in 1 : vector<8x128xf32>, vector<8x128xf32> -> vector<8x256xf32>
    %c0_82 = arith.constant 0 : index
    %c0_83 = arith.constant 0 : index
    %244 = vector.load %arg4[%c0_82, %c0_83] : memref<256x512xf32, #tpu.memory_space<vmem>>, vector<256x512xf32>
    %cst_84 = arith.constant dense<0.000000e+00> : vector<8x512xf32>
    %245 = tpu.matmul %243, %244, %cst_84 {dimension_numbers = #tpu.dot_dimension_numbers<[1], [0], [0], [1], [0, 0, 1, 1], [], []>} : vector<8x256xf32>, vector<256x512xf32>, vector<8x512xf32> -> vector<8x512xf32>
    %c0_85 = arith.constant 0 : index
    %c0_86 = arith.constant 0 : index
    %246 = vector.load %arg5[%c0_85, %c0_86] : memref<1x512xf32, #tpu.memory_space<vmem>>, vector<1x512xf32>
    %247 = vector.broadcast %246 : vector<1x512xf32> to vector<8x512xf32>
    %248 = arith.addf %245, %247 : vector<8x512xf32>
    %249 = vector.extract_strided_slice %248 {offsets = [0, 0], sizes = [8, 128], strides = [1, 1]} : vector<8x512xf32> to vector<8x128xf32>
    %250 = arith.negf %249 : vector<8x128xf32>
    %251 = math.exp %250 : vector<8x128xf32>
    %cst_87 = arith.constant 1.000000e+00 : f32
    %252 = vector.broadcast %cst_87 : f32 to vector<8x128xf32>
    %253 = arith.addf %252, %251 : vector<8x128xf32>
    %254 = arith.divf %252, %253 : vector<8x128xf32>
    %255 = vector.extract_strided_slice %248 {offsets = [0, 128], sizes = [8, 128], strides = [1, 1]} : vector<8x512xf32> to vector<8x128xf32>
    %256 = arith.negf %255 : vector<8x128xf32>
    %257 = math.exp %256 : vector<8x128xf32>
    %cst_88 = arith.constant 1.000000e+00 : f32
    %258 = vector.broadcast %cst_88 : f32 to vector<8x128xf32>
    %259 = arith.addf %258, %257 : vector<8x128xf32>
    %260 = arith.divf %258, %259 : vector<8x128xf32>
    %261 = vector.extract_strided_slice %248 {offsets = [0, 256], sizes = [8, 128], strides = [1, 1]} : vector<8x512xf32> to vector<8x128xf32>
    %262 = vector.extract_strided_slice %248 {offsets = [0, 384], sizes = [8, 128], strides = [1, 1]} : vector<8x512xf32> to vector<8x128xf32>
    %263 = arith.mulf %254, %262 : vector<8x128xf32>
    %264 = arith.addf %261, %263 : vector<8x128xf32>
    %265 = math.tanh %264 : vector<8x128xf32>
    %cst_89 = arith.constant 1.000000e+00 : f32
    %266 = vector.broadcast %cst_89 : f32 to vector<8x128xf32>
    %267 = arith.subf %266, %260 : vector<8x128xf32>
    %268 = arith.mulf %267, %265 : vector<8x128xf32>
    %269 = arith.mulf %260, %240 : vector<8x128xf32>
    %270 = arith.addf %268, %269 : vector<8x128xf32>
    %c9 = arith.constant 9 : index
    %c0_90 = arith.constant 0 : index
    %c0_91 = arith.constant 0 : index
    %271 = vector.load %arg2[%c9, %c0_90, %c0_91] : memref<10x8x128xf32, #tpu.memory_space<vmem>>, vector<1x8x128xf32>
    %272 = vector.shape_cast %271 : vector<1x8x128xf32> to vector<8x128xf32>
    %273 = tpu.concatenate %272, %270 in 1 : vector<8x128xf32>, vector<8x128xf32> -> vector<8x256xf32>
    %c0_92 = arith.constant 0 : index
    %c0_93 = arith.constant 0 : index
    %274 = vector.load %arg4[%c0_92, %c0_93] : memref<256x512xf32, #tpu.memory_space<vmem>>, vector<256x512xf32>
    %cst_94 = arith.constant dense<0.000000e+00> : vector<8x512xf32>
    %275 = tpu.matmul %273, %274, %cst_94 {dimension_numbers = #tpu.dot_dimension_numbers<[1], [0], [0], [1], [0, 0, 1, 1], [], []>} : vector<8x256xf32>, vector<256x512xf32>, vector<8x512xf32> -> vector<8x512xf32>
    %c0_95 = arith.constant 0 : index
    %c0_96 = arith.constant 0 : index
    %276 = vector.load %arg5[%c0_95, %c0_96] : memref<1x512xf32, #tpu.memory_space<vmem>>, vector<1x512xf32>
    %277 = vector.broadcast %276 : vector<1x512xf32> to vector<8x512xf32>
    %278 = arith.addf %275, %277 : vector<8x512xf32>
    %279 = vector.extract_strided_slice %278 {offsets = [0, 0], sizes = [8, 128], strides = [1, 1]} : vector<8x512xf32> to vector<8x128xf32>
    %280 = arith.negf %279 : vector<8x128xf32>
    %281 = math.exp %280 : vector<8x128xf32>
    %cst_97 = arith.constant 1.000000e+00 : f32
    %282 = vector.broadcast %cst_97 : f32 to vector<8x128xf32>
    %283 = arith.addf %282, %281 : vector<8x128xf32>
    %284 = arith.divf %282, %283 : vector<8x128xf32>
    %285 = vector.extract_strided_slice %278 {offsets = [0, 128], sizes = [8, 128], strides = [1, 1]} : vector<8x512xf32> to vector<8x128xf32>
    %286 = arith.negf %285 : vector<8x128xf32>
    %287 = math.exp %286 : vector<8x128xf32>
    %cst_98 = arith.constant 1.000000e+00 : f32
    %288 = vector.broadcast %cst_98 : f32 to vector<8x128xf32>
    %289 = arith.addf %288, %287 : vector<8x128xf32>
    %290 = arith.divf %288, %289 : vector<8x128xf32>
    %291 = vector.extract_strided_slice %278 {offsets = [0, 256], sizes = [8, 128], strides = [1, 1]} : vector<8x512xf32> to vector<8x128xf32>
    %292 = vector.extract_strided_slice %278 {offsets = [0, 384], sizes = [8, 128], strides = [1, 1]} : vector<8x512xf32> to vector<8x128xf32>
    %293 = arith.mulf %284, %292 : vector<8x128xf32>
    %294 = arith.addf %291, %293 : vector<8x128xf32>
    %295 = math.tanh %294 : vector<8x128xf32>
    %cst_99 = arith.constant 1.000000e+00 : f32
    %296 = vector.broadcast %cst_99 : f32 to vector<8x128xf32>
    %297 = arith.subf %296, %290 : vector<8x128xf32>
    %298 = arith.mulf %297, %295 : vector<8x128xf32>
    %299 = arith.mulf %290, %270 : vector<8x128xf32>
    %300 = arith.addf %298, %299 : vector<8x128xf32>
    %cst_100 = arith.constant 0.000000e+00 : f32
    %301 = vector.broadcast %cst_100 : f32 to vector<8x128xf32>
    %c0_101 = arith.constant 0 : index
    %c0_102 = arith.constant 0 : index
    %c0_103 = arith.constant 0 : index
    %302 = vector.load %arg11[%c0_101, %c0_102, %c0_103] : memref<8x8x128xf32, #tpu.memory_space<vmem>>, vector<1x8x128xf32>
    %303 = vector.shape_cast %302 : vector<1x8x128xf32> to vector<8x128xf32>
    %304 = vector.shape_cast %301 : vector<8x128xf32> to vector<1x8x128xf32>
    tpu.vector_store %arg11[%c0_101, %c0_102, %c0_103], %304 {strides = array<i32>} : memref<8x8x128xf32, #tpu.memory_space<vmem>>, vector<1x8x128xf32>,
    %305 = tpu.iota {dimensions = array<i32: 1>} : vector<8x128xi32>
    %306 = arith.sitofp %305 : vector<8x128xi32> to vector<8x128xf32>
    %c32_i32 = arith.constant 32 : i32
    %307 = vector.broadcast %c32_i32 : i32 to vector<8x128xi32>
    %308 = arith.cmpi slt, %305, %307 : vector<8x128xi32>
    %c0_104 = arith.constant 0 : index
    %c0_105 = arith.constant 0 : index
    %c0_106 = arith.constant 0 : index
    %309 = vector.load %arg3[%c0_104, %c0_105, %c0_106] : memref<8x8x128xf32, #tpu.memory_space<vmem>>, vector<1x8x128xf32>
    %310 = vector.shape_cast %309 : vector<1x8x128xf32> to vector<8x128xf32>
    %c0_107 = arith.constant 0 : index
    %c0_108 = arith.constant 0 : index
    %311 = vector.load %arg6[%c0_107, %c0_108] : memref<128x128xf32, #tpu.memory_space<vmem>>, vector<128x128xf32>
    %cst_109 = arith.constant dense<0.000000e+00> : vector<8x128xf32>
    %312 = tpu.matmul %310, %311, %cst_109 {dimension_numbers = #tpu.dot_dimension_numbers<[1], [0], [0], [1], [0, 0, 1, 1], [], []>} : vector<8x128xf32>, vector<128x128xf32>, vector<8x128xf32> -> vector<8x128xf32>
    %313 = tpu.concatenate %312, %300 in 1 : vector<8x128xf32>, vector<8x128xf32> -> vector<8x256xf32>
    %c0_110 = arith.constant 0 : index
    %c0_111 = arith.constant 0 : index
    %314 = vector.load %arg7[%c0_110, %c0_111] : memref<256x512xf32, #tpu.memory_space<vmem>>, vector<256x512xf32>
    %cst_112 = arith.constant dense<0.000000e+00> : vector<8x512xf32>
    %315 = tpu.matmul %313, %314, %cst_112 {dimension_numbers = #tpu.dot_dimension_numbers<[1], [0], [0], [1], [0, 0, 1, 1], [], []>} : vector<8x256xf32>, vector<256x512xf32>, vector<8x512xf32> -> vector<8x512xf32>
    %c0_113 = arith.constant 0 : index
    %c0_114 = arith.constant 0 : index
    %316 = vector.load %arg8[%c0_113, %c0_114] : memref<1x512xf32, #tpu.memory_space<vmem>>, vector<1x512xf32>
    %317 = vector.broadcast %316 : vector<1x512xf32> to vector<8x512xf32>
    %318 = arith.addf %315, %317 : vector<8x512xf32>
    %319 = vector.extract_strided_slice %318 {offsets = [0, 0], sizes = [8, 128], strides = [1, 1]} : vector<8x512xf32> to vector<8x128xf32>
    %320 = arith.negf %319 : vector<8x128xf32>
    %321 = math.exp %320 : vector<8x128xf32>
    %cst_115 = arith.constant 1.000000e+00 : f32
    %322 = vector.broadcast %cst_115 : f32 to vector<8x128xf32>
    %323 = arith.addf %322, %321 : vector<8x128xf32>
    %324 = arith.divf %322, %323 : vector<8x128xf32>
    %325 = vector.extract_strided_slice %318 {offsets = [0, 128], sizes = [8, 128], strides = [1, 1]} : vector<8x512xf32> to vector<8x128xf32>
    %326 = arith.negf %325 : vector<8x128xf32>
    %327 = math.exp %326 : vector<8x128xf32>
    %cst_116 = arith.constant 1.000000e+00 : f32
    %328 = vector.broadcast %cst_116 : f32 to vector<8x128xf32>
    %329 = arith.addf %328, %327 : vector<8x128xf32>
    %330 = arith.divf %328, %329 : vector<8x128xf32>
    %331 = vector.extract_strided_slice %318 {offsets = [0, 256], sizes = [8, 128], strides = [1, 1]} : vector<8x512xf32> to vector<8x128xf32>
    %332 = vector.extract_strided_slice %318 {offsets = [0, 384], sizes = [8, 128], strides = [1, 1]} : vector<8x512xf32> to vector<8x128xf32>
    %333 = arith.mulf %324, %332 : vector<8x128xf32>
    %334 = arith.addf %331, %333 : vector<8x128xf32>
    %335 = math.tanh %334 : vector<8x128xf32>
    %cst_117 = arith.constant 1.000000e+00 : f32
    %336 = vector.broadcast %cst_117 : f32 to vector<8x128xf32>
    %337 = arith.subf %336, %330 : vector<8x128xf32>
    %338 = arith.mulf %337, %335 : vector<8x128xf32>
    %339 = arith.mulf %330, %300 : vector<8x128xf32>
    %340 = arith.addf %338, %339 : vector<8x128xf32>
    %c0_118 = arith.constant 0 : index
    %c0_119 = arith.constant 0 : index
    %341 = vector.load %arg9[%c0_118, %c0_119] : memref<128x128xf32, #tpu.memory_space<vmem>>, vector<128x128xf32>
    %cst_120 = arith.constant dense<0.000000e+00> : vector<8x128xf32>
    %342 = tpu.matmul %340, %341, %cst_120 {dimension_numbers = #tpu.dot_dimension_numbers<[1], [0], [0], [1], [0, 0, 1, 1], [], []>} : vector<8x128xf32>, vector<128x128xf32>, vector<8x128xf32> -> vector<8x128xf32>
    %c0_121 = arith.constant 0 : index
    %c0_122 = arith.constant 0 : index
    %343 = vector.load %arg10[%c0_121, %c0_122] : memref<1x128xf32, #tpu.memory_space<vmem>>, vector<1x128xf32>
    %344 = vector.broadcast %343 : vector<1x128xf32> to vector<8x128xf32>
    %345 = arith.addf %342, %344 : vector<8x128xf32>
    %c1_123 = arith.constant 1 : index
    %c0_124 = arith.constant 0 : index
    %c0_125 = arith.constant 0 : index
    %346 = vector.load %arg11[%c1_123, %c0_124, %c0_125] : memref<8x8x128xf32, #tpu.memory_space<vmem>>, vector<1x8x128xf32>
    %347 = vector.shape_cast %346 : vector<1x8x128xf32> to vector<8x128xf32>
    %348 = vector.shape_cast %345 : vector<8x128xf32> to vector<1x8x128xf32>
    tpu.vector_store %arg11[%c1_123, %c0_124, %c0_125], %348 {strides = array<i32>} : memref<8x8x128xf32, #tpu.memory_space<vmem>>, vector<1x8x128xf32>,
    %cst_126 = arith.constant -1.000000e+30 : f32
    %349 = vector.broadcast %cst_126 : f32 to vector<8x128xf32>
    %350 = arith.select %308, %345, %349 : vector<8x128xi1>, vector<8x128xf32>
    %cst_127 = arith.constant dense<0xFF800000> : vector<8xf32>
    %351 = vector.multi_reduction <maximumf>, %350, %cst_127 [1] : vector<8x128xf32> to vector<8xf32>
    %352 = vector.shape_cast %351 : vector<8xf32> to vector<8x1xf32>
    %353 = vector.broadcast %352 : vector<8x1xf32> to vector<8x128xf32>
    %354 = arith.cmpf oeq, %350, %353 : vector<8x128xf32>
    %cst_128 = arith.constant 1.280000e+02 : f32
    %355 = vector.broadcast %cst_128 : f32 to vector<8x128xf32>
    %356 = arith.select %354, %306, %355 : vector<8x128xi1>, vector<8x128xf32>
    %cst_129 = arith.constant dense<0x7F800000> : vector<8xf32>
    %357 = vector.multi_reduction <minimumf>, %356, %cst_129 [1] : vector<8x128xf32> to vector<8xf32>
    %358 = vector.shape_cast %357 : vector<8xf32> to vector<8x1xf32>
    %359 = vector.broadcast %358 : vector<8x1xf32> to vector<8x128xf32>
    %360 = arith.cmpf oeq, %306, %359 : vector<8x128xf32>
    %361 = arith.extui %360 : vector<8x128xi1> to vector<8x128xi32>
    %362 = arith.sitofp %361 : vector<8x128xi32> to vector<8x128xf32>
    %c1_130 = arith.constant 1 : index
    %363 = memref.load %arg1[%c1_130] : memref<8xi32, #tpu.memory_space<smem>>
    %c0_i32 = arith.constant 0 : i32
    %364 = arith.cmpi sgt, %363, %c0_i32 : i32
    %365 = arith.extui %364 : i1 to i32
    %366 = arith.sitofp %365 : i32 to f32
    %c1_131 = arith.constant 1 : index
    %c0_132 = arith.constant 0 : index
    %c0_133 = arith.constant 0 : index
    %367 = vector.load %arg3[%c1_131, %c0_132, %c0_133] : memref<8x8x128xf32, #tpu.memory_space<vmem>>, vector<1x8x128xf32>
    %368 = vector.shape_cast %367 : vector<1x8x128xf32> to vector<8x128xf32>
    %369 = vector.broadcast %366 : f32 to vector<8x128xf32>
    %370 = arith.mulf %369, %368 : vector<8x128xf32>
    %cst_134 = arith.constant 1.000000e+00 : f32
    %371 = arith.subf %cst_134, %366 : f32
    %372 = vector.broadcast %371 : f32 to vector<8x128xf32>
    %373 = arith.mulf %372, %362 : vector<8x128xf32>
    %374 = arith.addf %370, %373 : vector<8x128xf32>
    %c0_135 = arith.constant 0 : index
    %c0_136 = arith.constant 0 : index
    %375 = vector.load %arg6[%c0_135, %c0_136] : memref<128x128xf32, #tpu.memory_space<vmem>>, vector<128x128xf32>
    %cst_137 = arith.constant dense<0.000000e+00> : vector<8x128xf32>
    %376 = tpu.matmul %374, %375, %cst_137 {dimension_numbers = #tpu.dot_dimension_numbers<[1], [0], [0], [1], [0, 0, 1, 1], [], []>} : vector<8x128xf32>, vector<128x128xf32>, vector<8x128xf32> -> vector<8x128xf32>
    %377 = tpu.concatenate %376, %340 in 1 : vector<8x128xf32>, vector<8x128xf32> -> vector<8x256xf32>
    %c0_138 = arith.constant 0 : index
    %c0_139 = arith.constant 0 : index
    %378 = vector.load %arg7[%c0_138, %c0_139] : memref<256x512xf32, #tpu.memory_space<vmem>>, vector<256x512xf32>
    %cst_140 = arith.constant dense<0.000000e+00> : vector<8x512xf32>
    %379 = tpu.matmul %377, %378, %cst_140 {dimension_numbers = #tpu.dot_dimension_numbers<[1], [0], [0], [1], [0, 0, 1, 1], [], []>} : vector<8x256xf32>, vector<256x512xf32>, vector<8x512xf32> -> vector<8x512xf32>
    %c0_141 = arith.constant 0 : index
    %c0_142 = arith.constant 0 : index
    %380 = vector.load %arg8[%c0_141, %c0_142] : memref<1x512xf32, #tpu.memory_space<vmem>>, vector<1x512xf32>
    %381 = vector.broadcast %380 : vector<1x512xf32> to vector<8x512xf32>
    %382 = arith.addf %379, %381 : vector<8x512xf32>
    %383 = vector.extract_strided_slice %382 {offsets = [0, 0], sizes = [8, 128], strides = [1, 1]} : vector<8x512xf32> to vector<8x128xf32>
    %384 = arith.negf %383 : vector<8x128xf32>
    %385 = math.exp %384 : vector<8x128xf32>
    %cst_143 = arith.constant 1.000000e+00 : f32
    %386 = vector.broadcast %cst_143 : f32 to vector<8x128xf32>
    %387 = arith.addf %386, %385 : vector<8x128xf32>
    %388 = arith.divf %386, %387 : vector<8x128xf32>
    %389 = vector.extract_strided_slice %382 {offsets = [0, 128], sizes = [8, 128], strides = [1, 1]} : vector<8x512xf32> to vector<8x128xf32>
    %390 = arith.negf %389 : vector<8x128xf32>
    %391 = math.exp %390 : vector<8x128xf32>
    %cst_144 = arith.constant 1.000000e+00 : f32
    %392 = vector.broadcast %cst_144 : f32 to vector<8x128xf32>
    %393 = arith.addf %392, %391 : vector<8x128xf32>
    %394 = arith.divf %392, %393 : vector<8x128xf32>
    %395 = vector.extract_strided_slice %382 {offsets = [0, 256], sizes = [8, 128], strides = [1, 1]} : vector<8x512xf32> to vector<8x128xf32>
    %396 = vector.extract_strided_slice %382 {offsets = [0, 384], sizes = [8, 128], strides = [1, 1]} : vector<8x512xf32> to vector<8x128xf32>
    %397 = arith.mulf %388, %396 : vector<8x128xf32>
    %398 = arith.addf %395, %397 : vector<8x128xf32>
    %399 = math.tanh %398 : vector<8x128xf32>
    %cst_145 = arith.constant 1.000000e+00 : f32
    %400 = vector.broadcast %cst_145 : f32 to vector<8x128xf32>
    %401 = arith.subf %400, %394 : vector<8x128xf32>
    %402 = arith.mulf %401, %399 : vector<8x128xf32>
    %403 = arith.mulf %394, %340 : vector<8x128xf32>
    %404 = arith.addf %402, %403 : vector<8x128xf32>
    %c0_146 = arith.constant 0 : index
    %c0_147 = arith.constant 0 : index
    %405 = vector.load %arg9[%c0_146, %c0_147] : memref<128x128xf32, #tpu.memory_space<vmem>>, vector<128x128xf32>
    %cst_148 = arith.constant dense<0.000000e+00> : vector<8x128xf32>
    %406 = tpu.matmul %404, %405, %cst_148 {dimension_numbers = #tpu.dot_dimension_numbers<[1], [0], [0], [1], [0, 0, 1, 1], [], []>} : vector<8x128xf32>, vector<128x128xf32>, vector<8x128xf32> -> vector<8x128xf32>
    %c0_149 = arith.constant 0 : index
    %c0_150 = arith.constant 0 : index
    %407 = vector.load %arg10[%c0_149, %c0_150] : memref<1x128xf32, #tpu.memory_space<vmem>>, vector<1x128xf32>
    %408 = vector.broadcast %407 : vector<1x128xf32> to vector<8x128xf32>
    %409 = arith.addf %406, %408 : vector<8x128xf32>
    %c2_151 = arith.constant 2 : index
    %c0_152 = arith.constant 0 : index
    %c0_153 = arith.constant 0 : index
    %410 = vector.load %arg11[%c2_151, %c0_152, %c0_153] : memref<8x8x128xf32, #tpu.memory_space<vmem>>, vector<1x8x128xf32>
    %411 = vector.shape_cast %410 : vector<1x8x128xf32> to vector<8x128xf32>
    %412 = vector.shape_cast %409 : vector<8x128xf32> to vector<1x8x128xf32>
    tpu.vector_store %arg11[%c2_151, %c0_152, %c0_153], %412 {strides = array<i32>} : memref<8x8x128xf32, #tpu.memory_space<vmem>>, vector<1x8x128xf32>,
    %cst_154 = arith.constant -1.000000e+30 : f32
    %413 = vector.broadcast %cst_154 : f32 to vector<8x128xf32>
    %414 = arith.select %308, %409, %413 : vector<8x128xi1>, vector<8x128xf32>
    %cst_155 = arith.constant dense<0xFF800000> : vector<8xf32>
    %415 = vector.multi_reduction <maximumf>, %414, %cst_155 [1] : vector<8x128xf32> to vector<8xf32>
    %416 = vector.shape_cast %415 : vector<8xf32> to vector<8x1xf32>
    %417 = vector.broadcast %416 : vector<8x1xf32> to vector<8x128xf32>
    %418 = arith.cmpf oeq, %414, %417 : vector<8x128xf32>
    %cst_156 = arith.constant 1.280000e+02 : f32
    %419 = vector.broadcast %cst_156 : f32 to vector<8x128xf32>
    %420 = arith.select %418, %306, %419 : vector<8x128xi1>, vector<8x128xf32>
    %cst_157 = arith.constant dense<0x7F800000> : vector<8xf32>
    %421 = vector.multi_reduction <minimumf>, %420, %cst_157 [1] : vector<8x128xf32> to vector<8xf32>
    %422 = vector.shape_cast %421 : vector<8xf32> to vector<8x1xf32>
    %423 = vector.broadcast %422 : vector<8x1xf32> to vector<8x128xf32>
    %424 = arith.cmpf oeq, %306, %423 : vector<8x128xf32>
    %425 = arith.extui %424 : vector<8x128xi1> to vector<8x128xi32>
    %426 = arith.sitofp %425 : vector<8x128xi32> to vector<8x128xf32>
    %c2_158 = arith.constant 2 : index
    %427 = memref.load %arg1[%c2_158] : memref<8xi32, #tpu.memory_space<smem>>
    %c0_i32_159 = arith.constant 0 : i32
    %428 = arith.cmpi sgt, %427, %c0_i32_159 : i32
    %429 = arith.extui %428 : i1 to i32
    %430 = arith.sitofp %429 : i32 to f32
    %c2_160 = arith.constant 2 : index
    %c0_161 = arith.constant 0 : index
    %c0_162 = arith.constant 0 : index
    %431 = vector.load %arg3[%c2_160, %c0_161, %c0_162] : memref<8x8x128xf32, #tpu.memory_space<vmem>>, vector<1x8x128xf32>
    %432 = vector.shape_cast %431 : vector<1x8x128xf32> to vector<8x128xf32>
    %433 = vector.broadcast %430 : f32 to vector<8x128xf32>
    %434 = arith.mulf %433, %432 : vector<8x128xf32>
    %cst_163 = arith.constant 1.000000e+00 : f32
    %435 = arith.subf %cst_163, %430 : f32
    %436 = vector.broadcast %435 : f32 to vector<8x128xf32>
    %437 = arith.mulf %436, %426 : vector<8x128xf32>
    %438 = arith.addf %434, %437 : vector<8x128xf32>
    %c0_164 = arith.constant 0 : index
    %c0_165 = arith.constant 0 : index
    %439 = vector.load %arg6[%c0_164, %c0_165] : memref<128x128xf32, #tpu.memory_space<vmem>>, vector<128x128xf32>
    %cst_166 = arith.constant dense<0.000000e+00> : vector<8x128xf32>
    %440 = tpu.matmul %438, %439, %cst_166 {dimension_numbers = #tpu.dot_dimension_numbers<[1], [0], [0], [1], [0, 0, 1, 1], [], []>} : vector<8x128xf32>, vector<128x128xf32>, vector<8x128xf32> -> vector<8x128xf32>
    %441 = tpu.concatenate %440, %404 in 1 : vector<8x128xf32>, vector<8x128xf32> -> vector<8x256xf32>
    %c0_167 = arith.constant 0 : index
    %c0_168 = arith.constant 0 : index
    %442 = vector.load %arg7[%c0_167, %c0_168] : memref<256x512xf32, #tpu.memory_space<vmem>>, vector<256x512xf32>
    %cst_169 = arith.constant dense<0.000000e+00> : vector<8x512xf32>
    %443 = tpu.matmul %441, %442, %cst_169 {dimension_numbers = #tpu.dot_dimension_numbers<[1], [0], [0], [1], [0, 0, 1, 1], [], []>} : vector<8x256xf32>, vector<256x512xf32>, vector<8x512xf32> -> vector<8x512xf32>
    %c0_170 = arith.constant 0 : index
    %c0_171 = arith.constant 0 : index
    %444 = vector.load %arg8[%c0_170, %c0_171] : memref<1x512xf32, #tpu.memory_space<vmem>>, vector<1x512xf32>
    %445 = vector.broadcast %444 : vector<1x512xf32> to vector<8x512xf32>
    %446 = arith.addf %443, %445 : vector<8x512xf32>
    %447 = vector.extract_strided_slice %446 {offsets = [0, 0], sizes = [8, 128], strides = [1, 1]} : vector<8x512xf32> to vector<8x128xf32>
    %448 = arith.negf %447 : vector<8x128xf32>
    %449 = math.exp %448 : vector<8x128xf32>
    %cst_172 = arith.constant 1.000000e+00 : f32
    %450 = vector.broadcast %cst_172 : f32 to vector<8x128xf32>
    %451 = arith.addf %450, %449 : vector<8x128xf32>
    %452 = arith.divf %450, %451 : vector<8x128xf32>
    %453 = vector.extract_strided_slice %446 {offsets = [0, 128], sizes = [8, 128], strides = [1, 1]} : vector<8x512xf32> to vector<8x128xf32>
    %454 = arith.negf %453 : vector<8x128xf32>
    %455 = math.exp %454 : vector<8x128xf32>
    %cst_173 = arith.constant 1.000000e+00 : f32
    %456 = vector.broadcast %cst_173 : f32 to vector<8x128xf32>
    %457 = arith.addf %456, %455 : vector<8x128xf32>
    %458 = arith.divf %456, %457 : vector<8x128xf32>
    %459 = vector.extract_strided_slice %446 {offsets = [0, 256], sizes = [8, 128], strides = [1, 1]} : vector<8x512xf32> to vector<8x128xf32>
    %460 = vector.extract_strided_slice %446 {offsets = [0, 384], sizes = [8, 128], strides = [1, 1]} : vector<8x512xf32> to vector<8x128xf32>
    %461 = arith.mulf %452, %460 : vector<8x128xf32>
    %462 = arith.addf %459, %461 : vector<8x128xf32>
    %463 = math.tanh %462 : vector<8x128xf32>
    %cst_174 = arith.constant 1.000000e+00 : f32
    %464 = vector.broadcast %cst_174 : f32 to vector<8x128xf32>
    %465 = arith.subf %464, %458 : vector<8x128xf32>
    %466 = arith.mulf %465, %463 : vector<8x128xf32>
    %467 = arith.mulf %458, %404 : vector<8x128xf32>
    %468 = arith.addf %466, %467 : vector<8x128xf32>
    %c0_175 = arith.constant 0 : index
    %c0_176 = arith.constant 0 : index
    %469 = vector.load %arg9[%c0_175, %c0_176] : memref<128x128xf32, #tpu.memory_space<vmem>>, vector<128x128xf32>
    %cst_177 = arith.constant dense<0.000000e+00> : vector<8x128xf32>
    %470 = tpu.matmul %468, %469, %cst_177 {dimension_numbers = #tpu.dot_dimension_numbers<[1], [0], [0], [1], [0, 0, 1, 1], [], []>} : vector<8x128xf32>, vector<128x128xf32>, vector<8x128xf32> -> vector<8x128xf32>
    %c0_178 = arith.constant 0 : index
    %c0_179 = arith.constant 0 : index
    %471 = vector.load %arg10[%c0_178, %c0_179] : memref<1x128xf32, #tpu.memory_space<vmem>>, vector<1x128xf32>
    %472 = vector.broadcast %471 : vector<1x128xf32> to vector<8x128xf32>
    %473 = arith.addf %470, %472 : vector<8x128xf32>
    %c3_180 = arith.constant 3 : index
    %c0_181 = arith.constant 0 : index
    %c0_182 = arith.constant 0 : index
    %474 = vector.load %arg11[%c3_180, %c0_181, %c0_182] : memref<8x8x128xf32, #tpu.memory_space<vmem>>, vector<1x8x128xf32>
    %475 = vector.shape_cast %474 : vector<1x8x128xf32> to vector<8x128xf32>
    %476 = vector.shape_cast %473 : vector<8x128xf32> to vector<1x8x128xf32>
    tpu.vector_store %arg11[%c3_180, %c0_181, %c0_182], %476 {strides = array<i32>} : memref<8x8x128xf32, #tpu.memory_space<vmem>>, vector<1x8x128xf32>,
    %cst_183 = arith.constant -1.000000e+30 : f32
    %477 = vector.broadcast %cst_183 : f32 to vector<8x128xf32>
    %478 = arith.select %308, %473, %477 : vector<8x128xi1>, vector<8x128xf32>
    %cst_184 = arith.constant dense<0xFF800000> : vector<8xf32>
    %479 = vector.multi_reduction <maximumf>, %478, %cst_184 [1] : vector<8x128xf32> to vector<8xf32>
    %480 = vector.shape_cast %479 : vector<8xf32> to vector<8x1xf32>
    %481 = vector.broadcast %480 : vector<8x1xf32> to vector<8x128xf32>
    %482 = arith.cmpf oeq, %478, %481 : vector<8x128xf32>
    %cst_185 = arith.constant 1.280000e+02 : f32
    %483 = vector.broadcast %cst_185 : f32 to vector<8x128xf32>
    %484 = arith.select %482, %306, %483 : vector<8x128xi1>, vector<8x128xf32>
    %cst_186 = arith.constant dense<0x7F800000> : vector<8xf32>
    %485 = vector.multi_reduction <minimumf>, %484, %cst_186 [1] : vector<8x128xf32> to vector<8xf32>
    %486 = vector.shape_cast %485 : vector<8xf32> to vector<8x1xf32>
    %487 = vector.broadcast %486 : vector<8x1xf32> to vector<8x128xf32>
    %488 = arith.cmpf oeq, %306, %487 : vector<8x128xf32>
    %489 = arith.extui %488 : vector<8x128xi1> to vector<8x128xi32>
    %490 = arith.sitofp %489 : vector<8x128xi32> to vector<8x128xf32>
    %c3_187 = arith.constant 3 : index
    %491 = memref.load %arg1[%c3_187] : memref<8xi32, #tpu.memory_space<smem>>
    %c0_i32_188 = arith.constant 0 : i32
    %492 = arith.cmpi sgt, %491, %c0_i32_188 : i32
    %493 = arith.extui %492 : i1 to i32
    %494 = arith.sitofp %493 : i32 to f32
    %c3_189 = arith.constant 3 : index
    %c0_190 = arith.constant 0 : index
    %c0_191 = arith.constant 0 : index
    %495 = vector.load %arg3[%c3_189, %c0_190, %c0_191] : memref<8x8x128xf32, #tpu.memory_space<vmem>>, vector<1x8x128xf32>
    %496 = vector.shape_cast %495 : vector<1x8x128xf32> to vector<8x128xf32>
    %497 = vector.broadcast %494 : f32 to vector<8x128xf32>
    %498 = arith.mulf %497, %496 : vector<8x128xf32>
    %cst_192 = arith.constant 1.000000e+00 : f32
    %499 = arith.subf %cst_192, %494 : f32
    %500 = vector.broadcast %499 : f32 to vector<8x128xf32>
    %501 = arith.mulf %500, %490 : vector<8x128xf32>
    %502 = arith.addf %498, %501 : vector<8x128xf32>
    %c0_193 = arith.constant 0 : index
    %c0_194 = arith.constant 0 : index
    %503 = vector.load %arg6[%c0_193, %c0_194] : memref<128x128xf32, #tpu.memory_space<vmem>>, vector<128x128xf32>
    %cst_195 = arith.constant dense<0.000000e+00> : vector<8x128xf32>
    %504 = tpu.matmul %502, %503, %cst_195 {dimension_numbers = #tpu.dot_dimension_numbers<[1], [0], [0], [1], [0, 0, 1, 1], [], []>} : vector<8x128xf32>, vector<128x128xf32>, vector<8x128xf32> -> vector<8x128xf32>
    %505 = tpu.concatenate %504, %468 in 1 : vector<8x128xf32>, vector<8x128xf32> -> vector<8x256xf32>
    %c0_196 = arith.constant 0 : index
    %c0_197 = arith.constant 0 : index
    %506 = vector.load %arg7[%c0_196, %c0_197] : memref<256x512xf32, #tpu.memory_space<vmem>>, vector<256x512xf32>
    %cst_198 = arith.constant dense<0.000000e+00> : vector<8x512xf32>
    %507 = tpu.matmul %505, %506, %cst_198 {dimension_numbers = #tpu.dot_dimension_numbers<[1], [0], [0], [1], [0, 0, 1, 1], [], []>} : vector<8x256xf32>, vector<256x512xf32>, vector<8x512xf32> -> vector<8x512xf32>
    %c0_199 = arith.constant 0 : index
    %c0_200 = arith.constant 0 : index
    %508 = vector.load %arg8[%c0_199, %c0_200] : memref<1x512xf32, #tpu.memory_space<vmem>>, vector<1x512xf32>
    %509 = vector.broadcast %508 : vector<1x512xf32> to vector<8x512xf32>
    %510 = arith.addf %507, %509 : vector<8x512xf32>
    %511 = vector.extract_strided_slice %510 {offsets = [0, 0], sizes = [8, 128], strides = [1, 1]} : vector<8x512xf32> to vector<8x128xf32>
    %512 = arith.negf %511 : vector<8x128xf32>
    %513 = math.exp %512 : vector<8x128xf32>
    %cst_201 = arith.constant 1.000000e+00 : f32
    %514 = vector.broadcast %cst_201 : f32 to vector<8x128xf32>
    %515 = arith.addf %514, %513 : vector<8x128xf32>
    %516 = arith.divf %514, %515 : vector<8x128xf32>
    %517 = vector.extract_strided_slice %510 {offsets = [0, 128], sizes = [8, 128], strides = [1, 1]} : vector<8x512xf32> to vector<8x128xf32>
    %518 = arith.negf %517 : vector<8x128xf32>
    %519 = math.exp %518 : vector<8x128xf32>
    %cst_202 = arith.constant 1.000000e+00 : f32
    %520 = vector.broadcast %cst_202 : f32 to vector<8x128xf32>
    %521 = arith.addf %520, %519 : vector<8x128xf32>
    %522 = arith.divf %520, %521 : vector<8x128xf32>
    %523 = vector.extract_strided_slice %510 {offsets = [0, 256], sizes = [8, 128], strides = [1, 1]} : vector<8x512xf32> to vector<8x128xf32>
    %524 = vector.extract_strided_slice %510 {offsets = [0, 384], sizes = [8, 128], strides = [1, 1]} : vector<8x512xf32> to vector<8x128xf32>
    %525 = arith.mulf %516, %524 : vector<8x128xf32>
    %526 = arith.addf %523, %525 : vector<8x128xf32>
    %527 = math.tanh %526 : vector<8x128xf32>
    %cst_203 = arith.constant 1.000000e+00 : f32
    %528 = vector.broadcast %cst_203 : f32 to vector<8x128xf32>
    %529 = arith.subf %528, %522 : vector<8x128xf32>
    %530 = arith.mulf %529, %527 : vector<8x128xf32>
    %531 = arith.mulf %522, %468 : vector<8x128xf32>
    %532 = arith.addf %530, %531 : vector<8x128xf32>
    %c0_204 = arith.constant 0 : index
    %c0_205 = arith.constant 0 : index
    %533 = vector.load %arg9[%c0_204, %c0_205] : memref<128x128xf32, #tpu.memory_space<vmem>>, vector<128x128xf32>
    %cst_206 = arith.constant dense<0.000000e+00> : vector<8x128xf32>
    %534 = tpu.matmul %532, %533, %cst_206 {dimension_numbers = #tpu.dot_dimension_numbers<[1], [0], [0], [1], [0, 0, 1, 1], [], []>} : vector<8x128xf32>, vector<128x128xf32>, vector<8x128xf32> -> vector<8x128xf32>
    %c0_207 = arith.constant 0 : index
    %c0_208 = arith.constant 0 : index
    %535 = vector.load %arg10[%c0_207, %c0_208] : memref<1x128xf32, #tpu.memory_space<vmem>>, vector<1x128xf32>
    %536 = vector.broadcast %535 : vector<1x128xf32> to vector<8x128xf32>
    %537 = arith.addf %534, %536 : vector<8x128xf32>
    %c4_209 = arith.constant 4 : index
    %c0_210 = arith.constant 0 : index
    %c0_211 = arith.constant 0 : index
    %538 = vector.load %arg11[%c4_209, %c0_210, %c0_211] : memref<8x8x128xf32, #tpu.memory_space<vmem>>, vector<1x8x128xf32>
    %539 = vector.shape_cast %538 : vector<1x8x128xf32> to vector<8x128xf32>
    %540 = vector.shape_cast %537 : vector<8x128xf32> to vector<1x8x128xf32>
    tpu.vector_store %arg11[%c4_209, %c0_210, %c0_211], %540 {strides = array<i32>} : memref<8x8x128xf32, #tpu.memory_space<vmem>>, vector<1x8x128xf32>,
    %cst_212 = arith.constant -1.000000e+30 : f32
    %541 = vector.broadcast %cst_212 : f32 to vector<8x128xf32>
    %542 = arith.select %308, %537, %541 : vector<8x128xi1>, vector<8x128xf32>
    %cst_213 = arith.constant dense<0xFF800000> : vector<8xf32>
    %543 = vector.multi_reduction <maximumf>, %542, %cst_213 [1] : vector<8x128xf32> to vector<8xf32>
    %544 = vector.shape_cast %543 : vector<8xf32> to vector<8x1xf32>
    %545 = vector.broadcast %544 : vector<8x1xf32> to vector<8x128xf32>
    %546 = arith.cmpf oeq, %542, %545 : vector<8x128xf32>
    %cst_214 = arith.constant 1.280000e+02 : f32
    %547 = vector.broadcast %cst_214 : f32 to vector<8x128xf32>
    %548 = arith.select %546, %306, %547 : vector<8x128xi1>, vector<8x128xf32>
    %cst_215 = arith.constant dense<0x7F800000> : vector<8xf32>
    %549 = vector.multi_reduction <minimumf>, %548, %cst_215 [1] : vector<8x128xf32> to vector<8xf32>
    %550 = vector.shape_cast %549 : vector<8xf32> to vector<8x1xf32>
    %551 = vector.broadcast %550 : vector<8x1xf32> to vector<8x128xf32>
    %552 = arith.cmpf oeq, %306, %551 : vector<8x128xf32>
    %553 = arith.extui %552 : vector<8x128xi1> to vector<8x128xi32>
    %554 = arith.sitofp %553 : vector<8x128xi32> to vector<8x128xf32>
    %c4_216 = arith.constant 4 : index
    %555 = memref.load %arg1[%c4_216] : memref<8xi32, #tpu.memory_space<smem>>
    %c0_i32_217 = arith.constant 0 : i32
    %556 = arith.cmpi sgt, %555, %c0_i32_217 : i32
    %557 = arith.extui %556 : i1 to i32
    %558 = arith.sitofp %557 : i32 to f32
    %c4_218 = arith.constant 4 : index
    %c0_219 = arith.constant 0 : index
    %c0_220 = arith.constant 0 : index
    %559 = vector.load %arg3[%c4_218, %c0_219, %c0_220] : memref<8x8x128xf32, #tpu.memory_space<vmem>>, vector<1x8x128xf32>
    %560 = vector.shape_cast %559 : vector<1x8x128xf32> to vector<8x128xf32>
    %561 = vector.broadcast %558 : f32 to vector<8x128xf32>
    %562 = arith.mulf %561, %560 : vector<8x128xf32>
    %cst_221 = arith.constant 1.000000e+00 : f32
    %563 = arith.subf %cst_221, %558 : f32
    %564 = vector.broadcast %563 : f32 to vector<8x128xf32>
    %565 = arith.mulf %564, %554 : vector<8x128xf32>
    %566 = arith.addf %562, %565 : vector<8x128xf32>
    %c0_222 = arith.constant 0 : index
    %c0_223 = arith.constant 0 : index
    %567 = vector.load %arg6[%c0_222, %c0_223] : memref<128x128xf32, #tpu.memory_space<vmem>>, vector<128x128xf32>
    %cst_224 = arith.constant dense<0.000000e+00> : vector<8x128xf32>
    %568 = tpu.matmul %566, %567, %cst_224 {dimension_numbers = #tpu.dot_dimension_numbers<[1], [0], [0], [1], [0, 0, 1, 1], [], []>} : vector<8x128xf32>, vector<128x128xf32>, vector<8x128xf32> -> vector<8x128xf32>
    %569 = tpu.concatenate %568, %532 in 1 : vector<8x128xf32>, vector<8x128xf32> -> vector<8x256xf32>
    %c0_225 = arith.constant 0 : index
    %c0_226 = arith.constant 0 : index
    %570 = vector.load %arg7[%c0_225, %c0_226] : memref<256x512xf32, #tpu.memory_space<vmem>>, vector<256x512xf32>
    %cst_227 = arith.constant dense<0.000000e+00> : vector<8x512xf32>
    %571 = tpu.matmul %569, %570, %cst_227 {dimension_numbers = #tpu.dot_dimension_numbers<[1], [0], [0], [1], [0, 0, 1, 1], [], []>} : vector<8x256xf32>, vector<256x512xf32>, vector<8x512xf32> -> vector<8x512xf32>
    %c0_228 = arith.constant 0 : index
    %c0_229 = arith.constant 0 : index
    %572 = vector.load %arg8[%c0_228, %c0_229] : memref<1x512xf32, #tpu.memory_space<vmem>>, vector<1x512xf32>
    %573 = vector.broadcast %572 : vector<1x512xf32> to vector<8x512xf32>
    %574 = arith.addf %571, %573 : vector<8x512xf32>
    %575 = vector.extract_strided_slice %574 {offsets = [0, 0], sizes = [8, 128], strides = [1, 1]} : vector<8x512xf32> to vector<8x128xf32>
    %576 = arith.negf %575 : vector<8x128xf32>
    %577 = math.exp %576 : vector<8x128xf32>
    %cst_230 = arith.constant 1.000000e+00 : f32
    %578 = vector.broadcast %cst_230 : f32 to vector<8x128xf32>
    %579 = arith.addf %578, %577 : vector<8x128xf32>
    %580 = arith.divf %578, %579 : vector<8x128xf32>
    %581 = vector.extract_strided_slice %574 {offsets = [0, 128], sizes = [8, 128], strides = [1, 1]} : vector<8x512xf32> to vector<8x128xf32>
    %582 = arith.negf %581 : vector<8x128xf32>
    %583 = math.exp %582 : vector<8x128xf32>
    %cst_231 = arith.constant 1.000000e+00 : f32
    %584 = vector.broadcast %cst_231 : f32 to vector<8x128xf32>
    %585 = arith.addf %584, %583 : vector<8x128xf32>
    %586 = arith.divf %584, %585 : vector<8x128xf32>
    %587 = vector.extract_strided_slice %574 {offsets = [0, 256], sizes = [8, 128], strides = [1, 1]} : vector<8x512xf32> to vector<8x128xf32>
    %588 = vector.extract_strided_slice %574 {offsets = [0, 384], sizes = [8, 128], strides = [1, 1]} : vector<8x512xf32> to vector<8x128xf32>
    %589 = arith.mulf %580, %588 : vector<8x128xf32>
    %590 = arith.addf %587, %589 : vector<8x128xf32>
    %591 = math.tanh %590 : vector<8x128xf32>
    %cst_232 = arith.constant 1.000000e+00 : f32
    %592 = vector.broadcast %cst_232 : f32 to vector<8x128xf32>
    %593 = arith.subf %592, %586 : vector<8x128xf32>
    %594 = arith.mulf %593, %591 : vector<8x128xf32>
    %595 = arith.mulf %586, %532 : vector<8x128xf32>
    %596 = arith.addf %594, %595 : vector<8x128xf32>
    %c0_233 = arith.constant 0 : index
    %c0_234 = arith.constant 0 : index
    %597 = vector.load %arg9[%c0_233, %c0_234] : memref<128x128xf32, #tpu.memory_space<vmem>>, vector<128x128xf32>
    %cst_235 = arith.constant dense<0.000000e+00> : vector<8x128xf32>
    %598 = tpu.matmul %596, %597, %cst_235 {dimension_numbers = #tpu.dot_dimension_numbers<[1], [0], [0], [1], [0, 0, 1, 1], [], []>} : vector<8x128xf32>, vector<128x128xf32>, vector<8x128xf32> -> vector<8x128xf32>
    %c0_236 = arith.constant 0 : index
    %c0_237 = arith.constant 0 : index
    %599 = vector.load %arg10[%c0_236, %c0_237] : memref<1x128xf32, #tpu.memory_space<vmem>>, vector<1x128xf32>
    %600 = vector.broadcast %599 : vector<1x128xf32> to vector<8x128xf32>
    %601 = arith.addf %598, %600 : vector<8x128xf32>
    %c5_238 = arith.constant 5 : index
    %c0_239 = arith.constant 0 : index
    %c0_240 = arith.constant 0 : index
    %602 = vector.load %arg11[%c5_238, %c0_239, %c0_240] : memref<8x8x128xf32, #tpu.memory_space<vmem>>, vector<1x8x128xf32>
    %603 = vector.shape_cast %602 : vector<1x8x128xf32> to vector<8x128xf32>
    %604 = vector.shape_cast %601 : vector<8x128xf32> to vector<1x8x128xf32>
    tpu.vector_store %arg11[%c5_238, %c0_239, %c0_240], %604 {strides = array<i32>} : memref<8x8x128xf32, #tpu.memory_space<vmem>>, vector<1x8x128xf32>,
    %cst_241 = arith.constant -1.000000e+30 : f32
    %605 = vector.broadcast %cst_241 : f32 to vector<8x128xf32>
    %606 = arith.select %308, %601, %605 : vector<8x128xi1>, vector<8x128xf32>
    %cst_242 = arith.constant dense<0xFF800000> : vector<8xf32>
    %607 = vector.multi_reduction <maximumf>, %606, %cst_242 [1] : vector<8x128xf32> to vector<8xf32>
    %608 = vector.shape_cast %607 : vector<8xf32> to vector<8x1xf32>
    %609 = vector.broadcast %608 : vector<8x1xf32> to vector<8x128xf32>
    %610 = arith.cmpf oeq, %606, %609 : vector<8x128xf32>
    %cst_243 = arith.constant 1.280000e+02 : f32
    %611 = vector.broadcast %cst_243 : f32 to vector<8x128xf32>
    %612 = arith.select %610, %306, %611 : vector<8x128xi1>, vector<8x128xf32>
    %cst_244 = arith.constant dense<0x7F800000> : vector<8xf32>
    %613 = vector.multi_reduction <minimumf>, %612, %cst_244 [1] : vector<8x128xf32> to vector<8xf32>
    %614 = vector.shape_cast %613 : vector<8xf32> to vector<8x1xf32>
    %615 = vector.broadcast %614 : vector<8x1xf32> to vector<8x128xf32>
    %616 = arith.cmpf oeq, %306, %615 : vector<8x128xf32>
    %617 = arith.extui %616 : vector<8x128xi1> to vector<8x128xi32>
    %618 = arith.sitofp %617 : vector<8x128xi32> to vector<8x128xf32>
    %c5_245 = arith.constant 5 : index
    %619 = memref.load %arg1[%c5_245] : memref<8xi32, #tpu.memory_space<smem>>
    %c0_i32_246 = arith.constant 0 : i32
    %620 = arith.cmpi sgt, %619, %c0_i32_246 : i32
    %621 = arith.extui %620 : i1 to i32
    %622 = arith.sitofp %621 : i32 to f32
    %c5_247 = arith.constant 5 : index
    %c0_248 = arith.constant 0 : index
    %c0_249 = arith.constant 0 : index
    %623 = vector.load %arg3[%c5_247, %c0_248, %c0_249] : memref<8x8x128xf32, #tpu.memory_space<vmem>>, vector<1x8x128xf32>
    %624 = vector.shape_cast %623 : vector<1x8x128xf32> to vector<8x128xf32>
    %625 = vector.broadcast %622 : f32 to vector<8x128xf32>
    %626 = arith.mulf %625, %624 : vector<8x128xf32>
    %cst_250 = arith.constant 1.000000e+00 : f32
    %627 = arith.subf %cst_250, %622 : f32
    %628 = vector.broadcast %627 : f32 to vector<8x128xf32>
    %629 = arith.mulf %628, %618 : vector<8x128xf32>
    %630 = arith.addf %626, %629 : vector<8x128xf32>
    %c0_251 = arith.constant 0 : index
    %c0_252 = arith.constant 0 : index
    %631 = vector.load %arg6[%c0_251, %c0_252] : memref<128x128xf32, #tpu.memory_space<vmem>>, vector<128x128xf32>
    %cst_253 = arith.constant dense<0.000000e+00> : vector<8x128xf32>
    %632 = tpu.matmul %630, %631, %cst_253 {dimension_numbers = #tpu.dot_dimension_numbers<[1], [0], [0], [1], [0, 0, 1, 1], [], []>} : vector<8x128xf32>, vector<128x128xf32>, vector<8x128xf32> -> vector<8x128xf32>
    %633 = tpu.concatenate %632, %596 in 1 : vector<8x128xf32>, vector<8x128xf32> -> vector<8x256xf32>
    %c0_254 = arith.constant 0 : index
    %c0_255 = arith.constant 0 : index
    %634 = vector.load %arg7[%c0_254, %c0_255] : memref<256x512xf32, #tpu.memory_space<vmem>>, vector<256x512xf32>
    %cst_256 = arith.constant dense<0.000000e+00> : vector<8x512xf32>
    %635 = tpu.matmul %633, %634, %cst_256 {dimension_numbers = #tpu.dot_dimension_numbers<[1], [0], [0], [1], [0, 0, 1, 1], [], []>} : vector<8x256xf32>, vector<256x512xf32>, vector<8x512xf32> -> vector<8x512xf32>
    %c0_257 = arith.constant 0 : index
    %c0_258 = arith.constant 0 : index
    %636 = vector.load %arg8[%c0_257, %c0_258] : memref<1x512xf32, #tpu.memory_space<vmem>>, vector<1x512xf32>
    %637 = vector.broadcast %636 : vector<1x512xf32> to vector<8x512xf32>
    %638 = arith.addf %635, %637 : vector<8x512xf32>
    %639 = vector.extract_strided_slice %638 {offsets = [0, 0], sizes = [8, 128], strides = [1, 1]} : vector<8x512xf32> to vector<8x128xf32>
    %640 = arith.negf %639 : vector<8x128xf32>
    %641 = math.exp %640 : vector<8x128xf32>
    %cst_259 = arith.constant 1.000000e+00 : f32
    %642 = vector.broadcast %cst_259 : f32 to vector<8x128xf32>
    %643 = arith.addf %642, %641 : vector<8x128xf32>
    %644 = arith.divf %642, %643 : vector<8x128xf32>
    %645 = vector.extract_strided_slice %638 {offsets = [0, 128], sizes = [8, 128], strides = [1, 1]} : vector<8x512xf32> to vector<8x128xf32>
    %646 = arith.negf %645 : vector<8x128xf32>
    %647 = math.exp %646 : vector<8x128xf32>
    %cst_260 = arith.constant 1.000000e+00 : f32
    %648 = vector.broadcast %cst_260 : f32 to vector<8x128xf32>
    %649 = arith.addf %648, %647 : vector<8x128xf32>
    %650 = arith.divf %648, %649 : vector<8x128xf32>
    %651 = vector.extract_strided_slice %638 {offsets = [0, 256], sizes = [8, 128], strides = [1, 1]} : vector<8x512xf32> to vector<8x128xf32>
    %652 = vector.extract_strided_slice %638 {offsets = [0, 384], sizes = [8, 128], strides = [1, 1]} : vector<8x512xf32> to vector<8x128xf32>
    %653 = arith.mulf %644, %652 : vector<8x128xf32>
    %654 = arith.addf %651, %653 : vector<8x128xf32>
    %655 = math.tanh %654 : vector<8x128xf32>
    %cst_261 = arith.constant 1.000000e+00 : f32
    %656 = vector.broadcast %cst_261 : f32 to vector<8x128xf32>
    %657 = arith.subf %656, %650 : vector<8x128xf32>
    %658 = arith.mulf %657, %655 : vector<8x128xf32>
    %659 = arith.mulf %650, %596 : vector<8x128xf32>
    %660 = arith.addf %658, %659 : vector<8x128xf32>
    %c0_262 = arith.constant 0 : index
    %c0_263 = arith.constant 0 : index
    %661 = vector.load %arg9[%c0_262, %c0_263] : memref<128x128xf32, #tpu.memory_space<vmem>>, vector<128x128xf32>
    %cst_264 = arith.constant dense<0.000000e+00> : vector<8x128xf32>
    %662 = tpu.matmul %660, %661, %cst_264 {dimension_numbers = #tpu.dot_dimension_numbers<[1], [0], [0], [1], [0, 0, 1, 1], [], []>} : vector<8x128xf32>, vector<128x128xf32>, vector<8x128xf32> -> vector<8x128xf32>
    %c0_265 = arith.constant 0 : index
    %c0_266 = arith.constant 0 : index
    %663 = vector.load %arg10[%c0_265, %c0_266] : memref<1x128xf32, #tpu.memory_space<vmem>>, vector<1x128xf32>
    %664 = vector.broadcast %663 : vector<1x128xf32> to vector<8x128xf32>
    %665 = arith.addf %662, %664 : vector<8x128xf32>
    %c6_267 = arith.constant 6 : index
    %c0_268 = arith.constant 0 : index
    %c0_269 = arith.constant 0 : index
    %666 = vector.load %arg11[%c6_267, %c0_268, %c0_269] : memref<8x8x128xf32, #tpu.memory_space<vmem>>, vector<1x8x128xf32>
    %667 = vector.shape_cast %666 : vector<1x8x128xf32> to vector<8x128xf32>
    %668 = vector.shape_cast %665 : vector<8x128xf32> to vector<1x8x128xf32>
    tpu.vector_store %arg11[%c6_267, %c0_268, %c0_269], %668 {strides = array<i32>} : memref<8x8x128xf32, #tpu.memory_space<vmem>>, vector<1x8x128xf32>,
    %cst_270 = arith.constant -1.000000e+30 : f32
    %669 = vector.broadcast %cst_270 : f32 to vector<8x128xf32>
    %670 = arith.select %308, %665, %669 : vector<8x128xi1>, vector<8x128xf32>
    %cst_271 = arith.constant dense<0xFF800000> : vector<8xf32>
    %671 = vector.multi_reduction <maximumf>, %670, %cst_271 [1] : vector<8x128xf32> to vector<8xf32>
    %672 = vector.shape_cast %671 : vector<8xf32> to vector<8x1xf32>
    %673 = vector.broadcast %672 : vector<8x1xf32> to vector<8x128xf32>
    %674 = arith.cmpf oeq, %670, %673 : vector<8x128xf32>
    %cst_272 = arith.constant 1.280000e+02 : f32
    %675 = vector.broadcast %cst_272 : f32 to vector<8x128xf32>
    %676 = arith.select %674, %306, %675 : vector<8x128xi1>, vector<8x128xf32>
    %cst_273 = arith.constant dense<0x7F800000> : vector<8xf32>
    %677 = vector.multi_reduction <minimumf>, %676, %cst_273 [1] : vector<8x128xf32> to vector<8xf32>
    %678 = vector.shape_cast %677 : vector<8xf32> to vector<8x1xf32>
    %679 = vector.broadcast %678 : vector<8x1xf32> to vector<8x128xf32>
    %680 = arith.cmpf oeq, %306, %679 : vector<8x128xf32>
    %681 = arith.extui %680 : vector<8x128xi1> to vector<8x128xi32>
    %682 = arith.sitofp %681 : vector<8x128xi32> to vector<8x128xf32>
    %c6_274 = arith.constant 6 : index
    %683 = memref.load %arg1[%c6_274] : memref<8xi32, #tpu.memory_space<smem>>
    %c0_i32_275 = arith.constant 0 : i32
    %684 = arith.cmpi sgt, %683, %c0_i32_275 : i32
    %685 = arith.extui %684 : i1 to i32
    %686 = arith.sitofp %685 : i32 to f32
    %c6_276 = arith.constant 6 : index
    %c0_277 = arith.constant 0 : index
    %c0_278 = arith.constant 0 : index
    %687 = vector.load %arg3[%c6_276, %c0_277, %c0_278] : memref<8x8x128xf32, #tpu.memory_space<vmem>>, vector<1x8x128xf32>
    %688 = vector.shape_cast %687 : vector<1x8x128xf32> to vector<8x128xf32>
    %689 = vector.broadcast %686 : f32 to vector<8x128xf32>
    %690 = arith.mulf %689, %688 : vector<8x128xf32>
    %cst_279 = arith.constant 1.000000e+00 : f32
    %691 = arith.subf %cst_279, %686 : f32
    %692 = vector.broadcast %691 : f32 to vector<8x128xf32>
    %693 = arith.mulf %692, %682 : vector<8x128xf32>
    %694 = arith.addf %690, %693 : vector<8x128xf32>
    %c0_280 = arith.constant 0 : index
    %c0_281 = arith.constant 0 : index
    %695 = vector.load %arg6[%c0_280, %c0_281] : memref<128x128xf32, #tpu.memory_space<vmem>>, vector<128x128xf32>
    %cst_282 = arith.constant dense<0.000000e+00> : vector<8x128xf32>
    %696 = tpu.matmul %694, %695, %cst_282 {dimension_numbers = #tpu.dot_dimension_numbers<[1], [0], [0], [1], [0, 0, 1, 1], [], []>} : vector<8x128xf32>, vector<128x128xf32>, vector<8x128xf32> -> vector<8x128xf32>
    %697 = tpu.concatenate %696, %660 in 1 : vector<8x128xf32>, vector<8x128xf32> -> vector<8x256xf32>
    %c0_283 = arith.constant 0 : index
    %c0_284 = arith.constant 0 : index
    %698 = vector.load %arg7[%c0_283, %c0_284] : memref<256x512xf32, #tpu.memory_space<vmem>>, vector<256x512xf32>
    %cst_285 = arith.constant dense<0.000000e+00> : vector<8x512xf32>
    %699 = tpu.matmul %697, %698, %cst_285 {dimension_numbers = #tpu.dot_dimension_numbers<[1], [0], [0], [1], [0, 0, 1, 1], [], []>} : vector<8x256xf32>, vector<256x512xf32>, vector<8x512xf32> -> vector<8x512xf32>
    %c0_286 = arith.constant 0 : index
    %c0_287 = arith.constant 0 : index
    %700 = vector.load %arg8[%c0_286, %c0_287] : memref<1x512xf32, #tpu.memory_space<vmem>>, vector<1x512xf32>
    %701 = vector.broadcast %700 : vector<1x512xf32> to vector<8x512xf32>
    %702 = arith.addf %699, %701 : vector<8x512xf32>
    %703 = vector.extract_strided_slice %702 {offsets = [0, 0], sizes = [8, 128], strides = [1, 1]} : vector<8x512xf32> to vector<8x128xf32>
    %704 = arith.negf %703 : vector<8x128xf32>
    %705 = math.exp %704 : vector<8x128xf32>
    %cst_288 = arith.constant 1.000000e+00 : f32
    %706 = vector.broadcast %cst_288 : f32 to vector<8x128xf32>
    %707 = arith.addf %706, %705 : vector<8x128xf32>
    %708 = arith.divf %706, %707 : vector<8x128xf32>
    %709 = vector.extract_strided_slice %702 {offsets = [0, 128], sizes = [8, 128], strides = [1, 1]} : vector<8x512xf32> to vector<8x128xf32>
    %710 = arith.negf %709 : vector<8x128xf32>
    %711 = math.exp %710 : vector<8x128xf32>
    %cst_289 = arith.constant 1.000000e+00 : f32
    %712 = vector.broadcast %cst_289 : f32 to vector<8x128xf32>
    %713 = arith.addf %712, %711 : vector<8x128xf32>
    %714 = arith.divf %712, %713 : vector<8x128xf32>
    %715 = vector.extract_strided_slice %702 {offsets = [0, 256], sizes = [8, 128], strides = [1, 1]} : vector<8x512xf32> to vector<8x128xf32>
    %716 = vector.extract_strided_slice %702 {offsets = [0, 384], sizes = [8, 128], strides = [1, 1]} : vector<8x512xf32> to vector<8x128xf32>
    %717 = arith.mulf %708, %716 : vector<8x128xf32>
    %718 = arith.addf %715, %717 : vector<8x128xf32>
    %719 = math.tanh %718 : vector<8x128xf32>
    %cst_290 = arith.constant 1.000000e+00 : f32
    %720 = vector.broadcast %cst_290 : f32 to vector<8x128xf32>
    %721 = arith.subf %720, %714 : vector<8x128xf32>
    %722 = arith.mulf %721, %719 : vector<8x128xf32>
    %723 = arith.mulf %714, %660 : vector<8x128xf32>
    %724 = arith.addf %722, %723 : vector<8x128xf32>
    %c0_291 = arith.constant 0 : index
    %c0_292 = arith.constant 0 : index
    %725 = vector.load %arg9[%c0_291, %c0_292] : memref<128x128xf32, #tpu.memory_space<vmem>>, vector<128x128xf32>
    %cst_293 = arith.constant dense<0.000000e+00> : vector<8x128xf32>
    %726 = tpu.matmul %724, %725, %cst_293 {dimension_numbers = #tpu.dot_dimension_numbers<[1], [0], [0], [1], [0, 0, 1, 1], [], []>} : vector<8x128xf32>, vector<128x128xf32>, vector<8x128xf32> -> vector<8x128xf32>
    %c0_294 = arith.constant 0 : index
    %c0_295 = arith.constant 0 : index
    %727 = vector.load %arg10[%c0_294, %c0_295] : memref<1x128xf32, #tpu.memory_space<vmem>>, vector<1x128xf32>
    %728 = vector.broadcast %727 : vector<1x128xf32> to vector<8x128xf32>
    %729 = arith.addf %726, %728 : vector<8x128xf32>
    %c7_296 = arith.constant 7 : index
    %c0_297 = arith.constant 0 : index
    %c0_298 = arith.constant 0 : index
    %730 = vector.load %arg11[%c7_296, %c0_297, %c0_298] : memref<8x8x128xf32, #tpu.memory_space<vmem>>, vector<1x8x128xf32>
    %731 = vector.shape_cast %730 : vector<1x8x128xf32> to vector<8x128xf32>
    %732 = vector.shape_cast %729 : vector<8x128xf32> to vector<1x8x128xf32>
    tpu.vector_store %arg11[%c7_296, %c0_297, %c0_298], %732 {strides = array<i32>} : memref<8x8x128xf32, #tpu.memory_space<vmem>>, vector<1x8x128xf32>,
    return
  }
  func.func @transform_0(%arg0: i32, %arg1: memref<8xi32, #tpu.memory_space<smem>>) -> (i32, i32, i32) {
    %c0_i32 = arith.constant 0 : i32
    %c0_i32_0 = arith.constant 0 : i32
    %c0_i32_1 = arith.constant 0 : i32
    %c0_i32_2 = arith.constant 0 : i32
    return %c0_i32, %c0_i32_0, %c0_i32_1 : i32, i32, i32
  }
  func.func @transform_1(%arg0: i32, %arg1: memref<8xi32, #tpu.memory_space<smem>>) -> (i32, i32, i32) {
    %c0_i32 = arith.constant 0 : i32
    %c0_i32_0 = arith.constant 0 : i32
    %c0_i32_1 = arith.constant 0 : i32
    %c0_i32_2 = arith.constant 0 : i32
    return %c0_i32, %c0_i32_0, %c0_i32_1 : i32, i32, i32
  }
  func.func @transform_2(%arg0: i32, %arg1: memref<8xi32, #tpu.memory_space<smem>>) -> (i32, i32) {
    %c0_i32 = arith.constant 0 : i32
    %c0_i32_0 = arith.constant 0 : i32
    %c0_i32_1 = arith.constant 0 : i32
    return %c0_i32, %c0_i32_0 : i32, i32
  }
  func.func @transform_3(%arg0: i32, %arg1: memref<8xi32, #tpu.memory_space<smem>>) -> (i32, i32) {
    %c0_i32 = arith.constant 0 : i32
    %c0_i32_0 = arith.constant 0 : i32
    %c0_i32_1 = arith.constant 0 : i32
    return %c0_i32, %c0_i32_0 : i32, i32
  }
  func.func @transform_4(%arg0: i32, %arg1: memref<8xi32, #tpu.memory_space<smem>>) -> (i32, i32) {
    %c0_i32 = arith.constant 0 : i32
    %c0_i32_0 = arith.constant 0 : i32
    %c0_i32_1 = arith.constant 0 : i32
    return %c0_i32, %c0_i32_0 : i32, i32
  }
  func.func @transform_5(%arg0: i32, %arg1: memref<8xi32, #tpu.memory_space<smem>>) -> (i32, i32) {
    %c0_i32 = arith.constant 0 : i32
    %c0_i32_0 = arith.constant 0 : i32
    %c0_i32_1 = arith.constant 0 : i32
    return %c0_i32, %c0_i32_0 : i32, i32
  }
  func.func @transform_6(%arg0: i32, %arg1: memref<8xi32, #tpu.memory_space<smem>>) -> (i32, i32) {
    %c0_i32 = arith.constant 0 : i32
    %c0_i32_0 = arith.constant 0 : i32
    %c0_i32_1 = arith.constant 0 : i32
    return %c0_i32, %c0_i32_0 : i32, i32
  }
  func.func @transform_7(%arg0: i32, %arg1: memref<8xi32, #tpu.memory_space<smem>>) -> (i32, i32) {
    %c0_i32 = arith.constant 0 : i32
    %c0_i32_0 = arith.constant 0 : i32
    %c0_i32_1 = arith.constant 0 : i32
    return %c0_i32, %c0_i32_0 : i32, i32
  }
  func.func @transform_8(%arg0: i32, %arg1: memref<8xi32, #tpu.memory_space<smem>>) -> (i32, i32) {
    %c0_i32 = arith.constant 0 : i32
    %c0_i32_0 = arith.constant 0 : i32
    %c0_i32_1 = arith.constant 0 : i32
    return %c0_i32, %c0_i32_0 : i32, i32
  }
  func.func @transform_9(%arg0: i32, %arg1: memref<8xi32, #tpu.memory_space<smem>>) -> (i32, i32, i32) {
    %c0_i32 = arith.constant 0 : i32
    %c0_i32_0 = arith.constant 0 : i32
    %c0_i32_1 = arith.constant 0 : i32
    %c0_i32_2 = arith.constant 0 : i32
    return %c0_i32, %c0_i32_0, %c0_i32_1 : i32, i32, i32
  }
}

</mosaic_0001>

<bundles_post_ra>
// kernel: tpu_custom_call.1
= control target key start
LH: loop header
LB: loop body
LE: loop exit
PB: predicated region body
PF: predicated region fallthrough
CT: control target
= control target key end

     0   :  { %s11497_s0 = inlined_call_operand.hbm [shape: s32[8], index: 0, kind: input, shape index: {}]   ;;  %s11498_s1 = inlined_call_operand.hbm [shape: f32[10,8,128], index: 1, kind: input, shape index: {}]   ;;  %s11499_s2 = inlined_call_operand.hbm [shape: f32[8,8,128], index: 2, kind: input, shape index: {}]   ;;  %s11500_s3 = inlined_call_operand.hbm [shape: f32[256,512], index: 3, kind: input, shape index: {}]   ;;  %s11501_s4 = inlined_call_operand.vmem [shape: f32[1,512], index: 4, kind: input, shape index: {}]   ;;  %s11502_s5 = inlined_call_operand.hbm [shape: f32[128,128], index: 5, kind: input, shape index: {}]   ;;  %s11503_s6 = inlined_call_operand.hbm [shape: f32[256,512], index: 6, kind: input, shape index: {}]   ;;  %s11504_s7 = inlined_call_operand.vmem [shape: f32[1,512], index: 7, kind: input, shape index: {}]   ;;  %s11505_s8 = inlined_call_operand.hbm [shape: f32[128,128], index: 8, kind: input, shape index: {}]   ;;  %s11506_s9 = inlined_call_operand.vmem [shape: f32[1,128], index: 9, kind: input, shape index: {}]   ;;  %s11507_s10 = inlined_call_operand.hbm [shape: f32[8,8,128], index: 10, kind: output, shape index: {}]  }
   0x1   :  { %s8983_s15 = scalar_lea.hbm %s11497_s0, 16 }
   0x2   :  { %p8984_p0 = scmp.ne.s32.totalorder %s11497_s0, %s8983_s15  ;;  %p8987_p1 = scmp.lt.u32.totalorder %s8983_s15, %s11497_s0 }
   0x4   :  { %p8989_p2 = pnand %p8987_p1, %p8984_p0 }
   0x6   :  { %8992 = shalt.err (!%p8989_p2)  }
   0x7   :  { %s9159_s20 = smov [#allocation3]  }
   0x8   :  { %16 = dma.hbm_to_smem %s11497_s0, 16, %s9159_s20, [#allocation2] }
   0x9   :  { %9147 = dma.done.wait [#allocation2], 16 }
   0xa   :  { %9148 = vsyncadd [#allocation2], 4294967280 }
   0xb   :  { %18 = sfence }
   0xc   :  { %19 = vsyncpa [#allocation5], 0 }
   0xd   :  { %20 = vsyncpa [#allocation8], 0 }
   0xe   :  { %21 = vsyncpa [#allocation11], 0 }
   0xf   :  { %22 = vsyncpa [#allocation14], 0 }
  0x10   :  { %23 = vsyncpa [#allocation6], 0  ;;  %s9160_s23 = smov [#allocation7]   ;;  %s9161_s25 = smov [#allocation10]  }
  0x11   :  { %s41_s24 = sshll.u32 %s9160_s23, 4  ;;  %s67_s26 = sshll.u32 %s9161_s25, 4  ;;  %s42_s24 = int_to_ptr.vmem [resolvable:$true] %s41_s24  ;;  %s9241_s26 = int_to_ptr.vmem [resolvable:$true] %s67_s26 }
  0x12   :  { %s8993_s29 = scalar_lea.hbm %s11499_s2, 1024 }
  0x13   :  { %p8994_p3 = scmp.ne.s32.totalorder %s11499_s2, %s8993_s29  ;;  %p8997_p4 = scmp.lt.u32.totalorder %s8993_s29, %s11499_s2 }
  0x15   :  { %p8999_p5 = pnand %p8997_p4, %p8994_p3 }
  0x17   :  { %9002 = shalt.err (!%p8999_p5)
}
  0x18   :  { %s9003_s13 = scalar_lea.vmem %s42_s24, 1024  ;;  %p9008_p7 = scmp.lt.s32.totalorder %s42_s24, %s42_s24 }
  0x19   :  { %p9004_p6 = scmp.ne.s32.totalorder %s42_s24, %s9003_s13  ;;  %p9009_p8 = scmp.lt.s32.totalorder %s9003_s13, %s9003_s13 }
  0x1b   :  { %p9010_p9 = por %p9009_p8, %p9008_p7 }
  0x1d   :  { %p9011_p10 = pnand %p9010_p9, %p9004_p6 }
  0x1f   :  { %9014 = shalt.err (!%p9011_p10)
}
  0x20   :  { %s9162_s14 = smov 128   ;;  %s9163_s15 = smov 8  }
  0x21   :  { %47 = dma.hbm_to_vmem [thread:$0]  %s11499_s2, 1024, %s42_s24, [#allocation8], %s9162_s14, %s9162_s14, %s9163_s15  }
  0x22   :  { %s9015_s20 = scalar_lea.hbm %s11502_s5, 2048 }
  0x23   :  { %p9016_p11 = scmp.ne.s32.totalorder %s11502_s5, %s9015_s20  ;;  %p9019_p12 = scmp.lt.u32.totalorder %s9015_s20, %s11502_s5 }
  0x25   :  { %p9021_p13 = pnand %p9019_p12, %p9016_p11 }
  0x27   :  { %9024 = shalt.err (!%p9021_p13)
}
  0x28   :  { %s9025_s27 = scalar_lea.vmem %s9241_s26, 2048  ;;  %p9030_p1 = scmp.lt.s32.totalorder %s9241_s26, %s9241_s26 }
  0x29   :  { %p9026_p0 = scmp.ne.s32.totalorder %s9241_s26, %s9025_s27  ;;  %p9031_p2 = scmp.lt.s32.totalorder %s9025_s27, %s9025_s27 }
  0x2b   :  { %p9032_p3 = por %p9031_p2, %p9030_p1 }
  0x2d   :  { %p9033_p4 = pnand %p9032_p3, %p9026_p0 }
  0x2f   :  { %9036 = shalt.err (!%p9033_p4)
}
  0x30   :  { %73 = dma.hbm_to_vmem [thread:$0]  %s11502_s5, 2048, %s9241_s26, [#allocation11], %s9162_s14, %s9162_s14, %s9163_s15  }
  0x31   :  { %s9164_s28 = smov [#allocation4]   ;;  %s9165_s0 = smov [#allocation9]  }
  0x32   :  { %s29_s29 = sshll.u32 %s9164_s28, 4  ;;  %s53_s30 = sshll.u32 %s9165_s0, 4  ;;  %s30_s29 = int_to_ptr.vmem [resolvable:$true] %s29_s29  ;;  %s9278_s30 = int_to_ptr.vmem [resolvable:$true] %s53_s30 }
  0x33   :  { %s9037_s13 = scalar_lea.hbm %s11498_s1, 1280 }
  0x34   :  { %p9038_p5 = scmp.ne.s32.totalorder %s11498_s1, %s9037_s13  ;;  %p9041_p6 = scmp.lt.u32.totalorder %s9037_s13, %s11498_s1 }
  0x36   :  { %p9043_p7 = pnand %p9041_p6, %p9038_p5 }
  0x38   :  { %9046 = shalt.err (!%p9043_p7)
}
  0x39   :  { %s9047_s5 = scalar_lea.vmem %s30_s29, 1280  ;;  %p9052_p9 = scmp.lt.s32.totalorder %s30_s29, %s30_s29 }
  0x3a   :  { %p9048_p8 = scmp.ne.s32.totalorder %s30_s29, %s9047_s5  ;;  %p9053_p10 = scmp.lt.s32.totalorder %s9047_s5, %s9047_s5 }
  0x3c   :  { %p9054_p11 = por %p9053_p10, %p9052_p9 }
  0x3e   :  { %p9055_p12 = pnand %p9054_p11, %p9048_p8 }
  0x40   :  { %9058 = shalt.err (!%p9055_p12)
}
  0x41   :  { %35 = dma.hbm_to_vmem [thread:$0]  %s11498_s1, 1280, %s30_s29, [#allocation5], %s9162_s14, %s9162_s14, %s9163_s15  }
  0x42   :  { %s9059_s23 = scalar_lea.hbm %s11500_s3, 16384 }
  0x43   :  { %p9060_p13 = scmp.ne.s32.totalorder %s11500_s3, %s9059_s23  ;;  %p9063_p0 = scmp.lt.u32.totalorder %s9059_s23, %s11500_s3 }
  0x45   :  { %p9065_p1 = pnand %p9063_p0, %p9060_p13 }
  0x47   :  { %9068 = shalt.err (!%p9065_p1)
}
  0x48   :  { %s9069_s28 = scalar_lea.vmem %s9278_s30, 16384  ;;  %p9074_p3 = scmp.lt.s32.totalorder %s9278_s30, %s9278_s30 }
  0x49   :  { %p9070_p2 = scmp.ne.s32.totalorder %s9278_s30, %s9069_s28  ;;  %p9075_p4 = scmp.lt.s32.totalorder %s9069_s28, %s9069_s28 }
  0x4b   :  { %p9076_p5 = por %p9075_p4, %p9074_p3 }
  0x4d   :  { %p9077_p6 = pnand %p9076_p5, %p9070_p2 }
  0x4f   :  { %9080 = shalt.err (!%p9077_p6)
}
  0x50   :  { %s9166_s1 = smov 512   ;;  %s9167_s29 = smov 32  }
  0x51   :  { %59 = dma.hbm_to_vmem [thread:$0]  %s11500_s3, 16384, %s9278_s30, [#allocation8], %s9166_s1, %s9166_s1, %s9167_s29  }
  0x52   :  { %s9168_s12 = smov [#allocation12]   ;;  %s9169_s16 = smov [#allocation13]  }
  0x53   :  { %s79_s13 = sshll.u32 %s9168_s12, 4  ;;  %s93_s17 = sshll.u32 %s9169_s16, 4  ;;  %s80_s13 = int_to_ptr.vmem [resolvable:$true] %s79_s13  ;;  %s9312_s17 = int_to_ptr.vmem [resolvable:$true] %s93_s17 }
  0x54   :  { %s9081_s5 = scalar_lea.hbm %s11503_s6, 16384 }
  0x55   :  { %p9082_p7 = scmp.ne.s32.totalorder %s11503_s6, %s9081_s5  ;;  %p9085_p8 = scmp.lt.u32.totalorder %s9081_s5, %s11503_s6 }
  0x57   :  { %p9087_p9 = pnand %p9085_p8, %p9082_p7 }
  0x59   :  { %9090 = shalt.err (!%p9087_p9)
}
  0x5a   :  { %s9091_s3 = scalar_lea.vmem %s80_s13, 16384  ;;  %p9096_p11 = scmp.lt.s32.totalorder %s80_s13, %s80_s13 }
  0x5b   :  { %p9092_p10 = scmp.ne.s32.totalorder %s80_s13, %s9091_s3  ;;  %p9097_p12 = scmp.lt.s32.totalorder %s9091_s3, %s9091_s3 }
  0x5d   :  { %p9098_p13 = por %p9097_p12, %p9096_p11 }
  0x5f   :  { %p9099_p0 = pnand %p9098_p13, %p9092_p10 }
  0x61   :  { %9102 = shalt.err (!%p9099_p0)
}
  0x62   :  { %85 = dma.hbm_to_vmem [thread:$0]  %s11503_s6, 16384, %s80_s13, [#allocation11], %s9166_s1, %s9166_s1, %s9167_s29  }
  0x63   :  { %s9103_s2 = scalar_lea.hbm %s11505_s8, 2048 }
  0x64   :  { %p9104_p1 = scmp.ne.s32.totalorder %s11505_s8, %s9103_s2  ;;  %p9107_p2 = scmp.lt.u32.totalorder %s9103_s2, %s11505_s8 }
  0x66   :  { %p9109_p3 = pnand %p9107_p2, %p9104_p1 }
  0x68   :  { %9112 = shalt.err (!%p9109_p3)
}
  0x69   :  { %s9113_s12 = scalar_lea.vmem %s9312_s17, 2048  ;;  %p9118_p5 = scmp.lt.s32.totalorder %s9312_s17, %s9312_s17 }
  0x6a   :  { %p9114_p4 = scmp.ne.s32.totalorder %s9312_s17, %s9113_s12  ;;  %p9119_p6 = scmp.lt.s32.totalorder %s9113_s12, %s9113_s12 }
  0x6c   :  { %p9120_p7 = por %p9119_p6, %p9118_p5 }
  0x6e   :  { %p9121_p8 = pnand %p9120_p7, %p9114_p4 }
  0x70   :  { %9124 = shalt.err (!%p9121_p8)
}
  0x71   :  { %99 = dma.hbm_to_vmem [thread:$0]  %s11505_s8, 2048, %s9312_s17, [#allocation14], %s9162_s14, %s9162_s14, %s9163_s15  }
  0x72   :  { %9149 = dma.done.wait [#allocation5], 1280  }
  0x73   :  { %9150 = vsyncadd [#allocation5], 4294966016 }
  0x74   :  { %9151 = dma.done.wait [#allocation8], 17408  }
  0x75   :  { %9152 = vsyncadd [#allocation8], 4294949888 }
  0x76   :  { %9153 = dma.done.wait [#allocation11], 18432  }
  0x77   :  { %9154 = vsyncadd [#allocation11], 4294948864 }
  0x78   :  { %9155 = dma.done.wait [#allocation14], 2048  }
  0x79   :  { %9156 = vsyncadd [#allocation14], 4294965248  ;;  %v9170_v0 = vmov 0.0   ;;  %v122_v1 = vld [vmem:[#allocation9 + $0x8] sm:$0xff]  ;;  %v121_v3 = vld [vmem:[#allocation9] sm:$0xff]  ;;  %vm9172_vm0 = vmmov 0  }
  0x7a   :  { %335 = vmatprep.mubr.f32.mxu0 %v9170_v0  ;;  %1899 = vst [vmem:[#allocation15] sm:$0xff] %v9170_v0  ;;  %406 = vmatprep.mubr.f32.mxu1 %v9170_v0  ;;  %v126_v2 = vld [vmem:[#allocation9 + $0x28] sm:$0xff]  ;;  %v125_v5 = vld [vmem:[#allocation9 + $0x20] sm:$0xff]  ;;  %v124_v22 = vld [vmem:[#allocation9 + $0x18] sm:$0xff]  ;;  %s5525_s18 = sld [smem:[#allocation3 + $0x1]]  ;;  %s5530_s22 = sld [smem:[#allocation3 + $0x2]] }
  0x7b   :  { %v9346_v4 = vpack.c.bf16 %v126_v2, %v122_v1  ;;  %v130_v6 = vld [vmem:[#allocation9 + $0x48] sm:$0xff]  ;;  %v9348_v8 = vpack.c.bf16 %v125_v5, %v121_v3  ;;  %v129_v10 = vld [vmem:[#allocation9 + $0x40] sm:$0xff]  ;;  %v128_v26 = vld [vmem:[#allocation9 + $0x38] sm:$0xff]  ;;  %s5535_s28 = sld [smem:[#allocation3 + $0x3]]  ;;  %s5540_s8 = sld [smem:[#allocation3 + $0x4]] }
  0x7c   :  { %v134_v7 = vld [vmem:[#allocation9 + $0x68] sm:$0xff]  ;;  %v133_v11 = vld [vmem:[#allocation9 + $0x60] sm:$0xff]  ;;  %v9365_v28 = vpack.c.bf16 %v128_v26, %v124_v22  ;;  %v123_v29 = vld [vmem:[#allocation9 + $0x10] sm:$0xff] }
  0x7d   :  { %11674 = vst [vmem:[#allocation22_spill] sm:$0xff] %v9346_v4  ;;  %v9350_v9 = vpack.c.bf16 %v134_v7, %v130_v6  ;;  %v138_v12 = vld [vmem:[#allocation9 + $0x88] sm:$0xff]  ;;  %6283 = vmatprep.subr.bf16.mxu0 %v9346_v4  ;;  %v9354_v14 = vpack.c.bf16 %v133_v11, %v129_v10  ;;  %v137_v16 = vld [vmem:[#allocation9 + $0x80] sm:$0xff]  ;;  %v127_v30 = vld [vmem:[#allocation9 + $0x30] sm:$0xff] }
  0x7e   :  { %v142_v13 = vld [vmem:[#allocation9 + $0xa8] sm:$0xff]  ;;  %6285 = vmatpush1.bf16.msra.mxu0 %v9348_v8  ;;  %v141_v17 = vld [vmem:[#allocation9 + $0xa0] sm:$0xff]  ;;  %11675 = vst [vmem:[#allocation23_spill] sm:$0xff] %v9365_v28  ;;  %v9367_v31 = vpack.c.bf16 %v127_v30, %v123_v29  ;;  %v132_v32 = vld [vmem:[#allocation9 + $0x58] sm:$0xff]  ;;  %6347 = vmatprep.subr.bf16.mxu1 %v9365_v28 }
  0x7f   :  { %6287 = vmatprep.subr.bf16.mxu0 %v9350_v9  ;;  %v9357_v15 = vpack.c.bf16 %v142_v13, %v138_v12  ;;  %v146_v18 = vld [vmem:[#allocation9 + $0xc8] sm:$0xff]  ;;  %v9360_v20 = vpack.c.bf16 %v141_v17, %v137_v16  ;;  %v145_v21 = vld [vmem:[#allocation9 + $0xc0] sm:$0xff]  ;;  %v136_v33 = vld [vmem:[#allocation9 + $0x78] sm:$0xff] }
  0x80   :  { %v150_v19 = vld [vmem:[#allocation9 + $0xe8] sm:$0xff]  ;;  %v149_v24 = vld [vmem:[#allocation9 + $0xe0] sm:$0xff]  ;;  %v9373_v36 = vpack.c.bf16 %v136_v33, %v132_v32  ;;  %v131_v37 = vld [vmem:[#allocation9 + $0x50] sm:$0xff]  ;;  %6349 = vmatpush1.bf16.msra.mxu1 %v9367_v31  ;;  %p2408_p9 = scmp.gt.s32.totalorder %s5525_s18, 0  ;;  %p2922_p10 = scmp.gt.s32.totalorder %s5530_s22, 0 }
  0x81   :  { %v9363_v23 = vpack.c.bf16 %v150_v19, %v146_v18  ;;  %v154_v25 = vld [vmem:[#allocation9 + $0x108] sm:$0xff]  ;;  %v9370_v34 = vpack.c.bf16 %v149_v24, %v145_v21  ;;  %v153_v35 = vld [vmem:[#allocation9 + $0x100] sm:$0xff]  ;;  %v135_v41 = vld [vmem:[#allocation9 + $0x70] sm:$0xff]  ;;  %p3436_p11 = scmp.gt.s32.totalorder %s5535_s28, 0  ;;  %p3950_p12 = scmp.gt.s32.totalorder %s5540_s8, 0 }
  0x82   :  { %6289 = vmatpush1.bf16.msra.mxu0 %v9354_v14  ;;  %v158_v27 = vld [vmem:[#allocation9 + $0x128] sm:$0xff]  ;;  %v157_v39 = vld [vmem:[#allocation9 + $0x120] sm:$0xff]  ;;  %6351 = vmatprep.subr.bf16.mxu1 %v9373_v36  ;;  %v9380_v43 = vpack.c.bf16 %v135_v41, %v131_v37  ;;  %v140_v44 = vld [vmem:[#allocation9 + $0x98] sm:$0xff]  ;;  %s2409_s19 = scalar_select %p2408_p9, 1, 0 }
  0x83   :  { %6291 = vmatprep.subr.bf16.mxu0 %v9357_v15  ;;  %v9376_v38 = vpack.c.bf16 %v158_v27, %v154_v25  ;;  %v162_v40 = vld [vmem:[#allocation9 + $0x148] sm:$0xff]  ;;  %v144_v45 = vld [vmem:[#allocation9 + $0xb8] sm:$0xff]  ;;  %v139_v47 = vld [vmem:[#allocation9 + $0x90] sm:$0xff]  ;;  %v9385_v49 = vpack.c.bf16 %v157_v39, %v153_v35  ;;  %s2923_s3 = scalar_select %p2922_p10, 1, 0 }
  0x84   :  { %v166_v42 = vld [vmem:[#allocation9 + $0x168] sm:$0xff]  ;;  %v9382_v46 = vpack.c.bf16 %v144_v45, %v140_v44  ;;  %v143_v48 = vld [vmem:[#allocation9 + $0xb0] sm:$0xff]  ;;  %v161_v50 = vld [vmem:[#allocation9 + $0x140] sm:$0xff]  ;;  %6353 = vmatpush1.bf16.msra.mxu1 %v9380_v43  ;;  %s2410_s5 = scvt.s32.f32 %s2409_s19 }
  0x85   :  { %v148_v51 = vld [vmem:[#allocation9 + $0xd8] sm:$0xff]  ;;  %v9388_v52 = vpack.c.bf16 %v166_v42, %v162_v40  ;;  %v165_v53 = vld [vmem:[#allocation9 + $0x160] sm:$0xff]  ;;  %v170_v54 = vld [vmem:[#allocation9 + $0x188] sm:$0xff]  ;;  %v9391_v55 = vpack.c.bf16 %v143_v48, %v139_v47  ;;  %s2924_s30 = scvt.s32.f32 %s2923_s3 }
  0x86   :  { %6293 = vmatpush1.bf16.msra.mxu0 %v9360_v20  ;;  %v152_v56 = vld [vmem:[#allocation9 + $0xf8] sm:$0xff]  ;;  %v174_v57 = vld [vmem:[#allocation9 + $0x1a8] sm:$0xff]  ;;  %6355 = vmatprep.subr.bf16.mxu1 %v9382_v46  ;;  %v147_v59 = vld [vmem:[#allocation9 + $0xd0] sm:$0xff]  ;;  %v9397_v63 = vpack.c.bf16 %v165_v53, %v161_v50  ;;  %s2415_s26 = ssub.f32 1.0, %s2410_s5 }
  0x87   :  { %6295 = vmatprep.subr.bf16.mxu0 %v9363_v23  ;;  %v9394_v58 = vpack.c.bf16 %v152_v56, %v148_v51  ;;  %v151_v60 = vld [vmem:[#allocation9 + $0xf0] sm:$0xff]  ;;  %v156_v61 = vld [vmem:[#allocation9 + $0x118] sm:$0xff]  ;;  %v9400_v0 = vpack.c.bf16 %v174_v57, %v170_v54  ;;  %v169_v1 = vld [vmem:[#allocation9 + $0x180] sm:$0xff]  ;;  %s2929_s23 = ssub.f32 1.0, %s2924_s30 }
  0x88   :  { %v160_v62 = vld [vmem:[#allocation9 + $0x138] sm:$0xff]  ;;  %v173_v2 = vld [vmem:[#allocation9 + $0x1a0] sm:$0xff]  ;;  %v178_v3 = vld [vmem:[#allocation9 + $0x1c8] sm:$0xff]  ;;  %6357 = vmatpush1.bf16.msra.mxu1 %v9391_v55  ;;  %v9403_v5 = vpack.c.bf16 %v151_v60, %v147_v59  ;;  %s3437_s0 = scalar_select %p3436_p11, 1, 0 }
  0x89   :  { %v182_v6 = vld [vmem:[#allocation9 + $0x1e8] sm:$0xff]  ;;  %6359 = vmatprep.subr.bf16.mxu1 %v9394_v58  ;;  %v9406_v7 = vpack.c.bf16 %v160_v62, %v156_v61  ;;  %v155_v10 = vld [vmem:[#allocation9 + $0x110] sm:$0xff]  ;;  %v164_v12 = vld [vmem:[#allocation9 + $0x158] sm:$0xff]  ;;  %v9409_v16 = vpack.c.bf16 %v173_v2, %v169_v1  ;;  %s3951_s29 = scalar_select %p3950_p12, 1, 0 }
  0x8a   :  { %6297 = vmatpush1.bf16.msra.mxu0 %v9370_v34  ;;  %v159_v11 = vld [vmem:[#allocation9 + $0x130] sm:$0xff]  ;;  %v168_v13 = vld [vmem:[#allocation9 + $0x178] sm:$0xff]  ;;  %v9412_v17 = vpack.c.bf16 %v182_v6, %v178_v3  ;;  %v177_v18 = vld [vmem:[#allocation9 + $0x1c0] sm:$0xff]  ;;  %s3438_s11 = scvt.s32.f32 %s3437_s0  ;;  %s9173_s0 = smov [#allocation15]  }
  0x8b   :  { %6299 = vmatprep.subr.bf16.mxu0 %v9376_v38  ;;  %v181_v19 = vld [vmem:[#allocation9 + $0x1e0] sm:$0xff]  ;;  %v186_v21 = vld [vmem:[#allocation9 + $0x208] sm:$0xff]  ;;  %v9415_v22 = vpack.c.bf16 %v159_v11, %v155_v10  ;;  %v9418_v25 = vpack.c.bf16 %v168_v13, %v164_v12  ;;  %v163_v26 = vld [vmem:[#allocation9 + $0x150] sm:$0xff] }
  0x8c   :  { %6361 = vmatpush1.bf16.msra.mxu1 %v9403_v5  ;;  %v190_v24 = vld [vmem:[#allocation9 + $0x228] sm:$0xff]  ;;  %v167_v27 = vld [vmem:[#allocation9 + $0x170] sm:$0xff]  ;;  %v172_v29 = vld [vmem:[#allocation9 + $0x198] sm:$0xff]  ;;  %v9421_v32 = vpack.c.bf16 %v181_v19, %v177_v18  ;;  %s3443_s12 = ssub.f32 1.0, %s3438_s11 }
  0x8d   :  { %6363 = vmatprep.subr.bf16.mxu1 %v9406_v7  ;;  %v176_v30 = vld [vmem:[#allocation9 + $0x1b8] sm:$0xff]  ;;  %v9424_v33 = vpack.c.bf16 %v190_v24, %v186_v21  ;;  %v185_v35 = vld [vmem:[#allocation9 + $0x200] sm:$0xff]  ;;  %v194_v39 = vld [vmem:[#allocation9 + $0x248] sm:$0xff]  ;;  %v9427_v40 = vpack.c.bf16 %v167_v27, %v163_v26 }
  0x8e   :  { %6301 = vmatpush1.bf16.msra.mxu0 %v9385_v49  ;;  %v189_v37 = vld [vmem:[#allocation9 + $0x220] sm:$0xff]  ;;  %v198_v41 = vld [vmem:[#allocation9 + $0x268] sm:$0xff]  ;;  %v9430_v42 = vpack.c.bf16 %v176_v30, %v172_v29  ;;  %v171_v44 = vld [vmem:[#allocation9 + $0x190] sm:$0xff] }
  0x8f   :  { %6303 = vmatprep.subr.bf16.mxu0 %v9388_v52  ;;  %v175_v45 = vld [vmem:[#allocation9 + $0x1b0] sm:$0xff]  ;;  %v180_v47 = vld [vmem:[#allocation9 + $0x1d8] sm:$0xff]  ;;  %v9433_v50 = vpack.c.bf16 %v189_v37, %v185_v35  ;;  %v9436_v51 = vpack.c.bf16 %v198_v41, %v194_v39  ;;  %v193_v53 = vld [vmem:[#allocation9 + $0x240] sm:$0xff] }
  0x90   :  { %6365 = vmatpush1.bf16.msra.mxu1 %v9415_v22  ;;  %v184_v48 = vld [vmem:[#allocation9 + $0x1f8] sm:$0xff]  ;;  %v197_v54 = vld [vmem:[#allocation9 + $0x260] sm:$0xff]  ;;  %v202_v56 = vld [vmem:[#allocation9 + $0x288] sm:$0xff]  ;;  %v9439_v57 = vpack.c.bf16 %v175_v45, %v171_v44 }
  0x91   :  { %6367 = vmatprep.subr.bf16.mxu1 %v9418_v25  ;;  %v206_v59 = vld [vmem:[#allocation9 + $0x2a8] sm:$0xff]  ;;  %v9442_v60 = vpack.c.bf16 %v184_v48, %v180_v47  ;;  %v179_v61 = vld [vmem:[#allocation9 + $0x1d0] sm:$0xff]  ;;  %v188_v1 = vld [vmem:[#allocation9 + $0x218] sm:$0xff]  ;;  %v9445_v3 = vpack.c.bf16 %v197_v54, %v193_v53 }
  0x92   :  { %6305 = vmatpush1.bf16.msra.mxu0 %v9397_v63  ;;  %v183_v62 = vld [vmem:[#allocation9 + $0x1f0] sm:$0xff]  ;;  %v192_v2 = vld [vmem:[#allocation9 + $0x238] sm:$0xff]  ;;  %v9448_v6 = vpack.c.bf16 %v206_v59, %v202_v56  ;;  %v201_v10 = vld [vmem:[#allocation9 + $0x280] sm:$0xff] }
  0x93   :  { %6307 = vmatprep.subr.bf16.mxu0 %v9400_v0  ;;  %v205_v11 = vld [vmem:[#allocation9 + $0x2a0] sm:$0xff]  ;;  %v210_v12 = vld [vmem:[#allocation9 + $0x2c8] sm:$0xff]  ;;  %v9451_v13 = vpack.c.bf16 %v183_v62, %v179_v61  ;;  %v9454_v19 = vpack.c.bf16 %v192_v2, %v188_v1  ;;  %v187_v21 = vld [vmem:[#allocation9 + $0x210] sm:$0xff] }
  0x94   :  { %6369 = vmatpush1.bf16.msra.mxu1 %v9427_v40  ;;  %v214_v18 = vld [vmem:[#allocation9 + $0x2e8] sm:$0xff]  ;;  %v191_v24 = vld [vmem:[#allocation9 + $0x230] sm:$0xff]  ;;  %v196_v26 = vld [vmem:[#allocation9 + $0x258] sm:$0xff]  ;;  %v9457_v29 = vpack.c.bf16 %v205_v11, %v201_v10 }
  0x95   :  { %6371 = vmatprep.subr.bf16.mxu1 %v9430_v42  ;;  %v200_v27 = vld [vmem:[#allocation9 + $0x278] sm:$0xff]  ;;  %v9460_v30 = vpack.c.bf16 %v214_v18, %v210_v12  ;;  %v209_v35 = vld [vmem:[#allocation9 + $0x2c0] sm:$0xff]  ;;  %v218_v39 = vld [vmem:[#allocation9 + $0x308] sm:$0xff]  ;;  %v9463_v41 = vpack.c.bf16 %v191_v24, %v187_v21 }
  0x96   :  { %6309 = vmatpush1.bf16.msra.mxu0 %v9409_v16  ;;  %v213_v37 = vld [vmem:[#allocation9 + $0x2e0] sm:$0xff]  ;;  %v222_v44 = vld [vmem:[#allocation9 + $0x328] sm:$0xff]  ;;  %v9466_v45 = vpack.c.bf16 %v200_v27, %v196_v26  ;;  %v195_v47 = vld [vmem:[#allocation9 + $0x250] sm:$0xff] }
  0x97   :  { %6311 = vmatprep.subr.bf16.mxu0 %v9412_v17  ;;  %v199_v48 = vld [vmem:[#allocation9 + $0x270] sm:$0xff]  ;;  %v204_v53 = vld [vmem:[#allocation9 + $0x298] sm:$0xff]  ;;  %v9469_v56 = vpack.c.bf16 %v213_v37, %v209_v35  ;;  %v9472_v59 = vpack.c.bf16 %v222_v44, %v218_v39  ;;  %v217_v61 = vld [vmem:[#allocation9 + $0x300] sm:$0xff] }
  0x98   :  { %6373 = vmatpush1.bf16.msra.mxu1 %v9439_v57  ;;  %v208_v54 = vld [vmem:[#allocation9 + $0x2b8] sm:$0xff]  ;;  %v221_v62 = vld [vmem:[#allocation9 + $0x320] sm:$0xff]  ;;  %v226_v1 = vld [vmem:[#allocation9 + $0x348] sm:$0xff]  ;;  %v9475_v2 = vpack.c.bf16 %v199_v48, %v195_v47 }
  0x99   :  { %6375 = vmatprep.subr.bf16.mxu1 %v9442_v60  ;;  %11676 = vst [vmem:[#allocation24_spill] sm:$0xff] %v9469_v56  ;;  %11677 = vst [vmem:[#allocation25_spill] sm:$0xff] %v9472_v59  ;;  %v230_v10 = vld [vmem:[#allocation9 + $0x368] sm:$0xff]  ;;  %v9478_v11 = vpack.c.bf16 %v208_v54, %v204_v53  ;;  %v203_v12 = vld [vmem:[#allocation9 + $0x290] sm:$0xff]  ;;  %v9481_v26 = vpack.c.bf16 %v221_v62, %v217_v61 }
  0x9a   :  { %6313 = vmatpush1.bf16.msra.mxu0 %v9421_v32  ;;  %11678 = vst [vmem:[#allocation26_spill] sm:$0xff] %v9475_v2  ;;  %v207_v18 = vld [vmem:[#allocation9 + $0x2b0] sm:$0xff]  ;;  %v212_v21 = vld [vmem:[#allocation9 + $0x2d8] sm:$0xff]  ;;  %v9484_v27 = vpack.c.bf16 %v230_v10, %v226_v1  ;;  %v225_v35 = vld [vmem:[#allocation9 + $0x340] sm:$0xff] }
  0x9b   :  { %6315 = vmatprep.subr.bf16.mxu0 %v9424_v33  ;;  %11679 = vst [vmem:[#allocation27_spill] sm:$0xff] %v9478_v11  ;;  %v216_v24 = vld [vmem:[#allocation9 + $0x2f8] sm:$0xff]  ;;  %11680 = vst [vmem:[#allocation28_spill] sm:$0xff] %v9481_v26  ;;  %v229_v37 = vld [vmem:[#allocation9 + $0x360] sm:$0xff]  ;;  %v9487_v44 = vpack.c.bf16 %v207_v18, %v203_v12 }
  0x9c   :  { %6377 = vmatpush1.bf16.msra.mxu1 %v9451_v13  ;;  %11681 = vst [vmem:[#allocation29_spill] sm:$0xff] %v9484_v27  ;;  %v234_v39 = vld [vmem:[#allocation9 + $0x388] sm:$0xff]  ;;  %v9490_v48 = vpack.c.bf16 %v216_v24, %v212_v21  ;;  %v211_v53 = vld [vmem:[#allocation9 + $0x2d0] sm:$0xff]  ;;  %v220_v61 = vld [vmem:[#allocation9 + $0x318] sm:$0xff]  ;;  %v9493_v1 = vpack.c.bf16 %v229_v37, %v225_v35 }
  0x9d   :  { %6379 = vmatprep.subr.bf16.mxu1 %v9454_v19  ;;  %11682 = vst [vmem:[#allocation30_spill] sm:$0xff] %v9487_v44  ;;  %v238_v47 = vld [vmem:[#allocation9 + $0x3a8] sm:$0xff]  ;;  %v215_v54 = vld [vmem:[#allocation9 + $0x2f0] sm:$0xff]  ;;  %v224_v62 = vld [vmem:[#allocation9 + $0x338] sm:$0xff] }
  0x9e   :  { %6317 = vmatpush1.bf16.msra.mxu0 %v9433_v50  ;;  %11683 = vst [vmem:[#allocation31_spill] sm:$0xff] %v9490_v48  ;;  %11684 = vst [vmem:[#allocation32_spill] sm:$0xff] %v9493_v1  ;;  %v9496_v10 = vpack.c.bf16 %v238_v47, %v234_v39  ;;  %v237_v12 = vld [vmem:[#allocation9 + $0x3a0] sm:$0xff]  ;;  %v242_v18 = vld [vmem:[#allocation9 + $0x3c8] sm:$0xff]  ;;  %v9502_v24 = vpack.c.bf16 %v224_v62, %v220_v61 }
  0x9f   :  { %6319 = vmatprep.subr.bf16.mxu0 %v9436_v51  ;;  %v246_v21 = vld [vmem:[#allocation9 + $0x3e8] sm:$0xff]  ;;  %v228_v35 = vld [vmem:[#allocation9 + $0x358] sm:$0xff]  ;;  %v227_v62 = vld [vmem:[#allocation9 + $0x350] sm:$0xff] }
  0xa0   :  { %6381 = vmatpush1.bf16.msra.mxu1 %v9463_v41  ;;  %11685 = vst [vmem:[#allocation33_spill] sm:$0xff] %v9496_v10  ;;  %11687 = vst [vmem:[#allocation35_spill] sm:$0xff] %v9502_v24  ;;  %v232_v37 = vld [vmem:[#allocation9 + $0x378] sm:$0xff]  ;;  %v9508_v47 = vpack.c.bf16 %v246_v21, %v242_v18  ;;  %v239_v18 = vld [vmem:[#allocation9 + $0x3b0] sm:$0xff] }
  0xa1   :  { %6383 = vmatprep.subr.bf16.mxu1 %v9466_v45  ;;  %v9514_v61 = vpack.c.bf16 %v232_v37, %v228_v35  ;;  %v244_v21 = vld [vmem:[#allocation9 + $0x3d8] sm:$0xff]  ;;  %v120_v37 = vld [vmem:[#allocation4] sm:$0xff] }
  0xa2   :  { %6321 = vmatpush1.bf16.msra.mxu0 %v9445_v3  ;;  %11689 = vst [vmem:[#allocation37_spill] sm:$0xff] %v9508_v47  ;;  %v248_v35 = vld [vmem:[#allocation9 + $0x3f8] sm:$0xff] }
  0xa3   :  { %6323 = vmatprep.subr.bf16.mxu0 %v9448_v6  ;;  %11691 = vst [vmem:[#allocation39_spill] sm:$0xff] %v9514_v61 }
  0xa4   :  { %6385 = vmatpush1.bf16.msra.mxu1 %v9475_v2  ;;  %v233_v2 = vld [vmem:[#allocation9 + $0x380] sm:$0xff] }
  0xa5   :  { %6387 = vmatprep.subr.bf16.mxu1 %v9478_v11  ;;  %v9499_v11 = vpack.c.bf16 %v215_v54, %v211_v53  ;;  %v9505_v39 = vpack.c.bf16 %v237_v12, %v233_v2  ;;  %v245_v53 = vld [vmem:[#allocation9 + $0x3e0] sm:$0xff] }
  0xa6   :  { %6325 = vmatpush1.bf16.msra.mxu0 %v9457_v29 }
  0xa7   :  { %6327 = vmatprep.subr.bf16.mxu0 %v9460_v30  ;;  %11686 = vst [vmem:[#allocation34_spill] sm:$0xff] %v9499_v11  ;;  %11688 = vst [vmem:[#allocation36_spill] sm:$0xff] %v9505_v39 }
  0xa8   :  { %6389 = vmatpush1.bf16.msra.mxu1 %v9487_v44  ;;  %v241_v44 = vld [vmem:[#allocation9 + $0x3c0] sm:$0xff] }
  0xa9   :  { %6391 = vmatprep.subr.bf16.mxu1 %v9490_v48  ;;  %v231_v48 = vld [vmem:[#allocation9 + $0x370] sm:$0xff]  ;;  %v9517_v2 = vpack.c.bf16 %v245_v53, %v241_v44 }
  0xaa   :  { %6329 = vmatpush1.bf16.msra.mxu0 %v9469_v56  ;;  %v9521_v12 = vpack.c.bf16 %v231_v48, %v227_v62  ;;  %v9532_v48 = vpack.c.bf16 %v248_v35, %v244_v21  ;;  %v243_v53 = vld [vmem:[#allocation9 + $0x3d0] sm:$0xff]  ;;  %v11698_v62 = vld [vmem:[#allocation25_spill] sm:$0xff] }
  0xab   :  { %6331 = vmatprep.subr.bf16.mxu0 %v9472_v59  ;;  %v219_v59 = vld [vmem:[#allocation9 + $0x310] sm:$0xff]  ;;  %11692 = vst [vmem:[#allocation40_spill] sm:$0xff] %v9517_v2  ;;  %v11702_v35 = vld [vmem:[#allocation29_spill] sm:$0xff] }
  0xac   :  { %6393 = vmatpush1.bf16.msra.mxu1 %v9499_v11  ;;  %11693 = vst [vmem:[#allocation41_spill] sm:$0xff] %v9521_v12  ;;  %11696 = vst [vmem:[#allocation44_spill] sm:$0xff] %v9532_v48  ;;  %v11701_v21 = vld [vmem:[#allocation28_spill] sm:$0xff] }
  0xad   :  { %6395 = vmatprep.subr.bf16.mxu1 %v9502_v24 }
  0xae   :  { %6333 = vmatpush1.bf16.msra.mxu0 %v9481_v26  ;;  %v223_v26 = vld [vmem:[#allocation9 + $0x330] sm:$0xff] }
  0xaf   :  { %6335 = vmatprep.subr.bf16.mxu0 %v9484_v27  ;;  %v9511_v54 = vpack.c.bf16 %v223_v26, %v219_v59  ;;  %v236_v27 = vld [vmem:[#allocation9 + $0x398] sm:$0xff]  ;;  %v235_v26 = vld [vmem:[#allocation9 + $0x390] sm:$0xff] }
  0xb0   :  { %v9528_v44 = vpack.c.bf16 %v239_v18, %v235_v26  ;;  %v11699_v26 = vld [vmem:[#allocation26_spill] sm:$0xff]  ;;  %v11700_v18 = vld [vmem:[#allocation27_spill] sm:$0xff] }
  0xb1   :  { %11690 = vst [vmem:[#allocation38_spill] sm:$0xff] %v9511_v54  ;;  %6397 = vmatpush1.bf16.msra.mxu1 %v9511_v54 }
  0xb2   :  { %6337 = vmatpush1.bf16.msra.mxu0 %v9493_v1  ;;  %v240_v1 = vld [vmem:[#allocation9 + $0x3b8] sm:$0xff]  ;;  %6399 = vmatprep.subr.bf16.mxu1 %v9514_v61  ;;  %11695 = vst [vmem:[#allocation43_spill] sm:$0xff] %v9528_v44 }
  0xb3   :  { %6339 = vmatprep.subr.bf16.mxu0 %v9496_v10  ;;  %v9524_v59 = vpack.c.bf16 %v240_v1, %v236_v27  ;;  %v247_v27 = vld [vmem:[#allocation9 + $0x3f0] sm:$0xff] }
  0xb4   :  { %v9536_v1 = vpack.c.bf16 %v247_v27, %v243_v53  ;;  %v11704_v53 = vld [vmem:[#allocation31_spill] sm:$0xff]  ;;  %v11705_v27 = vld [vmem:[#allocation32_spill] sm:$0xff] }
  0xb5   :  { %11694 = vst [vmem:[#allocation42_spill] sm:$0xff] %v9524_v59  ;;  %6401 = vmatpush1.bf16.msra.mxu1 %v9521_v12 }
  0xb6   :  { %6341 = vmatpush1.bf16.msra.mxu0 %v9505_v39  ;;  %6403 = vmatprep.subr.bf16.mxu1 %v9524_v59  ;;  %11697 = vst [vmem:[#allocation45_spill] sm:$0xff] %v9536_v1 }
  0xb7   :  { %6343 = vmatprep.subr.bf16.mxu0 %v9508_v47 }
  0xb9   :  { %6405 = vmatpush1.bf16.msra.mxu1 %v9528_v44 }
  0xba   :  { %6345 = vmatpush1.bf16.msra.mxu0 %v9517_v2  ;;  %6407 = vmatprep.subr.bf16.mxu1 %v9532_v48 }
  0xbb   :  { %6411 = vmatprep.subr.bf16.mxu0 %v9346_v4 }
  0xbd   :  { %336 = vmatmul.mubr.f32.vlgmr.msra.gmra.mrb[0].mxu0 %v120_v37  ;;  %6409 = vmatpush1.bf16.msra.mxu1 %v9536_v1 }
  0xbe   :  { %6413 = vmatpush1.bf16.msra.mxu0 %v9348_v8  ;;  %6475 = vmatprep.subr.bf16.mxu1 %v9365_v28 }
  0xbf   :  { %6415 = vmatprep.subr.bf16.mxu0 %v9350_v9 }
  0xc0   :  { %407 = vmatmul.mubr.f32.vlgmr.msra.gmra.mrb[0].mxu1 %v120_v37  ;;  %v11703_v37 = vld [vmem:[#allocation30_spill] sm:$0xff] }
  0xc1   :  { %6477 = vmatpush1.bf16.msra.mxu1 %v9367_v31 }
  0xc2   :  { %6417 = vmatpush1.bf16.msra.mxu0 %v9354_v14  ;;  %6479 = vmatprep.subr.bf16.mxu1 %v9373_v36 }
  0xc3   :  { %6419 = vmatprep.subr.bf16.mxu0 %v9357_v15 }
  0xc5   :  { %6481 = vmatpush1.bf16.msra.mxu1 %v9380_v43 }
  0xc6   :  { %6421 = vmatpush1.bf16.msra.mxu0 %v9360_v20  ;;  %6483 = vmatprep.subr.bf16.mxu1 %v9382_v46 }
  0xc7   :  { %6423 = vmatprep.subr.bf16.mxu0 %v9363_v23 }
  0xc9   :  { %6485 = vmatpush1.bf16.msra.mxu1 %v9391_v55 }
  0xca   :  { %6425 = vmatpush1.bf16.msra.mxu0 %v9370_v34  ;;  %6487 = vmatprep.subr.bf16.mxu1 %v9394_v58 }
  0xcb   :  { %6427 = vmatprep.subr.bf16.mxu0 %v9376_v38 }
  0xcd   :  { %6489 = vmatpush1.bf16.msra.mxu1 %v9403_v5 }
  0xce   :  { %6429 = vmatpush1.bf16.msra.mxu0 %v9385_v49  ;;  %6491 = vmatprep.subr.bf16.mxu1 %v9406_v7 }
  0xcf   :  { %6431 = vmatprep.subr.bf16.mxu0 %v9388_v52 }
  0xd1   :  { %6493 = vmatpush1.bf16.msra.mxu1 %v9415_v22 }
  0xd2   :  { %6433 = vmatpush1.bf16.msra.mxu0 %v9397_v63  ;;  %6495 = vmatprep.subr.bf16.mxu1 %v9418_v25 }
  0xd3   :  { %6435 = vmatprep.subr.bf16.mxu0 %v9400_v0 }
  0xd5   :  { %6497 = vmatpush1.bf16.msra.mxu1 %v9427_v40 }
  0xd6   :  { %6437 = vmatpush1.bf16.msra.mxu0 %v9409_v16  ;;  %6499 = vmatprep.subr.bf16.mxu1 %v9430_v42 }
  0xd7   :  { %6439 = vmatprep.subr.bf16.mxu0 %v9412_v17 }
  0xd9   :  { %6501 = vmatpush1.bf16.msra.mxu1 %v9439_v57 }
  0xda   :  { %6441 = vmatpush1.bf16.msra.mxu0 %v9421_v32  ;;  %6503 = vmatprep.subr.bf16.mxu1 %v9442_v60 }
  0xdb   :  { %6443 = vmatprep.subr.bf16.mxu0 %v9424_v33 }
  0xdd   :  { %6505 = vmatpush1.bf16.msra.mxu1 %v9451_v13 }
  0xde   :  { %6445 = vmatpush1.bf16.msra.mxu0 %v9433_v50  ;;  %6507 = vmatprep.subr.bf16.mxu1 %v9454_v19 }
  0xdf   :  { %6447 = vmatprep.subr.bf16.mxu0 %v9436_v51 }
  0xe1   :  { %6509 = vmatpush1.bf16.msra.mxu1 %v9463_v41 }
  0xe2   :  { %6449 = vmatpush1.bf16.msra.mxu0 %v9445_v3  ;;  %6511 = vmatprep.subr.bf16.mxu1 %v9466_v45 }
  0xe3   :  { %6451 = vmatprep.subr.bf16.mxu0 %v9448_v6 }
  0xe5   :  { %6513 = vmatpush1.bf16.msra.mxu1 %v11699_v26 }
  0xe6   :  { %6453 = vmatpush1.bf16.msra.mxu0 %v9457_v29  ;;  %6515 = vmatprep.subr.bf16.mxu1 %v11700_v18 }
  0xe7   :  { %6455 = vmatprep.subr.bf16.mxu0 %v9460_v30 }
  0xe9   :  { %6517 = vmatpush1.bf16.msra.mxu1 %v11703_v37 }
  0xea   :  { %6457 = vmatpush1.bf16.msra.mxu0 %v9469_v56  ;;  %6519 = vmatprep.subr.bf16.mxu1 %v11704_v53 }
  0xeb   :  { %6459 = vmatprep.subr.bf16.mxu0 %v11698_v62 }
  0xed   :  { %6521 = vmatpush1.bf16.msra.mxu1 %v9499_v11 }
  0xee   :  { %6461 = vmatpush1.bf16.msra.mxu0 %v11701_v21  ;;  %6523 = vmatprep.subr.bf16.mxu1 %v9502_v24 }
  0xef   :  { %6463 = vmatprep.subr.bf16.mxu0 %v11702_v35 }
  0xf1   :  { %6525 = vmatpush1.bf16.msra.mxu1 %v9511_v54 }
  0xf2   :  { %6465 = vmatpush1.bf16.msra.mxu0 %v11705_v27  ;;  %6527 = vmatprep.subr.bf16.mxu1 %v9514_v61 }
  0xf3   :  { %6467 = vmatprep.subr.bf16.mxu0 %v9496_v10 }
  0xf5   :  { %6529 = vmatpush1.bf16.msra.mxu1 %v9521_v12 }
  0xf6   :  { %6469 = vmatpush1.bf16.msra.mxu0 %v9505_v39  ;;  %6531 = vmatprep.subr.bf16.mxu1 %v9524_v59 }
  0xf7   :  { %6471 = vmatprep.subr.bf16.mxu0 %v9508_v47  ;;  %v11546_v47 = vlaneseq }
  0xf9   :  { %6533 = vmatpush1.bf16.msra.mxu1 %v9528_v44  ;;  %v252_v39 = vshrl.u32 %v11546_v47, 7 }
  0xfa   :  { %6473 = vmatpush1.bf16.msra.mxu0 %v9517_v2  ;;  %6535 = vmatprep.subr.bf16.mxu1 %v9532_v48  ;;  %v249_v2 = vld [vmem:[%s11501_s4] sm:$0xf]  ;;  %s3952_s4 = scvt.s32.f32 %s3951_s29 }
  0xfb   :  { %6539 = vmatprep.subr.bf16.mxu0 %v9346_v4  ;;  %v9605_v10 = vsub.s32 0, %v252_v39  ;;  %v9610_v4 = vsub.s32 1, %v252_v39  ;;  %v9620_v24 = vsub.s32 3, %v252_v39 }
  0xfc   :  { %s3957_s13 = ssub.f32 1.0, %s3952_s4 }
  0xfd   :  { %6537 = vmatpush1.bf16.msra.mxu1 %v9536_v1  ;;  %11706 = vst [vmem:[#allocation26_spill] sm:$0xff] %v9605_v10  ;;  %11707 = vst [vmem:[#allocation27_spill] sm:$0xff] %v9610_v4  ;;  %v9613_v59 = vrot.slane %v249_v2, %v9605_v10  ;;  %v9616_v48 = vrot.slane %v249_v2, %v9610_v4  ;;  %v9622_v10 = vsub.s32 2, %v252_v39 }
  0xfe   :  { %6603 = vmatprep.subr.bf16.mxu1 %v9365_v28  ;;  %11710 = vst [vmem:[#allocation47_spill] sm:$0xff] %v9620_v24  ;;  %v9625_v4 = vrot.slane %v249_v2, %v9620_v24 }
  0xff   :  { %11708 = vst [vmem:[#allocation30_spill] sm:$0xff] %v9613_v59  ;;  %11709 = vst [vmem:[#allocation46_spill] sm:$0xff] %v9616_v48 }
 0x100   :  { %11711 = vst [vmem:[#allocation48_spill] sm:$0xff] %v9622_v10 }
 0x190   :  { %v337_v44 = vpop.f32.mrb[0].mxu0 }
 0x191   :  { %v338_v28 = vadd.f32 %v337_v44, %v9613_v59  ;;  %v339_v1 = vpop.f32.mrb[1].mxu0 }
 0x192   :  { %v340_v47 = vadd.f32 %v339_v1, %v9616_v48 }
 0x193   :  { %v5501_v12 = vmul.f32 -1.442695, %v338_v28  ;;  %v408_v61 = vpop.f32.mrb[0].mxu1  ;;  %v9628_v28 = vrot.slane %v249_v2, %v9622_v10  ;;  %v11714_v2 = vld [vmem:[#allocation35_spill] sm:$0xff]  ;;  %v11727_v10 = vld [vmem:[#allocation40_spill] sm:$0xff] }
 0x194   :  { %v5502_v27 = vmul.f32 -1.442695, %v340_v47  ;;  %v410_v35 = vpop.f32.mrb[1].mxu1 }
 0x195   :  { %8809 = vpow2.f32 %v5501_v12  ;;  %v411_v47 = vadd.f32 %v410_v35, %v9625_v4  ;;  %v409_v1 = vadd.f32 %v408_v61, %v9628_v28  ;;  %v11713_v61 = vld [vmem:[#allocation25_spill] sm:$0xff]  ;;  %v11718_v35 = vld [vmem:[#allocation39_spill] sm:$0xff] }
 0x196   :  { %8811 = vpow2.f32 %v5502_v27 }
 0x19f   :  { %v8810_v54 = vpop.eup %8809 }
 0x1a0   :  { %v416_v21 = vadd.f32 1.0, %v8810_v54  ;;  %v8812_v44 = vpop.eup %8811 }
 0x1a1   :  { %v422_v59 = vadd.f32 1.0, %v8812_v44  ;;  %v433_v44 = vld [vmem:[#allocation4 + $0x8] sm:$0xff] }
 0x1a2   :  { %8813 = vrcp.f32 %v416_v21 }
 0x1a3   :  { %8815 = vrcp.f32 %v422_v59  ;;  %v11715_v59 = vld [vmem:[#allocation28_spill] sm:$0xff] }
 0x1ac   :  { %v8814_v12 = vpop.eup %8813 }
 0x1ad   :  { %v425_v54 = vmul.f32 %v8814_v12, %v411_v47  ;;  %v8816_v21 = vpop.eup %8815  ;;  %v11719_v47 = vld [vmem:[#allocation32_spill] sm:$0xff]  ;;  %v11720_v12 = vld [vmem:[#allocation41_spill] sm:$0xff] }
 0x1ae   :  { %v428_v39 = vsub.f32 1.0, %v8816_v21  ;;  %v430_v24 = vmul.f32 0.0, %v8816_v21  ;;  %v11724_v21 = vld [vmem:[#allocation43_spill] sm:$0xff] }
 0x1af   :  { %v426_v27 = vadd.f32 %v425_v54, %v409_v1  ;;  %v11721_v1 = vld [vmem:[#allocation33_spill] sm:$0xff]  ;;  %v11722_v54 = vld [vmem:[#allocation42_spill] sm:$0xff] }
 0x1b1   :  { %8817 = vtanh.f32 %v426_v27  ;;  %v11723_v27 = vld [vmem:[#allocation36_spill] sm:$0xff] }
 0x1bb   :  { %v8818_v48 = vpop.eup %8817 }
 0x1bc   :  { %v429_v62 = vmul.f32 %v8818_v48, %v428_v39  ;;  %v11716_v48 = vld [vmem:[#allocation38_spill] sm:$0xff]  ;;  %v11725_v39 = vld [vmem:[#allocation37_spill] sm:$0xff] }
 0x1be   :  { %v9632_v11 = vadd.f32 %v430_v24, %v429_v62  ;;  %v11712_v24 = vld [vmem:[#allocation34_spill] sm:$0xff]  ;;  %v11717_v62 = vld [vmem:[#allocation29_spill] sm:$0xff] }
 0x1c0   :  { %498 = vmatprep.mubr.f32.mxu0 %v9632_v11  ;;  %569 = vmatprep.mubr.f32.mxu1 %v9632_v11 }
 0x1c1   :  { %499 = vmatmul.mubr.f32.vlgmr.msra.gmra.mrb[2].mxu0 %v433_v44  ;;  %570 = vmatmul.mubr.f32.vlgmr.msra.gmra.mrb[2].mxu1 %v433_v44  ;;  %v11726_v44 = vld [vmem:[#allocation44_spill] sm:$0xff] }
 0x1c2   :  { %6541 = vmatpush1.bf16.msra.mxu0 %v9348_v8  ;;  %6605 = vmatpush1.bf16.msra.mxu1 %v9367_v31 }
 0x1c3   :  { %6543 = vmatprep.subr.bf16.mxu0 %v9350_v9  ;;  %6607 = vmatprep.subr.bf16.mxu1 %v9373_v36 }
 0x1c6   :  { %6545 = vmatpush1.bf16.msra.mxu0 %v9354_v14  ;;  %6609 = vmatpush1.bf16.msra.mxu1 %v9380_v43 }
 0x1c7   :  { %6547 = vmatprep.subr.bf16.mxu0 %v9357_v15  ;;  %6611 = vmatprep.subr.bf16.mxu1 %v9382_v46 }
 0x1ca   :  { %6549 = vmatpush1.bf16.msra.mxu0 %v9360_v20  ;;  %6613 = vmatpush1.bf16.msra.mxu1 %v9391_v55 }
 0x1cb   :  { %6551 = vmatprep.subr.bf16.mxu0 %v9363_v23  ;;  %6615 = vmatprep.subr.bf16.mxu1 %v9394_v58 }
 0x1ce   :  { %6553 = vmatpush1.bf16.msra.mxu0 %v9370_v34  ;;  %6617 = vmatpush1.bf16.msra.mxu1 %v9403_v5 }
 0x1cf   :  { %6555 = vmatprep.subr.bf16.mxu0 %v9376_v38  ;;  %6619 = vmatprep.subr.bf16.mxu1 %v9406_v7 }
 0x1d2   :  { %6557 = vmatpush1.bf16.msra.mxu0 %v9385_v49  ;;  %6621 = vmatpush1.bf16.msra.mxu1 %v9415_v22 }
 0x1d3   :  { %6559 = vmatprep.subr.bf16.mxu0 %v9388_v52  ;;  %6623 = vmatprep.subr.bf16.mxu1 %v9418_v25 }
 0x1d6   :  { %6561 = vmatpush1.bf16.msra.mxu0 %v9397_v63  ;;  %6625 = vmatpush1.bf16.msra.mxu1 %v9427_v40 }
 0x1d7   :  { %6563 = vmatprep.subr.bf16.mxu0 %v9400_v0  ;;  %6627 = vmatprep.subr.bf16.mxu1 %v9430_v42 }
 0x1da   :  { %6565 = vmatpush1.bf16.msra.mxu0 %v9409_v16  ;;  %6629 = vmatpush1.bf16.msra.mxu1 %v9439_v57 }
 0x1db   :  { %6567 = vmatprep.subr.bf16.mxu0 %v9412_v17  ;;  %6631 = vmatprep.subr.bf16.mxu1 %v9442_v60 }
 0x1de   :  { %6569 = vmatpush1.bf16.msra.mxu0 %v9421_v32  ;;  %6633 = vmatpush1.bf16.msra.mxu1 %v9451_v13 }
 0x1df   :  { %6571 = vmatprep.subr.bf16.mxu0 %v9424_v33  ;;  %6635 = vmatprep.subr.bf16.mxu1 %v9454_v19 }
 0x1e2   :  { %6573 = vmatpush1.bf16.msra.mxu0 %v9433_v50  ;;  %6637 = vmatpush1.bf16.msra.mxu1 %v9463_v41 }
 0x1e3   :  { %6575 = vmatprep.subr.bf16.mxu0 %v9436_v51  ;;  %6639 = vmatprep.subr.bf16.mxu1 %v9466_v45 }
 0x1e6   :  { %6577 = vmatpush1.bf16.msra.mxu0 %v9445_v3  ;;  %6641 = vmatpush1.bf16.msra.mxu1 %v11699_v26 }
 0x1e7   :  { %6579 = vmatprep.subr.bf16.mxu0 %v9448_v6  ;;  %6643 = vmatprep.subr.bf16.mxu1 %v11700_v18 }
 0x1ea   :  { %6581 = vmatpush1.bf16.msra.mxu0 %v9457_v29  ;;  %6645 = vmatpush1.bf16.msra.mxu1 %v11703_v37 }
 0x1eb   :  { %6583 = vmatprep.subr.bf16.mxu0 %v9460_v30  ;;  %6647 = vmatprep.subr.bf16.mxu1 %v11704_v53 }
 0x1ee   :  { %6585 = vmatpush1.bf16.msra.mxu0 %v9469_v56  ;;  %6649 = vmatpush1.bf16.msra.mxu1 %v11712_v24 }
 0x1ef   :  { %6587 = vmatprep.subr.bf16.mxu0 %v11713_v61  ;;  %6651 = vmatprep.subr.bf16.mxu1 %v11714_v2 }
 0x1f2   :  { %6589 = vmatpush1.bf16.msra.mxu0 %v11715_v59  ;;  %6653 = vmatpush1.bf16.msra.mxu1 %v11716_v48  ;;  %v11731_v48 = vld [vmem:[#allocation30_spill] sm:$0xff] }
 0x1f3   :  { %6591 = vmatprep.subr.bf16.mxu0 %v11717_v62  ;;  %6655 = vmatprep.subr.bf16.mxu1 %v11718_v35  ;;  %v11728_v62 = vld [vmem:[#allocation45_spill] sm:$0xff]  ;;  %v11729_v35 = vld [vmem:[#allocation22_spill] sm:$0xff] }
 0x1f6   :  { %6593 = vmatpush1.bf16.msra.mxu0 %v11719_v47  ;;  %6657 = vmatpush1.bf16.msra.mxu1 %v11720_v12  ;;  %v11730_v47 = vld [vmem:[#allocation23_spill] sm:$0xff] }
 0x1f7   :  { %6595 = vmatprep.subr.bf16.mxu0 %v11721_v1  ;;  %6659 = vmatprep.subr.bf16.mxu1 %v11722_v54 }
 0x1fa   :  { %6597 = vmatpush1.bf16.msra.mxu0 %v11723_v27  ;;  %6661 = vmatpush1.bf16.msra.mxu1 %v11724_v21  ;;  %v11732_v21 = vld [vmem:[#allocation46_spill] sm:$0xff] }
 0x1fb   :  { %6599 = vmatprep.subr.bf16.mxu0 %v11725_v39  ;;  %6663 = vmatprep.subr.bf16.mxu1 %v11726_v44 }
 0x1fe   :  { %6601 = vmatpush1.bf16.msra.mxu0 %v11727_v10  ;;  %6665 = vmatpush1.bf16.msra.mxu1 %v11728_v62 }
 0x1ff   :  { %6667 = vmatprep.subr.bf16.mxu0 %v11729_v35  ;;  %6731 = vmatprep.subr.bf16.mxu1 %v11730_v47 }
 0x294   :  { %v500_v12 = vpop.f32.mrb[2].mxu0  ;;  %v571_v1 = vpop.f32.mrb[2].mxu1 }
 0x295   :  { %v501_v54 = vadd.f32 %v500_v12, %v11731_v48  ;;  %v502_v59 = vpop.f32.mrb[3].mxu0  ;;  %v573_v27 = vpop.f32.mrb[3].mxu1  ;;  %v572_v56 = vadd.f32 %v571_v1, %v9628_v28  ;;  %v11741_v1 = vld [vmem:[#allocation39_spill] sm:$0xff] }
 0x296   :  { %v503_v61 = vadd.f32 %v502_v59, %v11732_v21  ;;  %v574_v35 = vadd.f32 %v573_v27, %v9625_v4  ;;  %v11742_v27 = vld [vmem:[#allocation32_spill] sm:$0xff] }
 0x297   :  { %v5503_v2 = vmul.f32 -1.442695, %v501_v54 }
 0x298   :  { %v5504_v39 = vmul.f32 -1.442695, %v503_v61 }
 0x299   :  { %8819 = vpow2.f32 %v5503_v2 }
 0x29a   :  { %8821 = vpow2.f32 %v5504_v39 }
 0x2a3   :  { %v8820_v44 = vpop.eup %8819 }
 0x2a4   :  { %v579_v10 = vadd.f32 1.0, %v8820_v44  ;;  %v8822_v62 = vpop.eup %8821  ;;  %v11743_v44 = vld [vmem:[#allocation41_spill] sm:$0xff] }
 0x2a5   :  { %v585_v24 = vadd.f32 1.0, %v8822_v62  ;;  %v11738_v62 = vld [vmem:[#allocation28_spill] sm:$0xff] }
 0x2a6   :  { %8823 = vrcp.f32 %v579_v10  ;;  %v596_v10 = vld [vmem:[#allocation4 + $0x10] sm:$0xff] }
 0x2a7   :  { %8825 = vrcp.f32 %v585_v24  ;;  %v11736_v24 = vld [vmem:[#allocation25_spill] sm:$0xff] }
 0x2b0   :  { %v8824_v47 = vpop.eup %8823 }
 0x2b1   :  { %v588_v12 = vmul.f32 %v8824_v47, %v574_v35  ;;  %v8826_v54 = vpop.eup %8825  ;;  %v11739_v35 = vld [vmem:[#allocation38_spill] sm:$0xff]  ;;  %v11740_v47 = vld [vmem:[#allocation29_spill] sm:$0xff] }
 0x2b2   :  { %v591_v53 = vsub.f32 1.0, %v8826_v54  ;;  %v593_v61 = vmul.f32 %v8826_v54, %v9632_v11  ;;  %v11734_v11 = vld [vmem:[#allocation24_spill] sm:$0xff]  ;;  %v11745_v54 = vld [vmem:[#allocation42_spill] sm:$0xff] }
 0x2b3   :  { %v589_v48 = vadd.f32 %v588_v12, %v572_v56  ;;  %v11733_v56 = vld [vmem:[#allocation31_spill] sm:$0xff]  ;;  %v11744_v12 = vld [vmem:[#allocation33_spill] sm:$0xff] }
 0x2b5   :  { %8827 = vtanh.f32 %v589_v48  ;;  %v11737_v48 = vld [vmem:[#allocation35_spill] sm:$0xff] }
 0x2bf   :  { %v8828_v59 = vpop.eup %8827 }
 0x2c0   :  { %v592_v2 = vmul.f32 %v8828_v59, %v591_v53  ;;  %v11735_v53 = vld [vmem:[#allocation34_spill] sm:$0xff]  ;;  %v11746_v59 = vld [vmem:[#allocation36_spill] sm:$0xff] }
 0x2c2   :  { %v9705_v39 = vadd.f32 %v593_v61, %v592_v2  ;;  %v11747_v2 = vld [vmem:[#allocation43_spill] sm:$0xff]  ;;  %v11748_v61 = vld [vmem:[#allocation37_spill] sm:$0xff] }
 0x2c4   :  { %661 = vmatprep.mubr.f32.mxu0 %v9705_v39  ;;  %732 = vmatprep.mubr.f32.mxu1 %v9705_v39 }
 0x2c5   :  { %662 = vmatmul.mubr.f32.vlgmr.msra.gmra.mrb[4].mxu0 %v596_v10  ;;  %733 = vmatmul.mubr.f32.vlgmr.msra.gmra.mrb[4].mxu1 %v596_v10  ;;  %v11749_v10 = vld [vmem:[#allocation44_spill] sm:$0xff] }
 0x2c6   :  { %6669 = vmatpush1.bf16.msra.mxu0 %v9348_v8  ;;  %6733 = vmatpush1.bf16.msra.mxu1 %v9367_v31 }
 0x2c7   :  { %6671 = vmatprep.subr.bf16.mxu0 %v9350_v9  ;;  %6735 = vmatprep.subr.bf16.mxu1 %v9373_v36 }
 0x2ca   :  { %6673 = vmatpush1.bf16.msra.mxu0 %v9354_v14  ;;  %6737 = vmatpush1.bf16.msra.mxu1 %v9380_v43 }
 0x2cb   :  { %6675 = vmatprep.subr.bf16.mxu0 %v9357_v15  ;;  %6739 = vmatprep.subr.bf16.mxu1 %v9382_v46 }
 0x2ce   :  { %6677 = vmatpush1.bf16.msra.mxu0 %v9360_v20  ;;  %6741 = vmatpush1.bf16.msra.mxu1 %v9391_v55 }
 0x2cf   :  { %6679 = vmatprep.subr.bf16.mxu0 %v9363_v23  ;;  %6743 = vmatprep.subr.bf16.mxu1 %v9394_v58 }
 0x2d2   :  { %6681 = vmatpush1.bf16.msra.mxu0 %v9370_v34  ;;  %6745 = vmatpush1.bf16.msra.mxu1 %v9403_v5 }
 0x2d3   :  { %6683 = vmatprep.subr.bf16.mxu0 %v9376_v38  ;;  %6747 = vmatprep.subr.bf16.mxu1 %v9406_v7 }
 0x2d6   :  { %6685 = vmatpush1.bf16.msra.mxu0 %v9385_v49  ;;  %6749 = vmatpush1.bf16.msra.mxu1 %v9415_v22 }
 0x2d7   :  { %6687 = vmatprep.subr.bf16.mxu0 %v9388_v52  ;;  %6751 = vmatprep.subr.bf16.mxu1 %v9418_v25 }
 0x2da   :  { %6689 = vmatpush1.bf16.msra.mxu0 %v9397_v63  ;;  %6753 = vmatpush1.bf16.msra.mxu1 %v9427_v40 }
 0x2db   :  { %6691 = vmatprep.subr.bf16.mxu0 %v9400_v0  ;;  %6755 = vmatprep.subr.bf16.mxu1 %v9430_v42 }
 0x2de   :  { %6693 = vmatpush1.bf16.msra.mxu0 %v9409_v16  ;;  %6757 = vmatpush1.bf16.msra.mxu1 %v9439_v57 }
 0x2df   :  { %6695 = vmatprep.subr.bf16.mxu0 %v9412_v17  ;;  %6759 = vmatprep.subr.bf16.mxu1 %v9442_v60 }
 0x2e2   :  { %6697 = vmatpush1.bf16.msra.mxu0 %v9421_v32  ;;  %6761 = vmatpush1.bf16.msra.mxu1 %v9451_v13 }
 0x2e3   :  { %6699 = vmatprep.subr.bf16.mxu0 %v9424_v33  ;;  %6763 = vmatprep.subr.bf16.mxu1 %v9454_v19 }
 0x2e6   :  { %6701 = vmatpush1.bf16.msra.mxu0 %v9433_v50  ;;  %6765 = vmatpush1.bf16.msra.mxu1 %v9463_v41 }
 0x2e7   :  { %6703 = vmatprep.subr.bf16.mxu0 %v9436_v51  ;;  %6767 = vmatprep.subr.bf16.mxu1 %v9466_v45 }
 0x2ea   :  { %6705 = vmatpush1.bf16.msra.mxu0 %v9445_v3  ;;  %6769 = vmatpush1.bf16.msra.mxu1 %v11699_v26 }
 0x2eb   :  { %6707 = vmatprep.subr.bf16.mxu0 %v9448_v6  ;;  %6771 = vmatprep.subr.bf16.mxu1 %v11700_v18 }
 0x2ee   :  { %6709 = vmatpush1.bf16.msra.mxu0 %v9457_v29  ;;  %6773 = vmatpush1.bf16.msra.mxu1 %v11703_v37 }
 0x2ef   :  { %6711 = vmatprep.subr.bf16.mxu0 %v9460_v30  ;;  %6775 = vmatprep.subr.bf16.mxu1 %v11733_v56 }
 0x2f2   :  { %6713 = vmatpush1.bf16.msra.mxu0 %v11734_v11  ;;  %6777 = vmatpush1.bf16.msra.mxu1 %v11735_v53 }
 0x2f3   :  { %6715 = vmatprep.subr.bf16.mxu0 %v11736_v24  ;;  %6779 = vmatprep.subr.bf16.mxu1 %v11737_v48 }
 0x2f6   :  { %6717 = vmatpush1.bf16.msra.mxu0 %v11738_v62  ;;  %6781 = vmatpush1.bf16.msra.mxu1 %v11739_v35  ;;  %v11750_v35 = vld [vmem:[#allocation40_spill] sm:$0xff]  ;;  %v11754_v62 = vld [vmem:[#allocation30_spill] sm:$0xff] }
 0x2f7   :  { %6719 = vmatprep.subr.bf16.mxu0 %v11740_v47  ;;  %6783 = vmatprep.subr.bf16.mxu1 %v11741_v1  ;;  %v11751_v47 = vld [vmem:[#allocation45_spill] sm:$0xff]  ;;  %v11752_v1 = vld [vmem:[#allocation22_spill] sm:$0xff] }
 0x2fa   :  { %6721 = vmatpush1.bf16.msra.mxu0 %v11742_v27  ;;  %6785 = vmatpush1.bf16.msra.mxu1 %v11743_v44  ;;  %v11753_v27 = vld [vmem:[#allocation23_spill] sm:$0xff] }
 0x2fb   :  { %6723 = vmatprep.subr.bf16.mxu0 %v11744_v12  ;;  %6787 = vmatprep.subr.bf16.mxu1 %v11745_v54 }
 0x2fe   :  { %6725 = vmatpush1.bf16.msra.mxu0 %v11746_v59  ;;  %6789 = vmatpush1.bf16.msra.mxu1 %v11747_v2 }
 0x2ff   :  { %6727 = vmatprep.subr.bf16.mxu0 %v11748_v61  ;;  %6791 = vmatprep.subr.bf16.mxu1 %v11749_v10 }
 0x302   :  { %6729 = vmatpush1.bf16.msra.mxu0 %v11750_v35  ;;  %6793 = vmatpush1.bf16.msra.mxu1 %v11751_v47 }
 0x303   :  { %6795 = vmatprep.subr.bf16.mxu0 %v11752_v1  ;;  %6859 = vmatprep.subr.bf16.mxu1 %v11753_v27 }
 0x398   :  { %v663_v44 = vpop.f32.mrb[4].mxu0  ;;  %v734_v12 = vpop.f32.mrb[4].mxu1 }
 0x399   :  { %v664_v54 = vadd.f32 %v663_v44, %v11754_v62  ;;  %v665_v48 = vpop.f32.mrb[5].mxu0  ;;  %v736_v59 = vpop.f32.mrb[5].mxu1  ;;  %v735_v11 = vadd.f32 %v734_v12, %v9628_v28  ;;  %v11763_v12 = vld [vmem:[#allocation39_spill] sm:$0xff] }
 0x39a   :  { %v666_v2 = vadd.f32 %v665_v48, %v11732_v21  ;;  %v737_v1 = vadd.f32 %v736_v59, %v9625_v4  ;;  %v11764_v59 = vld [vmem:[#allocation32_spill] sm:$0xff] }
 0x39b   :  { %v5505_v24 = vmul.f32 -1.442695, %v664_v54 }
 0x39c   :  { %v5506_v61 = vmul.f32 -1.442695, %v666_v2 }
 0x39d   :  { %8829 = vpow2.f32 %v5505_v24 }
 0x39e   :  { %8831 = vpow2.f32 %v5506_v61 }
 0x3a7   :  { %v8830_v10 = vpop.eup %8829 }
 0x3a8   :  { %v742_v35 = vadd.f32 1.0, %v8830_v10  ;;  %v8832_v47 = vpop.eup %8831  ;;  %v11765_v10 = vld [vmem:[#allocation41_spill] sm:$0xff] }
 0x3a9   :  { %v748_v53 = vadd.f32 1.0, %v8832_v47  ;;  %v11760_v47 = vld [vmem:[#allocation28_spill] sm:$0xff] }
 0x3aa   :  { %8833 = vrcp.f32 %v742_v35  ;;  %v759_v35 = vld [vmem:[#allocation4 + $0x18] sm:$0xff] }
 0x3ab   :  { %8835 = vrcp.f32 %v748_v53  ;;  %v11758_v53 = vld [vmem:[#allocation25_spill] sm:$0xff] }
 0x3b4   :  { %v8834_v27 = vpop.eup %8833 }
 0x3b5   :  { %v751_v44 = vmul.f32 %v8834_v27, %v737_v1  ;;  %v8836_v54 = vpop.eup %8835  ;;  %v11761_v1 = vld [vmem:[#allocation38_spill] sm:$0xff]  ;;  %v11762_v27 = vld [vmem:[#allocation29_spill] sm:$0xff] }
 0x3b6   :  { %v754_v56 = vsub.f32 1.0, %v8836_v54  ;;  %v756_v2 = vmul.f32 %v8836_v54, %v9705_v39  ;;  %v11755_v39 = vld [vmem:[#allocation31_spill] sm:$0xff]  ;;  %v11767_v54 = vld [vmem:[#allocation42_spill] sm:$0xff] }
 0x3b7   :  { %v752_v62 = vadd.f32 %v751_v44, %v735_v11  ;;  %v11757_v11 = vld [vmem:[#allocation34_spill] sm:$0xff]  ;;  %v11766_v44 = vld [vmem:[#allocation33_spill] sm:$0xff] }
 0x3b9   :  { %8837 = vtanh.f32 %v752_v62  ;;  %v11759_v62 = vld [vmem:[#allocation35_spill] sm:$0xff] }
 0x3c3   :  { %v8838_v48 = vpop.eup %8837 }
 0x3c4   :  { %v755_v24 = vmul.f32 %v8838_v48, %v754_v56  ;;  %v11756_v56 = vld [vmem:[#allocation24_spill] sm:$0xff] }
 0x3c5   :  { %v11768_v48 = vld [vmem:[#allocation36_spill] sm:$0xff] }
 0x3c6   :  { %v9778_v61 = vadd.f32 %v756_v2, %v755_v24  ;;  %v11769_v24 = vld [vmem:[#allocation43_spill] sm:$0xff]  ;;  %v11770_v2 = vld [vmem:[#allocation37_spill] sm:$0xff] }
 0x3c8   :  { %824 = vmatprep.mubr.f32.mxu0 %v9778_v61  ;;  %895 = vmatprep.mubr.f32.mxu1 %v9778_v61 }
 0x3c9   :  { %825 = vmatmul.mubr.f32.vlgmr.msra.gmra.mrb[6].mxu0 %v759_v35  ;;  %896 = vmatmul.mubr.f32.vlgmr.msra.gmra.mrb[6].mxu1 %v759_v35  ;;  %v11771_v35 = vld [vmem:[#allocation44_spill] sm:$0xff] }
 0x3ca   :  { %6797 = vmatpush1.bf16.msra.mxu0 %v9348_v8  ;;  %6861 = vmatpush1.bf16.msra.mxu1 %v9367_v31 }
 0x3cb   :  { %6799 = vmatprep.subr.bf16.mxu0 %v9350_v9  ;;  %6863 = vmatprep.subr.bf16.mxu1 %v9373_v36 }
 0x3ce   :  { %6801 = vmatpush1.bf16.msra.mxu0 %v9354_v14  ;;  %6865 = vmatpush1.bf16.msra.mxu1 %v9380_v43 }
 0x3cf   :  { %6803 = vmatprep.subr.bf16.mxu0 %v9357_v15  ;;  %6867 = vmatprep.subr.bf16.mxu1 %v9382_v46 }
 0x3d2   :  { %6805 = vmatpush1.bf16.msra.mxu0 %v9360_v20  ;;  %6869 = vmatpush1.bf16.msra.mxu1 %v9391_v55 }
 0x3d3   :  { %6807 = vmatprep.subr.bf16.mxu0 %v9363_v23  ;;  %6871 = vmatprep.subr.bf16.mxu1 %v9394_v58 }
 0x3d6   :  { %6809 = vmatpush1.bf16.msra.mxu0 %v9370_v34  ;;  %6873 = vmatpush1.bf16.msra.mxu1 %v9403_v5 }
 0x3d7   :  { %6811 = vmatprep.subr.bf16.mxu0 %v9376_v38  ;;  %6875 = vmatprep.subr.bf16.mxu1 %v9406_v7 }
 0x3da   :  { %6813 = vmatpush1.bf16.msra.mxu0 %v9385_v49  ;;  %6877 = vmatpush1.bf16.msra.mxu1 %v9415_v22 }
 0x3db   :  { %6815 = vmatprep.subr.bf16.mxu0 %v9388_v52  ;;  %6879 = vmatprep.subr.bf16.mxu1 %v9418_v25 }
 0x3de   :  { %6817 = vmatpush1.bf16.msra.mxu0 %v9397_v63  ;;  %6881 = vmatpush1.bf16.msra.mxu1 %v9427_v40 }
 0x3df   :  { %6819 = vmatprep.subr.bf16.mxu0 %v9400_v0  ;;  %6883 = vmatprep.subr.bf16.mxu1 %v9430_v42 }
 0x3e2   :  { %6821 = vmatpush1.bf16.msra.mxu0 %v9409_v16  ;;  %6885 = vmatpush1.bf16.msra.mxu1 %v9439_v57 }
 0x3e3   :  { %6823 = vmatprep.subr.bf16.mxu0 %v9412_v17  ;;  %6887 = vmatprep.subr.bf16.mxu1 %v9442_v60 }
 0x3e6   :  { %6825 = vmatpush1.bf16.msra.mxu0 %v9421_v32  ;;  %6889 = vmatpush1.bf16.msra.mxu1 %v9451_v13 }
 0x3e7   :  { %6827 = vmatprep.subr.bf16.mxu0 %v9424_v33  ;;  %6891 = vmatprep.subr.bf16.mxu1 %v9454_v19 }
 0x3ea   :  { %6829 = vmatpush1.bf16.msra.mxu0 %v9433_v50  ;;  %6893 = vmatpush1.bf16.msra.mxu1 %v9463_v41 }
 0x3eb   :  { %6831 = vmatprep.subr.bf16.mxu0 %v9436_v51  ;;  %6895 = vmatprep.subr.bf16.mxu1 %v9466_v45 }
 0x3ee   :  { %6833 = vmatpush1.bf16.msra.mxu0 %v9445_v3  ;;  %6897 = vmatpush1.bf16.msra.mxu1 %v11699_v26 }
 0x3ef   :  { %6835 = vmatprep.subr.bf16.mxu0 %v9448_v6  ;;  %6899 = vmatprep.subr.bf16.mxu1 %v11700_v18 }
 0x3f2   :  { %6837 = vmatpush1.bf16.msra.mxu0 %v9457_v29  ;;  %6901 = vmatpush1.bf16.msra.mxu1 %v11703_v37 }
 0x3f3   :  { %6839 = vmatprep.subr.bf16.mxu0 %v9460_v30  ;;  %6903 = vmatprep.subr.bf16.mxu1 %v11755_v39 }
 0x3f6   :  { %6841 = vmatpush1.bf16.msra.mxu0 %v11756_v56  ;;  %6905 = vmatpush1.bf16.msra.mxu1 %v11757_v11 }
 0x3f7   :  { %6843 = vmatprep.subr.bf16.mxu0 %v11758_v53  ;;  %6907 = vmatprep.subr.bf16.mxu1 %v11759_v62 }
 0x3fa   :  { %6845 = vmatpush1.bf16.msra.mxu0 %v11760_v47  ;;  %6909 = vmatpush1.bf16.msra.mxu1 %v11761_v1  ;;  %v11772_v1 = vld [vmem:[#allocation40_spill] sm:$0xff]  ;;  %v11776_v47 = vld [vmem:[#allocation30_spill] sm:$0xff] }
 0x3fb   :  { %6847 = vmatprep.subr.bf16.mxu0 %v11762_v27  ;;  %6911 = vmatprep.subr.bf16.mxu1 %v11763_v12  ;;  %v11773_v27 = vld [vmem:[#allocation45_spill] sm:$0xff]  ;;  %v11774_v12 = vld [vmem:[#allocation22_spill] sm:$0xff] }
 0x3fe   :  { %6849 = vmatpush1.bf16.msra.mxu0 %v11764_v59  ;;  %6913 = vmatpush1.bf16.msra.mxu1 %v11765_v10  ;;  %v11775_v59 = vld [vmem:[#allocation23_spill] sm:$0xff] }
 0x3ff   :  { %6851 = vmatprep.subr.bf16.mxu0 %v11766_v44  ;;  %6915 = vmatprep.subr.bf16.mxu1 %v11767_v54 }
 0x402   :  { %6853 = vmatpush1.bf16.msra.mxu0 %v11768_v48  ;;  %6917 = vmatpush1.bf16.msra.mxu1 %v11769_v24 }
 0x403   :  { %6855 = vmatprep.subr.bf16.mxu0 %v11770_v2  ;;  %6919 = vmatprep.subr.bf16.mxu1 %v11771_v35 }
 0x406   :  { %6857 = vmatpush1.bf16.msra.mxu0 %v11772_v1  ;;  %6921 = vmatpush1.bf16.msra.mxu1 %v11773_v27 }
 0x407   :  { %6923 = vmatprep.subr.bf16.mxu0 %v11774_v12  ;;  %6987 = vmatprep.subr.bf16.mxu1 %v11775_v59 }
 0x49c   :  { %v826_v10 = vpop.f32.mrb[6].mxu0  ;;  %v897_v44 = vpop.f32.mrb[6].mxu1 }
 0x49d   :  { %v827_v54 = vadd.f32 %v826_v10, %v11776_v47  ;;  %v828_v62 = vpop.f32.mrb[7].mxu0  ;;  %v899_v48 = vpop.f32.mrb[7].mxu1  ;;  %v898_v56 = vadd.f32 %v897_v44, %v9628_v28  ;;  %v11785_v44 = vld [vmem:[#allocation39_spill] sm:$0xff] }
 0x49e   :  { %v829_v24 = vadd.f32 %v828_v62, %v11732_v21  ;;  %v900_v12 = vadd.f32 %v899_v48, %v9625_v4  ;;  %v11786_v48 = vld [vmem:[#allocation32_spill] sm:$0xff] }
 0x49f   :  { %v5507_v53 = vmul.f32 -1.442695, %v827_v54 }
 0x4a0   :  { %v5508_v2 = vmul.f32 -1.442695, %v829_v24 }
 0x4a1   :  { %8839 = vpow2.f32 %v5507_v53 }
 0x4a2   :  { %8841 = vpow2.f32 %v5508_v2 }
 0x4ab   :  { %v8840_v35 = vpop.eup %8839 }
 0x4ac   :  { %v905_v1 = vadd.f32 1.0, %v8840_v35  ;;  %v8842_v27 = vpop.eup %8841  ;;  %v11787_v35 = vld [vmem:[#allocation41_spill] sm:$0xff] }
 0x4ad   :  { %v911_v11 = vadd.f32 1.0, %v8842_v27  ;;  %v11782_v27 = vld [vmem:[#allocation28_spill] sm:$0xff] }
 0x4ae   :  { %8843 = vrcp.f32 %v905_v1  ;;  %v922_v1 = vld [vmem:[#allocation4 + $0x20] sm:$0xff] }
 0x4af   :  { %8845 = vrcp.f32 %v911_v11  ;;  %v11780_v11 = vld [vmem:[#allocation25_spill] sm:$0xff] }
 0x4b8   :  { %v8844_v59 = vpop.eup %8843 }
 0x4b9   :  { %v914_v10 = vmul.f32 %v8844_v59, %v900_v12  ;;  %v8846_v54 = vpop.eup %8845  ;;  %v11783_v12 = vld [vmem:[#allocation38_spill] sm:$0xff]  ;;  %v11784_v59 = vld [vmem:[#allocation29_spill] sm:$0xff] }
 0x4ba   :  { %v917_v39 = vsub.f32 1.0, %v8846_v54  ;;  %v919_v24 = vmul.f32 %v8846_v54, %v9778_v61  ;;  %v11777_v61 = vld [vmem:[#allocation31_spill] sm:$0xff]  ;;  %v11789_v54 = vld [vmem:[#allocation42_spill] sm:$0xff] }
 0x4bb   :  { %v915_v47 = vadd.f32 %v914_v10, %v898_v56  ;;  %v11779_v56 = vld [vmem:[#allocation34_spill] sm:$0xff]  ;;  %v11788_v10 = vld [vmem:[#allocation33_spill] sm:$0xff] }
 0x4bd   :  { %8847 = vtanh.f32 %v915_v47  ;;  %v11781_v47 = vld [vmem:[#allocation35_spill] sm:$0xff] }
 0x4c7   :  { %v8848_v62 = vpop.eup %8847 }
 0x4c8   :  { %v918_v53 = vmul.f32 %v8848_v62, %v917_v39  ;;  %v11778_v39 = vld [vmem:[#allocation24_spill] sm:$0xff] }
 0x4c9   :  { %v11790_v62 = vld [vmem:[#allocation36_spill] sm:$0xff] }
 0x4ca   :  { %v9851_v2 = vadd.f32 %v919_v24, %v918_v53  ;;  %v11791_v53 = vld [vmem:[#allocation43_spill] sm:$0xff]  ;;  %v11792_v24 = vld [vmem:[#allocation37_spill] sm:$0xff] }
 0x4cc   :  { %987 = vmatprep.mubr.f32.mxu0 %v9851_v2  ;;  %1058 = vmatprep.mubr.f32.mxu1 %v9851_v2 }
 0x4cd   :  { %988 = vmatmul.mubr.f32.vlgmr.msra.gmra.mrb[8].mxu0 %v922_v1  ;;  %1059 = vmatmul.mubr.f32.vlgmr.msra.gmra.mrb[8].mxu1 %v922_v1  ;;  %v11793_v1 = vld [vmem:[#allocation44_spill] sm:$0xff] }
 0x4ce   :  { %6925 = vmatpush1.bf16.msra.mxu0 %v9348_v8  ;;  %6989 = vmatpush1.bf16.msra.mxu1 %v9367_v31 }
 0x4cf   :  { %6927 = vmatprep.subr.bf16.mxu0 %v9350_v9  ;;  %6991 = vmatprep.subr.bf16.mxu1 %v9373_v36 }
 0x4d2   :  { %6929 = vmatpush1.bf16.msra.mxu0 %v9354_v14  ;;  %6993 = vmatpush1.bf16.msra.mxu1 %v9380_v43 }
 0x4d3   :  { %6931 = vmatprep.subr.bf16.mxu0 %v9357_v15  ;;  %6995 = vmatprep.subr.bf16.mxu1 %v9382_v46 }
 0x4d6   :  { %6933 = vmatpush1.bf16.msra.mxu0 %v9360_v20  ;;  %6997 = vmatpush1.bf16.msra.mxu1 %v9391_v55 }
 0x4d7   :  { %6935 = vmatprep.subr.bf16.mxu0 %v9363_v23  ;;  %6999 = vmatprep.subr.bf16.mxu1 %v9394_v58 }
 0x4da   :  { %6937 = vmatpush1.bf16.msra.mxu0 %v9370_v34  ;;  %7001 = vmatpush1.bf16.msra.mxu1 %v9403_v5 }
 0x4db   :  { %6939 = vmatprep.subr.bf16.mxu0 %v9376_v38  ;;  %7003 = vmatprep.subr.bf16.mxu1 %v9406_v7 }
 0x4de   :  { %6941 = vmatpush1.bf16.msra.mxu0 %v9385_v49  ;;  %7005 = vmatpush1.bf16.msra.mxu1 %v9415_v22 }
 0x4df   :  { %6943 = vmatprep.subr.bf16.mxu0 %v9388_v52  ;;  %7007 = vmatprep.subr.bf16.mxu1 %v9418_v25 }
 0x4e2   :  { %6945 = vmatpush1.bf16.msra.mxu0 %v9397_v63  ;;  %7009 = vmatpush1.bf16.msra.mxu1 %v9427_v40 }
 0x4e3   :  { %6947 = vmatprep.subr.bf16.mxu0 %v9400_v0  ;;  %7011 = vmatprep.subr.bf16.mxu1 %v9430_v42 }
 0x4e6   :  { %6949 = vmatpush1.bf16.msra.mxu0 %v9409_v16  ;;  %7013 = vmatpush1.bf16.msra.mxu1 %v9439_v57 }
 0x4e7   :  { %6951 = vmatprep.subr.bf16.mxu0 %v9412_v17  ;;  %7015 = vmatprep.subr.bf16.mxu1 %v9442_v60 }
 0x4ea   :  { %6953 = vmatpush1.bf16.msra.mxu0 %v9421_v32  ;;  %7017 = vmatpush1.bf16.msra.mxu1 %v9451_v13 }
 0x4eb   :  { %6955 = vmatprep.subr.bf16.mxu0 %v9424_v33  ;;  %7019 = vmatprep.subr.bf16.mxu1 %v9454_v19 }
 0x4ee   :  { %6957 = vmatpush1.bf16.msra.mxu0 %v9433_v50  ;;  %7021 = vmatpush1.bf16.msra.mxu1 %v9463_v41 }
 0x4ef   :  { %6959 = vmatprep.subr.bf16.mxu0 %v9436_v51  ;;  %7023 = vmatprep.subr.bf16.mxu1 %v9466_v45 }
 0x4f2   :  { %6961 = vmatpush1.bf16.msra.mxu0 %v9445_v3  ;;  %7025 = vmatpush1.bf16.msra.mxu1 %v11699_v26 }
 0x4f3   :  { %6963 = vmatprep.subr.bf16.mxu0 %v9448_v6  ;;  %7027 = vmatprep.subr.bf16.mxu1 %v11700_v18 }
 0x4f6   :  { %6965 = vmatpush1.bf16.msra.mxu0 %v9457_v29  ;;  %7029 = vmatpush1.bf16.msra.mxu1 %v11703_v37 }
 0x4f7   :  { %6967 = vmatprep.subr.bf16.mxu0 %v9460_v30  ;;  %7031 = vmatprep.subr.bf16.mxu1 %v11777_v61 }
 0x4fa   :  { %6969 = vmatpush1.bf16.msra.mxu0 %v11778_v39  ;;  %7033 = vmatpush1.bf16.msra.mxu1 %v11779_v56 }
 0x4fb   :  { %6971 = vmatprep.subr.bf16.mxu0 %v11780_v11  ;;  %7035 = vmatprep.subr.bf16.mxu1 %v11781_v47 }
 0x4fe   :  { %6973 = vmatpush1.bf16.msra.mxu0 %v11782_v27  ;;  %7037 = vmatpush1.bf16.msra.mxu1 %v11783_v12  ;;  %v11794_v12 = vld [vmem:[#allocation40_spill] sm:$0xff]  ;;  %v11798_v27 = vld [vmem:[#allocation30_spill] sm:$0xff] }
 0x4ff   :  { %6975 = vmatprep.subr.bf16.mxu0 %v11784_v59  ;;  %7039 = vmatprep.subr.bf16.mxu1 %v11785_v44  ;;  %v11795_v59 = vld [vmem:[#allocation45_spill] sm:$0xff]  ;;  %v11796_v44 = vld [vmem:[#allocation22_spill] sm:$0xff] }
 0x502   :  { %6977 = vmatpush1.bf16.msra.mxu0 %v11786_v48  ;;  %7041 = vmatpush1.bf16.msra.mxu1 %v11787_v35  ;;  %v11797_v48 = vld [vmem:[#allocation23_spill] sm:$0xff] }
 0x503   :  { %6979 = vmatprep.subr.bf16.mxu0 %v11788_v10  ;;  %7043 = vmatprep.subr.bf16.mxu1 %v11789_v54 }
 0x506   :  { %6981 = vmatpush1.bf16.msra.mxu0 %v11790_v62  ;;  %7045 = vmatpush1.bf16.msra.mxu1 %v11791_v53 }
 0x507   :  { %6983 = vmatprep.subr.bf16.mxu0 %v11792_v24  ;;  %7047 = vmatprep.subr.bf16.mxu1 %v11793_v1 }
 0x50a   :  { %6985 = vmatpush1.bf16.msra.mxu0 %v11794_v12  ;;  %7049 = vmatpush1.bf16.msra.mxu1 %v11795_v59 }
 0x50b   :  { %7051 = vmatprep.subr.bf16.mxu0 %v11796_v44  ;;  %7115 = vmatprep.subr.bf16.mxu1 %v11797_v48 }
 0x5a0   :  { %v989_v35 = vpop.f32.mrb[8].mxu0  ;;  %v1060_v10 = vpop.f32.mrb[8].mxu1 }
 0x5a1   :  { %v990_v54 = vadd.f32 %v989_v35, %v11798_v27  ;;  %v991_v47 = vpop.f32.mrb[9].mxu0  ;;  %v1062_v62 = vpop.f32.mrb[9].mxu1  ;;  %v1061_v39 = vadd.f32 %v1060_v10, %v9628_v28  ;;  %v11807_v10 = vld [vmem:[#allocation39_spill] sm:$0xff] }
 0x5a2   :  { %v992_v53 = vadd.f32 %v991_v47, %v11732_v21  ;;  %v1063_v44 = vadd.f32 %v1062_v62, %v9625_v4  ;;  %v11808_v62 = vld [vmem:[#allocation32_spill] sm:$0xff] }
 0x5a3   :  { %v5509_v11 = vmul.f32 -1.442695, %v990_v54 }
 0x5a4   :  { %v5510_v24 = vmul.f32 -1.442695, %v992_v53 }
 0x5a5   :  { %8849 = vpow2.f32 %v5509_v11 }
 0x5a6   :  { %8851 = vpow2.f32 %v5510_v24 }
 0x5af   :  { %v8850_v1 = vpop.eup %8849 }
 0x5b0   :  { %v1068_v12 = vadd.f32 1.0, %v8850_v1  ;;  %v8852_v59 = vpop.eup %8851  ;;  %v11809_v1 = vld [vmem:[#allocation41_spill] sm:$0xff] }
 0x5b1   :  { %v1074_v56 = vadd.f32 1.0, %v8852_v59  ;;  %v11804_v59 = vld [vmem:[#allocation28_spill] sm:$0xff] }
 0x5b2   :  { %8853 = vrcp.f32 %v1068_v12  ;;  %v1085_v12 = vld [vmem:[#allocation4 + $0x28] sm:$0xff] }
 0x5b3   :  { %8855 = vrcp.f32 %v1074_v56  ;;  %v11802_v56 = vld [vmem:[#allocation25_spill] sm:$0xff] }
 0x5bc   :  { %v8854_v48 = vpop.eup %8853 }
 0x5bd   :  { %v1077_v35 = vmul.f32 %v8854_v48, %v1063_v44  ;;  %v8856_v54 = vpop.eup %8855  ;;  %v11805_v44 = vld [vmem:[#allocation38_spill] sm:$0xff]  ;;  %v11806_v48 = vld [vmem:[#allocation29_spill] sm:$0xff] }
 0x5be   :  { %v1080_v61 = vsub.f32 1.0, %v8856_v54  ;;  %v1082_v53 = vmul.f32 %v8856_v54, %v9851_v2  ;;  %v11799_v2 = vld [vmem:[#allocation31_spill] sm:$0xff]  ;;  %v11811_v54 = vld [vmem:[#allocation42_spill] sm:$0xff] }
 0x5bf   :  { %v1078_v27 = vadd.f32 %v1077_v35, %v1061_v39  ;;  %v11801_v39 = vld [vmem:[#allocation34_spill] sm:$0xff]  ;;  %v11810_v35 = vld [vmem:[#allocation33_spill] sm:$0xff] }
 0x5c1   :  { %8857 = vtanh.f32 %v1078_v27  ;;  %v11803_v27 = vld [vmem:[#allocation35_spill] sm:$0xff] }
 0x5cb   :  { %v8858_v47 = vpop.eup %8857 }
 0x5cc   :  { %v1081_v11 = vmul.f32 %v8858_v47, %v1080_v61  ;;  %v11800_v61 = vld [vmem:[#allocation24_spill] sm:$0xff] }
 0x5cd   :  { %v11812_v47 = vld [vmem:[#allocation36_spill] sm:$0xff] }
 0x5ce   :  { %v9924_v24 = vadd.f32 %v1082_v53, %v1081_v11  ;;  %v11813_v11 = vld [vmem:[#allocation43_spill] sm:$0xff]  ;;  %v11814_v53 = vld [vmem:[#allocation37_spill] sm:$0xff] }
 0x5d0   :  { %1150 = vmatprep.mubr.f32.mxu0 %v9924_v24  ;;  %1221 = vmatprep.mubr.f32.mxu1 %v9924_v24 }
 0x5d1   :  { %1151 = vmatmul.mubr.f32.vlgmr.msra.gmra.mrb[10].mxu0 %v1085_v12  ;;  %1222 = vmatmul.mubr.f32.vlgmr.msra.gmra.mrb[10].mxu1 %v1085_v12  ;;  %v11815_v12 = vld [vmem:[#allocation44_spill] sm:$0xff] }
 0x5d2   :  { %7053 = vmatpush1.bf16.msra.mxu0 %v9348_v8  ;;  %7117 = vmatpush1.bf16.msra.mxu1 %v9367_v31 }
 0x5d3   :  { %7055 = vmatprep.subr.bf16.mxu0 %v9350_v9  ;;  %7119 = vmatprep.subr.bf16.mxu1 %v9373_v36 }
 0x5d6   :  { %7057 = vmatpush1.bf16.msra.mxu0 %v9354_v14  ;;  %7121 = vmatpush1.bf16.msra.mxu1 %v9380_v43 }
 0x5d7   :  { %7059 = vmatprep.subr.bf16.mxu0 %v9357_v15  ;;  %7123 = vmatprep.subr.bf16.mxu1 %v9382_v46 }
 0x5da   :  { %7061 = vmatpush1.bf16.msra.mxu0 %v9360_v20  ;;  %7125 = vmatpush1.bf16.msra.mxu1 %v9391_v55 }
 0x5db   :  { %7063 = vmatprep.subr.bf16.mxu0 %v9363_v23  ;;  %7127 = vmatprep.subr.bf16.mxu1 %v9394_v58 }
 0x5de   :  { %7065 = vmatpush1.bf16.msra.mxu0 %v9370_v34  ;;  %7129 = vmatpush1.bf16.msra.mxu1 %v9403_v5 }
 0x5df   :  { %7067 = vmatprep.subr.bf16.mxu0 %v9376_v38  ;;  %7131 = vmatprep.subr.bf16.mxu1 %v9406_v7 }
 0x5e2   :  { %7069 = vmatpush1.bf16.msra.mxu0 %v9385_v49  ;;  %7133 = vmatpush1.bf16.msra.mxu1 %v9415_v22 }
 0x5e3   :  { %7071 = vmatprep.subr.bf16.mxu0 %v9388_v52  ;;  %7135 = vmatprep.subr.bf16.mxu1 %v9418_v25 }
 0x5e6   :  { %7073 = vmatpush1.bf16.msra.mxu0 %v9397_v63  ;;  %7137 = vmatpush1.bf16.msra.mxu1 %v9427_v40 }
 0x5e7   :  { %7075 = vmatprep.subr.bf16.mxu0 %v9400_v0  ;;  %7139 = vmatprep.subr.bf16.mxu1 %v9430_v42 }
 0x5ea   :  { %7077 = vmatpush1.bf16.msra.mxu0 %v9409_v16  ;;  %7141 = vmatpush1.bf16.msra.mxu1 %v9439_v57 }
 0x5eb   :  { %7079 = vmatprep.subr.bf16.mxu0 %v9412_v17  ;;  %7143 = vmatprep.subr.bf16.mxu1 %v9442_v60 }
 0x5ee   :  { %7081 = vmatpush1.bf16.msra.mxu0 %v9421_v32  ;;  %7145 = vmatpush1.bf16.msra.mxu1 %v9451_v13 }
 0x5ef   :  { %7083 = vmatprep.subr.bf16.mxu0 %v9424_v33  ;;  %7147 = vmatprep.subr.bf16.mxu1 %v9454_v19 }
 0x5f2   :  { %7085 = vmatpush1.bf16.msra.mxu0 %v9433_v50  ;;  %7149 = vmatpush1.bf16.msra.mxu1 %v9463_v41 }
 0x5f3   :  { %7087 = vmatprep.subr.bf16.mxu0 %v9436_v51  ;;  %7151 = vmatprep.subr.bf16.mxu1 %v9466_v45 }
 0x5f6   :  { %7089 = vmatpush1.bf16.msra.mxu0 %v9445_v3  ;;  %7153 = vmatpush1.bf16.msra.mxu1 %v11699_v26 }
 0x5f7   :  { %7091 = vmatprep.subr.bf16.mxu0 %v9448_v6  ;;  %7155 = vmatprep.subr.bf16.mxu1 %v11700_v18 }
 0x5fa   :  { %7093 = vmatpush1.bf16.msra.mxu0 %v9457_v29  ;;  %7157 = vmatpush1.bf16.msra.mxu1 %v11703_v37 }
 0x5fb   :  { %7095 = vmatprep.subr.bf16.mxu0 %v9460_v30  ;;  %7159 = vmatprep.subr.bf16.mxu1 %v11799_v2 }
 0x5fe   :  { %7097 = vmatpush1.bf16.msra.mxu0 %v11800_v61  ;;  %7161 = vmatpush1.bf16.msra.mxu1 %v11801_v39 }
 0x5ff   :  { %7099 = vmatprep.subr.bf16.mxu0 %v11802_v56  ;;  %7163 = vmatprep.subr.bf16.mxu1 %v11803_v27 }
 0x602   :  { %7101 = vmatpush1.bf16.msra.mxu0 %v11804_v59  ;;  %7165 = vmatpush1.bf16.msra.mxu1 %v11805_v44  ;;  %v11816_v44 = vld [vmem:[#allocation40_spill] sm:$0xff]  ;;  %v11820_v59 = vld [vmem:[#allocation30_spill] sm:$0xff] }
 0x603   :  { %7103 = vmatprep.subr.bf16.mxu0 %v11806_v48  ;;  %7167 = vmatprep.subr.bf16.mxu1 %v11807_v10  ;;  %v11817_v48 = vld [vmem:[#allocation45_spill] sm:$0xff]  ;;  %v11818_v10 = vld [vmem:[#allocation22_spill] sm:$0xff] }
 0x606   :  { %7105 = vmatpush1.bf16.msra.mxu0 %v11808_v62  ;;  %7169 = vmatpush1.bf16.msra.mxu1 %v11809_v1  ;;  %v11819_v62 = vld [vmem:[#allocation23_spill] sm:$0xff] }
 0x607   :  { %7107 = vmatprep.subr.bf16.mxu0 %v11810_v35  ;;  %7171 = vmatprep.subr.bf16.mxu1 %v11811_v54 }
 0x60a   :  { %7109 = vmatpush1.bf16.msra.mxu0 %v11812_v47  ;;  %7173 = vmatpush1.bf16.msra.mxu1 %v11813_v11 }
 0x60b   :  { %7111 = vmatprep.subr.bf16.mxu0 %v11814_v53  ;;  %7175 = vmatprep.subr.bf16.mxu1 %v11815_v12 }
 0x60e   :  { %7113 = vmatpush1.bf16.msra.mxu0 %v11816_v44  ;;  %7177 = vmatpush1.bf16.msra.mxu1 %v11817_v48 }
 0x60f   :  { %7179 = vmatprep.subr.bf16.mxu0 %v11818_v10  ;;  %7243 = vmatprep.subr.bf16.mxu1 %v11819_v62 }
 0x6a4   :  { %v1152_v1 = vpop.f32.mrb[10].mxu0  ;;  %v1223_v35 = vpop.f32.mrb[10].mxu1 }
 0x6a5   :  { %v1153_v54 = vadd.f32 %v1152_v1, %v11820_v59  ;;  %v1154_v27 = vpop.f32.mrb[11].mxu0  ;;  %v1225_v47 = vpop.f32.mrb[11].mxu1  ;;  %v1224_v61 = vadd.f32 %v1223_v35, %v9628_v28  ;;  %v11829_v35 = vld [vmem:[#allocation39_spill] sm:$0xff] }
 0x6a6   :  { %v1155_v11 = vadd.f32 %v1154_v27, %v11732_v21  ;;  %v1226_v10 = vadd.f32 %v1225_v47, %v9625_v4  ;;  %v11830_v47 = vld [vmem:[#allocation32_spill] sm:$0xff] }
 0x6a7   :  { %v5511_v56 = vmul.f32 -1.442695, %v1153_v54 }
 0x6a8   :  { %v5512_v53 = vmul.f32 -1.442695, %v1155_v11 }
 0x6a9   :  { %8859 = vpow2.f32 %v5511_v56 }
 0x6aa   :  { %8861 = vpow2.f32 %v5512_v53 }
 0x6b3   :  { %v8860_v12 = vpop.eup %8859 }
 0x6b4   :  { %v1231_v44 = vadd.f32 1.0, %v8860_v12  ;;  %v8862_v48 = vpop.eup %8861  ;;  %v11831_v12 = vld [vmem:[#allocation41_spill] sm:$0xff] }
 0x6b5   :  { %v1237_v39 = vadd.f32 1.0, %v8862_v48  ;;  %v11826_v48 = vld [vmem:[#allocation28_spill] sm:$0xff] }
 0x6b6   :  { %8863 = vrcp.f32 %v1231_v44  ;;  %v1248_v44 = vld [vmem:[#allocation4 + $0x30] sm:$0xff] }
 0x6b7   :  { %8865 = vrcp.f32 %v1237_v39  ;;  %v11824_v39 = vld [vmem:[#allocation25_spill] sm:$0xff] }
 0x6c0   :  { %v8864_v62 = vpop.eup %8863 }
 0x6c1   :  { %v1240_v1 = vmul.f32 %v8864_v62, %v1226_v10  ;;  %v8866_v54 = vpop.eup %8865  ;;  %v11827_v10 = vld [vmem:[#allocation38_spill] sm:$0xff]  ;;  %v11828_v62 = vld [vmem:[#allocation29_spill] sm:$0xff] }
 0x6c2   :  { %v1243_v2 = vsub.f32 1.0, %v8866_v54  ;;  %v1245_v11 = vmul.f32 %v8866_v54, %v9924_v24  ;;  %v11821_v24 = vld [vmem:[#allocation31_spill] sm:$0xff]  ;;  %v11833_v54 = vld [vmem:[#allocation42_spill] sm:$0xff] }
 0x6c3   :  { %v1241_v59 = vadd.f32 %v1240_v1, %v1224_v61  ;;  %v11823_v61 = vld [vmem:[#allocation34_spill] sm:$0xff]  ;;  %v11832_v1 = vld [vmem:[#allocation33_spill] sm:$0xff] }
 0x6c5   :  { %8867 = vtanh.f32 %v1241_v59  ;;  %v11825_v59 = vld [vmem:[#allocation35_spill] sm:$0xff] }
 0x6cf   :  { %v8868_v27 = vpop.eup %8867 }
 0x6d0   :  { %v1244_v56 = vmul.f32 %v8868_v27, %v1243_v2  ;;  %v11822_v2 = vld [vmem:[#allocation24_spill] sm:$0xff] }
 0x6d1   :  { %v11834_v27 = vld [vmem:[#allocation36_spill] sm:$0xff] }
 0x6d2   :  { %v9997_v53 = vadd.f32 %v1245_v11, %v1244_v56  ;;  %v11835_v56 = vld [vmem:[#allocation43_spill] sm:$0xff]  ;;  %v11836_v11 = vld [vmem:[#allocation37_spill] sm:$0xff] }
 0x6d4   :  { %1313 = vmatprep.mubr.f32.mxu0 %v9997_v53  ;;  %1384 = vmatprep.mubr.f32.mxu1 %v9997_v53 }
 0x6d5   :  { %1314 = vmatmul.mubr.f32.vlgmr.msra.gmra.mrb[12].mxu0 %v1248_v44  ;;  %1385 = vmatmul.mubr.f32.vlgmr.msra.gmra.mrb[12].mxu1 %v1248_v44  ;;  %v11837_v44 = vld [vmem:[#allocation44_spill] sm:$0xff] }
 0x6d6   :  { %7181 = vmatpush1.bf16.msra.mxu0 %v9348_v8  ;;  %7245 = vmatpush1.bf16.msra.mxu1 %v9367_v31 }
 0x6d7   :  { %7183 = vmatprep.subr.bf16.mxu0 %v9350_v9  ;;  %7247 = vmatprep.subr.bf16.mxu1 %v9373_v36 }
 0x6da   :  { %7185 = vmatpush1.bf16.msra.mxu0 %v9354_v14  ;;  %7249 = vmatpush1.bf16.msra.mxu1 %v9380_v43 }
 0x6db   :  { %7187 = vmatprep.subr.bf16.mxu0 %v9357_v15  ;;  %7251 = vmatprep.subr.bf16.mxu1 %v9382_v46 }
 0x6de   :  { %7189 = vmatpush1.bf16.msra.mxu0 %v9360_v20  ;;  %7253 = vmatpush1.bf16.msra.mxu1 %v9391_v55 }
 0x6df   :  { %7191 = vmatprep.subr.bf16.mxu0 %v9363_v23  ;;  %7255 = vmatprep.subr.bf16.mxu1 %v9394_v58 }
 0x6e2   :  { %7193 = vmatpush1.bf16.msra.mxu0 %v9370_v34  ;;  %7257 = vmatpush1.bf16.msra.mxu1 %v9403_v5 }
 0x6e3   :  { %7195 = vmatprep.subr.bf16.mxu0 %v9376_v38  ;;  %7259 = vmatprep.subr.bf16.mxu1 %v9406_v7 }
 0x6e6   :  { %7197 = vmatpush1.bf16.msra.mxu0 %v9385_v49  ;;  %7261 = vmatpush1.bf16.msra.mxu1 %v9415_v22 }
 0x6e7   :  { %7199 = vmatprep.subr.bf16.mxu0 %v9388_v52  ;;  %7263 = vmatprep.subr.bf16.mxu1 %v9418_v25 }
 0x6ea   :  { %7201 = vmatpush1.bf16.msra.mxu0 %v9397_v63  ;;  %7265 = vmatpush1.bf16.msra.mxu1 %v9427_v40 }
 0x6eb   :  { %7203 = vmatprep.subr.bf16.mxu0 %v9400_v0  ;;  %7267 = vmatprep.subr.bf16.mxu1 %v9430_v42 }
 0x6ee   :  { %7205 = vmatpush1.bf16.msra.mxu0 %v9409_v16  ;;  %7269 = vmatpush1.bf16.msra.mxu1 %v9439_v57 }
 0x6ef   :  { %7207 = vmatprep.subr.bf16.mxu0 %v9412_v17  ;;  %7271 = vmatprep.subr.bf16.mxu1 %v9442_v60 }
 0x6f2   :  { %7209 = vmatpush1.bf16.msra.mxu0 %v9421_v32  ;;  %7273 = vmatpush1.bf16.msra.mxu1 %v9451_v13 }
 0x6f3   :  { %7211 = vmatprep.subr.bf16.mxu0 %v9424_v33  ;;  %7275 = vmatprep.subr.bf16.mxu1 %v9454_v19 }
 0x6f6   :  { %7213 = vmatpush1.bf16.msra.mxu0 %v9433_v50  ;;  %7277 = vmatpush1.bf16.msra.mxu1 %v9463_v41 }
 0x6f7   :  { %7215 = vmatprep.subr.bf16.mxu0 %v9436_v51  ;;  %7279 = vmatprep.subr.bf16.mxu1 %v9466_v45 }
 0x6fa   :  { %7217 = vmatpush1.bf16.msra.mxu0 %v9445_v3  ;;  %7281 = vmatpush1.bf16.msra.mxu1 %v11699_v26 }
 0x6fb   :  { %7219 = vmatprep.subr.bf16.mxu0 %v9448_v6  ;;  %7283 = vmatprep.subr.bf16.mxu1 %v11700_v18 }
 0x6fe   :  { %7221 = vmatpush1.bf16.msra.mxu0 %v9457_v29  ;;  %7285 = vmatpush1.bf16.msra.mxu1 %v11703_v37 }
 0x6ff   :  { %7223 = vmatprep.subr.bf16.mxu0 %v9460_v30  ;;  %7287 = vmatprep.subr.bf16.mxu1 %v11821_v24 }
 0x702   :  { %7225 = vmatpush1.bf16.msra.mxu0 %v11822_v2  ;;  %7289 = vmatpush1.bf16.msra.mxu1 %v11823_v61 }
 0x703   :  { %7227 = vmatprep.subr.bf16.mxu0 %v11824_v39  ;;  %7291 = vmatprep.subr.bf16.mxu1 %v11825_v59 }
 0x706   :  { %7229 = vmatpush1.bf16.msra.mxu0 %v11826_v48  ;;  %7293 = vmatpush1.bf16.msra.mxu1 %v11827_v10  ;;  %v11838_v10 = vld [vmem:[#allocation40_spill] sm:$0xff]  ;;  %v11842_v48 = vld [vmem:[#allocation30_spill] sm:$0xff] }
 0x707   :  { %7231 = vmatprep.subr.bf16.mxu0 %v11828_v62  ;;  %7295 = vmatprep.subr.bf16.mxu1 %v11829_v35  ;;  %v11839_v62 = vld [vmem:[#allocation45_spill] sm:$0xff]  ;;  %v11840_v35 = vld [vmem:[#allocation22_spill] sm:$0xff] }
 0x70a   :  { %7233 = vmatpush1.bf16.msra.mxu0 %v11830_v47  ;;  %7297 = vmatpush1.bf16.msra.mxu1 %v11831_v12  ;;  %v11841_v47 = vld [vmem:[#allocation23_spill] sm:$0xff] }
 0x70b   :  { %7235 = vmatprep.subr.bf16.mxu0 %v11832_v1  ;;  %7299 = vmatprep.subr.bf16.mxu1 %v11833_v54 }
 0x70e   :  { %7237 = vmatpush1.bf16.msra.mxu0 %v11834_v27  ;;  %7301 = vmatpush1.bf16.msra.mxu1 %v11835_v56 }
 0x70f   :  { %7239 = vmatprep.subr.bf16.mxu0 %v11836_v11  ;;  %7303 = vmatprep.subr.bf16.mxu1 %v11837_v44 }
 0x712   :  { %7241 = vmatpush1.bf16.msra.mxu0 %v11838_v10  ;;  %7305 = vmatpush1.bf16.msra.mxu1 %v11839_v62 }
 0x713   :  { %7307 = vmatprep.subr.bf16.mxu0 %v11840_v35  ;;  %7371 = vmatprep.subr.bf16.mxu1 %v11841_v47 }
 0x7a8   :  { %v1315_v12 = vpop.f32.mrb[12].mxu0  ;;  %v1386_v1 = vpop.f32.mrb[12].mxu1 }
 0x7a9   :  { %v1316_v54 = vadd.f32 %v1315_v12, %v11842_v48  ;;  %v1317_v59 = vpop.f32.mrb[13].mxu0  ;;  %v1388_v27 = vpop.f32.mrb[13].mxu1  ;;  %v1387_v2 = vadd.f32 %v1386_v1, %v9628_v28  ;;  %v11851_v1 = vld [vmem:[#allocation39_spill] sm:$0xff] }
 0x7aa   :  { %v1318_v56 = vadd.f32 %v1317_v59, %v11732_v21  ;;  %v1389_v35 = vadd.f32 %v1388_v27, %v9625_v4  ;;  %v11852_v27 = vld [vmem:[#allocation32_spill] sm:$0xff] }
 0x7ab   :  { %v5513_v39 = vmul.f32 -1.442695, %v1316_v54 }
 0x7ac   :  { %v5514_v11 = vmul.f32 -1.442695, %v1318_v56 }
 0x7ad   :  { %8869 = vpow2.f32 %v5513_v39 }
 0x7ae   :  { %8871 = vpow2.f32 %v5514_v11 }
 0x7b7   :  { %v8870_v44 = vpop.eup %8869 }
 0x7b8   :  { %v1394_v10 = vadd.f32 1.0, %v8870_v44  ;;  %v8872_v62 = vpop.eup %8871  ;;  %v11853_v44 = vld [vmem:[#allocation41_spill] sm:$0xff] }
 0x7b9   :  { %v1400_v61 = vadd.f32 1.0, %v8872_v62  ;;  %v11848_v62 = vld [vmem:[#allocation28_spill] sm:$0xff] }
 0x7ba   :  { %8873 = vrcp.f32 %v1394_v10  ;;  %v1411_v10 = vld [vmem:[#allocation4 + $0x38] sm:$0xff] }
 0x7bb   :  { %8875 = vrcp.f32 %v1400_v61  ;;  %v11846_v61 = vld [vmem:[#allocation25_spill] sm:$0xff] }
 0x7c4   :  { %v8874_v47 = vpop.eup %8873 }
 0x7c5   :  { %v1403_v12 = vmul.f32 %v8874_v47, %v1389_v35  ;;  %v8876_v54 = vpop.eup %8875  ;;  %v11849_v35 = vld [vmem:[#allocation38_spill] sm:$0xff]  ;;  %v11850_v47 = vld [vmem:[#allocation29_spill] sm:$0xff] }
 0x7c6   :  { %v1406_v24 = vsub.f32 1.0, %v8876_v54  ;;  %v1408_v56 = vmul.f32 %v8876_v54, %v9997_v53  ;;  %v11843_v53 = vld [vmem:[#allocation31_spill] sm:$0xff]  ;;  %v11855_v54 = vld [vmem:[#allocation42_spill] sm:$0xff] }
 0x7c7   :  { %v1404_v48 = vadd.f32 %v1403_v12, %v1387_v2  ;;  %v11845_v2 = vld [vmem:[#allocation34_spill] sm:$0xff]  ;;  %v11854_v12 = vld [vmem:[#allocation33_spill] sm:$0xff] }
 0x7c9   :  { %8877 = vtanh.f32 %v1404_v48  ;;  %v11847_v48 = vld [vmem:[#allocation35_spill] sm:$0xff] }
 0x7d3   :  { %v8878_v59 = vpop.eup %8877 }
 0x7d4   :  { %v1407_v39 = vmul.f32 %v8878_v59, %v1406_v24  ;;  %v11844_v24 = vld [vmem:[#allocation24_spill] sm:$0xff] }
 0x7d5   :  { %v11856_v59 = vld [vmem:[#allocation36_spill] sm:$0xff] }
 0x7d6   :  { %v10070_v11 = vadd.f32 %v1408_v56, %v1407_v39  ;;  %v11857_v39 = vld [vmem:[#allocation43_spill] sm:$0xff]  ;;  %v11858_v56 = vld [vmem:[#allocation37_spill] sm:$0xff] }
 0x7d8   :  { %1476 = vmatprep.mubr.f32.mxu0 %v10070_v11  ;;  %1547 = vmatprep.mubr.f32.mxu1 %v10070_v11 }
 0x7d9   :  { %1477 = vmatmul.mubr.f32.vlgmr.msra.gmra.mrb[14].mxu0 %v1411_v10  ;;  %1548 = vmatmul.mubr.f32.vlgmr.msra.gmra.mrb[14].mxu1 %v1411_v10  ;;  %v11859_v10 = vld [vmem:[#allocation44_spill] sm:$0xff] }
 0x7da   :  { %7309 = vmatpush1.bf16.msra.mxu0 %v9348_v8  ;;  %7373 = vmatpush1.bf16.msra.mxu1 %v9367_v31 }
 0x7db   :  { %7311 = vmatprep.subr.bf16.mxu0 %v9350_v9  ;;  %7375 = vmatprep.subr.bf16.mxu1 %v9373_v36 }
 0x7de   :  { %7313 = vmatpush1.bf16.msra.mxu0 %v9354_v14  ;;  %7377 = vmatpush1.bf16.msra.mxu1 %v9380_v43 }
 0x7df   :  { %7315 = vmatprep.subr.bf16.mxu0 %v9357_v15  ;;  %7379 = vmatprep.subr.bf16.mxu1 %v9382_v46 }
 0x7e2   :  { %7317 = vmatpush1.bf16.msra.mxu0 %v9360_v20  ;;  %7381 = vmatpush1.bf16.msra.mxu1 %v9391_v55 }
 0x7e3   :  { %7319 = vmatprep.subr.bf16.mxu0 %v9363_v23  ;;  %7383 = vmatprep.subr.bf16.mxu1 %v9394_v58 }
 0x7e6   :  { %7321 = vmatpush1.bf16.msra.mxu0 %v9370_v34  ;;  %7385 = vmatpush1.bf16.msra.mxu1 %v9403_v5 }
 0x7e7   :  { %7323 = vmatprep.subr.bf16.mxu0 %v9376_v38  ;;  %7387 = vmatprep.subr.bf16.mxu1 %v9406_v7 }
 0x7ea   :  { %7325 = vmatpush1.bf16.msra.mxu0 %v9385_v49  ;;  %7389 = vmatpush1.bf16.msra.mxu1 %v9415_v22 }
 0x7eb   :  { %7327 = vmatprep.subr.bf16.mxu0 %v9388_v52  ;;  %7391 = vmatprep.subr.bf16.mxu1 %v9418_v25 }
 0x7ee   :  { %7329 = vmatpush1.bf16.msra.mxu0 %v9397_v63  ;;  %7393 = vmatpush1.bf16.msra.mxu1 %v9427_v40 }
 0x7ef   :  { %7331 = vmatprep.subr.bf16.mxu0 %v9400_v0  ;;  %7395 = vmatprep.subr.bf16.mxu1 %v9430_v42 }
 0x7f2   :  { %7333 = vmatpush1.bf16.msra.mxu0 %v9409_v16  ;;  %7397 = vmatpush1.bf16.msra.mxu1 %v9439_v57 }
 0x7f3   :  { %7335 = vmatprep.subr.bf16.mxu0 %v9412_v17  ;;  %7399 = vmatprep.subr.bf16.mxu1 %v9442_v60 }
 0x7f6   :  { %7337 = vmatpush1.bf16.msra.mxu0 %v9421_v32  ;;  %7401 = vmatpush1.bf16.msra.mxu1 %v9451_v13 }
 0x7f7   :  { %7339 = vmatprep.subr.bf16.mxu0 %v9424_v33  ;;  %7403 = vmatprep.subr.bf16.mxu1 %v9454_v19 }
 0x7fa   :  { %7341 = vmatpush1.bf16.msra.mxu0 %v9433_v50  ;;  %7405 = vmatpush1.bf16.msra.mxu1 %v9463_v41 }
 0x7fb   :  { %7343 = vmatprep.subr.bf16.mxu0 %v9436_v51  ;;  %7407 = vmatprep.subr.bf16.mxu1 %v9466_v45 }
 0x7fe   :  { %7345 = vmatpush1.bf16.msra.mxu0 %v9445_v3  ;;  %7409 = vmatpush1.bf16.msra.mxu1 %v11699_v26 }
 0x7ff   :  { %7347 = vmatprep.subr.bf16.mxu0 %v9448_v6  ;;  %7411 = vmatprep.subr.bf16.mxu1 %v11700_v18 }
 0x802   :  { %7349 = vmatpush1.bf16.msra.mxu0 %v9457_v29  ;;  %7413 = vmatpush1.bf16.msra.mxu1 %v11703_v37 }
 0x803   :  { %7351 = vmatprep.subr.bf16.mxu0 %v9460_v30  ;;  %7415 = vmatprep.subr.bf16.mxu1 %v11843_v53 }
 0x806   :  { %7353 = vmatpush1.bf16.msra.mxu0 %v11844_v24  ;;  %7417 = vmatpush1.bf16.msra.mxu1 %v11845_v2 }
 0x807   :  { %7355 = vmatprep.subr.bf16.mxu0 %v11846_v61  ;;  %7419 = vmatprep.subr.bf16.mxu1 %v11847_v48 }
 0x80a   :  { %7357 = vmatpush1.bf16.msra.mxu0 %v11848_v62  ;;  %7421 = vmatpush1.bf16.msra.mxu1 %v11849_v35  ;;  %v11860_v35 = vld [vmem:[#allocation40_spill] sm:$0xff]  ;;  %v11864_v62 = vld [vmem:[#allocation30_spill] sm:$0xff] }
 0x80b   :  { %7359 = vmatprep.subr.bf16.mxu0 %v11850_v47  ;;  %7423 = vmatprep.subr.bf16.mxu1 %v11851_v1  ;;  %v11861_v47 = vld [vmem:[#allocation45_spill] sm:$0xff]  ;;  %v11862_v1 = vld [vmem:[#allocation22_spill] sm:$0xff] }
 0x80e   :  { %7361 = vmatpush1.bf16.msra.mxu0 %v11852_v27  ;;  %7425 = vmatpush1.bf16.msra.mxu1 %v11853_v44  ;;  %v11863_v27 = vld [vmem:[#allocation23_spill] sm:$0xff] }
 0x80f   :  { %7363 = vmatprep.subr.bf16.mxu0 %v11854_v12  ;;  %7427 = vmatprep.subr.bf16.mxu1 %v11855_v54 }
 0x812   :  { %7365 = vmatpush1.bf16.msra.mxu0 %v11856_v59  ;;  %7429 = vmatpush1.bf16.msra.mxu1 %v11857_v39 }
 0x813   :  { %7367 = vmatprep.subr.bf16.mxu0 %v11858_v56  ;;  %7431 = vmatprep.subr.bf16.mxu1 %v11859_v10 }
 0x816   :  { %7369 = vmatpush1.bf16.msra.mxu0 %v11860_v35  ;;  %7433 = vmatpush1.bf16.msra.mxu1 %v11861_v47 }
 0x817   :  { %7435 = vmatprep.subr.bf16.mxu0 %v11862_v1  ;;  %7499 = vmatprep.subr.bf16.mxu1 %v11863_v27 }
 0x8ac   :  { %v1478_v44 = vpop.f32.mrb[14].mxu0  ;;  %v1549_v12 = vpop.f32.mrb[14].mxu1 }
 0x8ad   :  { %v1479_v54 = vadd.f32 %v1478_v44, %v11864_v62  ;;  %v1480_v48 = vpop.f32.mrb[15].mxu0  ;;  %v1551_v59 = vpop.f32.mrb[15].mxu1  ;;  %v1550_v24 = vadd.f32 %v1549_v12, %v9628_v28  ;;  %v1995_v12 = vld [vmem:[#allocation12 + $0x20] sm:$0xff] }
 0x8ae   :  { %v1481_v39 = vadd.f32 %v1480_v48, %v11732_v21  ;;  %v1552_v1 = vadd.f32 %v1551_v59, %v9625_v4  ;;  %v2000_v59 = vld [vmem:[#allocation12 + $0x48] sm:$0xff] }
 0x8af   :  { %v5515_v61 = vmul.f32 -1.442695, %v1479_v54 }
 0x8b0   :  { %v5516_v56 = vmul.f32 -1.442695, %v1481_v39 }
 0x8b1   :  { %8879 = vpow2.f32 %v5515_v61 }
 0x8b2   :  { %8881 = vpow2.f32 %v5516_v56 }
 0x8bb   :  { %v8880_v10 = vpop.eup %8879 }
 0x8bc   :  { %v1557_v35 = vadd.f32 1.0, %v8880_v10  ;;  %v8882_v47 = vpop.eup %8881  ;;  %v2004_v10 = vld [vmem:[#allocation12 + $0x68] sm:$0xff] }
 0x8bd   :  { %v1563_v2 = vadd.f32 1.0, %v8882_v47  ;;  %v1991_v47 = vld [vmem:[#allocation12] sm:$0xff] }
 0x8be   :  { %8883 = vrcp.f32 %v1557_v35  ;;  %v1574_v35 = vld [vmem:[#allocation4 + $0x40] sm:$0xff] }
 0x8bf   :  { %8885 = vrcp.f32 %v1563_v2 }
 0x8c8   :  { %v8884_v27 = vpop.eup %8883 }
 0x8c9   :  { %v1566_v44 = vmul.f32 %v8884_v27, %v1552_v1  ;;  %v8886_v54 = vpop.eup %8885  ;;  %v1737_v27 = vld [vmem:[#allocation4 + $0x48] sm:$0xff] }
 0x8ca   :  { %v1569_v53 = vsub.f32 1.0, %v8886_v54  ;;  %v1571_v39 = vmul.f32 %v8886_v54, %v10070_v11  ;;  %v1907_v54 = vld [vmem:[#allocation10 + $0x10] sm:$0xff] }
 0x8cb   :  { %v1567_v62 = vadd.f32 %v1566_v44, %v1550_v24  ;;  %v1906_v24 = vld [vmem:[#allocation10 + $0x8] sm:$0xff] }
 0x8cd   :  { %8887 = vtanh.f32 %v1567_v62 }
 0x8d7   :  { %v8888_v48 = vpop.eup %8887 }
 0x8d8   :  { %v1570_v61 = vmul.f32 %v8888_v48, %v1569_v53  ;;  %v1905_v53 = vld [vmem:[#allocation10] sm:$0xff]  ;;  %v1908_v48 = vld [vmem:[#allocation10 + $0x18] sm:$0xff] }
 0x8d9   :  { %v10220_v44 = vpack.c.bf16 %v1906_v24, %v1905_v53 }
 0x8da   :  { %v10143_v56 = vadd.f32 %v1571_v39, %v1570_v61  ;;  %v10222_v61 = vpack.c.bf16 %v1995_v12, %v1991_v47  ;;  %v10226_v39 = vpack.c.bf16 %v2004_v10, %v2000_v59  ;;  %v2010_v47 = vld [vmem:[#allocation12 + $0x98] sm:$0xff] }
 0x8db   :  { %v2014_v12 = vld [vmem:[#allocation12 + $0xb8] sm:$0xff] }
 0x8dc   :  { %1639 = vmatprep.mubr.f32.mxu0 %v10143_v56  ;;  %1710 = vmatprep.mubr.f32.mxu1 %v10143_v56  ;;  %v10289_v10 = vpack.c.bf16 %v2014_v12, %v2010_v47  ;;  %v2044_v47 = vld [vmem:[#allocation12 + $0x1a8] sm:$0xff]  ;;  %v2042_v12 = vld [vmem:[#allocation12 + $0x198] sm:$0xff] }
 0x8dd   :  { %1640 = vmatmul.mubr.f32.vlgmr.msra.gmra.mrb[16].mxu0 %v1574_v35  ;;  %1711 = vmatmul.mubr.f32.vlgmr.msra.gmra.mrb[16].mxu1 %v1574_v35  ;;  %v2003_v35 = vld [vmem:[#allocation12 + $0x60] sm:$0xff] }
 0x8de   :  { %7437 = vmatpush1.bf16.msra.mxu0 %v9348_v8  ;;  %7501 = vmatpush1.bf16.msra.mxu1 %v9367_v31  ;;  %v11865_v8 = vld [vmem:[#allocation31_spill] sm:$0xff]  ;;  %v11871_v31 = vld [vmem:[#allocation38_spill] sm:$0xff] }
 0x8df   :  { %7439 = vmatprep.subr.bf16.mxu0 %v9350_v9  ;;  %7503 = vmatprep.subr.bf16.mxu1 %v9373_v36  ;;  %v11866_v9 = vld [vmem:[#allocation24_spill] sm:$0xff]  ;;  %v11873_v36 = vld [vmem:[#allocation39_spill] sm:$0xff]  ;;  %11888 = vst [vmem:[#allocation31_spill] sm:$0xff] %v10289_v10 }
 0x8e2   :  { %7441 = vmatpush1.bf16.msra.mxu0 %v9354_v14  ;;  %7505 = vmatpush1.bf16.msra.mxu1 %v9380_v43  ;;  %v11867_v14 = vld [vmem:[#allocation34_spill] sm:$0xff]  ;;  %v11875_v43 = vld [vmem:[#allocation41_spill] sm:$0xff] }
 0x8e3   :  { %7443 = vmatprep.subr.bf16.mxu0 %v9357_v15  ;;  %7507 = vmatprep.subr.bf16.mxu1 %v9382_v46  ;;  %v11868_v15 = vld [vmem:[#allocation25_spill] sm:$0xff] }
 0x8e4   :  { %v11876_v46 = vld [vmem:[#allocation33_spill] sm:$0xff] }
 0x8e6   :  { %7445 = vmatpush1.bf16.msra.mxu0 %v9360_v20  ;;  %7509 = vmatpush1.bf16.msra.mxu1 %v9391_v55  ;;  %v11869_v20 = vld [vmem:[#allocation35_spill] sm:$0xff] }
 0x8e7   :  { %7447 = vmatprep.subr.bf16.mxu0 %v9363_v23  ;;  %7511 = vmatprep.subr.bf16.mxu1 %v9394_v58  ;;  %v11870_v23 = vld [vmem:[#allocation28_spill] sm:$0xff]  ;;  %v11879_v55 = vld [vmem:[#allocation43_spill] sm:$0xff]  ;;  %v11880_v58 = vld [vmem:[#allocation37_spill] sm:$0xff] }
 0x8ea   :  { %7449 = vmatpush1.bf16.msra.mxu0 %v9370_v34  ;;  %7513 = vmatpush1.bf16.msra.mxu1 %v9403_v5  ;;  %v11872_v34 = vld [vmem:[#allocation29_spill] sm:$0xff] }
 0x8eb   :  { %7451 = vmatprep.subr.bf16.mxu0 %v9376_v38  ;;  %7515 = vmatprep.subr.bf16.mxu1 %v9406_v7  ;;  %v11874_v38 = vld [vmem:[#allocation32_spill] sm:$0xff]  ;;  %v11883_v5 = vld [vmem:[#allocation45_spill] sm:$0xff]  ;;  %v11570_v7 = vmov 0.0|0.0  }
 0x8ee   :  { %7453 = vmatpush1.bf16.msra.mxu0 %v9385_v49  ;;  %7517 = vmatpush1.bf16.msra.mxu1 %v9415_v22  ;;  %v11877_v49 = vld [vmem:[#allocation42_spill] sm:$0xff] }
 0x8ef   :  { %7455 = vmatprep.subr.bf16.mxu0 %v9388_v52  ;;  %7519 = vmatprep.subr.bf16.mxu1 %v9418_v25  ;;  %v11878_v52 = vld [vmem:[#allocation36_spill] sm:$0xff] }
 0x8f2   :  { %7457 = vmatpush1.bf16.msra.mxu0 %v9397_v63  ;;  %7521 = vmatpush1.bf16.msra.mxu1 %v9427_v40  ;;  %v11881_v63 = vld [vmem:[#allocation44_spill] sm:$0xff] }
 0x8f3   :  { %7459 = vmatprep.subr.bf16.mxu0 %v9400_v0  ;;  %7523 = vmatprep.subr.bf16.mxu1 %v9430_v42  ;;  %v11882_v0 = vld [vmem:[#allocation40_spill] sm:$0xff] }
 0x8f6   :  { %7461 = vmatpush1.bf16.msra.mxu0 %v9409_v16  ;;  %7525 = vmatpush1.bf16.msra.mxu1 %v9439_v57  ;;  %v1992_v16 = vld [vmem:[#allocation12 + $0x8] sm:$0xff] }
 0x8f7   :  { %7463 = vmatprep.subr.bf16.mxu0 %v9412_v17  ;;  %7527 = vmatprep.subr.bf16.mxu1 %v9442_v60  ;;  %v1996_v17 = vld [vmem:[#allocation12 + $0x28] sm:$0xff] }
 0x8f8   :  { %v10210_v22 = vpack.c.bf16 %v1996_v17, %v1992_v16  ;;  %v1913_v17 = vld [vmem:[#allocation10 + $0x40] sm:$0xff] }
 0x8fa   :  { %7465 = vmatpush1.bf16.msra.mxu0 %v9421_v32  ;;  %7529 = vmatpush1.bf16.msra.mxu1 %v9451_v13 }
 0x8fb   :  { %7467 = vmatprep.subr.bf16.mxu0 %v9424_v33  ;;  %7531 = vmatprep.subr.bf16.mxu1 %v9454_v19  ;;  %v11884_v33 = vld [vmem:[#allocation30_spill] sm:$0xff] }
 0x8fe   :  { %7469 = vmatpush1.bf16.msra.mxu0 %v9433_v50  ;;  %7533 = vmatpush1.bf16.msra.mxu1 %v9463_v41 }
 0x8ff   :  { %7471 = vmatprep.subr.bf16.mxu0 %v9436_v51  ;;  %7535 = vmatprep.subr.bf16.mxu1 %v9466_v45 }
 0x902   :  { %7473 = vmatpush1.bf16.msra.mxu0 %v9445_v3  ;;  %7537 = vmatpush1.bf16.msra.mxu1 %v11699_v26 }
 0x903   :  { %7475 = vmatprep.subr.bf16.mxu0 %v9448_v6  ;;  %7539 = vmatprep.subr.bf16.mxu1 %v11700_v18 }
 0x906   :  { %7477 = vmatpush1.bf16.msra.mxu0 %v9457_v29  ;;  %7541 = vmatpush1.bf16.msra.mxu1 %v11703_v37 }
 0x907   :  { %7479 = vmatprep.subr.bf16.mxu0 %v9460_v30  ;;  %7543 = vmatprep.subr.bf16.mxu1 %v11865_v8  ;;  %v2008_v8 = vld [vmem:[#allocation12 + $0x88] sm:$0xff] }
 0x90a   :  { %7481 = vmatpush1.bf16.msra.mxu0 %v11866_v9  ;;  %7545 = vmatpush1.bf16.msra.mxu1 %v11867_v14  ;;  %v2012_v9 = vld [vmem:[#allocation12 + $0xa8] sm:$0xff]  ;;  %v10229_v14 = vpack.c.bf16 %v1908_v48, %v1907_v54  ;;  %v2013_v54 = vld [vmem:[#allocation12 + $0xb0] sm:$0xff]  ;;  %v2018_v48 = vld [vmem:[#allocation12 + $0xd8] sm:$0xff] }
 0x90b   :  { %7483 = vmatprep.subr.bf16.mxu0 %v11868_v15  ;;  %7547 = vmatprep.subr.bf16.mxu1 %v11869_v20  ;;  %v10231_v15 = vld [vmem:[#allocation15] sm:$0xff] }
 0x90c   :  { %v1909_v20 = vld [vmem:[#allocation10 + $0x20] sm:$0xff] }
 0x90e   :  { %7485 = vmatpush1.bf16.msra.mxu0 %v11870_v23  ;;  %7549 = vmatpush1.bf16.msra.mxu1 %v11871_v31  ;;  %v1910_v23 = vld [vmem:[#allocation10 + $0x28] sm:$0xff] }
 0x90f   :  { %7487 = vmatprep.subr.bf16.mxu0 %v11872_v34  ;;  %7551 = vmatprep.subr.bf16.mxu1 %v11873_v36  ;;  %v10240_v34 = vpack.c.bf16 %v2012_v9, %v2008_v8  ;;  %v2007_v36 = vld [vmem:[#allocation12 + $0x80] sm:$0xff]  ;;  %v2017_v9 = vld [vmem:[#allocation12 + $0xd0] sm:$0xff] }
 0x912   :  { %7489 = vmatpush1.bf16.msra.mxu0 %v11874_v38  ;;  %7553 = vmatpush1.bf16.msra.mxu1 %v11875_v43  ;;  %v2011_v38 = vld [vmem:[#allocation12 + $0xa0] sm:$0xff]  ;;  %v2016_v43 = vld [vmem:[#allocation12 + $0xc8] sm:$0xff] }
 0x913   :  { %7491 = vmatprep.subr.bf16.mxu0 %v11876_v46  ;;  %7555 = vmatprep.subr.bf16.mxu1 %v11877_v49  ;;  %v2020_v46 = vld [vmem:[#allocation12 + $0xe8] sm:$0xff]  ;;  %v10243_v49 = vpack.c.bf16 %v1910_v23, %v1909_v20  ;;  %v2021_v20 = vld [vmem:[#allocation12 + $0xf0] sm:$0xff] }
 0x914   :  { %v10298_v23 = vpack.c.bf16 %v2021_v20, %v2017_v9 }
 0x916   :  { %7493 = vmatpush1.bf16.msra.mxu0 %v11878_v52  ;;  %7557 = vmatpush1.bf16.msra.mxu1 %v11879_v55  ;;  %v1911_v52 = vld [vmem:[#allocation10 + $0x30] sm:$0xff]  ;;  %v1912_v55 = vld [vmem:[#allocation10 + $0x38] sm:$0xff]  ;;  %11891 = vst [vmem:[#allocation25_spill] sm:$0xff] %v10298_v23 }
 0x917   :  { %7495 = vmatprep.subr.bf16.mxu0 %v11880_v58  ;;  %7559 = vmatprep.subr.bf16.mxu1 %v11881_v63  ;;  %v10247_v58 = vpack.c.bf16 %v2011_v38, %v2007_v36  ;;  %v10250_v63 = vpack.c.bf16 %v2020_v46, %v2016_v43  ;;  %v10253_v16 = vpack.c.bf16 %v1912_v55, %v1911_v52  ;;  %v2024_v36 = vld [vmem:[#allocation12 + $0x108] sm:$0xff]  ;;  %v2026_v43 = vld [vmem:[#allocation12 + $0x118] sm:$0xff]  ;;  %v2023_v55 = vld [vmem:[#allocation12 + $0x100] sm:$0xff] }
 0x918   :  { %v2028_v38 = vld [vmem:[#allocation12 + $0x128] sm:$0xff]  ;;  %v2030_v52 = vld [vmem:[#allocation12 + $0x138] sm:$0xff] }
 0x919   :  { %v10302_v46 = vpack.c.bf16 %v2028_v38, %v2024_v36  ;;  %v2041_v36 = vld [vmem:[#allocation12 + $0x190] sm:$0xff] }
 0x91a   :  { %7497 = vmatpush1.bf16.msra.mxu0 %v11882_v0  ;;  %7561 = vmatpush1.bf16.msra.mxu1 %v11883_v5  ;;  %v2015_v0 = vld [vmem:[#allocation12 + $0xc0] sm:$0xff]  ;;  %v2045_v38 = vld [vmem:[#allocation12 + $0x1b0] sm:$0xff] }
 0x91b   :  { %7562 = vmatprep.subr.bf16.mxu0 %v11570_v7  ;;  %7587 = vmatprep.subr.bf16.mxu1 %v10210_v22  ;;  %v2019_v5 = vld [vmem:[#allocation12 + $0xe0] sm:$0xff] }
 0x9b0   :  { %v1641_v25 = vpop.f32.mrb[16].mxu0  ;;  %v1712_v32 = vpop.f32.mrb[16].mxu1 }
 0x9b1   :  { %v1642_v40 = vadd.f32 %v1641_v25, %v11884_v33  ;;  %v1643_v42 = vpop.f32.mrb[17].mxu0  ;;  %v1714_v50 = vpop.f32.mrb[17].mxu1  ;;  %v1713_v41 = vadd.f32 %v1712_v32, %v9628_v28  ;;  %v1914_v25 = vld [vmem:[#allocation10 + $0x48] sm:$0xff]  ;;  %v10257_v32 = vpack.c.bf16 %v2019_v5, %v2015_v0  ;;  %v2027_v0 = vld [vmem:[#allocation12 + $0x120] sm:$0xff]  ;;  %v10304_v5 = vpack.c.bf16 %v2030_v52, %v2026_v43 }
 0x9b2   :  { %v1644_v57 = vadd.f32 %v1643_v42, %v11732_v21  ;;  %v1715_v29 = vadd.f32 %v1714_v50, %v9625_v4  ;;  %v1915_v42 = vld [vmem:[#allocation10 + $0x50] sm:$0xff]  ;;  %v1916_v50 = vld [vmem:[#allocation10 + $0x58] sm:$0xff]  ;;  %v10333_v43 = vpack.c.bf16 %v2045_v38, %v2041_v36  ;;  %v2048_v52 = vld [vmem:[#allocation12 + $0x1c8] sm:$0xff] }
 0x9b3   :  { %v5517_v51 = vmul.f32 -1.442695, %v1642_v40  ;;  %v10261_v40 = vpack.c.bf16 %v1914_v25, %v1913_v17  ;;  %11892 = vst [vmem:[#allocation35_spill] sm:$0xff] %v10304_v5  ;;  %v10306_v17 = vpack.c.bf16 %v2027_v0, %v2023_v55  ;;  %v2025_v25 = vld [vmem:[#allocation12 + $0x110] sm:$0xff]  ;;  %v2052_v55 = vld [vmem:[#allocation12 + $0x1e8] sm:$0xff]  ;;  %v2050_v0 = vld [vmem:[#allocation12 + $0x1d8] sm:$0xff] }
 0x9b4   :  { %v5518_v60 = vmul.f32 -1.442695, %v1644_v57  ;;  %v1917_v57 = vld [vmem:[#allocation10 + $0x60] sm:$0xff]  ;;  %11897 = vst [vmem:[#allocation32_spill] sm:$0xff] %v10333_v43 }
 0x9b5   :  { %8889 = vpow2.f32 %v5517_v51  ;;  %v10266_v51 = vpack.c.bf16 %v1916_v50, %v1915_v42  ;;  %v2029_v42 = vld [vmem:[#allocation12 + $0x130] sm:$0xff] }
 0x9b6   :  { %8891 = vpow2.f32 %v5518_v60  ;;  %v1918_v60 = vld [vmem:[#allocation10 + $0x68] sm:$0xff]  ;;  %v10309_v50 = vpack.c.bf16 %v2029_v42, %v2025_v25  ;;  %v10338_v25 = vpack.c.bf16 %v2052_v55, %v2048_v52  ;;  %v2054_v42 = vld [vmem:[#allocation12 + $0x1f8] sm:$0xff]  ;;  %v2057_v52 = vld [vmem:[#allocation12 + $0x210] sm:$0xff] }
 0x9b7   :  { %v2061_v55 = vld [vmem:[#allocation12 + $0x230] sm:$0xff] }
 0x9b8   :  { %11893 = vst [vmem:[#allocation28_spill] sm:$0xff] %v10309_v50 }
 0x9bf   :  { %v8890_v3 = vpop.eup %8889 }
 0x9c0   :  { %v1720_v6 = vadd.f32 1.0, %v8890_v3  ;;  %v8892_v13 = vpop.eup %8891  ;;  %v10270_v3 = vpack.c.bf16 %v1918_v60, %v1917_v57  ;;  %v2032_v57 = vld [vmem:[#allocation12 + $0x148] sm:$0xff] }
 0x9c1   :  { %v1726_v19 = vadd.f32 1.0, %v8892_v13  ;;  %v1920_v13 = vld [vmem:[#allocation10 + $0x78] sm:$0xff]  ;;  %v2036_v60 = vld [vmem:[#allocation12 + $0x168] sm:$0xff] }
 0x9c2   :  { %8893 = vrcp.f32 %v1720_v6  ;;  %v1919_v6 = vld [vmem:[#allocation10 + $0x70] sm:$0xff] }
 0x9c3   :  { %8895 = vrcp.f32 %v1726_v19  ;;  %v1994_v19 = vld [vmem:[#allocation12 + $0x18] sm:$0xff] }
 0x9cc   :  { %v8894_v30 = vpop.eup %8893 }
 0x9cd   :  { %v1729_v45 = vmul.f32 %v8894_v30, %v1715_v29  ;;  %v8896_v18 = vpop.eup %8895  ;;  %v1998_v29 = vld [vmem:[#allocation12 + $0x38] sm:$0xff]  ;;  %v10274_v30 = vpack.c.bf16 %v1920_v13, %v1919_v6  ;;  %v10314_v13 = vpack.c.bf16 %v2036_v60, %v2032_v57  ;;  %v2047_v57 = vld [vmem:[#allocation12 + $0x1c0] sm:$0xff] }
 0x9ce   :  { %v1732_v37 = vsub.f32 1.0, %v8896_v18  ;;  %v1734_v62 = vmul.f32 %v8896_v18, %v10143_v56  ;;  %v1999_v56 = vld [vmem:[#allocation12 + $0x40] sm:$0xff]  ;;  %v2002_v18 = vld [vmem:[#allocation12 + $0x58] sm:$0xff] }
 0x9cf   :  { %v1730_v26 = vadd.f32 %v1729_v45, %v1713_v41  ;;  %v10237_v31 = vpack.c.bf16 %v2003_v35, %v1999_v56  ;;  %v10277_v41 = vpack.c.bf16 %v1998_v29, %v1994_v19  ;;  %v1993_v45 = vld [vmem:[#allocation12 + $0x10] sm:$0xff]  ;;  %v2022_v56 = vld [vmem:[#allocation12 + $0xf8] sm:$0xff]  ;;  %v2031_v29 = vld [vmem:[#allocation12 + $0x140] sm:$0xff] }
 0x9d0   :  { %v10295_v8 = vpack.c.bf16 %v2022_v56, %v2018_v48  ;;  %v2034_v6 = vld [vmem:[#allocation12 + $0x158] sm:$0xff]  ;;  %v2039_v48 = vld [vmem:[#allocation12 + $0x180] sm:$0xff] }
 0x9d1   :  { %8897 = vtanh.f32 %v1730_v26  ;;  %v1997_v26 = vld [vmem:[#allocation12 + $0x30] sm:$0xff]  ;;  %v2038_v19 = vld [vmem:[#allocation12 + $0x178] sm:$0xff]  ;;  %v2043_v56 = vld [vmem:[#allocation12 + $0x1a0] sm:$0xff] }
 0x9d2   :  { %v10280_v53 = vpack.c.bf16 %v1997_v26, %v1993_v45  ;;  %11890 = vst [vmem:[#allocation34_spill] sm:$0xff] %v10295_v8  ;;  %v2035_v45 = vld [vmem:[#allocation12 + $0x160] sm:$0xff]  ;;  %v10316_v26 = vpack.c.bf16 %v2038_v19, %v2034_v6  ;;  %v10330_v20 = vpack.c.bf16 %v2043_v56, %v2039_v48  ;;  %v10340_v6 = vpack.c.bf16 %v2054_v42, %v2050_v0  ;;  %v2064_v42 = vld [vmem:[#allocation12 + $0x248] sm:$0xff] }
 0x9d3   :  { %v2051_v60 = vld [vmem:[#allocation12 + $0x1e0] sm:$0xff]  ;;  %v10357_v0 = vpack.c.bf16 %v2061_v55, %v2057_v52  ;;  %v2072_v55 = vld [vmem:[#allocation12 + $0x288] sm:$0xff] }
 0x9d4   :  { %11885 = vst [vmem:[#allocation46_spill] sm:$0xff] %v10280_v53  ;;  %11894 = vst [vmem:[#allocation38_spill] sm:$0xff] %v10316_v26  ;;  %v10342_v19 = vpack.c.bf16 %v2051_v60, %v2047_v57  ;;  %v2055_v48 = vld [vmem:[#allocation12 + $0x200] sm:$0xff]  ;;  %v2068_v57 = vld [vmem:[#allocation12 + $0x268] sm:$0xff] }
 0x9d5   :  { %11898 = vst [vmem:[#allocation41_spill] sm:$0xff] %v10340_v6  ;;  %v2059_v56 = vld [vmem:[#allocation12 + $0x220] sm:$0xff]  ;;  %11901 = vst [vmem:[#allocation36_spill] sm:$0xff] %v10357_v0  ;;  %v2066_v60 = vld [vmem:[#allocation12 + $0x258] sm:$0xff] }
 0x9d6   :  { %v10354_v38 = vpack.c.bf16 %v2059_v56, %v2055_v48  ;;  %v2065_v48 = vld [vmem:[#allocation12 + $0x250] sm:$0xff] }
 0x9d7   :  { %v2069_v56 = vld [vmem:[#allocation12 + $0x270] sm:$0xff] }
 0x9d8   :  { %v10369_v52 = vpack.c.bf16 %v2069_v56, %v2065_v48  ;;  %v2073_v48 = vld [vmem:[#allocation12 + $0x290] sm:$0xff] }
 0x9d9   :  { %v2077_v56 = vld [vmem:[#allocation12 + $0x2b0] sm:$0xff] }
 0x9da   :  { %11903 = vst [vmem:[#allocation37_spill] sm:$0xff] %v10369_v52 }
 0x9db   :  { %v8898_v11 = vpop.eup %8897 }
 0x9dc   :  { %v1733_v2 = vmul.f32 %v8898_v11, %v1732_v37  ;;  %v2006_v37 = vld [vmem:[#allocation12 + $0x78] sm:$0xff]  ;;  %v1904_v11 = vld [vmem:[#allocation7] sm:$0xff] }
 0x9dd   :  { %v10283_v24 = vpack.c.bf16 %v2006_v37, %v2002_v18  ;;  %v10318_v18 = vpack.c.bf16 %v2035_v45, %v2031_v29  ;;  %v2033_v37 = vld [vmem:[#allocation12 + $0x150] sm:$0xff] }
 0x9de   :  { %v10218_v1 = vadd.f32 %v1734_v62, %v1733_v2  ;;  %v2001_v2 = vld [vmem:[#allocation12 + $0x50] sm:$0xff] }
 0x9df   :  { %11886 = vst [vmem:[#allocation22_spill] sm:$0xff] %v10283_v24  ;;  %v2005_v62 = vld [vmem:[#allocation12 + $0x70] sm:$0xff] }
 0x9e0   :  { %1802 = vmatprep.mubr.f32.mxu0 %v10218_v1  ;;  %1873 = vmatprep.mubr.f32.mxu1 %v10218_v1  ;;  %v10286_v59 = vpack.c.bf16 %v2005_v62, %v2001_v2  ;;  %v2040_v62 = vld [vmem:[#allocation12 + $0x188] sm:$0xff]  ;;  %v2049_v29 = vld [vmem:[#allocation12 + $0x1d0] sm:$0xff] }
 0x9e1   :  { %1803 = vmatmul.mubr.f32.vlgmr.msra.gmra.mrb[18].mxu0 %v1737_v27  ;;  %1874 = vmatmul.mubr.f32.vlgmr.msra.gmra.mrb[18].mxu1 %v1737_v27  ;;  %v2009_v27 = vld [vmem:[#allocation12 + $0x90] sm:$0xff] }
 0x9e2   :  { %7564 = vmatpush3.bf16.msra.mxu0 %v10220_v44  ;;  %5824 = vmatprep.mubr.msk.f32.mxu0 %vm9172_vm0, %v10231_v15  ;;  %11887 = vst [vmem:[#allocation23_spill] sm:$0xff] %v10286_v59  ;;  %v10292_v35 = vpack.c.bf16 %v2013_v54, %v2009_v27  ;;  %v10326_v27 = vpack.c.bf16 %v2044_v47, %v2040_v62  ;;  %v2046_v54 = vld [vmem:[#allocation12 + $0x1b8] sm:$0xff]  ;;  %v2053_v45 = vld [vmem:[#allocation12 + $0x1f0] sm:$0xff]  ;;  %v2060_v62 = vld [vmem:[#allocation12 + $0x228] sm:$0xff] }
 0x9e3   :  { %7565 = vmatprep.subr.bf16.mxu0 %v11570_v7  ;;  %7589 = vmatpush1.bf16.msra.mxu1 %v10222_v61  ;;  %v10328_v9 = vpack.c.bf16 %v2046_v54, %v2042_v12  ;;  %v2058_v47 = vld [vmem:[#allocation12 + $0x218] sm:$0xff] }
 0x9e4   :  { %7591 = vmatprep.subr.bf16.mxu1 %v10226_v39  ;;  %11889 = vst [vmem:[#allocation24_spill] sm:$0xff] %v10292_v35  ;;  %v2062_v54 = vld [vmem:[#allocation12 + $0x238] sm:$0xff] }
 0x9e5   :  { %11896 = vst [vmem:[#allocation39_spill] sm:$0xff] %v10328_v9  ;;  %v10352_v36 = vpack.c.bf16 %v2062_v54, %v2058_v47 }
 0x9e6   :  { %7567 = vmatpush3.bf16.msra.mxu0 %v10229_v14 }
 0x9e7   :  { %7568 = vmatprep.subr.bf16.mxu0 %v11570_v7  ;;  %7593 = vmatpush1.bf16.msra.mxu1 %v10237_v31  ;;  %11900 = vst [vmem:[#allocation42_spill] sm:$0xff] %v10352_v36 }
 0x9e8   :  { %7595 = vmatprep.subr.bf16.mxu1 %v10240_v34 }
 0x9ea   :  { %7570 = vmatpush3.bf16.msra.mxu0 %v10243_v49 }
 0x9eb   :  { %7571 = vmatprep.subr.bf16.mxu0 %v11570_v7  ;;  %7597 = vmatpush1.bf16.msra.mxu1 %v10247_v58 }
 0x9ec   :  { %7599 = vmatprep.subr.bf16.mxu1 %v10250_v63 }
 0x9ee   :  { %7573 = vmatpush3.bf16.msra.mxu0 %v10253_v16 }
 0x9ef   :  { %7574 = vmatprep.subr.bf16.mxu0 %v11570_v7  ;;  %7601 = vmatpush1.bf16.msra.mxu1 %v10257_v32 }
 0x9f0   :  { %7603 = vmatprep.subr.bf16.mxu1 %v10302_v46 }
 0x9f2   :  { %7576 = vmatpush3.bf16.msra.mxu0 %v10261_v40 }
 0x9f3   :  { %7577 = vmatprep.subr.bf16.mxu0 %v11570_v7  ;;  %7605 = vmatpush1.bf16.msra.mxu1 %v10306_v17 }
 0x9f4   :  { %7607 = vmatprep.subr.bf16.mxu1 %v10314_v13 }
 0x9f6   :  { %7579 = vmatpush3.bf16.msra.mxu0 %v10266_v51 }
 0x9f7   :  { %7580 = vmatprep.subr.bf16.mxu0 %v11570_v7  ;;  %7609 = vmatpush1.bf16.msra.mxu1 %v10318_v18 }
 0x9f8   :  { %7611 = vmatprep.subr.bf16.mxu1 %v10326_v27 }
 0x9fa   :  { %7582 = vmatpush3.bf16.msra.mxu0 %v10270_v3 }
 0x9fb   :  { %7583 = vmatprep.subr.bf16.mxu0 %v11570_v7  ;;  %7613 = vmatpush1.bf16.msra.mxu1 %v10330_v20 }
 0x9fc   :  { %7615 = vmatprep.subr.bf16.mxu1 %v10338_v25 }
 0x9fe   :  { %7585 = vmatpush3.bf16.msra.mxu0 %v10274_v30 }
 0x9ff   :  { %7651 = vmatprep.subr.bf16.mxu0 %v10277_v41  ;;  %7617 = vmatpush1.bf16.msra.mxu1 %v10342_v19 }
 0xa01   :  { %5825 = vmatmul.mubr.f32.vlgmr.msra.gmra.mrb[20].mxu0 %v1904_v11  ;;  %v2037_v11 = vld [vmem:[#allocation12 + $0x170] sm:$0xff] }
 0xa02   :  { %7653 = vmatpush1.bf16.msra.mxu0 %v10280_v53  ;;  %v10321_v2 = vpack.c.bf16 %v2037_v11, %v2033_v37  ;;  %v10345_v37 = vpack.c.bf16 %v2053_v45, %v2049_v29  ;;  %v2056_v11 = vld [vmem:[#allocation12 + $0x208] sm:$0xff]  ;;  %v10362_v29 = vpack.c.bf16 %v2068_v57, %v2064_v42  ;;  %v2070_v45 = vld [vmem:[#allocation12 + $0x278] sm:$0xff] }
 0xa03   :  { %7655 = vmatprep.subr.bf16.mxu0 %v10283_v24  ;;  %v10350_v12 = vpack.c.bf16 %v2060_v62, %v2056_v11  ;;  %v2063_v11 = vld [vmem:[#allocation12 + $0x240] sm:$0xff]  ;;  %v10364_v47 = vpack.c.bf16 %v2070_v45, %v2066_v60  ;;  %v2076_v42 = vld [vmem:[#allocation12 + $0x2a8] sm:$0xff]  ;;  %v2074_v57 = vld [vmem:[#allocation12 + $0x298] sm:$0xff] }
 0xa04   :  { %11895 = vst [vmem:[#allocation29_spill] sm:$0xff] %v10321_v2  ;;  %11899 = vst [vmem:[#allocation33_spill] sm:$0xff] %v10345_v37  ;;  %v2067_v62 = vld [vmem:[#allocation12 + $0x260] sm:$0xff]  ;;  %v10374_v7 = vpack.c.bf16 %v2076_v42, %v2072_v55  ;;  %v2078_v60 = vld [vmem:[#allocation12 + $0x2b8] sm:$0xff] }
 0xa05   :  { %7619 = vmatprep.subr.bf16.mxu1 %v10350_v12  ;;  %11902 = vst [vmem:[#allocation43_spill] sm:$0xff] %v10364_v47  ;;  %v10366_v54 = vpack.c.bf16 %v2067_v62, %v2063_v11  ;;  %v2071_v45 = vld [vmem:[#allocation12 + $0x280] sm:$0xff]  ;;  %v10376_v62 = vpack.c.bf16 %v2078_v60, %v2074_v57  ;;  %v2084_v55 = vld [vmem:[#allocation12 + $0x2e8] sm:$0xff]  ;;  %v2082_v42 = vld [vmem:[#allocation12 + $0x2d8] sm:$0xff] }
 0xa06   :  { %7657 = vmatpush1.bf16.msra.mxu0 %v10286_v59  ;;  %7621 = vmatpush1.bf16.msra.mxu1 %v10354_v38  ;;  %v2075_v11 = vld [vmem:[#allocation12 + $0x2a0] sm:$0xff]  ;;  %v2086_v57 = vld [vmem:[#allocation12 + $0x2f8] sm:$0xff] }
 0xa07   :  { %7659 = vmatprep.subr.bf16.mxu0 %v10289_v10  ;;  %7623 = vmatprep.subr.bf16.mxu1 %v10362_v29  ;;  %11904 = vst [vmem:[#allocation44_spill] sm:$0xff] %v10376_v62  ;;  %v2079_v60 = vld [vmem:[#allocation12 + $0x2c0] sm:$0xff] }
 0xa0a   :  { %7661 = vmatpush1.bf16.msra.mxu0 %v10292_v35  ;;  %7625 = vmatpush1.bf16.msra.mxu1 %v10366_v54  ;;  %v2117_v35 = vld [vmem:[#allocation12 + $0x3f0] sm:$0xff] }
 0xa0b   :  { %7663 = vmatprep.subr.bf16.mxu0 %v10295_v8  ;;  %7627 = vmatprep.subr.bf16.mxu1 %v10374_v7  ;;  %v2112_v8 = vld [vmem:[#allocation12 + $0x3c8] sm:$0xff] }
 0xa0e   :  { %7665 = vmatpush1.bf16.msra.mxu0 %v10298_v23 }
 0xa0f   :  { %7667 = vmatprep.subr.bf16.mxu0 %v10304_v5  ;;  %v2106_v5 = vld [vmem:[#allocation12 + $0x398] sm:$0xff] }
 0xa12   :  { %7669 = vmatpush1.bf16.msra.mxu0 %v10309_v50 }
 0xa13   :  { %7671 = vmatprep.subr.bf16.mxu0 %v10316_v26  ;;  %v2098_v26 = vld [vmem:[#allocation12 + $0x358] sm:$0xff] }
 0xa16   :  { %7673 = vmatpush1.bf16.msra.mxu0 %v10321_v2  ;;  %v2100_v2 = vld [vmem:[#allocation12 + $0x368] sm:$0xff] }
 0xa17   :  { %7675 = vmatprep.subr.bf16.mxu0 %v10328_v9  ;;  %v2096_v9 = vld [vmem:[#allocation12 + $0x348] sm:$0xff] }
 0xa1a   :  { %7677 = vmatpush1.bf16.msra.mxu0 %v10333_v43 }
 0xa1b   :  { %7679 = vmatprep.subr.bf16.mxu0 %v10340_v6 }
 0xa1e   :  { %7681 = vmatpush1.bf16.msra.mxu0 %v10345_v37 }
 0xa1f   :  { %7683 = vmatprep.subr.bf16.mxu0 %v10352_v36 }
 0xa22   :  { %7685 = vmatpush1.bf16.msra.mxu0 %v10357_v0  ;;  %v10378_v0 = vpack.c.bf16 %v2075_v11, %v2071_v45  ;;  %v2083_v45 = vld [vmem:[#allocation12 + $0x2e0] sm:$0xff]  ;;  %v10388_v11 = vpack.c.bf16 %v2086_v57, %v2082_v42  ;;  %v2094_v42 = vld [vmem:[#allocation12 + $0x338] sm:$0xff] }
 0xa23   :  { %7687 = vmatprep.subr.bf16.mxu0 %v10364_v47  ;;  %v10381_v47 = vpack.c.bf16 %v2077_v56, %v2073_v48  ;;  %v10390_v37 = vpack.c.bf16 %v2083_v45, %v2079_v60  ;;  %v2081_v48 = vld [vmem:[#allocation12 + $0x2d0] sm:$0xff]  ;;  %v2087_v57 = vld [vmem:[#allocation12 + $0x300] sm:$0xff] }
 0xa24   :  { %7629 = vmatpush1.bf16.msra.mxu1 %v10378_v0  ;;  %11906 = vst [vmem:[#allocation45_spill] sm:$0xff] %v10388_v11  ;;  %v2085_v56 = vld [vmem:[#allocation12 + $0x2f0] sm:$0xff]  ;;  %v2091_v60 = vld [vmem:[#allocation12 + $0x320] sm:$0xff] }
 0xa25   :  { %11905 = vst [vmem:[#allocation40_spill] sm:$0xff] %v10381_v47  ;;  %v10402_v43 = vpack.c.bf16 %v2091_v60, %v2087_v57 }
 0xa26   :  { %7689 = vmatpush1.bf16.msra.mxu0 %v10369_v52  ;;  %v2080_v52 = vld [vmem:[#allocation12 + $0x2c8] sm:$0xff] }
 0xa27   :  { %7691 = vmatprep.subr.bf16.mxu0 %v10376_v62  ;;  %v10386_v36 = vpack.c.bf16 %v2084_v55, %v2080_v52  ;;  %v10393_v62 = vpack.c.bf16 %v2085_v56, %v2081_v48  ;;  %v2092_v52 = vld [vmem:[#allocation12 + $0x328] sm:$0xff]  ;;  %v2090_v55 = vld [vmem:[#allocation12 + $0x318] sm:$0xff]  ;;  %v2089_v48 = vld [vmem:[#allocation12 + $0x310] sm:$0xff] }
 0xa28   :  { %v10400_v45 = vpack.c.bf16 %v2094_v42, %v2090_v55  ;;  %v2093_v56 = vld [vmem:[#allocation12 + $0x330] sm:$0xff]  ;;  %v2095_v55 = vld [vmem:[#allocation12 + $0x340] sm:$0xff] }
 0xa29   :  { %7631 = vmatprep.subr.bf16.mxu1 %v10386_v36  ;;  %11907 = vst [vmem:[#allocation30_spill] sm:$0xff] %v10393_v62  ;;  %v2099_v42 = vld [vmem:[#allocation12 + $0x360] sm:$0xff] }
 0xa2a   :  { %7693 = vmatpush1.bf16.msra.mxu0 %v10381_v47  ;;  %7633 = vmatpush1.bf16.msra.mxu1 %v10390_v37  ;;  %v2088_v47 = vld [vmem:[#allocation12 + $0x308] sm:$0xff]  ;;  %11908 = vst [vmem:[#allocation49_spill] sm:$0xff] %v10400_v45  ;;  %v10414_v60 = vpack.c.bf16 %v2099_v42, %v2095_v55  ;;  %v2105_v55 = vld [vmem:[#allocation12 + $0x390] sm:$0xff] }
 0xa2b   :  { %7695 = vmatprep.subr.bf16.mxu0 %v10388_v11  ;;  %v10398_v6 = vpack.c.bf16 %v2092_v52, %v2088_v47  ;;  %v10405_v11 = vpack.c.bf16 %v2093_v56, %v2089_v48  ;;  %v10409_v47 = vpack.c.bf16 %v2100_v2, %v2096_v9  ;;  %v2102_v52 = vld [vmem:[#allocation12 + $0x378] sm:$0xff]  ;;  %v2097_v48 = vld [vmem:[#allocation12 + $0x350] sm:$0xff] }
 0xa2c   :  { %v10412_v57 = vpack.c.bf16 %v2102_v52, %v2098_v26  ;;  %v2101_v56 = vld [vmem:[#allocation12 + $0x370] sm:$0xff]  ;;  %v2110_v2 = vld [vmem:[#allocation12 + $0x3b8] sm:$0xff]  ;;  %v2103_v26 = vld [vmem:[#allocation12 + $0x380] sm:$0xff] }
 0xa2d   :  { %7635 = vmatprep.subr.bf16.mxu1 %v10398_v6  ;;  %11909 = vst [vmem:[#allocation50_spill] sm:$0xff] %v10405_v11  ;;  %v10417_v50 = vpack.c.bf16 %v2101_v56, %v2097_v48  ;;  %v10422_v23 = vpack.c.bf16 %v2110_v2, %v2106_v5  ;;  %v2107_v52 = vld [vmem:[#allocation12 + $0x3a0] sm:$0xff]  ;;  %v2116_v48 = vld [vmem:[#allocation12 + $0x3e8] sm:$0xff]  ;;  %v2114_v5 = vld [vmem:[#allocation12 + $0x3d8] sm:$0xff] }
 0xa2e   :  { %7697 = vmatpush1.bf16.msra.mxu0 %v10393_v62  ;;  %7637 = vmatpush1.bf16.msra.mxu1 %v10402_v43  ;;  %11910 = vst [vmem:[#allocation51_spill] sm:$0xff] %v10412_v57  ;;  %v2104_v62 = vld [vmem:[#allocation12 + $0x388] sm:$0xff]  ;;  %v10425_v42 = vpack.c.bf16 %v2107_v52, %v2103_v26  ;;  %v2111_v2 = vld [vmem:[#allocation12 + $0x3c0] sm:$0xff]  ;;  %v2113_v52 = vld [vmem:[#allocation12 + $0x3d0] sm:$0xff] }
 0xa2f   :  { %7699 = vmatprep.subr.bf16.mxu0 %v10400_v45  ;;  %7639 = vmatprep.subr.bf16.mxu1 %v10409_v47  ;;  %11911 = vst [vmem:[#allocation52_spill] sm:$0xff] %v10417_v50  ;;  %v2108_v45 = vld [vmem:[#allocation12 + $0x3a8] sm:$0xff]  ;;  %11912 = vst [vmem:[#allocation53_spill] sm:$0xff] %v10422_v23  ;;  %v2115_v26 = vld [vmem:[#allocation12 + $0x3e0] sm:$0xff] }
 0xa30   :  { %v10420_v9 = vpack.c.bf16 %v2108_v45, %v2104_v62  ;;  %v10431_v62 = vpack.c.bf16 %v2116_v48, %v2112_v8  ;;  %v2118_v45 = vld [vmem:[#allocation12 + $0x3f8] sm:$0xff]  ;;  %v10437_v10 = vpack.c.bf16 %v2115_v26, %v2111_v2  ;;  %v10441_v8 = vpack.c.bf16 %v2117_v35, %v2113_v52 }
 0xa32   :  { %7701 = vmatpush1.bf16.msra.mxu0 %v10405_v11  ;;  %7641 = vmatpush1.bf16.msra.mxu1 %v10414_v60  ;;  %v2109_v11 = vld [vmem:[#allocation12 + $0x3b0] sm:$0xff]  ;;  %11915 = vst [vmem:[#allocation56_spill] sm:$0xff] %v10441_v8 }
 0xa33   :  { %7703 = vmatprep.subr.bf16.mxu0 %v10412_v57  ;;  %7643 = vmatprep.subr.bf16.mxu1 %v10420_v9  ;;  %v10429_v56 = vpack.c.bf16 %v2109_v11, %v2105_v55  ;;  %v10434_v57 = vpack.c.bf16 %v2118_v45, %v2114_v5  ;;  %v11916_v11 = vmov 0.0|0.0  }
 0xa35   :  { %11913 = vst [vmem:[#allocation54_spill] sm:$0xff] %v10429_v56  ;;  %11914 = vst [vmem:[#allocation55_spill] sm:$0xff] %v10434_v57 }
 0xa36   :  { %7705 = vmatpush1.bf16.msra.mxu0 %v10417_v50  ;;  %7645 = vmatpush1.bf16.msra.mxu1 %v10425_v42 }
 0xa37   :  { %7707 = vmatprep.subr.bf16.mxu0 %v10422_v23  ;;  %7647 = vmatprep.subr.bf16.mxu1 %v10431_v62 }
 0xa3a   :  { %7709 = vmatpush1.bf16.msra.mxu0 %v10429_v56  ;;  %7649 = vmatpush1.bf16.msra.mxu1 %v10437_v10 }
 0xa3b   :  { %7711 = vmatprep.subr.bf16.mxu0 %v10434_v57  ;;  %7714 = vmatprep.subr.bf16.mxu1 %v11916_v11 }
 0xa3e   :  { %7713 = vmatpush1.bf16.msra.mxu0 %v10441_v8 }
 0xa3f   :  { %7738 = vmatprep.subr.bf16.mxu0 %v11916_v11 }
 0xab4   :  { %v1804_v55 = vpop.f32.mrb[18].mxu0  ;;  %v1875_v48 = vpop.f32.mrb[18].mxu1 }
 0xab5   :  { %v1805_v5 = vadd.f32 %v1804_v55, %v11884_v33  ;;  %v1806_v45 = vpop.f32.mrb[19].mxu0  ;;  %v1877_v2 = vpop.f32.mrb[19].mxu1  ;;  %v1876_v24 = vadd.f32 %v1875_v48, %v9628_v28  ;;  %v2303_v28 = vld [vmem:[#allocation13 + $0x8] sm:$0xff]  ;;  %v2314_v48 = vld [vmem:[#allocation13 + $0x60] sm:$0xff] }
 0xab6   :  { %v1807_v35 = vadd.f32 %v1806_v45, %v11732_v21  ;;  %v1878_v50 = vadd.f32 %v1877_v2, %v9625_v4  ;;  %v2302_v4 = vld [vmem:[#allocation13] sm:$0xff]  ;;  %v2315_v2 = vld [vmem:[#allocation13 + $0x68] sm:$0xff] }
 0xab7   :  { %v5519_v26 = vmul.f32 -1.442695, %v1805_v5 }
 0xab8   :  { %v5520_v52 = vmul.f32 -1.442695, %v1807_v35 }
 0xab9   :  { %8899 = vpow2.f32 %v5519_v26 }
 0xaba   :  { %8901 = vpow2.f32 %v5520_v52  ;;  %v10500_v52 = vpack.c.bf16 %v2315_v2, %v2314_v48  ;;  %v11920_v48 = vld [vmem:[#allocation48_spill] sm:$0xff] }
 0xac3   :  { %v8900_v57 = vpop.eup %8899 }
 0xac4   :  { %v1883_v56 = vadd.f32 1.0, %v8900_v57  ;;  %v8902_v8 = vpop.eup %8901 }
 0xac5   :  { %v1889_v23 = vadd.f32 1.0, %v8902_v8 }
 0xac6   :  { %8903 = vrcp.f32 %v1883_v56 }
 0xac7   :  { %8905 = vrcp.f32 %v1889_v23  ;;  %v2312_v23 = vld [vmem:[#allocation13 + $0x50] sm:$0xff] }
 0xad0   :  { %v8904_v59 = vpop.eup %8903 }
 0xad1   :  { %v1892_v33 = vmul.f32 %v8904_v59, %v1878_v50  ;;  %v8906_v21 = vpop.eup %8905  ;;  %v2313_v50 = vld [vmem:[#allocation13 + $0x58] sm:$0xff] }
 0xad2   :  { %v1895_v45 = vsub.f32 1.0, %v8906_v21  ;;  %v1897_v57 = vmul.f32 %v8906_v21, %v10218_v1  ;;  %v10477_v1 = vpack.c.bf16 %v2303_v28, %v2302_v4  ;;  %v10497_v8 = vpack.c.bf16 %v2313_v50, %v2312_v23  ;;  %v2119_v21 = vld [vmem:[%s11504_s7] sm:$0xf]  ;;  %v11918_v4 = vld [vmem:[#allocation27_spill] sm:$0xff] }
 0xad3   :  { %v1893_v55 = vadd.f32 %v1892_v33, %v1876_v24  ;;  %v2311_v24 = vld [vmem:[#allocation13 + $0x48] sm:$0xff]  ;;  %v2316_v33 = vld [vmem:[#allocation13 + $0x70] sm:$0xff]  ;;  %v2128_v28 = vrot.slane %v2119_v21, %v11918_v4  ;;  %v2132_v2 = vrot.slane %v2119_v21, %v11920_v48 }
 0xad4   :  { %v1987_v53 = vpop.f32.mrb[20].mxu0  ;;  %v11919_v23 = vld [vmem:[#allocation47_spill] sm:$0xff] }
 0xad5   :  { %8907 = vtanh.f32 %v1893_v55  ;;  %v5826_v5 = vpop.f32.mrb[21].mxu0  ;;  %v2317_v55 = vld [vmem:[#allocation13 + $0x78] sm:$0xff]  ;;  %v2136_v50 = vrot.slane %v2119_v21, %v11919_v23 }
 0xad6   :  { %v10504_v5 = vpack.c.bf16 %v2317_v55, %v2316_v33 }
 0xadf   :  { %v8908_v26 = vpop.eup %8907 }
 0xae0   :  { %v1896_v35 = vmul.f32 %v8908_v26, %v1895_v45  ;;  %v11917_v45 = vld [vmem:[#allocation26_spill] sm:$0xff] }
 0xae1   :  { %v2124_v26 = vrot.slane %v2119_v21, %v11917_v45  ;;  %v11937_v21 = vld [vmem:[#allocation33_spill] sm:$0xff] }
 0xae2   :  { %v10453_v56 = vadd.f32 %v1897_v57, %v1896_v35 }
 0xae4   :  { %2205 = vmatprep.mubr.f32.mxu1 %v10453_v56  ;;  %2276 = vmatprep.mubr.f32.mxu0 %v10453_v56 }
 0xae5   :  { %2206 = vmatmul.mubr.f32.vlgmr.msra.gmra.mrb[20].mxu1 %v1987_v53  ;;  %2277 = vmatmul.mubr.f32.vlgmr.msra.gmra.mrb[22].mxu0 %v1987_v53  ;;  %v2310_v53 = vld [vmem:[#allocation13 + $0x40] sm:$0xff] }
 0xae6   :  { %5859 = vmatprep.mubr.msk.f32.mxu1 %vm9172_vm0, %v10231_v15  ;;  %7740 = vmatpush3.bf16.msra.mxu0 %v10220_v44  ;;  %v2304_v44 = vld [vmem:[#allocation13 + $0x10] sm:$0xff]  ;;  %v10493_v59 = vpack.c.bf16 %v2311_v24, %v2310_v53 }
 0xae7   :  { %7741 = vmatprep.subr.bf16.mxu0 %v11916_v11  ;;  %5894 = vmatprep.mubr.msk.f32.mxu0 %vm9172_vm0, %v10231_v15 }
 0xae8   :  { %7716 = vmatpush3.bf16.msra.mxu1 %v10477_v1 }
 0xae9   :  { %7717 = vmatprep.subr.bf16.mxu1 %v11916_v11 }
 0xaea   :  { %7743 = vmatpush3.bf16.msra.mxu0 %v10229_v14  ;;  %v2305_v14 = vld [vmem:[#allocation13 + $0x18] sm:$0xff] }
 0xaeb   :  { %7744 = vmatprep.subr.bf16.mxu0 %v11916_v11 }
 0xaee   :  { %7746 = vmatpush3.bf16.msra.mxu0 %v10243_v49  ;;  %v10481_v49 = vpack.c.bf16 %v2305_v14, %v2304_v44 }
 0xaef   :  { %7747 = vmatprep.subr.bf16.mxu0 %v11916_v11 }
 0xaf0   :  { %7719 = vmatpush3.bf16.msra.mxu1 %v10481_v49 }
 0xaf1   :  { %7720 = vmatprep.subr.bf16.mxu1 %v11916_v11 }
 0xaf2   :  { %7749 = vmatpush3.bf16.msra.mxu0 %v10253_v16  ;;  %v2306_v16 = vld [vmem:[#allocation13 + $0x20] sm:$0xff] }
 0xaf3   :  { %7750 = vmatprep.subr.bf16.mxu0 %v11916_v11 }
 0xaf6   :  { %7752 = vmatpush3.bf16.msra.mxu0 %v10261_v40  ;;  %v2307_v40 = vld [vmem:[#allocation13 + $0x28] sm:$0xff] }
 0xaf7   :  { %7753 = vmatprep.subr.bf16.mxu0 %v11916_v11 }
 0xafa   :  { %7755 = vmatpush3.bf16.msra.mxu0 %v10266_v51  ;;  %v10485_v51 = vpack.c.bf16 %v2307_v40, %v2306_v16 }
 0xafb   :  { %7756 = vmatprep.subr.bf16.mxu0 %v11916_v11 }
 0xafc   :  { %7722 = vmatpush3.bf16.msra.mxu1 %v10485_v51 }
 0xafd   :  { %7723 = vmatprep.subr.bf16.mxu1 %v11916_v11 }
 0xafe   :  { %7758 = vmatpush3.bf16.msra.mxu0 %v10270_v3  ;;  %v2308_v3 = vld [vmem:[#allocation13 + $0x30] sm:$0xff] }
 0xaff   :  { %7759 = vmatprep.subr.bf16.mxu0 %v11916_v11 }
 0xb02   :  { %7761 = vmatpush3.bf16.msra.mxu0 %v10274_v30  ;;  %v2309_v30 = vld [vmem:[#allocation13 + $0x38] sm:$0xff] }
 0xb03   :  { %7827 = vmatprep.subr.bf16.mxu0 %v10277_v41  ;;  %v10489_v41 = vpack.c.bf16 %v2309_v30, %v2308_v3 }
 0xb05   :  { %7725 = vmatpush3.bf16.msra.mxu1 %v10489_v41 }
 0xb06   :  { %7726 = vmatprep.subr.bf16.mxu1 %v11916_v11 }
 0xb09   :  { %7728 = vmatpush3.bf16.msra.mxu1 %v10493_v59 }
 0xb0a   :  { %7729 = vmatprep.subr.bf16.mxu1 %v11916_v11 }
 0xb0d   :  { %7731 = vmatpush3.bf16.msra.mxu1 %v10497_v8 }
 0xb0e   :  { %7732 = vmatprep.subr.bf16.mxu1 %v11916_v11 }
 0xb11   :  { %7734 = vmatpush3.bf16.msra.mxu1 %v10500_v52 }
 0xb12   :  { %7735 = vmatprep.subr.bf16.mxu1 %v11916_v11 }
 0xb15   :  { %7737 = vmatpush3.bf16.msra.mxu1 %v10504_v5 }
 0xb16   :  { %7763 = vmatprep.subr.bf16.mxu1 %v10210_v22 }
 0xbb8   :  { %v2207_v35 = vpop.f32.mrb[20].mxu1  ;;  %v2278_v57 = vpop.f32.mrb[22].mxu0 }
 0xbb9   :  { %v2208_v44 = vadd.f32 %v2207_v35, %v2124_v26  ;;  %v2209_v14 = vpop.f32.mrb[21].mxu1  ;;  %v2280_v16 = vpop.f32.mrb[23].mxu0  ;;  %v2279_v4 = vadd.f32 %v2278_v57, %v2132_v2  ;;  %v11939_v57 = vld [vmem:[#allocation36_spill] sm:$0xff]  ;;  %v11946_v2 = vld [vmem:[#allocation49_spill] sm:$0xff] }
 0xbba   :  { %v2210_v3 = vadd.f32 %v2209_v14, %v2128_v28  ;;  %v2281_v55 = vadd.f32 %v2280_v16, %v2136_v50  ;;  %v11941_v16 = vld [vmem:[#allocation37_spill] sm:$0xff]  ;;  %v11945_v50 = vld [vmem:[#allocation30_spill] sm:$0xff] }
 0xbbb   :  { %v5521_v40 = vmul.f32 -1.442695, %v2208_v44 }
 0xbbc   :  { %v5522_v30 = vmul.f32 -1.442695, %v2210_v3 }
 0xbbd   :  { %8909 = vpow2.f32 %v5521_v40 }
 0xbbe   :  { %8911 = vpow2.f32 %v5522_v30 }
 0xbc7   :  { %v8910_v53 = vpop.eup %8909 }
 0xbc8   :  { %v2286_v22 = vadd.f32 1.0, %v8910_v53  ;;  %v8912_v24 = vpop.eup %8911  ;;  %v11942_v53 = vld [vmem:[#allocation44_spill] sm:$0xff] }
 0xbc9   :  { %v2292_v33 = vadd.f32 1.0, %v8912_v24  ;;  %v11944_v24 = vld [vmem:[#allocation45_spill] sm:$0xff] }
 0xbca   :  { %8913 = vrcp.f32 %v2286_v22  ;;  %v11943_v22 = vld [vmem:[#allocation40_spill] sm:$0xff] }
 0xbcb   :  { %8915 = vrcp.f32 %v2292_v33  ;;  %v11947_v33 = vld [vmem:[#allocation50_spill] sm:$0xff] }
 0xbd4   :  { %v8914_v45 = vpop.eup %8913 }
 0xbd5   :  { %v2295_v26 = vmul.f32 %v8914_v45, %v2281_v55  ;;  %v8916_v28 = vpop.eup %8915  ;;  %v11938_v45 = vld [vmem:[#allocation42_spill] sm:$0xff]  ;;  %v11948_v55 = vld [vmem:[#allocation51_spill] sm:$0xff] }
 0xbd6   :  { %v2298_v44 = vsub.f32 1.0, %v8916_v28  ;;  %v2300_v3 = vmul.f32 %v8916_v28, %v10453_v56  ;;  %v11936_v56 = vld [vmem:[#allocation41_spill] sm:$0xff]  ;;  %v11951_v28 = vld [vmem:[#allocation54_spill] sm:$0xff] }
 0xbd7   :  { %v2296_v35 = vadd.f32 %v2295_v26, %v2279_v4  ;;  %v11940_v4 = vld [vmem:[#allocation43_spill] sm:$0xff]  ;;  %v11949_v26 = vld [vmem:[#allocation52_spill] sm:$0xff] }
 0xbd9   :  { %8917 = vtanh.f32 %v2296_v35  ;;  %v11950_v35 = vld [vmem:[#allocation53_spill] sm:$0xff] }
 0xbe3   :  { %v8918_v14 = vpop.eup %8917 }
 0xbe4   :  { %v2299_v40 = vmul.f32 %v8918_v14, %v2298_v44  ;;  %v11952_v44 = vld [vmem:[#allocation55_spill] sm:$0xff]  ;;  %v11953_v14 = vld [vmem:[#allocation56_spill] sm:$0xff] }
 0xbe6   :  { %v10517_v30 = vadd.f32 %v2300_v3, %v2299_v40 }
 0xbe8   :  { %5860 = vmatmul.mubr.f32.vlgmr.msra.gmra.mrb[22].mxu1 %v10517_v30 }
 0xbe9   :  { %2719 = vmatprep.mubr.f32.mxu1 %v10517_v30  ;;  %7765 = vmatpush1.bf16.msra.mxu1 %v10222_v61 }
 0xbea   :  { %7767 = vmatprep.subr.bf16.mxu1 %v10226_v39  ;;  %v10559_v39 = vld [vmem:[%s11506_s9] ss:$0 sm:$0xff] }
 0xbed   :  { %7769 = vmatpush1.bf16.msra.mxu1 %v10237_v31 }
 0xbee   :  { %7771 = vmatprep.subr.bf16.mxu1 %v10240_v34 }
 0xbf1   :  { %7773 = vmatpush1.bf16.msra.mxu1 %v10247_v58 }
 0xbf2   :  { %7775 = vmatprep.subr.bf16.mxu1 %v10250_v63 }
 0xbf5   :  { %7777 = vmatpush1.bf16.msra.mxu1 %v10257_v32 }
 0xbf6   :  { %7779 = vmatprep.subr.bf16.mxu1 %v10302_v46 }
 0xbf9   :  { %7781 = vmatpush1.bf16.msra.mxu1 %v10306_v17  ;;  %v2412_v17 = vld [vmem:[#allocation7 + $0x8] sm:$0xff] }
 0xbfa   :  { %7783 = vmatprep.subr.bf16.mxu1 %v10314_v13  ;;  %v2413_v13 = vstv %s2410_s5  ;;  %s5545_s5 = sld [smem:[#allocation3 + $0x5]] }
 0xbfd   :  { %7785 = vmatpush1.bf16.msra.mxu1 %v10318_v18  ;;  %v2416_v18 = vstv %s2415_s26 }
 0xbfe   :  { %7787 = vmatprep.subr.bf16.mxu1 %v10326_v27 }
 0xc00   :  { %p4464_p13 = scmp.gt.s32.totalorder %s5545_s5, 0 }
 0xc01   :  { %7789 = vmatpush1.bf16.msra.mxu1 %v10330_v20  ;;  %v2414_v20 = vmul.f32 %v2413_v13, %v2412_v17 }
 0xc02   :  { %7791 = vmatprep.subr.bf16.mxu1 %v10338_v25  ;;  %s4465_s26 = scalar_select %p4464_p13, 1, 0 }
 0xc04   :  { %s4466_s20 = scvt.s32.f32 %s4465_s26 }
 0xc05   :  { %7793 = vmatpush1.bf16.msra.mxu1 %v10342_v19  ;;  %v11923_v19 = vld [vmem:[#allocation46_spill] sm:$0xff] }
 0xc06   :  { %7795 = vmatprep.subr.bf16.mxu1 %v10350_v12  ;;  %v11925_v12 = vld [vmem:[#allocation23_spill] sm:$0xff]  ;;  %s4471_s21 = ssub.f32 1.0, %s4466_s20 }
 0xc09   :  { %7797 = vmatpush1.bf16.msra.mxu1 %v10354_v38  ;;  %v11927_v38 = vld [vmem:[#allocation24_spill] sm:$0xff] }
 0xc0a   :  { %7799 = vmatprep.subr.bf16.mxu1 %v10362_v29  ;;  %v11929_v29 = vld [vmem:[#allocation25_spill] sm:$0xff] }
 0xc0d   :  { %7801 = vmatpush1.bf16.msra.mxu1 %v10366_v54  ;;  %v11930_v54 = vld [vmem:[#allocation35_spill] sm:$0xff] }
 0xc0e   :  { %7803 = vmatprep.subr.bf16.mxu1 %v10374_v7  ;;  %v11921_v7 = vlaneseq }
 0xc10   :  { %v10554_v61 = vand.u32 127, %v11921_v7 }
 0xc11   :  { %7805 = vmatpush1.bf16.msra.mxu1 %v10378_v0  ;;  %v11928_v0 = vld [vmem:[#allocation34_spill] sm:$0xff] }
 0xc12   :  { %7807 = vmatprep.subr.bf16.mxu1 %v10386_v36  ;;  %11922 = vst [vmem:[#allocation47_spill] sm:$0xff] %v10554_v61  ;;  %vm1903_vm1 = vcmp.lt.s32.totalorder %v10554_v61, 32  ;;  %v10566_v32 = vcvt.s32.f32 %v10554_v61  ;;  %v11926_v36 = vld [vmem:[#allocation31_spill] sm:$0xff]  ;;  %v3029_v61 = vld [vmem:[#allocation12 + $0x50] sm:$0xff] }
 0xc15   :  { %7809 = vmatpush1.bf16.msra.mxu1 %v10390_v37  ;;  %v11924_v37 = vld [vmem:[#allocation22_spill] sm:$0xff] }
 0xc16   :  { %7811 = vmatprep.subr.bf16.mxu1 %v10398_v6 }
 0xc19   :  { %7813 = vmatpush1.bf16.msra.mxu1 %v10402_v43 }
 0xc1a   :  { %7815 = vmatprep.subr.bf16.mxu1 %v10409_v47  ;;  %v11931_v47 = vld [vmem:[#allocation28_spill] sm:$0xff] }
 0xc1d   :  { %7817 = vmatpush1.bf16.msra.mxu1 %v10414_v60  ;;  %v11932_v60 = vld [vmem:[#allocation38_spill] sm:$0xff] }
 0xc1e   :  { %7819 = vmatprep.subr.bf16.mxu1 %v10420_v9  ;;  %v11933_v9 = vld [vmem:[#allocation29_spill] sm:$0xff] }
 0xc21   :  { %7821 = vmatpush1.bf16.msra.mxu1 %v10425_v42  ;;  %v11934_v42 = vld [vmem:[#allocation39_spill] sm:$0xff] }
 0xc22   :  { %7823 = vmatprep.subr.bf16.mxu1 %v10431_v62  ;;  %v11935_v62 = vld [vmem:[#allocation32_spill] sm:$0xff] }
 0xc25   :  { %7825 = vmatpush1.bf16.msra.mxu1 %v10437_v10 }
 0xc26   :  { %7890 = vmatprep.subr.bf16.mxu1 %v11916_v11 }
 0xcbb   :  { %v2391_v31 = vpop.f32.mrb[22].mxu1 }
 0xcbc   :  { %v2392_v34 = vadd.f32 %v10559_v39, %v2391_v31  ;;  %v5861_v58 = vpop.f32.mrb[23].mxu1 }
 0xcbe   :  { %2396 = vst [vmem:[#allocation15 + $0x8] sm:$0xff] %v2392_v34  ;;  %v2397_v63 = vsel %vm1903_vm1, %v2392_v34, -1e+30 }
 0xcbf   :  { %2398 = vmax.xlane.f32.xlu0 %v2397_v63 }
 0xd4c   :  { %v2399_v10 = vpop.xlane.xlu0 %2398 }
 0xd4d   :  { %vm2400_vm2 = vcmp.eq.f32.partialorder %v2397_v63, %v2399_v10 }
 0xd4e   :  { %v2401_v46 = vsel %vm2400_vm2, %v10566_v32, 128.0 }
 0xd4f   :  { %2402 = vmin.xlane.f32.xlu0 %v2401_v46 }
 0xddc   :  { %v2403_v27 = vpop.xlane.xlu0 %2402 }
 0xddd   :  { %vm2404_vm3 = vcmp.eq.f32.partialorder %v10566_v32, %v2403_v27 }
 0xdde   :  { %v5524_v43 = vsel %vm2404_vm3, 1.0, %v10231_v15 }
 0xddf   :  { %v2417_v25 = vmul.f32 %v5524_v43, %v2416_v18 }
 0xde1   :  { %v2418_v6 = vadd.f32 %v2417_v25, %v2414_v20 }
 0xde3   :  { %5895 = vmatmul.mubr.f32.vlgmr.msra.gmra.mrb[24].mxu0 %v2418_v6 }
 0xde4   :  { %2790 = vmatprep.mubr.f32.mxu0 %v10517_v30  ;;  %7829 = vmatpush1.bf16.msra.mxu0 %v11923_v19 }
 0xde5   :  { %7831 = vmatprep.subr.bf16.mxu0 %v11924_v37 }
 0xde8   :  { %7833 = vmatpush1.bf16.msra.mxu0 %v11925_v12 }
 0xde9   :  { %7835 = vmatprep.subr.bf16.mxu0 %v11926_v36 }
 0xdec   :  { %7837 = vmatpush1.bf16.msra.mxu0 %v11927_v38 }
 0xded   :  { %7839 = vmatprep.subr.bf16.mxu0 %v11928_v0 }
 0xdf0   :  { %7841 = vmatpush1.bf16.msra.mxu0 %v11929_v29 }
 0xdf1   :  { %7843 = vmatprep.subr.bf16.mxu0 %v11930_v54 }
 0xdf4   :  { %7845 = vmatpush1.bf16.msra.mxu0 %v11931_v47 }
 0xdf5   :  { %7847 = vmatprep.subr.bf16.mxu0 %v11932_v60 }
 0xdf8   :  { %7849 = vmatpush1.bf16.msra.mxu0 %v11933_v9  ;;  %v2933_v9 = vld [vmem:[#allocation10] sm:$0xff] }
 0xdf9   :  { %7851 = vmatprep.subr.bf16.mxu0 %v11934_v42  ;;  %v2934_v42 = vld [vmem:[#allocation10 + $0x8] sm:$0xff] }
 0xdfc   :  { %7853 = vmatpush1.bf16.msra.mxu0 %v11935_v62  ;;  %v2935_v62 = vld [vmem:[#allocation10 + $0x10] sm:$0xff] }
 0xdfd   :  { %7855 = vmatprep.subr.bf16.mxu0 %v11936_v56  ;;  %v10638_v56 = vpack.c.bf16 %v2934_v42, %v2933_v9  ;;  %v3051_v9 = vld [vmem:[#allocation12 + $0x100] sm:$0xff] }
 0xdfe   :  { %v3055_v42 = vld [vmem:[#allocation12 + $0x120] sm:$0xff] }
 0xe00   :  { %7857 = vmatpush1.bf16.msra.mxu0 %v11937_v21 }
 0xe01   :  { %7859 = vmatprep.subr.bf16.mxu0 %v11938_v45  ;;  %v2937_v45 = vld [vmem:[#allocation10 + $0x20] sm:$0xff] }
 0xe04   :  { %7861 = vmatpush1.bf16.msra.mxu0 %v11939_v57 }
 0xe05   :  { %7863 = vmatprep.subr.bf16.mxu0 %v11940_v4  ;;  %v2939_v4 = vld [vmem:[#allocation10 + $0x30] sm:$0xff] }
 0xe08   :  { %7865 = vmatpush1.bf16.msra.mxu0 %v11941_v16  ;;  %v2940_v16 = vld [vmem:[#allocation10 + $0x38] sm:$0xff] }
 0xe09   :  { %7867 = vmatprep.subr.bf16.mxu0 %v11942_v53  ;;  %v10649_v53 = vpack.c.bf16 %v2940_v16, %v2939_v4  ;;  %v3059_v4 = vld [vmem:[#allocation12 + $0x140] sm:$0xff] }
 0xe0a   :  { %v3063_v16 = vld [vmem:[#allocation12 + $0x160] sm:$0xff] }
 0xe0c   :  { %7869 = vmatpush1.bf16.msra.mxu0 %v11943_v22  ;;  %v2941_v22 = vld [vmem:[#allocation10 + $0x40] sm:$0xff] }
 0xe0d   :  { %7871 = vmatprep.subr.bf16.mxu0 %v11944_v24  ;;  %v2942_v24 = vld [vmem:[#allocation10 + $0x48] sm:$0xff] }
 0xe10   :  { %7873 = vmatpush1.bf16.msra.mxu0 %v11945_v50  ;;  %v10653_v50 = vpack.c.bf16 %v2942_v24, %v2941_v22  ;;  %v10705_v22 = vpack.c.bf16 %v3063_v16, %v3059_v4  ;;  %v3068_v24 = vld [vmem:[#allocation12 + $0x188] sm:$0xff]  ;;  %v3107_v4 = vld [vmem:[#allocation12 + $0x2c0] sm:$0xff] }
 0xe11   :  { %7875 = vmatprep.subr.bf16.mxu0 %v11946_v2  ;;  %v2943_v2 = vld [vmem:[#allocation10 + $0x50] sm:$0xff]  ;;  %v3111_v16 = vld [vmem:[#allocation12 + $0x2e0] sm:$0xff] }
 0xe14   :  { %7877 = vmatpush1.bf16.msra.mxu0 %v11947_v33  ;;  %v2944_v33 = vld [vmem:[#allocation10 + $0x58] sm:$0xff] }
 0xe15   :  { %7879 = vmatprep.subr.bf16.mxu0 %v11948_v55  ;;  %v10657_v55 = vpack.c.bf16 %v2944_v33, %v2943_v2  ;;  %v3072_v2 = vld [vmem:[#allocation12 + $0x1a8] sm:$0xff] }
 0xe16   :  { %v10708_v33 = vpack.c.bf16 %v3072_v2, %v3068_v24  ;;  %v10741_v24 = vpack.c.bf16 %v3111_v16, %v3107_v4  ;;  %v3116_v2 = vld [vmem:[#allocation12 + $0x308] sm:$0xff]  ;;  %v3139_v4 = vld [vmem:[#allocation12 + $0x3c0] sm:$0xff] }
 0xe17   :  { %v3143_v16 = vld [vmem:[#allocation12 + $0x3e0] sm:$0xff] }
 0xe18   :  { %7881 = vmatpush1.bf16.msra.mxu0 %v11949_v26  ;;  %v2945_v26 = vld [vmem:[#allocation10 + $0x60] sm:$0xff] }
 0xe19   :  { %7883 = vmatprep.subr.bf16.mxu0 %v11950_v35  ;;  %v2946_v35 = vld [vmem:[#allocation10 + $0x68] sm:$0xff] }
 0xe1c   :  { %7885 = vmatpush1.bf16.msra.mxu0 %v11951_v28  ;;  %v10661_v28 = vpack.c.bf16 %v2946_v35, %v2945_v26  ;;  %v3067_v26 = vld [vmem:[#allocation12 + $0x180] sm:$0xff] }
 0xe1d   :  { %7887 = vmatprep.subr.bf16.mxu0 %v11952_v44  ;;  %v3071_v35 = vld [vmem:[#allocation12 + $0x1a0] sm:$0xff] }
 0xe20   :  { %7889 = vmatpush1.bf16.msra.mxu0 %v11953_v14 }
 0xe21   :  { %7914 = vmatprep.subr.bf16.mxu0 %v11916_v11 }
 0xeb6   :  { %v2501_v40 = vpop.f32.mrb[24].mxu0 }
 0xeb7   :  { %v5896_v3 = vpop.f32.mrb[25].mxu0  ;;  %2720 = vmatmul.mubr.f32.vlgmr.msra.gmra.mrb[24].mxu1 %v2501_v40  ;;  %2791 = vmatmul.mubr.f32.vlgmr.msra.gmra.mrb[26].mxu0 %v2501_v40  ;;  %v2947_v40 = vld [vmem:[#allocation10 + $0x70] sm:$0xff] }
 0xeb8   :  { %7892 = vmatpush3.bf16.msra.mxu1 %v10477_v1  ;;  %5929 = vmatprep.mubr.msk.f32.mxu1 %vm9172_vm0, %v10231_v15  ;;  %v11954_v1 = vld [vmem:[#allocation26_spill] sm:$0xff]  ;;  %v2948_v3 = vld [vmem:[#allocation10 + $0x78] sm:$0xff] }
 0xeb9   :  { %7893 = vmatprep.subr.bf16.mxu1 %v11916_v11  ;;  %5964 = vmatprep.mubr.msk.f32.mxu0 %vm9172_vm0, %v10231_v15  ;;  %v2633_v15 = vld [vmem:[%s11504_s7] sm:$0xf] }
 0xeba   :  { %v2650_v17 = vrot.slane %v2633_v15, %v11919_v23  ;;  %v2646_v13 = vrot.slane %v2633_v15, %v11920_v48  ;;  %7916 = vmatpush3.bf16.msra.mxu0 %v10638_v56 }
 0xebb   :  { %7917 = vmatprep.subr.bf16.mxu0 %v11916_v11 }
 0xebc   :  { %7895 = vmatpush3.bf16.msra.mxu1 %v10481_v49  ;;  %v2638_v49 = vrot.slane %v2633_v15, %v11954_v1 }
 0xebd   :  { %7896 = vmatprep.subr.bf16.mxu1 %v11916_v11 }
 0xec0   :  { %7898 = vmatpush3.bf16.msra.mxu1 %v10485_v51 }
 0xec1   :  { %7899 = vmatprep.subr.bf16.mxu1 %v11916_v11 }
 0xec4   :  { %7901 = vmatpush3.bf16.msra.mxu1 %v10489_v41 }
 0xec5   :  { %7902 = vmatprep.subr.bf16.mxu1 %v11916_v11 }
 0xec8   :  { %7904 = vmatpush3.bf16.msra.mxu1 %v10493_v59  ;;  %v11955_v59 = vld [vmem:[#allocation27_spill] sm:$0xff] }
 0xec9   :  { %7905 = vmatprep.subr.bf16.mxu1 %v11916_v11  ;;  %v2642_v7 = vrot.slane %v2633_v15, %v11955_v59  ;;  %v10667_v15 = vpack.c.bf16 %v2948_v3, %v2947_v40  ;;  %v3080_v40 = vld [vmem:[#allocation12 + $0x1e8] sm:$0xff] }
 0xecc   :  { %7907 = vmatpush3.bf16.msra.mxu1 %v10497_v8 }
 0xecd   :  { %7908 = vmatprep.subr.bf16.mxu1 %v11916_v11 }
 0xed0   :  { %7910 = vmatpush3.bf16.msra.mxu1 %v10500_v52 }
 0xed1   :  { %7911 = vmatprep.subr.bf16.mxu1 %v11916_v11 }
 0xed4   :  { %7913 = vmatpush3.bf16.msra.mxu1 %v10504_v5 }
 0xf8a   :  { %v2721_v51 = vpop.f32.mrb[24].mxu1  ;;  %v2792_v41 = vpop.f32.mrb[26].mxu0 }
 0xf8b   :  { %v2722_v31 = vadd.f32 %v2721_v51, %v2638_v49  ;;  %v2723_v8 = vpop.f32.mrb[25].mxu1  ;;  %v2794_v34 = vpop.f32.mrb[27].mxu0  ;;  %v2793_v43 = vadd.f32 %v2792_v41, %v2646_v13  ;;  %v3020_v49 = vld [vmem:[#allocation12 + $0x8] sm:$0xff]  ;;  %v3022_v41 = vld [vmem:[#allocation12 + $0x18] sm:$0xff] }
 0xf8c   :  { %v2724_v63 = vadd.f32 %v2723_v8, %v2642_v7  ;;  %v2795_v27 = vadd.f32 %v2794_v34, %v2650_v17  ;;  %v3024_v51 = vld [vmem:[#allocation12 + $0x28] sm:$0xff]  ;;  %v3019_v8 = vld [vmem:[#allocation12] sm:$0xff] }
 0xf8d   :  { %v5526_v58 = vmul.f32 -1.442695, %v2722_v31  ;;  %v10670_v7 = vpack.c.bf16 %v3024_v51, %v3020_v49  ;;  %v3026_v31 = vld [vmem:[#allocation12 + $0x38] sm:$0xff]  ;;  %v3023_v34 = vld [vmem:[#allocation12 + $0x20] sm:$0xff] }
 0xf8e   :  { %v5527_v52 = vmul.f32 -1.442695, %v2724_v63  ;;  %v10674_v63 = vpack.c.bf16 %v3023_v34, %v3019_v8  ;;  %v3031_v17 = vld [vmem:[#allocation12 + $0x60] sm:$0xff]  ;;  %v3088_v8 = vld [vmem:[#allocation12 + $0x228] sm:$0xff] }
 0xf8f   :  { %8919 = vpow2.f32 %v5526_v58  ;;  %v10672_v58 = vpack.c.bf16 %v3026_v31, %v3022_v41  ;;  %7939 = vmatprep.subr.bf16.mxu1 %v10670_v7  ;;  %v3075_v49 = vld [vmem:[#allocation12 + $0x1c0] sm:$0xff]  ;;  %v3084_v31 = vld [vmem:[#allocation12 + $0x208] sm:$0xff] }
 0xf90   :  { %8921 = vpow2.f32 %v5527_v52  ;;  %v3028_v52 = vld [vmem:[#allocation12 + $0x48] sm:$0xff]  ;;  %v3079_v51 = vld [vmem:[#allocation12 + $0x1e0] sm:$0xff]  ;;  %v10720_v34 = vpack.c.bf16 %v3088_v8, %v3084_v31 }
 0xf91   :  { %v10717_v41 = vpack.c.bf16 %v3079_v51, %v3075_v49  ;;  %v3124_v51 = vld [vmem:[#allocation12 + $0x348] sm:$0xff] }
 0xf92   :  { %v3128_v31 = vld [vmem:[#allocation12 + $0x368] sm:$0xff] }
 0xf93   :  { %v10750_v8 = vpack.c.bf16 %v3128_v31, %v3124_v51 }
 0xf99   :  { %v8920_v10 = vpop.eup %8919 }
 0xf9a   :  { %v2800_v5 = vadd.f32 1.0, %v8920_v10  ;;  %v8922_v46 = vpop.eup %8921  ;;  %v3032_v10 = vld [vmem:[#allocation12 + $0x68] sm:$0xff] }
 0xf9b   :  { %v2806_v18 = vadd.f32 1.0, %v8922_v46  ;;  %v3027_v46 = vld [vmem:[#allocation12 + $0x40] sm:$0xff] }
 0xf9c   :  { %8923 = vrcp.f32 %v2800_v5  ;;  %v10679_v5 = vpack.c.bf16 %v3032_v10, %v3028_v52  ;;  %v10681_v13 = vpack.c.bf16 %v3031_v17, %v3027_v46  ;;  %v3083_v52 = vld [vmem:[#allocation12 + $0x200] sm:$0xff]  ;;  %v3092_v17 = vld [vmem:[#allocation12 + $0x248] sm:$0xff] }
 0xf9d   :  { %8925 = vrcp.f32 %v2806_v18  ;;  %v3036_v18 = vld [vmem:[#allocation12 + $0x88] sm:$0xff]  ;;  %v3087_v10 = vld [vmem:[#allocation12 + $0x220] sm:$0xff] }
 0xf9e   :  { %v10723_v46 = vpack.c.bf16 %v3087_v10, %v3083_v52  ;;  %v3123_v52 = vld [vmem:[#allocation12 + $0x340] sm:$0xff] }
 0xf9f   :  { %v3127_v10 = vld [vmem:[#allocation12 + $0x360] sm:$0xff] }
 0xfa6   :  { %v8924_v20 = vpop.eup %8923 }
 0xfa7   :  { %v2809_v25 = vmul.f32 %v8924_v20, %v2795_v27  ;;  %v8926_v19 = vpop.eup %8925  ;;  %v3040_v27 = vld [vmem:[#allocation12 + $0xa8] sm:$0xff] }
 0xfa8   :  { %v2812_v37 = vsub.f32 1.0, %v8926_v19  ;;  %v2814_v38 = vmul.f32 %v8926_v19, %v10517_v30  ;;  %v2936_v30 = vld [vmem:[#allocation10 + $0x18] sm:$0xff]  ;;  %v10684_v20 = vpack.c.bf16 %v3040_v27, %v3036_v18  ;;  %v3044_v19 = vld [vmem:[#allocation12 + $0xc8] sm:$0xff] }
 0xfa9   :  { %v2810_v6 = vadd.f32 %v2809_v25, %v2793_v43  ;;  %v10641_v21 = vpack.c.bf16 %v2936_v30, %v2935_v62  ;;  %v3035_v43 = vld [vmem:[#allocation12 + $0x80] sm:$0xff]  ;;  %v10699_v62 = vpack.c.bf16 %v3055_v42, %v3051_v9  ;;  %v3060_v30 = vld [vmem:[#allocation12 + $0x148] sm:$0xff] }
 0xfaa   :  { %v3039_v25 = vld [vmem:[#allocation12 + $0xa0] sm:$0xff]  ;;  %v3096_v18 = vld [vmem:[#allocation12 + $0x268] sm:$0xff] }
 0xfab   :  { %8927 = vtanh.f32 %v2810_v6  ;;  %7919 = vmatpush3.bf16.msra.mxu0 %v10641_v21  ;;  %v10687_v6 = vpack.c.bf16 %v3039_v25, %v3035_v43  ;;  %v10726_v27 = vpack.c.bf16 %v3096_v18, %v3092_v17  ;;  %v3091_v43 = vld [vmem:[#allocation12 + $0x240] sm:$0xff]  ;;  %v3108_v42 = vld [vmem:[#allocation12 + $0x2c8] sm:$0xff]  ;;  %v10753_v17 = vpack.c.bf16 %v3127_v10, %v3123_v52  ;;  %v3021_v52 = vld [vmem:[#allocation12 + $0x10] sm:$0xff] }
 0xfac   :  { %7920 = vmatprep.subr.bf16.mxu0 %v11916_v11  ;;  %v3095_v25 = vld [vmem:[#allocation12 + $0x260] sm:$0xff]  ;;  %v3132_v18 = vld [vmem:[#allocation12 + $0x388] sm:$0xff]  ;;  %v3025_v10 = vld [vmem:[#allocation12 + $0x30] sm:$0xff] }
 0xfb5   :  { %v8928_v12 = vpop.eup %8927 }
 0xfb6   :  { %v2813_v36 = vmul.f32 %v8928_v12, %v2812_v37  ;;  %v3048_v37 = vld [vmem:[#allocation12 + $0xe8] sm:$0xff] }
 0xfb7   :  { %v10690_v12 = vpack.c.bf16 %v3048_v37, %v3044_v19  ;;  %v10729_v19 = vpack.c.bf16 %v3095_v25, %v3091_v43  ;;  %v3100_v37 = vld [vmem:[#allocation12 + $0x288] sm:$0xff] }
 0xfb8   :  { %v10631_v0 = vadd.f32 %v2814_v38, %v2813_v36  ;;  %v3043_v36 = vld [vmem:[#allocation12 + $0xc0] sm:$0xff]  ;;  %v3136_v43 = vld [vmem:[#allocation12 + $0x3a8] sm:$0xff] }
 0xfb9   :  { %v3047_v38 = vld [vmem:[#allocation12 + $0xe0] sm:$0xff]  ;;  %v10756_v25 = vpack.c.bf16 %v3136_v43, %v3132_v18 }
 0xfba   :  { %5930 = vmatmul.mubr.f32.vlgmr.msra.gmra.mrb[26].mxu1 %v10631_v0  ;;  %v10771_v18 = vld [vmem:[#allocation15] sm:$0xff] }
 0xfbb   :  { %3233 = vmatprep.mubr.f32.mxu1 %v10631_v0  ;;  %7941 = vmatpush1.bf16.msra.mxu1 %v10674_v63 }
 0xfbc   :  { %7943 = vmatprep.subr.bf16.mxu1 %v10679_v5 }
 0xfbf   :  { %7945 = vmatpush1.bf16.msra.mxu1 %v10681_v13 }
 0xfc0   :  { %7947 = vmatprep.subr.bf16.mxu1 %v10684_v20 }
 0xfc3   :  { %7949 = vmatpush1.bf16.msra.mxu1 %v10687_v6 }
 0xfc4   :  { %7951 = vmatprep.subr.bf16.mxu1 %v10690_v12 }
0x108d   :  { %v2905_v29 = vpop.f32.mrb[26].mxu1 }
0x108e   :  { %v2906_v54 = vadd.f32 %v10559_v39, %v2905_v29  ;;  %v5931_v47 = vpop.f32.mrb[27].mxu1  ;;  %v2938_v39 = vld [vmem:[#allocation10 + $0x28] sm:$0xff]  ;;  %v10693_v29 = vpack.c.bf16 %v3047_v38, %v3043_v36 }
0x108f   :  { %v10645_v57 = vpack.c.bf16 %v2938_v39, %v2937_v45  ;;  %v3056_v47 = vld [vmem:[#allocation12 + $0x128] sm:$0xff] }
0x1090   :  { %2910 = vst [vmem:[#allocation15 + $0x10] sm:$0xff] %v2906_v54  ;;  %v2911_v60 = vsel %vm1903_vm1, %v2906_v54, -1e+30  ;;  %v3052_v54 = vld [vmem:[#allocation12 + $0x108] sm:$0xff]  ;;  %7953 = vmatpush1.bf16.msra.mxu1 %v10693_v29 }
0x1091   :  { %2912 = vmax.xlane.f32.xlu1 %v2911_v60  ;;  %7922 = vmatpush3.bf16.msra.mxu0 %v10645_v57  ;;  %v3064_v45 = vld [vmem:[#allocation12 + $0x168] sm:$0xff] }
0x1092   :  { %7923 = vmatprep.subr.bf16.mxu0 %v11916_v11  ;;  %v10702_v39 = vpack.c.bf16 %v3064_v45, %v3060_v30  ;;  %v3104_v36 = vld [vmem:[#allocation12 + $0x2a8] sm:$0xff] }
0x1093   :  { %v10732_v38 = vpack.c.bf16 %v3104_v36, %v3100_v37  ;;  %v3112_v30 = vld [vmem:[#allocation12 + $0x2e8] sm:$0xff]  ;;  %v3131_v37 = vld [vmem:[#allocation12 + $0x380] sm:$0xff] }
0x1094   :  { %v10738_v45 = vpack.c.bf16 %v3112_v30, %v3108_v42  ;;  %v3135_v36 = vld [vmem:[#allocation12 + $0x3a0] sm:$0xff]  ;;  %v3144_v42 = vld [vmem:[#allocation12 + $0x3e8] sm:$0xff] }
0x1095   :  { %7925 = vmatpush3.bf16.msra.mxu0 %v10649_v53 }
0x1096   :  { %7926 = vmatprep.subr.bf16.mxu0 %v11916_v11 }
0x1099   :  { %7928 = vmatpush3.bf16.msra.mxu0 %v10653_v50 }
0x109a   :  { %7929 = vmatprep.subr.bf16.mxu0 %v11916_v11 }
0x109d   :  { %7931 = vmatpush3.bf16.msra.mxu0 %v10657_v55 }
0x109e   :  { %7932 = vmatprep.subr.bf16.mxu0 %v11916_v11 }
0x10a1   :  { %7934 = vmatpush3.bf16.msra.mxu0 %v10661_v28 }
0x10a2   :  { %7935 = vmatprep.subr.bf16.mxu0 %v11916_v11 }
0x10a5   :  { %7937 = vmatpush3.bf16.msra.mxu0 %v10667_v15 }
0x10a6   :  { %8003 = vmatprep.subr.bf16.mxu0 %v10672_v58 }
0x111e   :  { %v2913_v44 = vpop.xlane.xlu1 %2912 }
0x111f   :  { %vm2914_vm4 = vcmp.eq.f32.partialorder %v2911_v60, %v2913_v44  ;;  %v10696_v60 = vpack.c.bf16 %v3056_v47, %v3052_v54  ;;  %v10711_v44 = vpack.c.bf16 %v3071_v35, %v3067_v26  ;;  %v3099_v54 = vld [vmem:[#allocation12 + $0x280] sm:$0xff]  ;;  %v3120_v26 = vld [vmem:[#allocation12 + $0x328] sm:$0xff] }
0x1120   :  { %v2915_v14 = vsel %vm2914_vm4, %v10566_v32, 128.0  ;;  %v3103_v47 = vld [vmem:[#allocation12 + $0x2a0] sm:$0xff]  ;;  %v10744_v35 = vpack.c.bf16 %v3120_v26, %v3116_v2  ;;  %v10765_v2 = vpack.c.bf16 %v3143_v16, %v3139_v4  ;;  %v2926_v26 = vld [vmem:[#allocation7 + $0x10] sm:$0xff] }
0x1121   :  { %2916 = vmin.xlane.f32.xlu1 %v2915_v14  ;;  %7955 = vmatprep.subr.bf16.mxu1 %v10696_v60  ;;  %v3076_v14 = vld [vmem:[#allocation12 + $0x1c8] sm:$0xff]  ;;  %v10735_v9 = vpack.c.bf16 %v3103_v47, %v3099_v54  ;;  %v10759_v54 = vpack.c.bf16 %v3135_v36, %v3131_v37  ;;  %v3030_v37 = vld [vmem:[#allocation12 + $0x58] sm:$0xff] }
0x1122   :  { %7957 = vmatpush1.bf16.msra.mxu1 %v10699_v62  ;;  %v10714_v3 = vpack.c.bf16 %v3080_v40, %v3076_v14  ;;  %v3115_v14 = vld [vmem:[#allocation12 + $0x300] sm:$0xff]  ;;  %v3140_v47 = vld [vmem:[#allocation12 + $0x3c8] sm:$0xff]  ;;  %11957 = vst [vmem:[#allocation46_spill] sm:$0xff] %v10765_v2  ;;  %v3034_v36 = vld [vmem:[#allocation12 + $0x78] sm:$0xff] }
0x1123   :  { %7959 = vmatprep.subr.bf16.mxu1 %v10702_v39  ;;  %v3119_v40 = vld [vmem:[#allocation12 + $0x320] sm:$0xff]  ;;  %v10762_v30 = vpack.c.bf16 %v3144_v42, %v3140_v47  ;;  %v10774_v42 = vpack.c.bf16 %v3025_v10, %v3021_v52  ;;  %v10776_v16 = vpack.c.bf16 %v3034_v36, %v3030_v37  ;;  %v3041_v52 = vld [vmem:[#allocation12 + $0xb0] sm:$0xff]  ;;  %v3050_v10 = vld [vmem:[#allocation12 + $0xf8] sm:$0xff] }
0x1124   :  { %v10747_v49 = vpack.c.bf16 %v3119_v40, %v3115_v14  ;;  %v2927_v14 = vstv %s2924_s30  ;;  %v2930_v40 = vstv %s2929_s23  ;;  %v3045_v36 = vld [vmem:[#allocation12 + $0xd0] sm:$0xff]  ;;  %s5550_s30 = sld [smem:[#allocation3 + $0x6]] }
0x1125   :  { %11956 = vst [vmem:[#allocation48_spill] sm:$0xff] %v10762_v30  ;;  %v2928_v31 = vmul.f32 %v2927_v14, %v2926_v26  ;;  %v3042_v26 = vld [vmem:[#allocation12 + $0xb8] sm:$0xff] }
0x1126   :  { %7961 = vmatpush1.bf16.msra.mxu1 %v10705_v22 }
0x1127   :  { %7963 = vmatprep.subr.bf16.mxu1 %v10708_v33 }
0x112a   :  { %7965 = vmatpush1.bf16.msra.mxu1 %v10711_v44  ;;  %p4978_p0 = scmp.gt.s32.totalorder %s5550_s30, 0 }
0x112b   :  { %7967 = vmatprep.subr.bf16.mxu1 %v10714_v3 }
0x112c   :  { %s4979_s23 = scalar_select %p4978_p0, 1, 0 }
0x112e   :  { %7969 = vmatpush1.bf16.msra.mxu1 %v10717_v41  ;;  %s4980_s25 = scvt.s32.f32 %s4979_s23 }
0x112f   :  { %7971 = vmatprep.subr.bf16.mxu1 %v10720_v34 }
0x1130   :  { %s4985_s27 = ssub.f32 1.0, %s4980_s25 }
0x1132   :  { %7973 = vmatpush1.bf16.msra.mxu1 %v10723_v46 }
0x1133   :  { %7975 = vmatprep.subr.bf16.mxu1 %v10726_v27 }
0x1136   :  { %7977 = vmatpush1.bf16.msra.mxu1 %v10729_v19 }
0x1137   :  { %7979 = vmatprep.subr.bf16.mxu1 %v10732_v38 }
0x113a   :  { %7981 = vmatpush1.bf16.msra.mxu1 %v10735_v9 }
0x113b   :  { %7983 = vmatprep.subr.bf16.mxu1 %v10738_v45 }
0x113e   :  { %7985 = vmatpush1.bf16.msra.mxu1 %v10741_v24 }
0x113f   :  { %7987 = vmatprep.subr.bf16.mxu1 %v10744_v35 }
0x1142   :  { %7989 = vmatpush1.bf16.msra.mxu1 %v10747_v49 }
0x1143   :  { %7991 = vmatprep.subr.bf16.mxu1 %v10750_v8 }
0x1146   :  { %7993 = vmatpush1.bf16.msra.mxu1 %v10753_v17 }
0x1147   :  { %7995 = vmatprep.subr.bf16.mxu1 %v10756_v25 }
0x114a   :  { %7997 = vmatpush1.bf16.msra.mxu1 %v10759_v54 }
0x114b   :  { %7999 = vmatprep.subr.bf16.mxu1 %v10762_v30  ;;  %v3038_v30 = vld [vmem:[#allocation12 + $0x98] sm:$0xff] }
0x114e   :  { %8001 = vmatpush1.bf16.msra.mxu1 %v10765_v2  ;;  %v3033_v2 = vld [vmem:[#allocation12 + $0x70] sm:$0xff] }
0x114f   :  { %8066 = vmatprep.subr.bf16.mxu1 %v11916_v11  ;;  %v10780_v14 = vpack.c.bf16 %v3033_v2, %v3029_v61  ;;  %v3054_v61 = vld [vmem:[#allocation12 + $0x118] sm:$0xff] }
0x1150   :  { %v3058_v2 = vld [vmem:[#allocation12 + $0x138] sm:$0xff] }
0x1151   :  { %11958 = vst [vmem:[#allocation22_spill] sm:$0xff] %v10780_v14 }
0x11ae   :  { %v2917_v51 = vpop.xlane.xlu1 %2916 }
0x11af   :  { %vm2918_vm5 = vcmp.eq.f32.partialorder %v10566_v32, %v2917_v51  ;;  %v10783_v51 = vpack.c.bf16 %v3042_v26, %v3038_v30  ;;  %v3053_v26 = vld [vmem:[#allocation12 + $0x110] sm:$0xff] }
0x11b0   :  { %v5529_v43 = vsel %vm2918_vm5, 1.0, %v10771_v18 }
0x11b1   :  { %v2931_v47 = vmul.f32 %v5529_v43, %v2930_v40  ;;  %11959 = vst [vmem:[#allocation23_spill] sm:$0xff] %v10783_v51  ;;  %v3037_v40 = vld [vmem:[#allocation12 + $0x90] sm:$0xff] }
0x11b2   :  { %v10786_v43 = vpack.c.bf16 %v3041_v52, %v3037_v40  ;;  %v3062_v40 = vld [vmem:[#allocation12 + $0x158] sm:$0xff] }
0x11b3   :  { %v2932_v4 = vadd.f32 %v2931_v47, %v2928_v31  ;;  %v3046_v31 = vld [vmem:[#allocation12 + $0xd8] sm:$0xff]  ;;  %v3049_v47 = vld [vmem:[#allocation12 + $0xf0] sm:$0xff] }
0x11b4   :  { %11960 = vst [vmem:[#allocation31_spill] sm:$0xff] %v10786_v43  ;;  %v10789_v37 = vpack.c.bf16 %v3050_v10, %v3046_v31  ;;  %v10792_v30 = vpack.c.bf16 %v3049_v47, %v3045_v36  ;;  %v3066_v52 = vld [vmem:[#allocation12 + $0x178] sm:$0xff] }
0x11b5   :  { %5965 = vmatmul.mubr.f32.vlgmr.msra.gmra.mrb[28].mxu0 %v2932_v4  ;;  %v10795_v4 = vpack.c.bf16 %v3058_v2, %v3054_v61  ;;  %v10801_v10 = vpack.c.bf16 %v3066_v52, %v3062_v40  ;;  %v3070_v36 = vld [vmem:[#allocation12 + $0x198] sm:$0xff] }
0x11b6   :  { %3304 = vmatprep.mubr.f32.mxu0 %v10631_v0  ;;  %8005 = vmatpush1.bf16.msra.mxu0 %v10774_v42  ;;  %11961 = vst [vmem:[#allocation24_spill] sm:$0xff] %v10789_v37  ;;  %11962 = vst [vmem:[#allocation34_spill] sm:$0xff] %v10792_v30  ;;  %v3074_v47 = vld [vmem:[#allocation12 + $0x1b8] sm:$0xff] }
0x11b7   :  { %8007 = vmatprep.subr.bf16.mxu0 %v10776_v16  ;;  %11963 = vst [vmem:[#allocation25_spill] sm:$0xff] %v10795_v4  ;;  %11965 = vst [vmem:[#allocation28_spill] sm:$0xff] %v10801_v10  ;;  %v10807_v2 = vpack.c.bf16 %v3074_v47, %v3070_v36 }
0x11b9   :  { %11967 = vst [vmem:[#allocation29_spill] sm:$0xff] %v10807_v2 }
0x11ba   :  { %8009 = vmatpush1.bf16.msra.mxu0 %v10780_v14  ;;  %v3057_v14 = vld [vmem:[#allocation12 + $0x130] sm:$0xff] }
0x11bb   :  { %8011 = vmatprep.subr.bf16.mxu0 %v10783_v51  ;;  %v10798_v31 = vpack.c.bf16 %v3057_v14, %v3053_v26  ;;  %v3061_v51 = vld [vmem:[#allocation12 + $0x150] sm:$0xff]  ;;  %v3078_v14 = vld [vmem:[#allocation12 + $0x1d8] sm:$0xff] }
0x11bc   :  { %v3082_v26 = vld [vmem:[#allocation12 + $0x1f8] sm:$0xff] }
0x11bd   :  { %11964 = vst [vmem:[#allocation35_spill] sm:$0xff] %v10798_v31  ;;  %v10813_v52 = vpack.c.bf16 %v3082_v26, %v3078_v14 }
0x11be   :  { %8013 = vmatpush1.bf16.msra.mxu0 %v10786_v43  ;;  %v3065_v43 = vld [vmem:[#allocation12 + $0x170] sm:$0xff] }
0x11bf   :  { %8015 = vmatprep.subr.bf16.mxu0 %v10789_v37  ;;  %v10804_v61 = vpack.c.bf16 %v3065_v43, %v3061_v51  ;;  %v3069_v37 = vld [vmem:[#allocation12 + $0x190] sm:$0xff]  ;;  %11969 = vst [vmem:[#allocation32_spill] sm:$0xff] %v10813_v52  ;;  %v3086_v51 = vld [vmem:[#allocation12 + $0x218] sm:$0xff] }
0x11c0   :  { %v3090_v43 = vld [vmem:[#allocation12 + $0x238] sm:$0xff] }
0x11c1   :  { %11966 = vst [vmem:[#allocation38_spill] sm:$0xff] %v10804_v61  ;;  %v10819_v47 = vpack.c.bf16 %v3090_v43, %v3086_v51 }
0x11c2   :  { %8017 = vmatpush1.bf16.msra.mxu0 %v10792_v30  ;;  %v3073_v30 = vld [vmem:[#allocation12 + $0x1b0] sm:$0xff] }
0x11c3   :  { %8019 = vmatprep.subr.bf16.mxu0 %v10795_v4  ;;  %v10810_v40 = vpack.c.bf16 %v3073_v30, %v3069_v37  ;;  %v3077_v4 = vld [vmem:[#allocation12 + $0x1d0] sm:$0xff]  ;;  %11971 = vst [vmem:[#allocation33_spill] sm:$0xff] %v10819_v47  ;;  %v3094_v37 = vld [vmem:[#allocation12 + $0x258] sm:$0xff] }
0x11c4   :  { %v3098_v30 = vld [vmem:[#allocation12 + $0x278] sm:$0xff] }
0x11c5   :  { %11968 = vst [vmem:[#allocation39_spill] sm:$0xff] %v10810_v40  ;;  %v10825_v26 = vpack.c.bf16 %v3098_v30, %v3094_v37 }
0x11c6   :  { %8021 = vmatpush1.bf16.msra.mxu0 %v10798_v31  ;;  %v3081_v31 = vld [vmem:[#allocation12 + $0x1f0] sm:$0xff] }
0x11c7   :  { %8023 = vmatprep.subr.bf16.mxu0 %v10801_v10  ;;  %v10816_v36 = vpack.c.bf16 %v3081_v31, %v3077_v4  ;;  %v3085_v10 = vld [vmem:[#allocation12 + $0x210] sm:$0xff]  ;;  %11973 = vst [vmem:[#allocation36_spill] sm:$0xff] %v10825_v26  ;;  %v3102_v4 = vld [vmem:[#allocation12 + $0x298] sm:$0xff] }
0x11c8   :  { %v3106_v31 = vld [vmem:[#allocation12 + $0x2b8] sm:$0xff] }
0x11c9   :  { %11970 = vst [vmem:[#allocation41_spill] sm:$0xff] %v10816_v36  ;;  %v10831_v43 = vpack.c.bf16 %v3106_v31, %v3102_v4 }
0x11ca   :  { %8025 = vmatpush1.bf16.msra.mxu0 %v10804_v61  ;;  %v3089_v61 = vld [vmem:[#allocation12 + $0x230] sm:$0xff] }
0x11cb   :  { %8027 = vmatprep.subr.bf16.mxu0 %v10807_v2  ;;  %v10822_v14 = vpack.c.bf16 %v3089_v61, %v3085_v10  ;;  %v3093_v2 = vld [vmem:[#allocation12 + $0x250] sm:$0xff]  ;;  %11975 = vst [vmem:[#allocation37_spill] sm:$0xff] %v10831_v43  ;;  %v3110_v10 = vld [vmem:[#allocation12 + $0x2d8] sm:$0xff] }
0x11cc   :  { %v3114_v61 = vld [vmem:[#allocation12 + $0x2f8] sm:$0xff] }
0x11cd   :  { %11972 = vst [vmem:[#allocation42_spill] sm:$0xff] %v10822_v14  ;;  %v10837_v30 = vpack.c.bf16 %v3114_v61, %v3110_v10 }
0x11ce   :  { %8029 = vmatpush1.bf16.msra.mxu0 %v10810_v40  ;;  %v3097_v40 = vld [vmem:[#allocation12 + $0x270] sm:$0xff] }
0x11cf   :  { %8031 = vmatprep.subr.bf16.mxu0 %v10813_v52  ;;  %v10828_v51 = vpack.c.bf16 %v3097_v40, %v3093_v2  ;;  %v3101_v52 = vld [vmem:[#allocation12 + $0x290] sm:$0xff]  ;;  %11977 = vst [vmem:[#allocation40_spill] sm:$0xff] %v10837_v30  ;;  %v3118_v2 = vld [vmem:[#allocation12 + $0x318] sm:$0xff] }
0x11d0   :  { %v3122_v40 = vld [vmem:[#allocation12 + $0x338] sm:$0xff] }
0x11d1   :  { %11974 = vst [vmem:[#allocation43_spill] sm:$0xff] %v10828_v51  ;;  %v10843_v31 = vpack.c.bf16 %v3122_v40, %v3118_v2 }
0x11d2   :  { %8033 = vmatpush1.bf16.msra.mxu0 %v10816_v36  ;;  %v3105_v36 = vld [vmem:[#allocation12 + $0x2b0] sm:$0xff] }
0x11d3   :  { %8035 = vmatprep.subr.bf16.mxu0 %v10819_v47  ;;  %v10834_v37 = vpack.c.bf16 %v3105_v36, %v3101_v52  ;;  %v3109_v47 = vld [vmem:[#allocation12 + $0x2d0] sm:$0xff]  ;;  %11979 = vst [vmem:[#allocation30_spill] sm:$0xff] %v10843_v31  ;;  %v3126_v52 = vld [vmem:[#allocation12 + $0x358] sm:$0xff] }
0x11d4   :  { %v3130_v36 = vld [vmem:[#allocation12 + $0x378] sm:$0xff] }
0x11d5   :  { %11976 = vst [vmem:[#allocation44_spill] sm:$0xff] %v10834_v37  ;;  %v10849_v61 = vpack.c.bf16 %v3130_v36, %v3126_v52 }
0x11d6   :  { %8037 = vmatpush1.bf16.msra.mxu0 %v10822_v14  ;;  %v3113_v14 = vld [vmem:[#allocation12 + $0x2f0] sm:$0xff] }
0x11d7   :  { %8039 = vmatprep.subr.bf16.mxu0 %v10825_v26  ;;  %v10840_v4 = vpack.c.bf16 %v3113_v14, %v3109_v47  ;;  %v3117_v26 = vld [vmem:[#allocation12 + $0x310] sm:$0xff]  ;;  %v3134_v47 = vld [vmem:[#allocation12 + $0x398] sm:$0xff] }
0x11d8   :  { %v3138_v14 = vld [vmem:[#allocation12 + $0x3b8] sm:$0xff] }
0x11d9   :  { %11978 = vst [vmem:[#allocation45_spill] sm:$0xff] %v10840_v4  ;;  %v10855_v40 = vpack.c.bf16 %v3138_v14, %v3134_v47  ;;  %v3339_v14 = vld [vmem:[#allocation13 + $0x48] sm:$0xff] }
0x11da   :  { %8041 = vmatpush1.bf16.msra.mxu0 %v10828_v51  ;;  %v3121_v51 = vld [vmem:[#allocation12 + $0x330] sm:$0xff] }
0x11db   :  { %8043 = vmatprep.subr.bf16.mxu0 %v10831_v43  ;;  %v10846_v10 = vpack.c.bf16 %v3121_v51, %v3117_v26  ;;  %v3125_v43 = vld [vmem:[#allocation12 + $0x350] sm:$0xff]  ;;  %v3142_v26 = vld [vmem:[#allocation12 + $0x3d8] sm:$0xff] }
0x11dc   :  { %v3146_v51 = vld [vmem:[#allocation12 + $0x3f8] sm:$0xff] }
0x11dd   :  { %11980 = vst [vmem:[#allocation49_spill] sm:$0xff] %v10846_v10  ;;  %v10861_v36 = vpack.c.bf16 %v3146_v51, %v3142_v26  ;;  %v3340_v51 = vld [vmem:[#allocation13 + $0x50] sm:$0xff] }
0x11de   :  { %8045 = vmatpush1.bf16.msra.mxu0 %v10834_v37  ;;  %v3129_v37 = vld [vmem:[#allocation12 + $0x370] sm:$0xff] }
0x11df   :  { %8047 = vmatprep.subr.bf16.mxu0 %v10837_v30  ;;  %v10852_v2 = vpack.c.bf16 %v3129_v37, %v3125_v43  ;;  %v3133_v30 = vld [vmem:[#allocation12 + $0x390] sm:$0xff] }
0x11e2   :  { %8049 = vmatpush1.bf16.msra.mxu0 %v10840_v4  ;;  %v3137_v4 = vld [vmem:[#allocation12 + $0x3b0] sm:$0xff] }
0x11e3   :  { %8051 = vmatprep.subr.bf16.mxu0 %v10843_v31  ;;  %v10858_v52 = vpack.c.bf16 %v3137_v4, %v3133_v30  ;;  %v3141_v31 = vld [vmem:[#allocation12 + $0x3d0] sm:$0xff]  ;;  %v3337_v4 = vld [vmem:[#allocation13 + $0x38] sm:$0xff] }
0x11e6   :  { %8053 = vmatpush1.bf16.msra.mxu0 %v10846_v10  ;;  %v3145_v10 = vld [vmem:[#allocation12 + $0x3f0] sm:$0xff] }
0x11e7   :  { %8055 = vmatprep.subr.bf16.mxu0 %v10849_v61  ;;  %v10864_v43 = vpack.c.bf16 %v3145_v10, %v3141_v31  ;;  %v3338_v10 = vld [vmem:[#allocation13 + $0x40] sm:$0xff] }
0x11e8   :  { %v10905_v26 = vpack.c.bf16 %v3339_v14, %v3338_v10 }
0x11ea   :  { %8057 = vmatpush1.bf16.msra.mxu0 %v10852_v2  ;;  %11984 = vst [vmem:[#allocation53_spill] sm:$0xff] %v10905_v26 }
0x11eb   :  { %8059 = vmatprep.subr.bf16.mxu0 %v10855_v40 }
0x11ee   :  { %8061 = vmatpush1.bf16.msra.mxu0 %v10858_v52 }
0x11ef   :  { %8063 = vmatprep.subr.bf16.mxu0 %v10861_v36 }
0x11f2   :  { %8065 = vmatpush1.bf16.msra.mxu0 %v10864_v43 }
0x11f3   :  { %8090 = vmatprep.subr.bf16.mxu0 %v11916_v11 }
0x1288   :  { %v3015_v37 = vpop.f32.mrb[28].mxu0 }
0x1289   :  { %v5966_v47 = vpop.f32.mrb[29].mxu0  ;;  %3234 = vmatmul.mubr.f32.vlgmr.msra.gmra.mrb[28].mxu1 %v3015_v37  ;;  %3305 = vmatmul.mubr.f32.vlgmr.msra.gmra.mrb[30].mxu0 %v3015_v37  ;;  %v3341_v37 = vld [vmem:[#allocation13 + $0x58] sm:$0xff] }
0x128a   :  { %5999 = vmatprep.mubr.msk.f32.mxu1 %vm9172_vm0, %v10771_v18  ;;  %8092 = vmatpush3.bf16.msra.mxu0 %v10638_v56  ;;  %v3330_v56 = vld [vmem:[#allocation13] sm:$0xff]  ;;  %v10909_v47 = vpack.c.bf16 %v3341_v37, %v3340_v51 }
0x128b   :  { %8093 = vmatprep.subr.bf16.mxu0 %v11916_v11  ;;  %6034 = vmatprep.mubr.msk.f32.mxu0 %vm9172_vm0, %v10771_v18 }
0x128c   :  { %11985 = vst [vmem:[#allocation54_spill] sm:$0xff] %v10909_v47 }
0x128e   :  { %8095 = vmatpush3.bf16.msra.mxu0 %v10641_v21  ;;  %v3331_v21 = vld [vmem:[#allocation13 + $0x8] sm:$0xff] }
0x128f   :  { %8096 = vmatprep.subr.bf16.mxu0 %v11916_v11 }
0x1292   :  { %8098 = vmatpush3.bf16.msra.mxu0 %v10645_v57  ;;  %v10889_v57 = vpack.c.bf16 %v3331_v21, %v3330_v56  ;;  %v3342_v56 = vld [vmem:[#allocation13 + $0x60] sm:$0xff]  ;;  %v3343_v21 = vld [vmem:[#allocation13 + $0x68] sm:$0xff] }
0x1293   :  { %8099 = vmatprep.subr.bf16.mxu0 %v11916_v11 }
0x1294   :  { %8068 = vmatpush3.bf16.msra.mxu1 %v10889_v57 }
0x1295   :  { %8069 = vmatprep.subr.bf16.mxu1 %v11916_v11 }
0x1296   :  { %8101 = vmatpush3.bf16.msra.mxu0 %v10649_v53  ;;  %v3332_v53 = vld [vmem:[#allocation13 + $0x10] sm:$0xff] }
0x1297   :  { %8102 = vmatprep.subr.bf16.mxu0 %v11916_v11 }
0x129a   :  { %8104 = vmatpush3.bf16.msra.mxu0 %v10653_v50  ;;  %v3333_v50 = vld [vmem:[#allocation13 + $0x18] sm:$0xff] }
0x129b   :  { %8105 = vmatprep.subr.bf16.mxu0 %v11916_v11 }
0x129e   :  { %8107 = vmatpush3.bf16.msra.mxu0 %v10657_v55  ;;  %v10893_v55 = vpack.c.bf16 %v3333_v50, %v3332_v53  ;;  %v10912_v53 = vpack.c.bf16 %v3343_v21, %v3342_v56  ;;  %v3344_v50 = vld [vmem:[#allocation13 + $0x70] sm:$0xff] }
0x129f   :  { %8108 = vmatprep.subr.bf16.mxu0 %v11916_v11 }
0x12a0   :  { %11981 = vst [vmem:[#allocation50_spill] sm:$0xff] %v10893_v55  ;;  %8071 = vmatpush3.bf16.msra.mxu1 %v10893_v55  ;;  %11986 = vst [vmem:[#allocation55_spill] sm:$0xff] %v10912_v53 }
0x12a1   :  { %8072 = vmatprep.subr.bf16.mxu1 %v11916_v11 }
0x12a2   :  { %8110 = vmatpush3.bf16.msra.mxu0 %v10661_v28  ;;  %v3334_v28 = vld [vmem:[#allocation13 + $0x20] sm:$0xff] }
0x12a3   :  { %8111 = vmatprep.subr.bf16.mxu0 %v11916_v11 }
0x12a6   :  { %8113 = vmatpush3.bf16.msra.mxu0 %v10667_v15  ;;  %v3335_v15 = vld [vmem:[#allocation13 + $0x28] sm:$0xff] }
0x12a7   :  { %8179 = vmatprep.subr.bf16.mxu0 %v10672_v58  ;;  %v10897_v30 = vpack.c.bf16 %v3335_v15, %v3334_v28  ;;  %v3336_v58 = vld [vmem:[#allocation13 + $0x30] sm:$0xff]  ;;  %v3345_v28 = vld [vmem:[#allocation13 + $0x78] sm:$0xff] }
0x12a8   :  { %v10901_v31 = vpack.c.bf16 %v3337_v4, %v3336_v58  ;;  %v10916_v15 = vpack.c.bf16 %v3345_v28, %v3344_v50  ;;  %v3147_v58 = vld [vmem:[%s11504_s7] sm:$0xf] }
0x12a9   :  { %11982 = vst [vmem:[#allocation51_spill] sm:$0xff] %v10897_v30  ;;  %8074 = vmatpush3.bf16.msra.mxu1 %v10897_v30  ;;  %v3152_v4 = vrot.slane %v3147_v58, %v11954_v1  ;;  %v3156_v51 = vrot.slane %v3147_v58, %v11955_v59  ;;  %v3160_v1 = vrot.slane %v3147_v58, %v11920_v48 }
0x12aa   :  { %8075 = vmatprep.subr.bf16.mxu1 %v11916_v11  ;;  %11983 = vst [vmem:[#allocation52_spill] sm:$0xff] %v10901_v31  ;;  %11987 = vst [vmem:[#allocation56_spill] sm:$0xff] %v10916_v15 }
0x12ad   :  { %8077 = vmatpush3.bf16.msra.mxu1 %v10901_v31 }
0x12ae   :  { %8078 = vmatprep.subr.bf16.mxu1 %v11916_v11 }
0x12b1   :  { %8080 = vmatpush3.bf16.msra.mxu1 %v10905_v26  ;;  %v3164_v26 = vrot.slane %v3147_v58, %v11919_v23  ;;  %v12012_v58 = vld [vmem:[#allocation30_spill] sm:$0xff] }
0x12b2   :  { %8081 = vmatprep.subr.bf16.mxu1 %v11916_v11 }
0x12b5   :  { %8083 = vmatpush3.bf16.msra.mxu1 %v10909_v47 }
0x12b6   :  { %8084 = vmatprep.subr.bf16.mxu1 %v11916_v11 }
0x12b9   :  { %8086 = vmatpush3.bf16.msra.mxu1 %v10912_v53 }
0x12ba   :  { %8087 = vmatprep.subr.bf16.mxu1 %v11916_v11 }
0x12bd   :  { %8089 = vmatpush3.bf16.msra.mxu1 %v10916_v15 }
0x12be   :  { %8115 = vmatprep.subr.bf16.mxu1 %v10670_v7 }
0x135c   :  { %v3235_v10 = vpop.f32.mrb[28].mxu1  ;;  %v3306_v14 = vpop.f32.mrb[30].mxu0 }
0x135d   :  { %v3236_v37 = vadd.f32 %v3235_v10, %v3152_v4  ;;  %v3237_v56 = vpop.f32.mrb[29].mxu1  ;;  %v3308_v21 = vpop.f32.mrb[31].mxu0  ;;  %v3307_v59 = vadd.f32 %v3306_v14, %v3160_v1  ;;  %v11988_v1 = vld [vmem:[#allocation48_spill] sm:$0xff]  ;;  %v12013_v14 = vld [vmem:[#allocation49_spill] sm:$0xff] }
0x135e   :  { %v3238_v28 = vadd.f32 %v3237_v56, %v3156_v51  ;;  %v3309_v30 = vadd.f32 %v3308_v21, %v3164_v26  ;;  %v12010_v26 = vld [vmem:[#allocation40_spill] sm:$0xff] }
0x135f   :  { %v5531_v50 = vmul.f32 -1.442695, %v3236_v37 }
0x1360   :  { %v5532_v53 = vmul.f32 -1.442695, %v3238_v28 }
0x1361   :  { %8929 = vpow2.f32 %v5531_v50 }
0x1362   :  { %8931 = vpow2.f32 %v5532_v53 }
0x136b   :  { %v8930_v15 = vpop.eup %8929 }
0x136c   :  { %v3314_v7 = vadd.f32 1.0, %v8930_v15  ;;  %v8932_v47 = vpop.eup %8931 }
0x136d   :  { %v3320_v31 = vadd.f32 1.0, %v8932_v47  ;;  %v12011_v47 = vld [vmem:[#allocation45_spill] sm:$0xff] }
0x136e   :  { %8933 = vrcp.f32 %v3314_v7  ;;  %v12021_v7 = vld [vmem:[#allocation26_spill] sm:$0xff] }
0x136f   :  { %8935 = vrcp.f32 %v3320_v31  ;;  %v12009_v31 = vld [vmem:[#allocation44_spill] sm:$0xff] }
0x1378   :  { %v8934_v55 = vpop.eup %8933 }
0x1379   :  { %v3323_v4 = vmul.f32 %v8934_v55, %v3309_v30  ;;  %v8936_v51 = vpop.eup %8935  ;;  %v12007_v55 = vld [vmem:[#allocation43_spill] sm:$0xff]  ;;  %v12008_v30 = vld [vmem:[#allocation37_spill] sm:$0xff] }
0x137a   :  { %v3326_v37 = vsub.f32 1.0, %v8936_v51  ;;  %v3328_v15 = vmul.f32 %v8936_v51, %v10631_v0  ;;  %v10968_v0 = vld [vmem:[%s11506_s9] ss:$0 sm:$0xff] }
0x137b   :  { %v3324_v10 = vadd.f32 %v3323_v4, %v3307_v59  ;;  %v11989_v59 = vld [vmem:[#allocation46_spill] sm:$0xff] }
0x137d   :  { %8937 = vtanh.f32 %v3324_v10 }
0x1387   :  { %v8938_v56 = vpop.eup %8937 }
0x1388   :  { %v3327_v53 = vmul.f32 %v8938_v56, %v3326_v37  ;;  %v12022_v37 = vld [vmem:[#allocation27_spill] sm:$0xff] }
0x138a   :  { %v10929_v50 = vadd.f32 %v3328_v15, %v3327_v53 }
0x138c   :  { %6000 = vmatmul.mubr.f32.vlgmr.msra.gmra.mrb[30].mxu1 %v10929_v50 }
0x138d   :  { %3747 = vmatprep.mubr.f32.mxu1 %v10929_v50  ;;  %8117 = vmatpush1.bf16.msra.mxu1 %v10674_v63 }
0x138e   :  { %8119 = vmatprep.subr.bf16.mxu1 %v10679_v5 }
0x1391   :  { %8121 = vmatpush1.bf16.msra.mxu1 %v10681_v13 }
0x1392   :  { %8123 = vmatprep.subr.bf16.mxu1 %v10684_v20  ;;  %v4057_v20 = vld [vmem:[#allocation12 + $0x50] sm:$0xff] }
0x1395   :  { %8125 = vmatpush1.bf16.msra.mxu1 %v10687_v6 }
0x1396   :  { %8127 = vmatprep.subr.bf16.mxu1 %v10690_v12 }
0x1399   :  { %8129 = vmatpush1.bf16.msra.mxu1 %v10693_v29 }
0x139a   :  { %8131 = vmatprep.subr.bf16.mxu1 %v10696_v60  ;;  %v3440_v60 = vld [vmem:[#allocation7 + $0x18] sm:$0xff] }
0x139d   :  { %8133 = vmatpush1.bf16.msra.mxu1 %v10699_v62  ;;  %v3441_v62 = vstv %s3438_s11  ;;  %s5486_s11 = sshll.u32 %s9173_s0, 4  ;;  %s5487_s11 = int_to_ptr.vmem [resolvable:$true] %s5486_s11 }
0x139e   :  { %8135 = vmatprep.subr.bf16.mxu1 %v10702_v39  ;;  %v3444_v39 = vstv %s3443_s12  ;;  %s9125_s12 = scalar_lea.vmem %s5487_s11, 1024  ;;  %p9130_p2 = scmp.lt.s32.totalorder %s5487_s11, %s5487_s11 }
0x139f   :  { %p9126_p1 = scmp.ne.s32.totalorder %s5487_s11, %s9125_s12  ;;  %p9131_p3 = scmp.lt.s32.totalorder %s9125_s12, %s9125_s12 }
0x13a1   :  { %8137 = vmatpush1.bf16.msra.mxu1 %v10705_v22  ;;  %p9132_p4 = por %p9131_p3, %p9130_p2 }
0x13a2   :  { %8139 = vmatprep.subr.bf16.mxu1 %v10708_v33  ;;  %v3442_v33 = vmul.f32 %v3441_v62, %v3440_v60 }
0x13a3   :  { %p9133_p5 = pnand %p9132_p4, %p9126_p1 }
0x13a5   :  { %8141 = vmatpush1.bf16.msra.mxu1 %v10711_v44 }
0x13a6   :  { %8143 = vmatprep.subr.bf16.mxu1 %v10714_v3 }
0x13a9   :  { %8145 = vmatpush1.bf16.msra.mxu1 %v10717_v41 }
0x13aa   :  { %8147 = vmatprep.subr.bf16.mxu1 %v10720_v34  ;;  %v11991_v34 = vld [vmem:[#allocation22_spill] sm:$0xff] }
0x13ad   :  { %8149 = vmatpush1.bf16.msra.mxu1 %v10723_v46  ;;  %v11992_v46 = vld [vmem:[#allocation23_spill] sm:$0xff] }
0x13ae   :  { %8151 = vmatprep.subr.bf16.mxu1 %v10726_v27  ;;  %v11993_v27 = vld [vmem:[#allocation31_spill] sm:$0xff] }
0x13b1   :  { %8153 = vmatpush1.bf16.msra.mxu1 %v10729_v19  ;;  %v11994_v19 = vld [vmem:[#allocation24_spill] sm:$0xff] }
0x13b2   :  { %8155 = vmatprep.subr.bf16.mxu1 %v10732_v38  ;;  %v11995_v38 = vld [vmem:[#allocation34_spill] sm:$0xff] }
0x13b5   :  { %8157 = vmatpush1.bf16.msra.mxu1 %v10735_v9  ;;  %v11996_v9 = vld [vmem:[#allocation25_spill] sm:$0xff] }
0x13b6   :  { %8159 = vmatprep.subr.bf16.mxu1 %v10738_v45  ;;  %v11997_v45 = vld [vmem:[#allocation35_spill] sm:$0xff] }
0x13b9   :  { %8161 = vmatpush1.bf16.msra.mxu1 %v10741_v24  ;;  %v11998_v24 = vld [vmem:[#allocation28_spill] sm:$0xff] }
0x13ba   :  { %8163 = vmatprep.subr.bf16.mxu1 %v10744_v35  ;;  %v11999_v35 = vld [vmem:[#allocation38_spill] sm:$0xff] }
0x13bd   :  { %8165 = vmatpush1.bf16.msra.mxu1 %v10747_v49  ;;  %v12000_v49 = vld [vmem:[#allocation29_spill] sm:$0xff] }
0x13be   :  { %8167 = vmatprep.subr.bf16.mxu1 %v10750_v8  ;;  %v12001_v8 = vld [vmem:[#allocation39_spill] sm:$0xff] }
0x13c1   :  { %8169 = vmatpush1.bf16.msra.mxu1 %v10753_v17  ;;  %v12002_v17 = vld [vmem:[#allocation32_spill] sm:$0xff] }
0x13c2   :  { %8171 = vmatprep.subr.bf16.mxu1 %v10756_v25  ;;  %v12003_v25 = vld [vmem:[#allocation41_spill] sm:$0xff] }
0x13c5   :  { %8173 = vmatpush1.bf16.msra.mxu1 %v10759_v54  ;;  %v12004_v54 = vld [vmem:[#allocation33_spill] sm:$0xff] }
0x13c6   :  { %8175 = vmatprep.subr.bf16.mxu1 %v11988_v1 }
0x13c9   :  { %8177 = vmatpush1.bf16.msra.mxu1 %v11989_v59 }
0x13ca   :  { %8242 = vmatprep.subr.bf16.mxu1 %v11916_v11 }
0x145f   :  { %v3419_v63 = vpop.f32.mrb[30].mxu1 }
0x1460   :  { %v3420_v5 = vadd.f32 %v10968_v0, %v3419_v63  ;;  %v6001_v13 = vpop.f32.mrb[31].mxu1 }
0x1462   :  { %3424 = vst [vmem:[#allocation15 + $0x18] sm:$0xff] %v3420_v5  ;;  %v3425_v6 = vsel %vm1903_vm1, %v3420_v5, -1e+30 }
0x1463   :  { %3426 = vmax.xlane.f32.xlu0 %v3425_v6 }
0x14f0   :  { %v3427_v12 = vpop.xlane.xlu0 %3426 }
0x14f1   :  { %vm3428_vm6 = vcmp.eq.f32.partialorder %v3425_v6, %v3427_v12 }
0x14f2   :  { %v3429_v29 = vsel %vm3428_vm6, %v10566_v32, 128.0 }
0x14f3   :  { %3430 = vmin.xlane.f32.xlu1 %v3429_v29 }
0x1580   :  { %v3431_v22 = vpop.xlane.xlu1 %3430 }
0x1581   :  { %vm3432_vm7 = vcmp.eq.f32.partialorder %v10566_v32, %v3431_v22 }
0x1582   :  { %v5534_v44 = vsel %vm3432_vm7, 1.0, %v10771_v18 }
0x1583   :  { %v3445_v3 = vmul.f32 %v5534_v44, %v3444_v39 }
0x1585   :  { %v3446_v41 = vadd.f32 %v3445_v3, %v3442_v33 }
0x1587   :  { %6035 = vmatmul.mubr.f32.vlgmr.msra.gmra.mrb[32].mxu0 %v3446_v41 }
0x1588   :  { %3818 = vmatprep.mubr.f32.mxu0 %v10929_v50  ;;  %8181 = vmatpush1.bf16.msra.mxu0 %v10774_v42  ;;  %v12005_v42 = vld [vmem:[#allocation42_spill] sm:$0xff] }
0x1589   :  { %8183 = vmatprep.subr.bf16.mxu0 %v10776_v16  ;;  %v12006_v16 = vld [vmem:[#allocation36_spill] sm:$0xff] }
0x158c   :  { %8185 = vmatpush1.bf16.msra.mxu0 %v11991_v34 }
0x158d   :  { %8187 = vmatprep.subr.bf16.mxu0 %v11992_v46 }
0x1590   :  { %8189 = vmatpush1.bf16.msra.mxu0 %v11993_v27 }
0x1591   :  { %8191 = vmatprep.subr.bf16.mxu0 %v11994_v19 }
0x1594   :  { %8193 = vmatpush1.bf16.msra.mxu0 %v11995_v38 }
0x1595   :  { %8195 = vmatprep.subr.bf16.mxu0 %v11996_v9 }
0x1598   :  { %8197 = vmatpush1.bf16.msra.mxu0 %v11997_v45 }
0x1599   :  { %8199 = vmatprep.subr.bf16.mxu0 %v11998_v24 }
0x159c   :  { %8201 = vmatpush1.bf16.msra.mxu0 %v11999_v35 }
0x159d   :  { %8203 = vmatprep.subr.bf16.mxu0 %v12000_v49  ;;  %v3961_v49 = vld [vmem:[#allocation10] sm:$0xff] }
0x15a0   :  { %8205 = vmatpush1.bf16.msra.mxu0 %v12001_v8  ;;  %v3962_v8 = vld [vmem:[#allocation10 + $0x8] sm:$0xff] }
0x15a1   :  { %8207 = vmatprep.subr.bf16.mxu0 %v12002_v17  ;;  %v3963_v17 = vld [vmem:[#allocation10 + $0x10] sm:$0xff] }
0x15a4   :  { %8209 = vmatpush1.bf16.msra.mxu0 %v12003_v25  ;;  %v11043_v25 = vpack.c.bf16 %v3962_v8, %v3961_v49  ;;  %v4079_v49 = vld [vmem:[#allocation12 + $0x100] sm:$0xff] }
0x15a5   :  { %8211 = vmatprep.subr.bf16.mxu0 %v12004_v54  ;;  %v4083_v8 = vld [vmem:[#allocation12 + $0x120] sm:$0xff] }
0x15a8   :  { %8213 = vmatpush1.bf16.msra.mxu0 %v12005_v42  ;;  %v3965_v42 = vld [vmem:[#allocation10 + $0x20] sm:$0xff] }
0x15a9   :  { %8215 = vmatprep.subr.bf16.mxu0 %v12006_v16 }
0x15ac   :  { %8217 = vmatpush1.bf16.msra.mxu0 %v12007_v55  ;;  %v3967_v55 = vld [vmem:[#allocation10 + $0x30] sm:$0xff] }
0x15ad   :  { %8219 = vmatprep.subr.bf16.mxu0 %v12008_v30  ;;  %v3968_v30 = vld [vmem:[#allocation10 + $0x38] sm:$0xff] }
0x15b0   :  { %8221 = vmatpush1.bf16.msra.mxu0 %v12009_v31  ;;  %v11054_v31 = vpack.c.bf16 %v3968_v30, %v3967_v55  ;;  %v4087_v55 = vld [vmem:[#allocation12 + $0x140] sm:$0xff] }
0x15b1   :  { %8223 = vmatprep.subr.bf16.mxu0 %v12010_v26  ;;  %v3969_v26 = vld [vmem:[#allocation10 + $0x40] sm:$0xff] }
0x15b2   :  { %v4091_v30 = vld [vmem:[#allocation12 + $0x160] sm:$0xff] }
0x15b4   :  { %8225 = vmatpush1.bf16.msra.mxu0 %v12011_v47  ;;  %v3970_v47 = vld [vmem:[#allocation10 + $0x48] sm:$0xff] }
0x15b5   :  { %8227 = vmatprep.subr.bf16.mxu0 %v12012_v58  ;;  %v11058_v58 = vpack.c.bf16 %v3970_v47, %v3969_v26  ;;  %v11110_v26 = vpack.c.bf16 %v4091_v30, %v4087_v55  ;;  %v4096_v47 = vld [vmem:[#allocation12 + $0x188] sm:$0xff]  ;;  %v4135_v55 = vld [vmem:[#allocation12 + $0x2c0] sm:$0xff] }
0x15b6   :  { %v4139_v30 = vld [vmem:[#allocation12 + $0x2e0] sm:$0xff] }
0x15b8   :  { %8229 = vmatpush1.bf16.msra.mxu0 %v12013_v14  ;;  %v3971_v14 = vld [vmem:[#allocation10 + $0x50] sm:$0xff] }
0x15b9   :  { %8231 = vmatprep.subr.bf16.mxu0 %v10849_v61  ;;  %v12014_v61 = vld [vmem:[#allocation50_spill] sm:$0xff] }
0x15bc   :  { %8233 = vmatpush1.bf16.msra.mxu0 %v10852_v2  ;;  %v12015_v2 = vld [vmem:[#allocation51_spill] sm:$0xff] }
0x15bd   :  { %8235 = vmatprep.subr.bf16.mxu0 %v10855_v40  ;;  %v12016_v40 = vld [vmem:[#allocation52_spill] sm:$0xff] }
0x15c0   :  { %8237 = vmatpush1.bf16.msra.mxu0 %v10858_v52  ;;  %v12017_v52 = vld [vmem:[#allocation53_spill] sm:$0xff] }
0x15c1   :  { %8239 = vmatprep.subr.bf16.mxu0 %v10861_v36  ;;  %v12018_v36 = vld [vmem:[#allocation54_spill] sm:$0xff] }
0x15c4   :  { %8241 = vmatpush1.bf16.msra.mxu0 %v10864_v43  ;;  %v12020_v43 = vld [vmem:[#allocation56_spill] sm:$0xff] }
0x15c5   :  { %8266 = vmatprep.subr.bf16.mxu0 %v11916_v11 }
0x165a   :  { %v3529_v21 = vpop.f32.mrb[32].mxu0 }
0x165b   :  { %v6036_v28 = vpop.f32.mrb[33].mxu0  ;;  %3748 = vmatmul.mubr.f32.vlgmr.msra.gmra.mrb[32].mxu1 %v3529_v21  ;;  %3819 = vmatmul.mubr.f32.vlgmr.msra.gmra.mrb[34].mxu0 %v3529_v21  ;;  %v3972_v21 = vld [vmem:[#allocation10 + $0x58] sm:$0xff] }
0x165c   :  { %8244 = vmatpush3.bf16.msra.mxu1 %v10889_v57  ;;  %6069 = vmatprep.mubr.msk.f32.mxu1 %vm9172_vm0, %v10771_v18  ;;  %v3661_v57 = vld [vmem:[%s11504_s7] sm:$0xf]  ;;  %v11062_v28 = vpack.c.bf16 %v3972_v21, %v3971_v14  ;;  %v4100_v14 = vld [vmem:[#allocation12 + $0x1a8] sm:$0xff] }
0x165d   :  { %8245 = vmatprep.subr.bf16.mxu1 %v11916_v11  ;;  %6104 = vmatprep.mubr.msk.f32.mxu0 %vm9172_vm0, %v10771_v18  ;;  %v12019_v18 = vld [vmem:[#allocation55_spill] sm:$0xff]  ;;  %v3666_v4 = vrot.slane %v3661_v57, %v12021_v7  ;;  %v3670_v56 = vrot.slane %v3661_v57, %v12022_v37  ;;  %v3678_v29 = vrot.slane %v3661_v57, %v11919_v23 }
0x165e   :  { %v3674_v60 = vrot.slane %v3661_v57, %v11920_v48  ;;  %8268 = vmatpush3.bf16.msra.mxu0 %v11043_v25  ;;  %v11113_v21 = vpack.c.bf16 %v4100_v14, %v4096_v47  ;;  %v11146_v47 = vpack.c.bf16 %v4139_v30, %v4135_v55  ;;  %v4144_v14 = vld [vmem:[#allocation12 + $0x308] sm:$0xff]  ;;  %v4167_v55 = vld [vmem:[#allocation12 + $0x3c0] sm:$0xff] }
0x165f   :  { %8269 = vmatprep.subr.bf16.mxu0 %v11916_v11  ;;  %v4171_v30 = vld [vmem:[#allocation12 + $0x3e0] sm:$0xff] }
0x1660   :  { %8247 = vmatpush3.bf16.msra.mxu1 %v12014_v61  ;;  %v3973_v61 = vld [vmem:[#allocation10 + $0x60] sm:$0xff] }
0x1661   :  { %8248 = vmatprep.subr.bf16.mxu1 %v11916_v11 }
0x1664   :  { %8250 = vmatpush3.bf16.msra.mxu1 %v12015_v2  ;;  %v3974_v2 = vld [vmem:[#allocation10 + $0x68] sm:$0xff] }
0x1665   :  { %8251 = vmatprep.subr.bf16.mxu1 %v11916_v11 }
0x1668   :  { %8253 = vmatpush3.bf16.msra.mxu1 %v12016_v40  ;;  %v11066_v40 = vpack.c.bf16 %v3974_v2, %v3973_v61  ;;  %v4095_v61 = vld [vmem:[#allocation12 + $0x180] sm:$0xff] }
0x1669   :  { %8254 = vmatprep.subr.bf16.mxu1 %v11916_v11  ;;  %v4099_v2 = vld [vmem:[#allocation12 + $0x1a0] sm:$0xff] }
0x166c   :  { %8256 = vmatpush3.bf16.msra.mxu1 %v12017_v52 }
0x166d   :  { %8257 = vmatprep.subr.bf16.mxu1 %v11916_v11 }
0x1670   :  { %8259 = vmatpush3.bf16.msra.mxu1 %v12018_v36 }
0x1671   :  { %8260 = vmatprep.subr.bf16.mxu1 %v11916_v11 }
0x1674   :  { %8262 = vmatpush3.bf16.msra.mxu1 %v12019_v18  ;;  %v3975_v18 = vld [vmem:[#allocation10 + $0x70] sm:$0xff] }
0x1675   :  { %8263 = vmatprep.subr.bf16.mxu1 %v11916_v11 }
0x1678   :  { %8265 = vmatpush3.bf16.msra.mxu1 %v12020_v43  ;;  %v3976_v43 = vld [vmem:[#allocation10 + $0x78] sm:$0xff] }
0x1679   :  { %v11072_v57 = vpack.c.bf16 %v3976_v43, %v3975_v18  ;;  %v4108_v18 = vld [vmem:[#allocation12 + $0x1e8] sm:$0xff] }
0x172e   :  { %v3749_v10 = vpop.f32.mrb[32].mxu1  ;;  %v3820_v51 = vpop.f32.mrb[34].mxu0 }
0x172f   :  { %v3750_v53 = vadd.f32 %v3749_v10, %v3666_v4  ;;  %v3751_v15 = vpop.f32.mrb[33].mxu1  ;;  %v3822_v1 = vpop.f32.mrb[35].mxu0  ;;  %v3821_v33 = vadd.f32 %v3820_v51, %v3674_v60  ;;  %v4048_v4 = vld [vmem:[#allocation12 + $0x8] sm:$0xff]  ;;  %v4050_v51 = vld [vmem:[#allocation12 + $0x18] sm:$0xff] }
0x1730   :  { %v3752_v63 = vadd.f32 %v3751_v15, %v3670_v56  ;;  %v3823_v39 = vadd.f32 %v3822_v1, %v3678_v29  ;;  %v4052_v10 = vld [vmem:[#allocation12 + $0x28] sm:$0xff]  ;;  %v4047_v15 = vld [vmem:[#allocation12] sm:$0xff] }
0x1731   :  { %v5536_v59 = vmul.f32 -1.442695, %v3750_v53  ;;  %v11075_v56 = vpack.c.bf16 %v4052_v10, %v4048_v4  ;;  %v4054_v53 = vld [vmem:[#allocation12 + $0x38] sm:$0xff]  ;;  %v4051_v1 = vld [vmem:[#allocation12 + $0x20] sm:$0xff] }
0x1732   :  { %v5537_v5 = vmul.f32 -1.442695, %v3752_v63  ;;  %v11079_v63 = vpack.c.bf16 %v4051_v1, %v4047_v15  ;;  %v4059_v29 = vld [vmem:[#allocation12 + $0x60] sm:$0xff]  ;;  %v4116_v15 = vld [vmem:[#allocation12 + $0x228] sm:$0xff] }
0x1733   :  { %8939 = vpow2.f32 %v5536_v59  ;;  %v11077_v59 = vpack.c.bf16 %v4054_v53, %v4050_v51  ;;  %8291 = vmatprep.subr.bf16.mxu1 %v11075_v56  ;;  %v4103_v4 = vld [vmem:[#allocation12 + $0x1c0] sm:$0xff]  ;;  %v4112_v53 = vld [vmem:[#allocation12 + $0x208] sm:$0xff] }
0x1734   :  { %8941 = vpow2.f32 %v5537_v5  ;;  %v4056_v5 = vld [vmem:[#allocation12 + $0x48] sm:$0xff]  ;;  %v4107_v10 = vld [vmem:[#allocation12 + $0x1e0] sm:$0xff]  ;;  %v11125_v1 = vpack.c.bf16 %v4116_v15, %v4112_v53 }
0x1735   :  { %v11122_v51 = vpack.c.bf16 %v4107_v10, %v4103_v4  ;;  %v4152_v10 = vld [vmem:[#allocation12 + $0x348] sm:$0xff] }
0x1736   :  { %v4156_v53 = vld [vmem:[#allocation12 + $0x368] sm:$0xff] }
0x1737   :  { %v11155_v15 = vpack.c.bf16 %v4156_v53, %v4152_v10 }
0x173d   :  { %v8940_v13 = vpop.eup %8939 }
0x173e   :  { %v3828_v6 = vadd.f32 1.0, %v8940_v13  ;;  %v8942_v12 = vpop.eup %8941  ;;  %v4060_v13 = vld [vmem:[#allocation12 + $0x68] sm:$0xff] }
0x173f   :  { %v3834_v62 = vadd.f32 1.0, %v8942_v12  ;;  %v4055_v12 = vld [vmem:[#allocation12 + $0x40] sm:$0xff] }
0x1740   :  { %8943 = vrcp.f32 %v3828_v6  ;;  %v11084_v6 = vpack.c.bf16 %v4060_v13, %v4056_v5  ;;  %v11086_v60 = vpack.c.bf16 %v4059_v29, %v4055_v12  ;;  %v4111_v5 = vld [vmem:[#allocation12 + $0x200] sm:$0xff]  ;;  %v4120_v29 = vld [vmem:[#allocation12 + $0x248] sm:$0xff] }
0x1741   :  { %8945 = vrcp.f32 %v3834_v62  ;;  %v4064_v62 = vld [vmem:[#allocation12 + $0x88] sm:$0xff]  ;;  %v4115_v13 = vld [vmem:[#allocation12 + $0x220] sm:$0xff] }
0x1742   :  { %v11128_v12 = vpack.c.bf16 %v4115_v13, %v4111_v5  ;;  %v4151_v5 = vld [vmem:[#allocation12 + $0x340] sm:$0xff] }
0x1743   :  { %v4155_v13 = vld [vmem:[#allocation12 + $0x360] sm:$0xff] }
0x174a   :  { %v8944_v22 = vpop.eup %8943 }
0x174b   :  { %v3837_v44 = vmul.f32 %v8944_v22, %v3823_v39  ;;  %v8946_v41 = vpop.eup %8945  ;;  %v4068_v39 = vld [vmem:[#allocation12 + $0xa8] sm:$0xff] }
0x174c   :  { %v3840_v34 = vsub.f32 1.0, %v8946_v41  ;;  %v3842_v19 = vmul.f32 %v8946_v41, %v10929_v50  ;;  %v3964_v50 = vld [vmem:[#allocation10 + $0x18] sm:$0xff]  ;;  %v11089_v22 = vpack.c.bf16 %v4068_v39, %v4064_v62  ;;  %v4072_v41 = vld [vmem:[#allocation12 + $0xc8] sm:$0xff] }
0x174d   :  { %v3838_v3 = vadd.f32 %v3837_v44, %v3821_v33  ;;  %v11046_v54 = vpack.c.bf16 %v3964_v50, %v3963_v17  ;;  %v4063_v33 = vld [vmem:[#allocation12 + $0x80] sm:$0xff]  ;;  %v11104_v17 = vpack.c.bf16 %v4083_v8, %v4079_v49  ;;  %v4088_v50 = vld [vmem:[#allocation12 + $0x148] sm:$0xff] }
0x174e   :  { %v4067_v44 = vld [vmem:[#allocation12 + $0xa0] sm:$0xff]  ;;  %v4124_v62 = vld [vmem:[#allocation12 + $0x268] sm:$0xff] }
0x174f   :  { %8947 = vtanh.f32 %v3838_v3  ;;  %8271 = vmatpush3.bf16.msra.mxu0 %v11046_v54  ;;  %v11092_v3 = vpack.c.bf16 %v4067_v44, %v4063_v33  ;;  %v11131_v39 = vpack.c.bf16 %v4124_v62, %v4120_v29  ;;  %v4119_v33 = vld [vmem:[#allocation12 + $0x240] sm:$0xff]  ;;  %v4136_v8 = vld [vmem:[#allocation12 + $0x2c8] sm:$0xff]  ;;  %v11158_v29 = vpack.c.bf16 %v4155_v13, %v4151_v5  ;;  %v4049_v5 = vld [vmem:[#allocation12 + $0x10] sm:$0xff] }
0x1750   :  { %8272 = vmatprep.subr.bf16.mxu0 %v11916_v11  ;;  %v4123_v44 = vld [vmem:[#allocation12 + $0x260] sm:$0xff]  ;;  %v4160_v62 = vld [vmem:[#allocation12 + $0x388] sm:$0xff]  ;;  %v4053_v13 = vld [vmem:[#allocation12 + $0x30] sm:$0xff] }
0x1759   :  { %v8948_v46 = vpop.eup %8947 }
0x175a   :  { %v3841_v27 = vmul.f32 %v8948_v46, %v3840_v34  ;;  %v4076_v34 = vld [vmem:[#allocation12 + $0xe8] sm:$0xff] }
0x175b   :  { %v11095_v46 = vpack.c.bf16 %v4076_v34, %v4072_v41  ;;  %v11134_v41 = vpack.c.bf16 %v4123_v44, %v4119_v33  ;;  %v4128_v34 = vld [vmem:[#allocation12 + $0x288] sm:$0xff] }
0x175c   :  { %v11036_v38 = vadd.f32 %v3842_v19, %v3841_v27  ;;  %v4071_v27 = vld [vmem:[#allocation12 + $0xc0] sm:$0xff]  ;;  %v4164_v33 = vld [vmem:[#allocation12 + $0x3a8] sm:$0xff] }
0x175d   :  { %v4075_v19 = vld [vmem:[#allocation12 + $0xe0] sm:$0xff]  ;;  %v11161_v44 = vpack.c.bf16 %v4164_v33, %v4160_v62 }
0x175e   :  { %6070 = vmatmul.mubr.f32.vlgmr.msra.gmra.mrb[34].mxu1 %v11036_v38  ;;  %v11176_v62 = vld [vmem:[#allocation15] sm:$0xff] }
0x175f   :  { %4261 = vmatprep.mubr.f32.mxu1 %v11036_v38  ;;  %8293 = vmatpush1.bf16.msra.mxu1 %v11079_v63 }
0x1760   :  { %8295 = vmatprep.subr.bf16.mxu1 %v11084_v6 }
0x1763   :  { %8297 = vmatpush1.bf16.msra.mxu1 %v11086_v60 }
0x1764   :  { %8299 = vmatprep.subr.bf16.mxu1 %v11089_v22 }
0x1767   :  { %8301 = vmatpush1.bf16.msra.mxu1 %v11092_v3 }
0x1768   :  { %8303 = vmatprep.subr.bf16.mxu1 %v11095_v46 }
0x1831   :  { %v3933_v9 = vpop.f32.mrb[34].mxu1 }
0x1832   :  { %v3934_v45 = vadd.f32 %v10968_v0, %v3933_v9  ;;  %v6071_v24 = vpop.f32.mrb[35].mxu1  ;;  %v3966_v0 = vld [vmem:[#allocation10 + $0x28] sm:$0xff]  ;;  %v11098_v9 = vpack.c.bf16 %v4075_v19, %v4071_v27 }
0x1833   :  { %v11050_v16 = vpack.c.bf16 %v3966_v0, %v3965_v42  ;;  %v4084_v24 = vld [vmem:[#allocation12 + $0x128] sm:$0xff] }
0x1834   :  { %3938 = vst [vmem:[#allocation15 + $0x20] sm:$0xff] %v3934_v45  ;;  %v3939_v35 = vsel %vm1903_vm1, %v3934_v45, -1e+30  ;;  %v4080_v45 = vld [vmem:[#allocation12 + $0x108] sm:$0xff]  ;;  %8305 = vmatpush1.bf16.msra.mxu1 %v11098_v9 }
0x1835   :  { %3940 = vmax.xlane.f32.xlu0 %v3939_v35  ;;  %8274 = vmatpush3.bf16.msra.mxu0 %v11050_v16  ;;  %v4092_v42 = vld [vmem:[#allocation12 + $0x168] sm:$0xff] }
0x1836   :  { %8275 = vmatprep.subr.bf16.mxu0 %v11916_v11  ;;  %v11107_v0 = vpack.c.bf16 %v4092_v42, %v4088_v50  ;;  %v4132_v27 = vld [vmem:[#allocation12 + $0x2a8] sm:$0xff] }
0x1837   :  { %v11137_v19 = vpack.c.bf16 %v4132_v27, %v4128_v34  ;;  %v4140_v50 = vld [vmem:[#allocation12 + $0x2e8] sm:$0xff]  ;;  %v4159_v34 = vld [vmem:[#allocation12 + $0x380] sm:$0xff] }
0x1838   :  { %v11143_v42 = vpack.c.bf16 %v4140_v50, %v4136_v8  ;;  %v4163_v27 = vld [vmem:[#allocation12 + $0x3a0] sm:$0xff]  ;;  %v4172_v8 = vld [vmem:[#allocation12 + $0x3e8] sm:$0xff] }
0x1839   :  { %8277 = vmatpush3.bf16.msra.mxu0 %v11054_v31 }
0x183a   :  { %8278 = vmatprep.subr.bf16.mxu0 %v11916_v11 }
0x183d   :  { %8280 = vmatpush3.bf16.msra.mxu0 %v11058_v58 }
0x183e   :  { %8281 = vmatprep.subr.bf16.mxu0 %v11916_v11 }
0x1841   :  { %8283 = vmatpush3.bf16.msra.mxu0 %v11062_v28 }
0x1842   :  { %8284 = vmatprep.subr.bf16.mxu0 %v11916_v11 }
0x1845   :  { %8286 = vmatpush3.bf16.msra.mxu0 %v11066_v40 }
0x1846   :  { %8287 = vmatprep.subr.bf16.mxu0 %v11916_v11 }
0x1849   :  { %8289 = vmatpush3.bf16.msra.mxu0 %v11072_v57 }
0x184a   :  { %8355 = vmatprep.subr.bf16.mxu0 %v11077_v59 }
0x18c2   :  { %v3941_v52 = vpop.xlane.xlu0 %3940 }
0x18c3   :  { %vm3942_vm8 = vcmp.eq.f32.partialorder %v3939_v35, %v3941_v52  ;;  %v11101_v35 = vpack.c.bf16 %v4084_v24, %v4080_v45  ;;  %v11116_v52 = vpack.c.bf16 %v4099_v2, %v4095_v61  ;;  %v4127_v45 = vld [vmem:[#allocation12 + $0x280] sm:$0xff]  ;;  %v4148_v61 = vld [vmem:[#allocation12 + $0x328] sm:$0xff] }
0x18c4   :  { %v3943_v36 = vsel %vm3942_vm8, %v10566_v32, 128.0  ;;  %v4131_v24 = vld [vmem:[#allocation12 + $0x2a0] sm:$0xff]  ;;  %v11149_v2 = vpack.c.bf16 %v4148_v61, %v4144_v14  ;;  %v11170_v14 = vpack.c.bf16 %v4171_v30, %v4167_v55 }
0x18c5   :  { %3944 = vmin.xlane.f32.xlu1 %v3943_v36  ;;  %8307 = vmatprep.subr.bf16.mxu1 %v11101_v35  ;;  %v4104_v36 = vld [vmem:[#allocation12 + $0x1c8] sm:$0xff]  ;;  %v11140_v49 = vpack.c.bf16 %v4131_v24, %v4127_v45  ;;  %v11164_v45 = vpack.c.bf16 %v4163_v27, %v4159_v34  ;;  %v3954_v61 = vld [vmem:[#allocation7 + $0x20] sm:$0xff]  ;;  %v4058_v34 = vld [vmem:[#allocation12 + $0x58] sm:$0xff] }
0x18c6   :  { %8309 = vmatpush1.bf16.msra.mxu1 %v11104_v17  ;;  %v11119_v43 = vpack.c.bf16 %v4108_v18, %v4104_v36  ;;  %v4143_v36 = vld [vmem:[#allocation12 + $0x300] sm:$0xff]  ;;  %v4168_v24 = vld [vmem:[#allocation12 + $0x3c8] sm:$0xff]  ;;  %12024 = vst [vmem:[#allocation46_spill] sm:$0xff] %v11170_v14  ;;  %v4062_v27 = vld [vmem:[#allocation12 + $0x78] sm:$0xff] }
0x18c7   :  { %8311 = vmatprep.subr.bf16.mxu1 %v11107_v0  ;;  %v4147_v18 = vld [vmem:[#allocation12 + $0x320] sm:$0xff]  ;;  %v11167_v50 = vpack.c.bf16 %v4172_v8, %v4168_v24  ;;  %v11179_v8 = vpack.c.bf16 %v4053_v13, %v4049_v5  ;;  %v11181_v30 = vpack.c.bf16 %v4062_v27, %v4058_v34  ;;  %v4069_v5 = vld [vmem:[#allocation12 + $0xb0] sm:$0xff]  ;;  %v4078_v13 = vld [vmem:[#allocation12 + $0xf8] sm:$0xff] }
0x18c8   :  { %v11152_v4 = vpack.c.bf16 %v4147_v18, %v4143_v36  ;;  %v3955_v36 = vstv %s3952_s4  ;;  %v3958_v18 = vstv %s3957_s13  ;;  %v4073_v27 = vld [vmem:[#allocation12 + $0xd0] sm:$0xff] }
0x18c9   :  { %12023 = vst [vmem:[#allocation48_spill] sm:$0xff] %v11167_v50  ;;  %v3956_v53 = vmul.f32 %v3955_v36, %v3954_v61  ;;  %v4070_v61 = vld [vmem:[#allocation12 + $0xb8] sm:$0xff] }
0x18ca   :  { %8313 = vmatpush1.bf16.msra.mxu1 %v11110_v26 }
0x18cb   :  { %8315 = vmatprep.subr.bf16.mxu1 %v11113_v21 }
0x18ce   :  { %8317 = vmatpush1.bf16.msra.mxu1 %v11116_v52 }
0x18cf   :  { %8319 = vmatprep.subr.bf16.mxu1 %v11119_v43 }
0x18d2   :  { %8321 = vmatpush1.bf16.msra.mxu1 %v11122_v51 }
0x18d3   :  { %8323 = vmatprep.subr.bf16.mxu1 %v11125_v1 }
0x18d6   :  { %8325 = vmatpush1.bf16.msra.mxu1 %v11128_v12 }
0x18d7   :  { %8327 = vmatprep.subr.bf16.mxu1 %v11131_v39 }
0x18da   :  { %8329 = vmatpush1.bf16.msra.mxu1 %v11134_v41 }
0x18db   :  { %8331 = vmatprep.subr.bf16.mxu1 %v11137_v19 }
0x18de   :  { %8333 = vmatpush1.bf16.msra.mxu1 %v11140_v49 }
0x18df   :  { %8335 = vmatprep.subr.bf16.mxu1 %v11143_v42 }
0x18e2   :  { %8337 = vmatpush1.bf16.msra.mxu1 %v11146_v47 }
0x18e3   :  { %8339 = vmatprep.subr.bf16.mxu1 %v11149_v2 }
0x18e6   :  { %8341 = vmatpush1.bf16.msra.mxu1 %v11152_v4 }
0x18e7   :  { %8343 = vmatprep.subr.bf16.mxu1 %v11155_v15 }
0x18ea   :  { %8345 = vmatpush1.bf16.msra.mxu1 %v11158_v29 }
0x18eb   :  { %8347 = vmatprep.subr.bf16.mxu1 %v11161_v44 }
0x18ee   :  { %8349 = vmatpush1.bf16.msra.mxu1 %v11164_v45 }
0x18ef   :  { %8351 = vmatprep.subr.bf16.mxu1 %v11167_v50  ;;  %v4066_v50 = vld [vmem:[#allocation12 + $0x98] sm:$0xff] }
0x18f2   :  { %8353 = vmatpush1.bf16.msra.mxu1 %v11170_v14  ;;  %v4061_v14 = vld [vmem:[#allocation12 + $0x70] sm:$0xff] }
0x18f3   :  { %8418 = vmatprep.subr.bf16.mxu1 %v11916_v11  ;;  %v11185_v36 = vpack.c.bf16 %v4061_v14, %v4057_v20  ;;  %v4082_v20 = vld [vmem:[#allocation12 + $0x118] sm:$0xff] }
0x18f4   :  { %v4086_v14 = vld [vmem:[#allocation12 + $0x138] sm:$0xff] }
0x18f5   :  { %12025 = vst [vmem:[#allocation22_spill] sm:$0xff] %v11185_v36 }
0x1952   :  { %v3945_v10 = vpop.xlane.xlu1 %3944 }
0x1953   :  { %vm3946_vm9 = vcmp.eq.f32.partialorder %v10566_v32, %v3945_v10  ;;  %v11188_v10 = vpack.c.bf16 %v4070_v61, %v4066_v50  ;;  %v4081_v61 = vld [vmem:[#allocation12 + $0x110] sm:$0xff] }
0x1954   :  { %v5539_v33 = vsel %vm3946_vm9, 1.0, %v11176_v62 }
0x1955   :  { %v3959_v24 = vmul.f32 %v5539_v33, %v3958_v18  ;;  %12026 = vst [vmem:[#allocation23_spill] sm:$0xff] %v11188_v10  ;;  %v4065_v18 = vld [vmem:[#allocation12 + $0x90] sm:$0xff] }
0x1956   :  { %v11191_v33 = vpack.c.bf16 %v4069_v5, %v4065_v18  ;;  %v4090_v18 = vld [vmem:[#allocation12 + $0x158] sm:$0xff] }
0x1957   :  { %v3960_v55 = vadd.f32 %v3959_v24, %v3956_v53  ;;  %v4074_v53 = vld [vmem:[#allocation12 + $0xd8] sm:$0xff]  ;;  %v4077_v24 = vld [vmem:[#allocation12 + $0xf0] sm:$0xff] }
0x1958   :  { %12027 = vst [vmem:[#allocation31_spill] sm:$0xff] %v11191_v33  ;;  %v11194_v34 = vpack.c.bf16 %v4078_v13, %v4074_v53  ;;  %v11197_v50 = vpack.c.bf16 %v4077_v24, %v4073_v27  ;;  %v4094_v5 = vld [vmem:[#allocation12 + $0x178] sm:$0xff] }
0x1959   :  { %6105 = vmatmul.mubr.f32.vlgmr.msra.gmra.mrb[36].mxu0 %v3960_v55  ;;  %v11200_v55 = vpack.c.bf16 %v4086_v14, %v4082_v20  ;;  %v11206_v13 = vpack.c.bf16 %v4094_v5, %v4090_v18  ;;  %v4098_v27 = vld [vmem:[#allocation12 + $0x198] sm:$0xff] }
0x195a   :  { %4332 = vmatprep.mubr.f32.mxu0 %v11036_v38  ;;  %8357 = vmatpush1.bf16.msra.mxu0 %v11179_v8  ;;  %12028 = vst [vmem:[#allocation24_spill] sm:$0xff] %v11194_v34  ;;  %12029 = vst [vmem:[#allocation34_spill] sm:$0xff] %v11197_v50  ;;  %v4102_v24 = vld [vmem:[#allocation12 + $0x1b8] sm:$0xff] }
0x195b   :  { %8359 = vmatprep.subr.bf16.mxu0 %v11181_v30  ;;  %12030 = vst [vmem:[#allocation25_spill] sm:$0xff] %v11200_v55  ;;  %12032 = vst [vmem:[#allocation28_spill] sm:$0xff] %v11206_v13  ;;  %v11212_v14 = vpack.c.bf16 %v4102_v24, %v4098_v27 }
0x195d   :  { %12034 = vst [vmem:[#allocation29_spill] sm:$0xff] %v11212_v14 }
0x195e   :  { %8361 = vmatpush1.bf16.msra.mxu0 %v11185_v36  ;;  %v4085_v36 = vld [vmem:[#allocation12 + $0x130] sm:$0xff] }
0x195f   :  { %8363 = vmatprep.subr.bf16.mxu0 %v11188_v10  ;;  %v11203_v53 = vpack.c.bf16 %v4085_v36, %v4081_v61  ;;  %v4089_v10 = vld [vmem:[#allocation12 + $0x150] sm:$0xff]  ;;  %v4106_v36 = vld [vmem:[#allocation12 + $0x1d8] sm:$0xff] }
0x1960   :  { %v4110_v61 = vld [vmem:[#allocation12 + $0x1f8] sm:$0xff] }
0x1961   :  { %12031 = vst [vmem:[#allocation35_spill] sm:$0xff] %v11203_v53  ;;  %v11218_v5 = vpack.c.bf16 %v4110_v61, %v4106_v36 }
0x1962   :  { %8365 = vmatpush1.bf16.msra.mxu0 %v11191_v33  ;;  %v4093_v33 = vld [vmem:[#allocation12 + $0x170] sm:$0xff] }
0x1963   :  { %8367 = vmatprep.subr.bf16.mxu0 %v11194_v34  ;;  %v11209_v20 = vpack.c.bf16 %v4093_v33, %v4089_v10  ;;  %v4097_v34 = vld [vmem:[#allocation12 + $0x190] sm:$0xff]  ;;  %12036 = vst [vmem:[#allocation32_spill] sm:$0xff] %v11218_v5  ;;  %v4114_v10 = vld [vmem:[#allocation12 + $0x218] sm:$0xff] }
0x1964   :  { %v4118_v33 = vld [vmem:[#allocation12 + $0x238] sm:$0xff] }
0x1965   :  { %12033 = vst [vmem:[#allocation38_spill] sm:$0xff] %v11209_v20  ;;  %v11224_v24 = vpack.c.bf16 %v4118_v33, %v4114_v10 }
0x1966   :  { %8369 = vmatpush1.bf16.msra.mxu0 %v11197_v50  ;;  %v4101_v50 = vld [vmem:[#allocation12 + $0x1b0] sm:$0xff] }
0x1967   :  { %8371 = vmatprep.subr.bf16.mxu0 %v11200_v55  ;;  %v11215_v18 = vpack.c.bf16 %v4101_v50, %v4097_v34  ;;  %v4105_v55 = vld [vmem:[#allocation12 + $0x1d0] sm:$0xff]  ;;  %12038 = vst [vmem:[#allocation33_spill] sm:$0xff] %v11224_v24  ;;  %v4122_v34 = vld [vmem:[#allocation12 + $0x258] sm:$0xff] }
0x1968   :  { %v4126_v50 = vld [vmem:[#allocation12 + $0x278] sm:$0xff] }
0x1969   :  { %12035 = vst [vmem:[#allocation39_spill] sm:$0xff] %v11215_v18  ;;  %v11230_v61 = vpack.c.bf16 %v4126_v50, %v4122_v34 }
0x196a   :  { %8373 = vmatpush1.bf16.msra.mxu0 %v11203_v53  ;;  %v4109_v53 = vld [vmem:[#allocation12 + $0x1f0] sm:$0xff] }
0x196b   :  { %8375 = vmatprep.subr.bf16.mxu0 %v11206_v13  ;;  %v11221_v27 = vpack.c.bf16 %v4109_v53, %v4105_v55  ;;  %v4113_v13 = vld [vmem:[#allocation12 + $0x210] sm:$0xff]  ;;  %12040 = vst [vmem:[#allocation36_spill] sm:$0xff] %v11230_v61  ;;  %v4130_v55 = vld [vmem:[#allocation12 + $0x298] sm:$0xff] }
0x196c   :  { %v4134_v53 = vld [vmem:[#allocation12 + $0x2b8] sm:$0xff] }
0x196d   :  { %12037 = vst [vmem:[#allocation41_spill] sm:$0xff] %v11221_v27  ;;  %v11236_v33 = vpack.c.bf16 %v4134_v53, %v4130_v55 }
0x196e   :  { %8377 = vmatpush1.bf16.msra.mxu0 %v11209_v20  ;;  %v4117_v20 = vld [vmem:[#allocation12 + $0x230] sm:$0xff] }
0x196f   :  { %8379 = vmatprep.subr.bf16.mxu0 %v11212_v14  ;;  %v11227_v36 = vpack.c.bf16 %v4117_v20, %v4113_v13  ;;  %v4121_v14 = vld [vmem:[#allocation12 + $0x250] sm:$0xff]  ;;  %12042 = vst [vmem:[#allocation37_spill] sm:$0xff] %v11236_v33  ;;  %v4138_v13 = vld [vmem:[#allocation12 + $0x2d8] sm:$0xff] }
0x1970   :  { %v4142_v20 = vld [vmem:[#allocation12 + $0x2f8] sm:$0xff] }
0x1971   :  { %12039 = vst [vmem:[#allocation42_spill] sm:$0xff] %v11227_v36  ;;  %v11242_v50 = vpack.c.bf16 %v4142_v20, %v4138_v13 }
0x1972   :  { %8381 = vmatpush1.bf16.msra.mxu0 %v11215_v18  ;;  %v4125_v18 = vld [vmem:[#allocation12 + $0x270] sm:$0xff] }
0x1973   :  { %8383 = vmatprep.subr.bf16.mxu0 %v11218_v5  ;;  %v11233_v10 = vpack.c.bf16 %v4125_v18, %v4121_v14  ;;  %v4129_v5 = vld [vmem:[#allocation12 + $0x290] sm:$0xff]  ;;  %12044 = vst [vmem:[#allocation40_spill] sm:$0xff] %v11242_v50  ;;  %v4146_v14 = vld [vmem:[#allocation12 + $0x318] sm:$0xff] }
0x1974   :  { %v4150_v18 = vld [vmem:[#allocation12 + $0x338] sm:$0xff] }
0x1975   :  { %12041 = vst [vmem:[#allocation43_spill] sm:$0xff] %v11233_v10  ;;  %v11248_v53 = vpack.c.bf16 %v4150_v18, %v4146_v14 }
0x1976   :  { %8385 = vmatpush1.bf16.msra.mxu0 %v11221_v27  ;;  %v4133_v27 = vld [vmem:[#allocation12 + $0x2b0] sm:$0xff] }
0x1977   :  { %8387 = vmatprep.subr.bf16.mxu0 %v11224_v24  ;;  %v11239_v34 = vpack.c.bf16 %v4133_v27, %v4129_v5  ;;  %v4137_v24 = vld [vmem:[#allocation12 + $0x2d0] sm:$0xff]  ;;  %12046 = vst [vmem:[#allocation30_spill] sm:$0xff] %v11248_v53  ;;  %v4154_v5 = vld [vmem:[#allocation12 + $0x358] sm:$0xff] }
0x1978   :  { %v4158_v27 = vld [vmem:[#allocation12 + $0x378] sm:$0xff] }
0x1979   :  { %12043 = vst [vmem:[#allocation44_spill] sm:$0xff] %v11239_v34  ;;  %v11254_v20 = vpack.c.bf16 %v4158_v27, %v4154_v5 }
0x197a   :  { %8389 = vmatpush1.bf16.msra.mxu0 %v11227_v36  ;;  %v4141_v36 = vld [vmem:[#allocation12 + $0x2f0] sm:$0xff] }
0x197b   :  { %8391 = vmatprep.subr.bf16.mxu0 %v11230_v61  ;;  %v11245_v55 = vpack.c.bf16 %v4141_v36, %v4137_v24  ;;  %v4145_v61 = vld [vmem:[#allocation12 + $0x310] sm:$0xff]  ;;  %v4162_v24 = vld [vmem:[#allocation12 + $0x398] sm:$0xff] }
0x197c   :  { %v4166_v36 = vld [vmem:[#allocation12 + $0x3b8] sm:$0xff] }
0x197d   :  { %12045 = vst [vmem:[#allocation45_spill] sm:$0xff] %v11245_v55  ;;  %v11260_v18 = vpack.c.bf16 %v4166_v36, %v4162_v24  ;;  %v4367_v36 = vld [vmem:[#allocation13 + $0x48] sm:$0xff] }
0x197e   :  { %8393 = vmatpush1.bf16.msra.mxu0 %v11233_v10  ;;  %v4149_v10 = vld [vmem:[#allocation12 + $0x330] sm:$0xff] }
0x197f   :  { %8395 = vmatprep.subr.bf16.mxu0 %v11236_v33  ;;  %v11251_v13 = vpack.c.bf16 %v4149_v10, %v4145_v61  ;;  %v4153_v33 = vld [vmem:[#allocation12 + $0x350] sm:$0xff]  ;;  %v4170_v61 = vld [vmem:[#allocation12 + $0x3d8] sm:$0xff] }
0x1980   :  { %v4174_v10 = vld [vmem:[#allocation12 + $0x3f8] sm:$0xff] }
0x1981   :  { %12047 = vst [vmem:[#allocation49_spill] sm:$0xff] %v11251_v13  ;;  %v11266_v27 = vpack.c.bf16 %v4174_v10, %v4170_v61  ;;  %v4368_v10 = vld [vmem:[#allocation13 + $0x50] sm:$0xff] }
0x1982   :  { %8397 = vmatpush1.bf16.msra.mxu0 %v11239_v34  ;;  %v4157_v34 = vld [vmem:[#allocation12 + $0x370] sm:$0xff] }
0x1983   :  { %8399 = vmatprep.subr.bf16.mxu0 %v11242_v50  ;;  %v11257_v14 = vpack.c.bf16 %v4157_v34, %v4153_v33  ;;  %v4161_v50 = vld [vmem:[#allocation12 + $0x390] sm:$0xff] }
0x1986   :  { %8401 = vmatpush1.bf16.msra.mxu0 %v11245_v55  ;;  %v4165_v55 = vld [vmem:[#allocation12 + $0x3b0] sm:$0xff] }
0x1987   :  { %8403 = vmatprep.subr.bf16.mxu0 %v11248_v53  ;;  %v11263_v5 = vpack.c.bf16 %v4165_v55, %v4161_v50  ;;  %v4169_v53 = vld [vmem:[#allocation12 + $0x3d0] sm:$0xff]  ;;  %v4365_v55 = vld [vmem:[#allocation13 + $0x38] sm:$0xff] }
0x198a   :  { %8405 = vmatpush1.bf16.msra.mxu0 %v11251_v13  ;;  %v4173_v13 = vld [vmem:[#allocation12 + $0x3f0] sm:$0xff] }
0x198b   :  { %8407 = vmatprep.subr.bf16.mxu0 %v11254_v20  ;;  %v11269_v33 = vpack.c.bf16 %v4173_v13, %v4169_v53  ;;  %v4366_v13 = vld [vmem:[#allocation13 + $0x40] sm:$0xff] }
0x198c   :  { %v11310_v61 = vpack.c.bf16 %v4367_v36, %v4366_v13 }
0x198e   :  { %8409 = vmatpush1.bf16.msra.mxu0 %v11257_v14  ;;  %12051 = vst [vmem:[#allocation53_spill] sm:$0xff] %v11310_v61 }
0x198f   :  { %8411 = vmatprep.subr.bf16.mxu0 %v11260_v18 }
0x1992   :  { %8413 = vmatpush1.bf16.msra.mxu0 %v11263_v5 }
0x1993   :  { %8415 = vmatprep.subr.bf16.mxu0 %v11266_v27 }
0x1996   :  { %8417 = vmatpush1.bf16.msra.mxu0 %v11269_v33 }
0x1997   :  { %8442 = vmatprep.subr.bf16.mxu0 %v11916_v11 }
0x1a2c   :  { %v4043_v34 = vpop.f32.mrb[36].mxu0 }
0x1a2d   :  { %v6106_v24 = vpop.f32.mrb[37].mxu0  ;;  %4262 = vmatmul.mubr.f32.vlgmr.msra.gmra.mrb[36].mxu1 %v4043_v34  ;;  %4333 = vmatmul.mubr.f32.vlgmr.msra.gmra.mrb[38].mxu0 %v4043_v34  ;;  %v4369_v34 = vld [vmem:[#allocation13 + $0x58] sm:$0xff] }
0x1a2e   :  { %6139 = vmatprep.mubr.msk.f32.mxu1 %vm9172_vm0, %v11176_v62  ;;  %8444 = vmatpush3.bf16.msra.mxu0 %v11043_v25  ;;  %v4358_v25 = vld [vmem:[#allocation13] sm:$0xff]  ;;  %v11314_v24 = vpack.c.bf16 %v4369_v34, %v4368_v10 }
0x1a2f   :  { %8445 = vmatprep.subr.bf16.mxu0 %v11916_v11  ;;  %6174 = vmatprep.mubr.msk.f32.mxu0 %vm9172_vm0, %v11176_v62 }
0x1a30   :  { %12052 = vst [vmem:[#allocation54_spill] sm:$0xff] %v11314_v24 }
0x1a32   :  { %8447 = vmatpush3.bf16.msra.mxu0 %v11046_v54  ;;  %v4359_v54 = vld [vmem:[#allocation13 + $0x8] sm:$0xff] }
0x1a33   :  { %8448 = vmatprep.subr.bf16.mxu0 %v11916_v11 }
0x1a36   :  { %8450 = vmatpush3.bf16.msra.mxu0 %v11050_v16  ;;  %v11294_v16 = vpack.c.bf16 %v4359_v54, %v4358_v25  ;;  %v4370_v25 = vld [vmem:[#allocation13 + $0x60] sm:$0xff]  ;;  %v4371_v54 = vld [vmem:[#allocation13 + $0x68] sm:$0xff] }
0x1a37   :  { %8451 = vmatprep.subr.bf16.mxu0 %v11916_v11 }
0x1a38   :  { %8420 = vmatpush3.bf16.msra.mxu1 %v11294_v16 }
0x1a39   :  { %8421 = vmatprep.subr.bf16.mxu1 %v11916_v11 }
0x1a3a   :  { %8453 = vmatpush3.bf16.msra.mxu0 %v11054_v31  ;;  %v4360_v31 = vld [vmem:[#allocation13 + $0x10] sm:$0xff] }
0x1a3b   :  { %8454 = vmatprep.subr.bf16.mxu0 %v11916_v11 }
0x1a3e   :  { %8456 = vmatpush3.bf16.msra.mxu0 %v11058_v58  ;;  %v4361_v58 = vld [vmem:[#allocation13 + $0x18] sm:$0xff] }
0x1a3f   :  { %8457 = vmatprep.subr.bf16.mxu0 %v11916_v11 }
0x1a42   :  { %8459 = vmatpush3.bf16.msra.mxu0 %v11062_v28  ;;  %v11298_v28 = vpack.c.bf16 %v4361_v58, %v4360_v31  ;;  %v11317_v31 = vpack.c.bf16 %v4371_v54, %v4370_v25  ;;  %v4372_v58 = vld [vmem:[#allocation13 + $0x70] sm:$0xff] }
0x1a43   :  { %8460 = vmatprep.subr.bf16.mxu0 %v11916_v11 }
0x1a44   :  { %12048 = vst [vmem:[#allocation50_spill] sm:$0xff] %v11298_v28  ;;  %8423 = vmatpush3.bf16.msra.mxu1 %v11298_v28  ;;  %12053 = vst [vmem:[#allocation55_spill] sm:$0xff] %v11317_v31 }
0x1a45   :  { %8424 = vmatprep.subr.bf16.mxu1 %v11916_v11 }
0x1a46   :  { %8462 = vmatpush3.bf16.msra.mxu0 %v11066_v40  ;;  %v4362_v40 = vld [vmem:[#allocation13 + $0x20] sm:$0xff] }
0x1a47   :  { %8463 = vmatprep.subr.bf16.mxu0 %v11916_v11 }
0x1a4a   :  { %8465 = vmatpush3.bf16.msra.mxu0 %v11072_v57  ;;  %v4363_v57 = vld [vmem:[#allocation13 + $0x28] sm:$0xff] }
0x1a4b   :  { %8531 = vmatprep.subr.bf16.mxu0 %v11077_v59  ;;  %v11302_v50 = vpack.c.bf16 %v4363_v57, %v4362_v40  ;;  %v4364_v59 = vld [vmem:[#allocation13 + $0x30] sm:$0xff]  ;;  %v4373_v40 = vld [vmem:[#allocation13 + $0x78] sm:$0xff] }
0x1a4c   :  { %v11306_v53 = vpack.c.bf16 %v4365_v55, %v4364_v59  ;;  %v11321_v57 = vpack.c.bf16 %v4373_v40, %v4372_v58  ;;  %v4175_v59 = vld [vmem:[%s11504_s7] sm:$0xf] }
0x1a4d   :  { %12049 = vst [vmem:[#allocation51_spill] sm:$0xff] %v11302_v50  ;;  %8426 = vmatpush3.bf16.msra.mxu1 %v11302_v50  ;;  %v4180_v55 = vrot.slane %v4175_v59, %v12021_v7  ;;  %v4184_v10 = vrot.slane %v4175_v59, %v12022_v37  ;;  %v4188_v7 = vrot.slane %v4175_v59, %v11920_v48 }
0x1a4e   :  { %8427 = vmatprep.subr.bf16.mxu1 %v11916_v11  ;;  %12050 = vst [vmem:[#allocation52_spill] sm:$0xff] %v11306_v53  ;;  %12054 = vst [vmem:[#allocation56_spill] sm:$0xff] %v11321_v57 }
0x1a51   :  { %8429 = vmatpush3.bf16.msra.mxu1 %v11306_v53 }
0x1a52   :  { %8430 = vmatprep.subr.bf16.mxu1 %v11916_v11 }
0x1a55   :  { %8432 = vmatpush3.bf16.msra.mxu1 %v11310_v61  ;;  %v4192_v61 = vrot.slane %v4175_v59, %v11919_v23  ;;  %v12079_v59 = vld [vmem:[#allocation30_spill] sm:$0xff] }
0x1a56   :  { %8433 = vmatprep.subr.bf16.mxu1 %v11916_v11 }
0x1a59   :  { %8435 = vmatpush3.bf16.msra.mxu1 %v11314_v24 }
0x1a5a   :  { %8436 = vmatprep.subr.bf16.mxu1 %v11916_v11 }
0x1a5d   :  { %8438 = vmatpush3.bf16.msra.mxu1 %v11317_v31 }
0x1a5e   :  { %8439 = vmatprep.subr.bf16.mxu1 %v11916_v11 }
0x1a61   :  { %8441 = vmatpush3.bf16.msra.mxu1 %v11321_v57 }
0x1a62   :  { %8467 = vmatprep.subr.bf16.mxu1 %v11075_v56 }
0x1b00   :  { %v4263_v13 = vpop.f32.mrb[36].mxu1  ;;  %v4334_v36 = vpop.f32.mrb[38].mxu0 }
0x1b01   :  { %v4264_v34 = vadd.f32 %v4263_v13, %v4180_v55  ;;  %v4265_v25 = vpop.f32.mrb[37].mxu1  ;;  %v4336_v54 = vpop.f32.mrb[39].mxu0  ;;  %v4335_v37 = vadd.f32 %v4334_v36, %v4188_v7  ;;  %v12055_v7 = vld [vmem:[#allocation48_spill] sm:$0xff]  ;;  %v12080_v36 = vld [vmem:[#allocation49_spill] sm:$0xff] }
0x1b02   :  { %v4266_v40 = vadd.f32 %v4265_v25, %v4184_v10  ;;  %v4337_v50 = vadd.f32 %v4336_v54, %v4192_v61  ;;  %v12077_v61 = vld [vmem:[#allocation40_spill] sm:$0xff] }
0x1b03   :  { %v5541_v58 = vmul.f32 -1.442695, %v4264_v34 }
0x1b04   :  { %v5542_v31 = vmul.f32 -1.442695, %v4266_v40 }
0x1b05   :  { %8949 = vpow2.f32 %v5541_v58 }
0x1b06   :  { %8951 = vpow2.f32 %v5542_v31 }
0x1b0f   :  { %v8950_v57 = vpop.eup %8949 }
0x1b10   :  { %v4342_v56 = vadd.f32 1.0, %v8950_v57  ;;  %v8952_v24 = vpop.eup %8951 }
0x1b11   :  { %v4348_v53 = vadd.f32 1.0, %v8952_v24  ;;  %v12078_v24 = vld [vmem:[#allocation45_spill] sm:$0xff] }
0x1b12   :  { %8953 = vrcp.f32 %v4342_v56  ;;  %v12088_v56 = vld [vmem:[#allocation26_spill] sm:$0xff] }
0x1b13   :  { %8955 = vrcp.f32 %v4348_v53  ;;  %v12076_v53 = vld [vmem:[#allocation44_spill] sm:$0xff] }
0x1b1c   :  { %v8954_v28 = vpop.eup %8953 }
0x1b1d   :  { %v4351_v55 = vmul.f32 %v8954_v28, %v4337_v50  ;;  %v8956_v10 = vpop.eup %8955  ;;  %v12074_v28 = vld [vmem:[#allocation43_spill] sm:$0xff]  ;;  %v12075_v50 = vld [vmem:[#allocation37_spill] sm:$0xff] }
0x1b1e   :  { %v4354_v34 = vsub.f32 1.0, %v8956_v10  ;;  %v4356_v57 = vmul.f32 %v8956_v10, %v11036_v38  ;;  %v11373_v38 = vld [vmem:[%s11506_s9] ss:$0 sm:$0xff] }
0x1b1f   :  { %v4352_v13 = vadd.f32 %v4351_v55, %v4335_v37  ;;  %v12056_v37 = vld [vmem:[#allocation46_spill] sm:$0xff] }
0x1b21   :  { %8957 = vtanh.f32 %v4352_v13 }
0x1b2b   :  { %v8958_v25 = vpop.eup %8957 }
0x1b2c   :  { %v4355_v31 = vmul.f32 %v8958_v25, %v4354_v34  ;;  %v12089_v34 = vld [vmem:[#allocation27_spill] sm:$0xff] }
0x1b2e   :  { %v11334_v58 = vadd.f32 %v4356_v57, %v4355_v31 }
0x1b30   :  { %6140 = vmatmul.mubr.f32.vlgmr.msra.gmra.mrb[38].mxu1 %v11334_v58 }
0x1b31   :  { %4775 = vmatprep.mubr.f32.mxu1 %v11334_v58  ;;  %8469 = vmatpush1.bf16.msra.mxu1 %v11079_v63 }
0x1b32   :  { %8471 = vmatprep.subr.bf16.mxu1 %v11084_v6 }
0x1b35   :  { %8473 = vmatpush1.bf16.msra.mxu1 %v11086_v60 }
0x1b36   :  { %8475 = vmatprep.subr.bf16.mxu1 %v11089_v22 }
0x1b39   :  { %8477 = vmatpush1.bf16.msra.mxu1 %v11092_v3 }
0x1b3a   :  { %8479 = vmatprep.subr.bf16.mxu1 %v11095_v46 }
0x1b3d   :  { %8481 = vmatpush1.bf16.msra.mxu1 %v11098_v9 }
0x1b3e   :  { %8483 = vmatprep.subr.bf16.mxu1 %v11101_v35  ;;  %v4468_v35 = vld [vmem:[#allocation7 + $0x28] sm:$0xff] }
0x1b41   :  { %8485 = vmatpush1.bf16.msra.mxu1 %v11104_v17  ;;  %v4469_v17 = vstv %s4466_s20 }
0x1b42   :  { %8487 = vmatprep.subr.bf16.mxu1 %v11107_v0  ;;  %v4472_v0 = vstv %s4471_s21 }
0x1b45   :  { %8489 = vmatpush1.bf16.msra.mxu1 %v11110_v26 }
0x1b46   :  { %8491 = vmatprep.subr.bf16.mxu1 %v11113_v21  ;;  %v4470_v21 = vmul.f32 %v4469_v17, %v4468_v35 }
0x1b49   :  { %8493 = vmatpush1.bf16.msra.mxu1 %v11116_v52 }
0x1b4a   :  { %8495 = vmatprep.subr.bf16.mxu1 %v11119_v43 }
0x1b4d   :  { %8497 = vmatpush1.bf16.msra.mxu1 %v11122_v51 }
0x1b4e   :  { %8499 = vmatprep.subr.bf16.mxu1 %v11125_v1  ;;  %v12058_v1 = vld [vmem:[#allocation22_spill] sm:$0xff] }
0x1b51   :  { %8501 = vmatpush1.bf16.msra.mxu1 %v11128_v12  ;;  %v12059_v12 = vld [vmem:[#allocation23_spill] sm:$0xff] }
0x1b52   :  { %8503 = vmatprep.subr.bf16.mxu1 %v11131_v39  ;;  %v12060_v39 = vld [vmem:[#allocation31_spill] sm:$0xff] }
0x1b55   :  { %8505 = vmatpush1.bf16.msra.mxu1 %v11134_v41  ;;  %v12061_v41 = vld [vmem:[#allocation24_spill] sm:$0xff] }
0x1b56   :  { %8507 = vmatprep.subr.bf16.mxu1 %v11137_v19  ;;  %v12062_v19 = vld [vmem:[#allocation34_spill] sm:$0xff] }
0x1b59   :  { %8509 = vmatpush1.bf16.msra.mxu1 %v11140_v49  ;;  %v12063_v49 = vld [vmem:[#allocation25_spill] sm:$0xff] }
0x1b5a   :  { %8511 = vmatprep.subr.bf16.mxu1 %v11143_v42  ;;  %v12064_v42 = vld [vmem:[#allocation35_spill] sm:$0xff] }
0x1b5d   :  { %8513 = vmatpush1.bf16.msra.mxu1 %v11146_v47  ;;  %v12065_v47 = vld [vmem:[#allocation28_spill] sm:$0xff] }
0x1b5e   :  { %8515 = vmatprep.subr.bf16.mxu1 %v11149_v2  ;;  %v12066_v2 = vld [vmem:[#allocation38_spill] sm:$0xff] }
0x1b61   :  { %8517 = vmatpush1.bf16.msra.mxu1 %v11152_v4  ;;  %v12067_v4 = vld [vmem:[#allocation29_spill] sm:$0xff] }
0x1b62   :  { %8519 = vmatprep.subr.bf16.mxu1 %v11155_v15  ;;  %v12068_v15 = vld [vmem:[#allocation39_spill] sm:$0xff] }
0x1b65   :  { %8521 = vmatpush1.bf16.msra.mxu1 %v11158_v29  ;;  %v12069_v29 = vld [vmem:[#allocation32_spill] sm:$0xff] }
0x1b66   :  { %8523 = vmatprep.subr.bf16.mxu1 %v11161_v44  ;;  %v12070_v44 = vld [vmem:[#allocation41_spill] sm:$0xff] }
0x1b69   :  { %8525 = vmatpush1.bf16.msra.mxu1 %v11164_v45  ;;  %v12071_v45 = vld [vmem:[#allocation33_spill] sm:$0xff] }
0x1b6a   :  { %8527 = vmatprep.subr.bf16.mxu1 %v12055_v7 }
0x1b6d   :  { %8529 = vmatpush1.bf16.msra.mxu1 %v12056_v37 }
0x1b6e   :  { %8594 = vmatprep.subr.bf16.mxu1 %v11916_v11 }
0x1c03   :  { %v4447_v63 = vpop.f32.mrb[38].mxu1 }
0x1c04   :  { %v4448_v6 = vadd.f32 %v11373_v38, %v4447_v63  ;;  %v6141_v60 = vpop.f32.mrb[39].mxu1 }
0x1c06   :  { %4452 = vst [vmem:[#allocation15 + $0x28] sm:$0xff] %v4448_v6  ;;  %v4453_v3 = vsel %vm1903_vm1, %v4448_v6, -1e+30 }
0x1c07   :  { %4454 = vmax.xlane.f32.xlu0 %v4453_v3 }
0x1c94   :  { %v4455_v46 = vpop.xlane.xlu0 %4454 }
0x1c95   :  { %vm4456_vm10 = vcmp.eq.f32.partialorder %v4453_v3, %v4455_v46 }
0x1c96   :  { %v4457_v9 = vsel %vm4456_vm10, %v10566_v32, 128.0 }
0x1c97   :  { %4458 = vmin.xlane.f32.xlu1 %v4457_v9 }
0x1d24   :  { %v4459_v26 = vpop.xlane.xlu1 %4458 }
0x1d25   :  { %vm4460_vm11 = vcmp.eq.f32.partialorder %v10566_v32, %v4459_v26 }
0x1d26   :  { %v5544_v52 = vsel %vm4460_vm11, 1.0, %v11176_v62 }
0x1d27   :  { %v4473_v43 = vmul.f32 %v5544_v52, %v4472_v0 }
0x1d29   :  { %v4474_v51 = vadd.f32 %v4473_v43, %v4470_v21 }
0x1d2b   :  { %6175 = vmatmul.mubr.f32.vlgmr.msra.gmra.mrb[40].mxu0 %v4474_v51 }
0x1d2c   :  { %4846 = vmatprep.mubr.f32.mxu0 %v11334_v58  ;;  %8533 = vmatpush1.bf16.msra.mxu0 %v11179_v8  ;;  %v12072_v8 = vld [vmem:[#allocation42_spill] sm:$0xff] }
0x1d2d   :  { %8535 = vmatprep.subr.bf16.mxu0 %v11181_v30  ;;  %v12073_v30 = vld [vmem:[#allocation36_spill] sm:$0xff] }
0x1d30   :  { %8537 = vmatpush1.bf16.msra.mxu0 %v12058_v1 }
0x1d31   :  { %8539 = vmatprep.subr.bf16.mxu0 %v12059_v12 }
0x1d34   :  { %8541 = vmatpush1.bf16.msra.mxu0 %v12060_v39 }
0x1d35   :  { %8543 = vmatprep.subr.bf16.mxu0 %v12061_v41 }
0x1d38   :  { %8545 = vmatpush1.bf16.msra.mxu0 %v12062_v19 }
0x1d39   :  { %8547 = vmatprep.subr.bf16.mxu0 %v12063_v49 }
0x1d3c   :  { %8549 = vmatpush1.bf16.msra.mxu0 %v12064_v42 }
0x1d3d   :  { %8551 = vmatprep.subr.bf16.mxu0 %v12065_v47 }
0x1d40   :  { %8553 = vmatpush1.bf16.msra.mxu0 %v12066_v2 }
0x1d41   :  { %8555 = vmatprep.subr.bf16.mxu0 %v12067_v4  ;;  %v4989_v4 = vld [vmem:[#allocation10] sm:$0xff] }
0x1d44   :  { %8557 = vmatpush1.bf16.msra.mxu0 %v12068_v15  ;;  %v4990_v15 = vld [vmem:[#allocation10 + $0x8] sm:$0xff] }
0x1d45   :  { %8559 = vmatprep.subr.bf16.mxu0 %v12069_v29  ;;  %v4991_v29 = vld [vmem:[#allocation10 + $0x10] sm:$0xff] }
0x1d48   :  { %8561 = vmatpush1.bf16.msra.mxu0 %v12070_v44  ;;  %v8619_v44 = vpack.c.bf16 %v4990_v15, %v4989_v4  ;;  %v5111_v4 = vld [vmem:[#allocation12 + $0x120] sm:$0xff] }
0x1d49   :  { %8563 = vmatprep.subr.bf16.mxu0 %v12071_v45 }
0x1d4c   :  { %8565 = vmatpush1.bf16.msra.mxu0 %v12072_v8  ;;  %v4993_v8 = vld [vmem:[#allocation10 + $0x20] sm:$0xff] }
0x1d4d   :  { %8567 = vmatprep.subr.bf16.mxu0 %v12073_v30  ;;  %v4994_v30 = vld [vmem:[#allocation10 + $0x28] sm:$0xff] }
0x1d50   :  { %8569 = vmatpush1.bf16.msra.mxu0 %v12074_v28  ;;  %v8625_v28 = vpack.c.bf16 %v4994_v30, %v4993_v8  ;;  %v5119_v8 = vld [vmem:[#allocation12 + $0x160] sm:$0xff] }
0x1d51   :  { %8571 = vmatprep.subr.bf16.mxu0 %v12075_v50  ;;  %v4996_v50 = vld [vmem:[#allocation10 + $0x38] sm:$0xff] }
0x1d54   :  { %8573 = vmatpush1.bf16.msra.mxu0 %v12076_v53  ;;  %v4997_v53 = vld [vmem:[#allocation10 + $0x40] sm:$0xff] }
0x1d55   :  { %8575 = vmatprep.subr.bf16.mxu0 %v12077_v61  ;;  %v4998_v61 = vld [vmem:[#allocation10 + $0x48] sm:$0xff] }
0x1d58   :  { %8577 = vmatpush1.bf16.msra.mxu0 %v12078_v24  ;;  %v8631_v24 = vpack.c.bf16 %v4998_v61, %v4997_v53  ;;  %v5127_v53 = vld [vmem:[#allocation12 + $0x1a0] sm:$0xff] }
0x1d59   :  { %8579 = vmatprep.subr.bf16.mxu0 %v12079_v59  ;;  %v4999_v59 = vld [vmem:[#allocation10 + $0x50] sm:$0xff] }
0x1d5c   :  { %8581 = vmatpush1.bf16.msra.mxu0 %v12080_v36  ;;  %v5000_v36 = vld [vmem:[#allocation10 + $0x58] sm:$0xff] }
0x1d5d   :  { %8583 = vmatprep.subr.bf16.mxu0 %v11254_v20  ;;  %v12081_v20 = vld [vmem:[#allocation50_spill] sm:$0xff] }
0x1d60   :  { %8585 = vmatpush1.bf16.msra.mxu0 %v11257_v14  ;;  %v12082_v14 = vld [vmem:[#allocation51_spill] sm:$0xff] }
0x1d61   :  { %8587 = vmatprep.subr.bf16.mxu0 %v11260_v18  ;;  %v12083_v18 = vld [vmem:[#allocation52_spill] sm:$0xff] }
0x1d64   :  { %8589 = vmatpush1.bf16.msra.mxu0 %v11263_v5  ;;  %v12084_v5 = vld [vmem:[#allocation53_spill] sm:$0xff] }
0x1d65   :  { %8591 = vmatprep.subr.bf16.mxu0 %v11266_v27  ;;  %v12085_v27 = vld [vmem:[#allocation54_spill] sm:$0xff] }
0x1d68   :  { %8593 = vmatpush1.bf16.msra.mxu0 %v11269_v33  ;;  %v12087_v33 = vld [vmem:[#allocation56_spill] sm:$0xff] }
0x1d69   :  { %8618 = vmatprep.subr.bf16.mxu0 %v11916_v11 }
0x1dfe   :  { %v4557_v54 = vpop.f32.mrb[40].mxu0 }
0x1dff   :  { %v6176_v40 = vpop.f32.mrb[41].mxu0  ;;  %4776 = vmatmul.mubr.f32.vlgmr.msra.gmra.mrb[40].mxu1 %v4557_v54  ;;  %4847 = vmatmul.mubr.f32.vlgmr.msra.gmra.mrb[42].mxu0 %v4557_v54  ;;  %v8634_v54 = vpack.c.bf16 %v5000_v36, %v4999_v59  ;;  %v5136_v59 = vld [vmem:[#allocation12 + $0x1e8] sm:$0xff] }
0x1e00   :  { %8596 = vmatpush3.bf16.msra.mxu1 %v11294_v16  ;;  %6209 = vmatprep.mubr.msk.f32.mxu1 %vm9172_vm0, %v11176_v62  ;;  %v4689_v16 = vld [vmem:[%s11504_s7] sm:$0xf] }
0x1e01   :  { %8597 = vmatprep.subr.bf16.mxu1 %v11916_v11  ;;  %6244 = vmatprep.mubr.msk.f32.mxu0 %vm9172_vm0, %v11176_v62  ;;  %v12086_v62 = vld [vmem:[#allocation55_spill] sm:$0xff]  ;;  %v4694_v55 = vrot.slane %v4689_v16, %v12088_v56  ;;  %v4698_v25 = vrot.slane %v4689_v16, %v12089_v34  ;;  %v4706_v9 = vrot.slane %v4689_v16, %v11919_v23  ;;  %v5001_v40 = vld [vmem:[#allocation10 + $0x60] sm:$0xff] }
0x1e02   :  { %v4702_v35 = vrot.slane %v4689_v16, %v11920_v48  ;;  %8620 = vmatpush3.bf16.msra.mxu0 %v8619_v44  ;;  %v5076_v16 = vld [vmem:[#allocation12 + $0x8] sm:$0xff] }
0x1e03   :  { %8621 = vmatprep.subr.bf16.mxu0 %v11916_v11  ;;  %v5120_v44 = vld [vmem:[#allocation12 + $0x168] sm:$0xff] }
0x1e04   :  { %8599 = vmatpush3.bf16.msra.mxu1 %v12081_v20  ;;  %v5002_v20 = vld [vmem:[#allocation10 + $0x68] sm:$0xff] }
0x1e05   :  { %8600 = vmatprep.subr.bf16.mxu1 %v11916_v11 }
0x1e08   :  { %8602 = vmatpush3.bf16.msra.mxu1 %v12082_v14  ;;  %v8637_v14 = vpack.c.bf16 %v5002_v20, %v5001_v40  ;;  %v5135_v40 = vld [vmem:[#allocation12 + $0x1e0] sm:$0xff] }
0x1e09   :  { %8603 = vmatprep.subr.bf16.mxu1 %v11916_v11 }
0x1e0c   :  { %8605 = vmatpush3.bf16.msra.mxu1 %v12083_v18 }
0x1e0d   :  { %8606 = vmatprep.subr.bf16.mxu1 %v11916_v11 }
0x1e10   :  { %8608 = vmatpush3.bf16.msra.mxu1 %v12084_v5 }
0x1e11   :  { %8609 = vmatprep.subr.bf16.mxu1 %v11916_v11 }
0x1e14   :  { %8611 = vmatpush3.bf16.msra.mxu1 %v12085_v27  ;;  %v5003_v27 = vld [vmem:[#allocation10 + $0x70] sm:$0xff] }
0x1e15   :  { %8612 = vmatprep.subr.bf16.mxu1 %v11916_v11 }
0x1e18   :  { %8614 = vmatpush3.bf16.msra.mxu1 %v12086_v62  ;;  %v5004_v62 = vld [vmem:[#allocation10 + $0x78] sm:$0xff] }
0x1e19   :  { %8615 = vmatprep.subr.bf16.mxu1 %v11916_v11 }
0x1e1c   :  { %8617 = vmatpush3.bf16.msra.mxu1 %v12087_v33  ;;  %v8640_v33 = vpack.c.bf16 %v5004_v62, %v5003_v27  ;;  %v5139_v27 = vld [vmem:[#allocation12 + $0x200] sm:$0xff] }
0x1e1d   :  { %v5143_v62 = vld [vmem:[#allocation12 + $0x220] sm:$0xff] }
0x1ed2   :  { %v4777_v13 = vpop.f32.mrb[40].mxu1  ;;  %v4848_v10 = vpop.f32.mrb[42].mxu0 }
0x1ed3   :  { %v4778_v31 = vadd.f32 %v4777_v13, %v4694_v55  ;;  %v4779_v57 = vpop.f32.mrb[41].mxu1  ;;  %v4850_v7 = vpop.f32.mrb[43].mxu0  ;;  %v4849_v21 = vadd.f32 %v4848_v10, %v4702_v35  ;;  %v5080_v55 = vld [vmem:[#allocation12 + $0x28] sm:$0xff]  ;;  %v5078_v13 = vld [vmem:[#allocation12 + $0x18] sm:$0xff] }
0x1ed4   :  { %v4780_v63 = vadd.f32 %v4779_v57, %v4698_v25  ;;  %v4851_v0 = vadd.f32 %v4850_v7, %v4706_v9  ;;  %v8642_v10 = vpack.c.bf16 %v5080_v55, %v5076_v16  ;;  %v5082_v25 = vld [vmem:[#allocation12 + $0x38] sm:$0xff]  ;;  %v5079_v57 = vld [vmem:[#allocation12 + $0x20] sm:$0xff]  ;;  %v5092_v35 = vld [vmem:[#allocation12 + $0x88] sm:$0xff] }
0x1ed5   :  { %v5546_v37 = vmul.f32 -1.442695, %v4778_v31  ;;  %v5075_v31 = vld [vmem:[#allocation12] sm:$0xff]  ;;  %v8706_v7 = vpack.c.bf16 %v5082_v25, %v5078_v13  ;;  %v5148_v16 = vld [vmem:[#allocation12 + $0x248] sm:$0xff] }
0x1ed6   :  { %v5547_v6 = vmul.f32 -1.442695, %v4780_v63  ;;  %v5084_v63 = vld [vmem:[#allocation12 + $0x48] sm:$0xff]  ;;  %8643 = vmatprep.subr.bf16.mxu1 %v8642_v10  ;;  %v5147_v10 = vld [vmem:[#allocation12 + $0x240] sm:$0xff] }
0x1ed7   :  { %8959 = vpow2.f32 %v5546_v37  ;;  %v8644_v37 = vpack.c.bf16 %v5079_v57, %v5075_v31  ;;  %v5152_v55 = vld [vmem:[#allocation12 + $0x268] sm:$0xff]  ;;  %v5151_v25 = vld [vmem:[#allocation12 + $0x260] sm:$0xff] }
0x1ed8   :  { %8961 = vpow2.f32 %v5547_v6  ;;  %v5088_v6 = vld [vmem:[#allocation12 + $0x68] sm:$0xff]  ;;  %v8678_v13 = vpack.c.bf16 %v5152_v55, %v5148_v16  ;;  %v8680_v31 = vpack.c.bf16 %v5151_v25, %v5147_v10  ;;  %v5085_v16 = vld [vmem:[#allocation12 + $0x50] sm:$0xff]  ;;  %v5098_v10 = vld [vmem:[#allocation12 + $0xb8] sm:$0xff] }
0x1ed9   :  { %v5156_v57 = vld [vmem:[#allocation12 + $0x288] sm:$0xff]  ;;  %v5089_v55 = vld [vmem:[#allocation12 + $0x70] sm:$0xff] }
0x1ee1   :  { %v8960_v60 = vpop.eup %8959 }
0x1ee2   :  { %v4856_v3 = vadd.f32 1.0, %v8960_v60  ;;  %v8962_v46 = vpop.eup %8961  ;;  %v8646_v60 = vpack.c.bf16 %v5088_v6, %v5084_v63  ;;  %v5155_v63 = vld [vmem:[#allocation12 + $0x280] sm:$0xff] }
0x1ee3   :  { %v4862_v17 = vadd.f32 1.0, %v8962_v46  ;;  %v5087_v46 = vld [vmem:[#allocation12 + $0x60] sm:$0xff] }
0x1ee4   :  { %8963 = vrcp.f32 %v4856_v3  ;;  %v5083_v3 = vld [vmem:[#allocation12 + $0x40] sm:$0xff] }
0x1ee5   :  { %8965 = vrcp.f32 %v4862_v17  ;;  %v8648_v9 = vpack.c.bf16 %v5087_v46, %v5083_v3  ;;  %v5096_v17 = vld [vmem:[#allocation12 + $0xa8] sm:$0xff]  ;;  %v5159_v6 = vld [vmem:[#allocation12 + $0x2a0] sm:$0xff] }
0x1ee6   :  { %v5164_v3 = vld [vmem:[#allocation12 + $0x2c8] sm:$0xff] }
0x1ee7   :  { %v5168_v46 = vld [vmem:[#allocation12 + $0x2e8] sm:$0xff] }
0x1eee   :  { %v8964_v26 = vpop.eup %8963 }
0x1eef   :  { %v4865_v52 = vmul.f32 %v8964_v26, %v4851_v0  ;;  %v8966_v51 = vpop.eup %8965  ;;  %v8650_v0 = vpack.c.bf16 %v5096_v17, %v5092_v35  ;;  %v5091_v26 = vld [vmem:[#allocation12 + $0x80] sm:$0xff] }
0x1ef0   :  { %v4868_v1 = vsub.f32 1.0, %v8966_v51  ;;  %v4870_v41 = vmul.f32 %v8966_v51, %v11334_v58  ;;  %v4992_v58 = vld [vmem:[#allocation10 + $0x18] sm:$0xff]  ;;  %v5104_v51 = vld [vmem:[#allocation12 + $0xe8] sm:$0xff]  ;;  %v5163_v35 = vld [vmem:[#allocation12 + $0x2c0] sm:$0xff] }
0x1ef1   :  { %v4866_v43 = vadd.f32 %v4865_v52, %v4849_v21  ;;  %v8622_v45 = vpack.c.bf16 %v4992_v58, %v4991_v29  ;;  %v5095_v21 = vld [vmem:[#allocation12 + $0xa0] sm:$0xff]  ;;  %v5116_v29 = vld [vmem:[#allocation12 + $0x148] sm:$0xff] }
0x1ef2   :  { %v8652_v52 = vpack.c.bf16 %v5095_v21, %v5091_v26  ;;  %v8662_v58 = vpack.c.bf16 %v5120_v44, %v5116_v29  ;;  %v5167_v17 = vld [vmem:[#allocation12 + $0x2e0] sm:$0xff]  ;;  %v5172_v26 = vld [vmem:[#allocation12 + $0x308] sm:$0xff] }
0x1ef3   :  { %8967 = vtanh.f32 %v4866_v43  ;;  %8623 = vmatpush3.bf16.msra.mxu0 %v8622_v45  ;;  %v5100_v43 = vld [vmem:[#allocation12 + $0xc8] sm:$0xff]  ;;  %v5115_v45 = vld [vmem:[#allocation12 + $0x140] sm:$0xff] }
0x1ef4   :  { %8624 = vmatprep.subr.bf16.mxu0 %v11916_v11  ;;  %v8664_v30 = vpack.c.bf16 %v5119_v8, %v5115_v45  ;;  %v5176_v21 = vld [vmem:[#allocation12 + $0x328] sm:$0xff]  ;;  %v5187_v29 = vld [vmem:[#allocation12 + $0x380] sm:$0xff] }
0x1ef5   :  { %v5191_v44 = vld [vmem:[#allocation12 + $0x3a0] sm:$0xff]  ;;  %v5196_v45 = vld [vmem:[#allocation12 + $0x3c8] sm:$0xff] }
0x1ef6   :  { %v5200_v8 = vld [vmem:[#allocation12 + $0x3e8] sm:$0xff] }
0x1ef7   :  { %8626 = vmatpush3.bf16.msra.mxu0 %v8625_v28  ;;  %v5124_v28 = vld [vmem:[#allocation12 + $0x188] sm:$0xff] }
0x1ef8   :  { %8627 = vmatprep.subr.bf16.mxu0 %v11916_v11 }
0x1efd   :  { %v8968_v12 = vpop.eup %8967 }
0x1efe   :  { %v4869_v39 = vmul.f32 %v8968_v12, %v4868_v1  ;;  %v8654_v1 = vpack.c.bf16 %v5104_v51, %v5100_v43  ;;  %v5099_v12 = vld [vmem:[#allocation12 + $0xc0] sm:$0xff] }
0x1eff   :  { %v5171_v43 = vld [vmem:[#allocation12 + $0x300] sm:$0xff] }
0x1f00   :  { %v11441_v19 = vadd.f32 %v4870_v41, %v4869_v39  ;;  %v5103_v39 = vld [vmem:[#allocation12 + $0xe0] sm:$0xff] }
0x1f01   :  { %v8656_v41 = vpack.c.bf16 %v5103_v39, %v5099_v12  ;;  %v5175_v51 = vld [vmem:[#allocation12 + $0x320] sm:$0xff]  ;;  %v5180_v12 = vld [vmem:[#allocation12 + $0x348] sm:$0xff] }
0x1f02   :  { %6210 = vmatmul.mubr.f32.vlgmr.msra.gmra.mrb[42].mxu1 %v11441_v19  ;;  %v5184_v39 = vld [vmem:[#allocation12 + $0x368] sm:$0xff] }
0x1f03   :  { %5289 = vmatprep.mubr.f32.mxu1 %v11441_v19  ;;  %8645 = vmatpush1.bf16.msra.mxu1 %v8644_v37 }
0x1f04   :  { %8647 = vmatprep.subr.bf16.mxu1 %v8646_v60  ;;  %v8684_v60 = vpack.c.bf16 %v5159_v6, %v5155_v63 }
0x1f07   :  { %8649 = vmatpush1.bf16.msra.mxu1 %v8648_v9  ;;  %v8686_v9 = vpack.c.bf16 %v5168_v46, %v5164_v3  ;;  %v5105_v3 = vld [vmem:[#allocation12 + $0xf0] sm:$0xff]  ;;  %v5110_v46 = vld [vmem:[#allocation12 + $0x118] sm:$0xff] }
0x1f08   :  { %8651 = vmatprep.subr.bf16.mxu1 %v8650_v0  ;;  %v8688_v0 = vpack.c.bf16 %v5167_v17, %v5163_v35 }
0x1f0b   :  { %8653 = vmatpush1.bf16.msra.mxu1 %v8652_v52  ;;  %v8690_v52 = vpack.c.bf16 %v5176_v21, %v5172_v26  ;;  %v5113_v26 = vld [vmem:[#allocation12 + $0x130] sm:$0xff]  ;;  %v5118_v21 = vld [vmem:[#allocation12 + $0x158] sm:$0xff] }
0x1f0c   :  { %8655 = vmatprep.subr.bf16.mxu1 %v8654_v1  ;;  %v8692_v1 = vpack.c.bf16 %v5175_v51, %v5171_v43 }
0x1f0f   :  { %8657 = vmatpush1.bf16.msra.mxu1 %v8656_v41  ;;  %v8694_v41 = vpack.c.bf16 %v5184_v39, %v5180_v12  ;;  %v5121_v12 = vld [vmem:[#allocation12 + $0x170] sm:$0xff]  ;;  %v5126_v39 = vld [vmem:[#allocation12 + $0x198] sm:$0xff] }
0x1fd5   :  { %v4961_v49 = vpop.f32.mrb[42].mxu1 }
0x1fd6   :  { %v4962_v42 = vadd.f32 %v11373_v38, %v4961_v49  ;;  %v6211_v47 = vpop.f32.mrb[43].mxu1  ;;  %v4995_v38 = vld [vmem:[#allocation10 + $0x30] sm:$0xff]  ;;  %v5108_v49 = vld [vmem:[#allocation12 + $0x108] sm:$0xff] }
0x1fd7   :  { %v8628_v22 = vpack.c.bf16 %v4996_v50, %v4995_v38  ;;  %v5128_v38 = vld [vmem:[#allocation12 + $0x1a8] sm:$0xff] }
0x1fd8   :  { %4966 = vst [vmem:[#allocation15 + $0x30] sm:$0xff] %v4962_v42  ;;  %v4967_v2 = vsel %vm1903_vm1, %v4962_v42, -1e+30  ;;  %v5112_v42 = vld [vmem:[#allocation12 + $0x128] sm:$0xff]  ;;  %v8666_v50 = vpack.c.bf16 %v5128_v38, %v5124_v28  ;;  %v5195_v28 = vld [vmem:[#allocation12 + $0x3c0] sm:$0xff] }
0x1fd9   :  { %4968 = vmax.xlane.f32.xlu0 %v4967_v2  ;;  %8629 = vmatpush3.bf16.msra.mxu0 %v8628_v22  ;;  %v8658_v47 = vpack.c.bf16 %v5112_v42, %v5108_v49  ;;  %v5123_v22 = vld [vmem:[#allocation12 + $0x180] sm:$0xff] }
0x1fda   :  { %8630 = vmatprep.subr.bf16.mxu0 %v11916_v11  ;;  %v8668_v61 = vpack.c.bf16 %v5127_v53, %v5123_v22  ;;  %v5179_v49 = vld [vmem:[#allocation12 + $0x340] sm:$0xff]  ;;  %v4982_v22 = vld [vmem:[#allocation7 + $0x30] sm:$0xff]  ;;  %v4983_v53 = vstv %s4980_s25 }
0x1fdb   :  { %8659 = vmatprep.subr.bf16.mxu1 %v8658_v47  ;;  %v5183_v42 = vld [vmem:[#allocation12 + $0x360] sm:$0xff] }
0x1fdc   :  { %v8696_v47 = vpack.c.bf16 %v5183_v42, %v5179_v49  ;;  %v5199_v38 = vld [vmem:[#allocation12 + $0x3e0] sm:$0xff] }
0x1fdd   :  { %8632 = vmatpush3.bf16.msra.mxu0 %v8631_v24  ;;  %v5132_v24 = vld [vmem:[#allocation12 + $0x1c8] sm:$0xff] }
0x1fde   :  { %8633 = vmatprep.subr.bf16.mxu0 %v11916_v11  ;;  %v8670_v36 = vpack.c.bf16 %v5136_v59, %v5132_v24  ;;  %v4984_v59 = vmul.f32 %v4983_v53, %v4982_v22  ;;  %v5145_v22 = vld [vmem:[#allocation12 + $0x230] sm:$0xff]  ;;  %v5150_v53 = vld [vmem:[#allocation12 + $0x258] sm:$0xff] }
0x1fe1   :  { %8635 = vmatpush3.bf16.msra.mxu0 %v8634_v54  ;;  %v5131_v54 = vld [vmem:[#allocation12 + $0x1c0] sm:$0xff] }
0x1fe2   :  { %8636 = vmatprep.subr.bf16.mxu0 %v11916_v11  ;;  %v8672_v20 = vpack.c.bf16 %v5135_v40, %v5131_v54  ;;  %v5081_v54 = vld [vmem:[#allocation12 + $0x30] sm:$0xff]  ;;  %v11458_v40 = vld [vmem:[#allocation15] sm:$0xff] }
0x1fe5   :  { %8638 = vmatpush3.bf16.msra.mxu0 %v8637_v14  ;;  %v5140_v14 = vld [vmem:[#allocation12 + $0x208] sm:$0xff] }
0x1fe6   :  { %8639 = vmatprep.subr.bf16.mxu0 %v11916_v11 }
0x1fe9   :  { %8641 = vmatpush3.bf16.msra.mxu0 %v8640_v33  ;;  %v8676_v33 = vpack.c.bf16 %v5143_v62, %v5139_v27 }
0x1fea   :  { %8707 = vmatprep.subr.bf16.mxu0 %v8706_v7  ;;  %v5160_v7 = vld [vmem:[#allocation12 + $0x2a8] sm:$0xff] }
0x1feb   :  { %v8682_v37 = vpack.c.bf16 %v5160_v7, %v5156_v57  ;;  %v5097_v57 = vld [vmem:[#allocation12 + $0xb0] sm:$0xff]  ;;  %v5102_v7 = vld [vmem:[#allocation12 + $0xd8] sm:$0xff] }
0x2066   :  { %v4969_v18 = vpop.xlane.xlu0 %4968 }
0x2067   :  { %vm4970_vm12 = vcmp.eq.f32.partialorder %v4967_v2, %v4969_v18  ;;  %v5107_v2 = vld [vmem:[#allocation12 + $0x100] sm:$0xff]  ;;  %v5144_v18 = vld [vmem:[#allocation12 + $0x228] sm:$0xff] }
0x2068   :  { %v4971_v5 = vsel %vm4970_vm12, %v10566_v32, 128.0  ;;  %v8660_v15 = vpack.c.bf16 %v5111_v4, %v5107_v2  ;;  %v5188_v2 = vld [vmem:[#allocation12 + $0x388] sm:$0xff] }
0x2069   :  { %4972 = vmin.xlane.f32.xlu1 %v4971_v5  ;;  %v8674_v5 = vpack.c.bf16 %v5144_v18, %v5140_v14  ;;  %v5192_v4 = vld [vmem:[#allocation12 + $0x3a8] sm:$0xff]  ;;  %v5086_v14 = vld [vmem:[#allocation12 + $0x58] sm:$0xff] }
0x206a   :  { %8661 = vmatpush1.bf16.msra.mxu1 %v8660_v15  ;;  %v8698_v15 = vpack.c.bf16 %v5192_v4, %v5188_v2  ;;  %v5090_v18 = vld [vmem:[#allocation12 + $0x78] sm:$0xff]  ;;  %v5129_v2 = vld [vmem:[#allocation12 + $0x1b0] sm:$0xff] }
0x206b   :  { %8663 = vmatprep.subr.bf16.mxu1 %v8662_v58  ;;  %v8700_v58 = vpack.c.bf16 %v5191_v44, %v5187_v29  ;;  %v5134_v4 = vld [vmem:[#allocation12 + $0x1d8] sm:$0xff] }
0x206e   :  { %8665 = vmatpush1.bf16.msra.mxu1 %v8664_v30  ;;  %v8702_v30 = vpack.c.bf16 %v5200_v8, %v5196_v45  ;;  %v5137_v45 = vld [vmem:[#allocation12 + $0x1f0] sm:$0xff]  ;;  %v5142_v8 = vld [vmem:[#allocation12 + $0x218] sm:$0xff] }
0x206f   :  { %8667 = vmatprep.subr.bf16.mxu1 %v8666_v50  ;;  %v8704_v50 = vpack.c.bf16 %v5199_v38, %v5195_v28 }
0x2072   :  { %8669 = vmatpush1.bf16.msra.mxu1 %v8668_v61  ;;  %v4986_v61 = vstv %s4985_s27 }
0x2073   :  { %8671 = vmatprep.subr.bf16.mxu1 %v8670_v36  ;;  %v5077_v36 = vld [vmem:[#allocation12 + $0x10] sm:$0xff] }
0x2074   :  { %v8708_v27 = vpack.c.bf16 %v5081_v54, %v5077_v36  ;;  %v5149_v36 = vld [vmem:[#allocation12 + $0x250] sm:$0xff] }
0x2075   :  { %v5153_v54 = vld [vmem:[#allocation12 + $0x270] sm:$0xff] }
0x2076   :  { %8673 = vmatpush1.bf16.msra.mxu1 %v8672_v20 }
0x2077   :  { %8675 = vmatprep.subr.bf16.mxu1 %v8674_v5 }
0x207a   :  { %8677 = vmatpush1.bf16.msra.mxu1 %v8676_v33  ;;  %v8710_v33 = vpack.c.bf16 %v5090_v18, %v5086_v14  ;;  %v5162_v14 = vld [vmem:[#allocation12 + $0x2b8] sm:$0xff]  ;;  %v8744_v18 = vpack.c.bf16 %v5153_v54, %v5149_v36  ;;  %v5398_v54 = vld [vmem:[#allocation13 + $0x60] sm:$0xff] }
0x207b   :  { %8679 = vmatprep.subr.bf16.mxu1 %v8678_v13  ;;  %v5094_v13 = vld [vmem:[#allocation12 + $0x98] sm:$0xff] }
0x207c   :  { %v8714_v25 = vpack.c.bf16 %v5098_v10, %v5094_v13  ;;  %v5165_v10 = vld [vmem:[#allocation12 + $0x2d0] sm:$0xff] }
0x207e   :  { %8681 = vmatpush1.bf16.msra.mxu1 %v8680_v31  ;;  %v5093_v31 = vld [vmem:[#allocation12 + $0x90] sm:$0xff] }
0x207f   :  { %8683 = vmatprep.subr.bf16.mxu1 %v8682_v37  ;;  %v5106_v37 = vld [vmem:[#allocation12 + $0xf8] sm:$0xff]  ;;  %v8716_v63 = vpack.c.bf16 %v5097_v57, %v5093_v31 }
0x2080   :  { %v8718_v6 = vpack.c.bf16 %v5106_v37, %v5102_v7  ;;  %v5178_v31 = vld [vmem:[#allocation12 + $0x338] sm:$0xff]  ;;  %v5173_v37 = vld [vmem:[#allocation12 + $0x310] sm:$0xff] }
0x2082   :  { %8685 = vmatpush1.bf16.msra.mxu1 %v8684_v60  ;;  %v5101_v60 = vld [vmem:[#allocation12 + $0xd0] sm:$0xff] }
0x2083   :  { %8687 = vmatprep.subr.bf16.mxu1 %v8686_v9  ;;  %v5114_v9 = vld [vmem:[#allocation12 + $0x138] sm:$0xff]  ;;  %v8720_v35 = vpack.c.bf16 %v5105_v3, %v5101_v60 }
0x2084   :  { %v8722_v17 = vpack.c.bf16 %v5114_v9, %v5110_v46  ;;  %v5186_v60 = vld [vmem:[#allocation12 + $0x378] sm:$0xff]  ;;  %v5181_v9 = vld [vmem:[#allocation12 + $0x350] sm:$0xff] }
0x2086   :  { %8689 = vmatpush1.bf16.msra.mxu1 %v8688_v0  ;;  %v5109_v0 = vld [vmem:[#allocation12 + $0x110] sm:$0xff] }
0x2087   :  { %8691 = vmatprep.subr.bf16.mxu1 %v8690_v52  ;;  %v5122_v52 = vld [vmem:[#allocation12 + $0x178] sm:$0xff]  ;;  %v8724_v43 = vpack.c.bf16 %v5113_v26, %v5109_v0 }
0x2088   :  { %v8726_v51 = vpack.c.bf16 %v5122_v52, %v5118_v21  ;;  %v5194_v0 = vld [vmem:[#allocation12 + $0x3b8] sm:$0xff]  ;;  %v5189_v52 = vld [vmem:[#allocation12 + $0x390] sm:$0xff] }
0x208a   :  { %8693 = vmatpush1.bf16.msra.mxu1 %v8692_v1  ;;  %v5117_v1 = vld [vmem:[#allocation12 + $0x150] sm:$0xff] }
0x208b   :  { %8695 = vmatprep.subr.bf16.mxu1 %v8694_v41  ;;  %v5130_v41 = vld [vmem:[#allocation12 + $0x1b8] sm:$0xff]  ;;  %v8728_v49 = vpack.c.bf16 %v5121_v12, %v5117_v1 }
0x208c   :  { %v8730_v42 = vpack.c.bf16 %v5130_v41, %v5126_v39  ;;  %v5202_v1 = vld [vmem:[#allocation12 + $0x3f8] sm:$0xff]  ;;  %v5197_v41 = vld [vmem:[#allocation12 + $0x3d0] sm:$0xff] }
0x208e   :  { %8697 = vmatpush1.bf16.msra.mxu1 %v8696_v47  ;;  %v5125_v47 = vld [vmem:[#allocation12 + $0x190] sm:$0xff] }
0x208f   :  { %8699 = vmatprep.subr.bf16.mxu1 %v8698_v15  ;;  %v5138_v15 = vld [vmem:[#allocation12 + $0x1f8] sm:$0xff]  ;;  %v8732_v29 = vpack.c.bf16 %v5129_v2, %v5125_v47 }
0x2090   :  { %v8734_v44 = vpack.c.bf16 %v5138_v15, %v5134_v4  ;;  %v5386_v4 = vld [vmem:[#allocation13] sm:$0xff]  ;;  %v5387_v15 = vld [vmem:[#allocation13 + $0x8] sm:$0xff] }
0x2092   :  { %8701 = vmatpush1.bf16.msra.mxu1 %v8700_v58  ;;  %v5133_v58 = vld [vmem:[#allocation12 + $0x1d0] sm:$0xff] }
0x2093   :  { %8703 = vmatprep.subr.bf16.mxu1 %v8702_v30  ;;  %v5146_v30 = vld [vmem:[#allocation12 + $0x238] sm:$0xff]  ;;  %v8736_v28 = vpack.c.bf16 %v5137_v45, %v5133_v58 }
0x2094   :  { %v8738_v38 = vpack.c.bf16 %v5146_v30, %v5142_v8  ;;  %v5389_v58 = vld [vmem:[#allocation13 + $0x18] sm:$0xff]  ;;  %v5390_v8 = vld [vmem:[#allocation13 + $0x20] sm:$0xff]  ;;  %v5391_v30 = vld [vmem:[#allocation13 + $0x28] sm:$0xff] }
0x2096   :  { %8705 = vmatpush1.bf16.msra.mxu1 %v8704_v50  ;;  %v5141_v50 = vld [vmem:[#allocation12 + $0x210] sm:$0xff] }
0x2097   :  { %8770 = vmatprep.subr.bf16.mxu1 %v11916_v11 }
0x20f6   :  { %v4973_v24 = vpop.xlane.xlu1 %4972 }
0x20f7   :  { %vm4974_vm13 = vcmp.eq.f32.partialorder %v10566_v32, %v4973_v24  ;;  %v8712_v32 = vpack.c.bf16 %v5089_v55, %v5085_v16  ;;  %v8740_v24 = vpack.c.bf16 %v5145_v22, %v5141_v50  ;;  %v5170_v16 = vld [vmem:[#allocation12 + $0x2f8] sm:$0xff]  ;;  %v5394_v22 = vld [vmem:[#allocation13 + $0x40] sm:$0xff] }
0x20f8   :  { %v5549_v20 = vsel %vm4974_vm13, 1.0, %v11458_v40 }
0x20f9   :  { %v4987_v5 = vmul.f32 %v5549_v20, %v4986_v61  ;;  %v5154_v61 = vld [vmem:[#allocation12 + $0x278] sm:$0xff] }
0x20fa   :  { %v5158_v20 = vld [vmem:[#allocation12 + $0x298] sm:$0xff] }
0x20fb   :  { %v4988_v62 = vadd.f32 %v4987_v5, %v4984_v59  ;;  %v8742_v59 = vpack.c.bf16 %v5154_v61, %v5150_v53  ;;  %v8746_v5 = vpack.c.bf16 %v5162_v14, %v5158_v20  ;;  %v5395_v53 = vld [vmem:[#allocation13 + $0x48] sm:$0xff] }
0x20fc   :  { %v8783_v61 = vpack.c.bf16 %v5395_v53, %v5394_v22  ;;  %v5399_v20 = vld [vmem:[#allocation13 + $0x68] sm:$0xff] }
0x20fd   :  { %6245 = vmatmul.mubr.f32.vlgmr.msra.gmra.mrb[44].mxu0 %v4988_v62  ;;  %v5161_v62 = vld [vmem:[#allocation12 + $0x2b0] sm:$0xff]  ;;  %v8789_v14 = vpack.c.bf16 %v5399_v20, %v5398_v54 }
0x20fe   :  { %5360 = vmatprep.mubr.f32.mxu0 %v11441_v19  ;;  %8709 = vmatpush1.bf16.msra.mxu0 %v8708_v27  ;;  %v5157_v27 = vld [vmem:[#allocation12 + $0x290] sm:$0xff] }
0x20ff   :  { %8711 = vmatprep.subr.bf16.mxu0 %v8710_v33  ;;  %v5166_v33 = vld [vmem:[#allocation12 + $0x2d8] sm:$0xff]  ;;  %v8748_v55 = vpack.c.bf16 %v5161_v62, %v5157_v27  ;;  %v5203_v62 = vld [vmem:[%s11504_s7] sm:$0xf] }
0x2100   :  { %v8750_v13 = vpack.c.bf16 %v5170_v16, %v5166_v33  ;;  %v5208_v33 = vrot.slane %v5203_v62, %v12088_v56  ;;  %v5216_v56 = vrot.slane %v5203_v62, %v11920_v48 }
0x2102   :  { %8713 = vmatpush1.bf16.msra.mxu0 %v8712_v32  ;;  %v5169_v32 = vld [vmem:[#allocation12 + $0x2f0] sm:$0xff] }
0x2103   :  { %8715 = vmatprep.subr.bf16.mxu0 %v8714_v25  ;;  %v5174_v25 = vld [vmem:[#allocation12 + $0x318] sm:$0xff]  ;;  %v8752_v57 = vpack.c.bf16 %v5169_v32, %v5165_v10 }
0x2104   :  { %v8754_v7 = vpack.c.bf16 %v5178_v31, %v5174_v25 }
0x2106   :  { %8717 = vmatpush1.bf16.msra.mxu0 %v8716_v63  ;;  %v5177_v63 = vld [vmem:[#allocation12 + $0x330] sm:$0xff] }
0x2107   :  { %8719 = vmatprep.subr.bf16.mxu0 %v8718_v6  ;;  %v5182_v6 = vld [vmem:[#allocation12 + $0x358] sm:$0xff]  ;;  %v8756_v3 = vpack.c.bf16 %v5177_v63, %v5173_v37 }
0x2108   :  { %v8758_v46 = vpack.c.bf16 %v5186_v60, %v5182_v6  ;;  %v5220_v6 = vrot.slane %v5203_v62, %v11919_v23  ;;  %v5553_v23 = vld [vmem:[%s11506_s9] ss:$0 sm:$0xff] }
0x210a   :  { %8721 = vmatpush1.bf16.msra.mxu0 %v8720_v35  ;;  %v5185_v35 = vld [vmem:[#allocation12 + $0x370] sm:$0xff] }
0x210b   :  { %8723 = vmatprep.subr.bf16.mxu0 %v8722_v17  ;;  %v5190_v17 = vld [vmem:[#allocation12 + $0x398] sm:$0xff]  ;;  %v8760_v26 = vpack.c.bf16 %v5185_v35, %v5181_v9 }
0x210c   :  { %v8762_v21 = vpack.c.bf16 %v5194_v0, %v5190_v17 }
0x210e   :  { %8725 = vmatpush1.bf16.msra.mxu0 %v8724_v43  ;;  %v5193_v43 = vld [vmem:[#allocation12 + $0x3b0] sm:$0xff] }
0x210f   :  { %8727 = vmatprep.subr.bf16.mxu0 %v8726_v51  ;;  %v5198_v51 = vld [vmem:[#allocation12 + $0x3d8] sm:$0xff]  ;;  %v8764_v12 = vpack.c.bf16 %v5193_v43, %v5189_v52 }
0x2110   :  { %v8766_v39 = vpack.c.bf16 %v5202_v1, %v5198_v51 }
0x2112   :  { %8729 = vmatpush1.bf16.msra.mxu0 %v8728_v49  ;;  %v5201_v49 = vld [vmem:[#allocation12 + $0x3f0] sm:$0xff] }
0x2113   :  { %8731 = vmatprep.subr.bf16.mxu0 %v8730_v42  ;;  %v8768_v42 = vpack.c.bf16 %v5201_v49, %v5197_v41 }
0x2116   :  { %8733 = vmatpush1.bf16.msra.mxu0 %v8732_v29  ;;  %v8771_v29 = vpack.c.bf16 %v5387_v15, %v5386_v4 }
0x2117   :  { %8735 = vmatprep.subr.bf16.mxu0 %v8734_v44  ;;  %v5388_v44 = vld [vmem:[#allocation13 + $0x10] sm:$0xff] }
0x2118   :  { %v8774_v45 = vpack.c.bf16 %v5389_v58, %v5388_v44 }
0x211a   :  { %8737 = vmatpush1.bf16.msra.mxu0 %v8736_v28  ;;  %v8777_v28 = vpack.c.bf16 %v5391_v30, %v5390_v8 }
0x211b   :  { %8739 = vmatprep.subr.bf16.mxu0 %v8738_v38  ;;  %v5392_v38 = vld [vmem:[#allocation13 + $0x30] sm:$0xff] }
0x211e   :  { %8741 = vmatpush1.bf16.msra.mxu0 %v8740_v24  ;;  %v5396_v24 = vld [vmem:[#allocation13 + $0x50] sm:$0xff] }
0x211f   :  { %8743 = vmatprep.subr.bf16.mxu0 %v8742_v59  ;;  %v5397_v59 = vld [vmem:[#allocation13 + $0x58] sm:$0xff] }
0x2120   :  { %v8786_v36 = vpack.c.bf16 %v5397_v59, %v5396_v24 }
0x2122   :  { %8745 = vmatpush1.bf16.msra.mxu0 %v8744_v18  ;;  %v5400_v18 = vld [vmem:[#allocation13 + $0x70] sm:$0xff] }
0x2123   :  { %8747 = vmatprep.subr.bf16.mxu0 %v8746_v5  ;;  %v5401_v5 = vld [vmem:[#allocation13 + $0x78] sm:$0xff] }
0x2124   :  { %v8792_v27 = vpack.c.bf16 %v5401_v5, %v5400_v18 }
0x2126   :  { %8749 = vmatpush1.bf16.msra.mxu0 %v8748_v55 }
0x2127   :  { %8751 = vmatprep.subr.bf16.mxu0 %v8750_v13  ;;  %v5212_v13 = vrot.slane %v5203_v62, %v12089_v34 }
0x212a   :  { %8753 = vmatpush1.bf16.msra.mxu0 %v8752_v57 }
0x212b   :  { %8755 = vmatprep.subr.bf16.mxu0 %v8754_v7 }
0x212e   :  { %8757 = vmatpush1.bf16.msra.mxu0 %v8756_v3 }
0x212f   :  { %8759 = vmatprep.subr.bf16.mxu0 %v8758_v46 }
0x2132   :  { %8761 = vmatpush1.bf16.msra.mxu0 %v8760_v26 }
0x2133   :  { %8763 = vmatprep.subr.bf16.mxu0 %v8762_v21 }
0x2136   :  { %8765 = vmatpush1.bf16.msra.mxu0 %v8764_v12 }
0x2137   :  { %8767 = vmatprep.subr.bf16.mxu0 %v8766_v39 }
0x213a   :  { %8769 = vmatpush1.bf16.msra.mxu0 %v8768_v42 }
0x21d0   :  { %v5071_v47 = vpop.f32.mrb[44].mxu0 }
0x21d1   :  { %v6246_v2 = vpop.f32.mrb[45].mxu0  ;;  %5290 = vmatmul.mubr.f32.vlgmr.msra.gmra.mrb[44].mxu1 %v5071_v47  ;;  %5361 = vmatmul.mubr.f32.vlgmr.msra.gmra.mrb[46].mxu0 %v5071_v47 }
0x21d2   :  { %6279 = vmatprep.mubr.msk.f32.mxu1 %vm9172_vm0, %v11458_v40  ;;  %8772 = vmatpush3.bf16.msra.mxu1 %v8771_v29  ;;  %v5393_v40 = vld [vmem:[#allocation13 + $0x38] sm:$0xff] }
0x21d3   :  { %8773 = vmatprep.subr.bf16.mxu1 %v11916_v11  ;;  %v8780_v50 = vpack.c.bf16 %v5393_v40, %v5392_v38 }
0x21d6   :  { %8775 = vmatpush3.bf16.msra.mxu1 %v8774_v45 }
0x21d7   :  { %8776 = vmatprep.subr.bf16.mxu1 %v11916_v11 }
0x21da   :  { %8778 = vmatpush3.bf16.msra.mxu1 %v8777_v28 }
0x21db   :  { %8779 = vmatprep.subr.bf16.mxu1 %v11916_v11 }
0x21de   :  { %8781 = vmatpush3.bf16.msra.mxu1 %v8780_v50 }
0x21df   :  { %8782 = vmatprep.subr.bf16.mxu1 %v11916_v11 }
0x21e2   :  { %8784 = vmatpush3.bf16.msra.mxu1 %v8783_v61 }
0x21e3   :  { %8785 = vmatprep.subr.bf16.mxu1 %v11916_v11 }
0x21e6   :  { %8787 = vmatpush3.bf16.msra.mxu1 %v8786_v36 }
0x21e7   :  { %8788 = vmatprep.subr.bf16.mxu1 %v11916_v11 }
0x21ea   :  { %8790 = vmatpush3.bf16.msra.mxu1 %v8789_v14 }
0x21eb   :  { %8791 = vmatprep.subr.bf16.mxu1 %v11916_v11 }
0x21ee   :  { %8793 = vmatpush3.bf16.msra.mxu1 %v8792_v27 }
0x22a4   :  { %v5291_v16 = vpop.f32.mrb[44].mxu1  ;;  %v5362_v55 = vpop.f32.mrb[46].mxu0 }
0x22a5   :  { %v5292_v10 = vadd.f32 %v5291_v16, %v5208_v33  ;;  %v5293_v32 = vpop.f32.mrb[45].mxu1  ;;  %v5364_v25 = vpop.f32.mrb[47].mxu0  ;;  %v5363_v34 = vadd.f32 %v5362_v55, %v5216_v56 }
0x22a6   :  { %v5294_v57 = vadd.f32 %v5293_v32, %v5212_v13  ;;  %v5365_v3 = vadd.f32 %v5364_v25, %v5220_v6 }
0x22a7   :  { %v5551_v31 = vmul.f32 -1.442695, %v5292_v10 }
0x22a8   :  { %v5552_v7 = vmul.f32 -1.442695, %v5294_v57 }
0x22a9   :  { %8969 = vpow2.f32 %v5551_v31 }
0x22aa   :  { %8971 = vpow2.f32 %v5552_v7 }
0x22b3   :  { %v8970_v11 = vpop.eup %8969 }
0x22b4   :  { %v5370_v37 = vadd.f32 1.0, %v8970_v11  ;;  %v8972_v63 = vpop.eup %8971 }
0x22b5   :  { %v5376_v60 = vadd.f32 1.0, %v8972_v63 }
0x22b6   :  { %8973 = vrcp.f32 %v5370_v37 }
0x22b7   :  { %8975 = vrcp.f32 %v5376_v60 }
0x22c0   :  { %v8974_v46 = vpop.eup %8973 }
0x22c1   :  { %v5379_v9 = vmul.f32 %v8974_v46, %v5365_v3  ;;  %v8976_v17 = vpop.eup %8975 }
0x22c2   :  { %v5382_v0 = vsub.f32 1.0, %v8976_v17  ;;  %v5384_v52 = vmul.f32 %v8976_v17, %v11441_v19 }
0x22c3   :  { %v5380_v35 = vadd.f32 %v5379_v9, %v5363_v34 }
0x22c5   :  { %8977 = vtanh.f32 %v5380_v35 }
0x22cf   :  { %v8978_v26 = vpop.eup %8977 }
0x22d0   :  { %v5383_v21 = vmul.f32 %v8978_v26, %v5382_v0 }
0x22d2   :  { %v5385_v43 = vadd.f32 %v5384_v52, %v5383_v21 }
0x22d4   :  { %6280 = vmatmul.mubr.f32.vlgmr.msra.gmra.mrb[46].mxu1 %v5385_v43 }
0x23a7   :  { %v5475_v48 = vpop.f32.mrb[46].mxu1 }
0x23a8   :  { %v5476_v51 = vadd.f32 %v5553_v23, %v5475_v48  ;;  %v6281_v1 = vpop.f32.mrb[47].mxu1 }
0x23aa   :  { %5480 = vst [vmem:[#allocation15 + $0x38] sm:$0xff] %v5476_v51 }
0x23ab   :  { %9136 = shalt.err (!%p9133_p5)
}
0x23ac   :  { %s9137_s8 = scalar_lea.hbm %s11507_s10, 1024 }
0x23ad   :  { %p9138_p6 = scmp.ne.s32.totalorder %s11507_s10, %s9137_s8  ;;  %p9141_p7 = scmp.lt.u32.totalorder %s9137_s8, %s11507_s10 }
0x23af   :  { %p9143_p8 = pnand %p9141_p7, %p9138_p6 }
0x23b1   :  { %9146 = shalt.err (!%p9143_p8)
}
0x23b2   :  { %5492 = dma.vmem_to_hbm [thread:$0]  %s5487_s11, 1024, %s11507_s10, [#allocation6], %s9162_s14, %s9162_s14, %s9163_s15  }
0x23b3   :  { %9157 = dma.done.wait [#allocation6], 1024  }
0x23b4   :  { %9158 = vsyncadd [#allocation6], 4294966272 }
0x23b5   :  { %5496 = vsyncpa [#allocation5], 1 }
0x23b6   :  { %5497 = vsyncpa [#allocation8], 1 }
0x23b7   :  { %5498 = vsyncpa [#allocation11], 1 }
0x23b8   :  { %5499 = vsyncpa [#allocation14], 1 }
0x23b9   :  { %5500 = vsyncpa [#allocation6], 1 }

</bundles_post_ra>
